<compile_context>
chip_gen: v6e
topology: v6e:2x2x1
jax: 0.10.0
libtpu: 0.0.40
codegen_flags: <defaults>
</compile_context>

<pallas_src>
import jax
import jax.numpy as jnp
import numpy as np
from jax.experimental import pallas as pl
from jax.experimental.pallas import tpu as pltpu

# ---- synthetic model hyper-parameters (small, consistent with the module) ----
LAT_EX = 16                 # expression latent dim (cond['exp'])
LAT_GEO = 32                # identity/geometry latent dim (cond['geo'])
HIDDEN = 64                 # MLP hidden width
N_HYPER = 2                 # ex_model.n_hyper
EX_OUT = 3 + N_HYPER + 1    # offsets(3) + hyper(NH) + sdf_corrective(1) = 6
ID_IN = 3 + N_HYPER         # canonical coords + hyper coords = 5
ID_OUT = 1 + 3              # sdf + rgb = 4
PACK_C = 1 + 3 + 3 + ID_IN + 1   # packed output channels = 13
TQ = 1024                   # points per tile (raised from 512)


def _nn3dmm_kernel(q_ref, b0e_ref, c0e_ref, wq_ref, w1_ref, b1_ref,
                   wh1_ref, v1_ref, c1_ref, vh_ref, bh_ref, out_ref):
    f32 = jnp.float32
    bf16 = jnp.bfloat16
    q = q_ref[0]                                          # (TQ, 3) f32
    qb = q.astype(bf16)

    # ---- fused layer-0 of both MLPs: single K=3 matmul, 128 lanes ----
    l0 = jnp.dot(qb, wq_ref[...], preferred_element_type=f32)      # (TQ, 128)
    h = jnp.maximum(l0[:, 0:HIDDEN] + b0e_ref[0], 0.0)             # ex layer-0 (f32)
    g0q = l0[:, HIDDEN:2 * HIDDEN]                                 # id layer-0 q-part

    # ---- ex layer-1 ----
    h1 = jnp.maximum(
        jnp.dot(h.astype(bf16), w1_ref[...], preferred_element_type=f32) + b1_ref[...],
        0.0)                                                       # (TQ, H)

    # ---- fused h1 consumers: [id layer-0 contribution (H) | packed head (13)] ----
    h1mix = jnp.dot(h1.astype(bf16), wh1_ref[...], preferred_element_type=f32)  # (TQ, 77)

    # ---- id branch ----
    g = jnp.maximum(g0q + h1mix[:, 0:HIDDEN] + c0e_ref[0], 0.0)
    g1 = jnp.maximum(
        jnp.dot(g.astype(bf16), v1_ref[...], preferred_element_type=f32) + c1_ref[...],
        0.0)                                                       # (TQ, H)

    # ---- packed head: [sdf | color(3) | offsets(3) | q_can(3) | hyper(NH) | sdf_corr] ----
    packed = (jnp.dot(g1.astype(bf16), vh_ref[...], preferred_element_type=f32)
              + h1mix[:, HIDDEN:HIDDEN + PACK_C] + bh_ref[...])    # (TQ, 13)
    out_ref[0] = packed
    out_ref[0, :, 7:10] = packed[:, 7:10] + q                      # q_can = q + offsets


def _const_spec(shape):
    """BlockSpec for a parameter fully resident every grid step."""
    zeros = (0,) * len(shape)
    return pl.BlockSpec(shape, lambda i, b, z=zeros: z)


def nn3dmm_forward(queries, lat_ex, lat_geo, params, *, tq=TQ):
    """queries: (B, N, 3) f32; lat_ex: (B, LAT_EX); lat_geo: (B, LAT_GEO)."""
    B, N, _ = queries.shape
    (w0x, w0l, b0, w1, b1, w2, b2,
     v0x, v0l, c0, v1, c1, v2, c2) = params
    f32, bf16 = jnp.float32, jnp.bfloat16
    H = HIDDEN

    # ---- wrapper-side folding (f32, O(B*H + H^2), negligible) ----
    b0_eff = (lat_ex @ w0l + b0).reshape(B, 1, H)                               # (B,1,H)
    w_fuse = w2[:, :ID_IN] @ v0x                                                # (H,H)
    c0_eff = (lat_geo @ v0l + c0 + b2[:, :ID_IN] @ v0x).reshape(B, 1, H)        # (B,1,H)

    # fused layer-0 weight: [w0x | v0x[0:3]] -> (3, 128), bf16
    wq_cat = jnp.concatenate([w0x, v0x[0:3, :]], axis=1).astype(bf16)

    # packed head weights / bias:
    #   channels: [sdf | color(3) | offsets(3) | q_can(3) | hyper(NH) | sdf_corr]
    zH3 = jnp.zeros((H, 3), f32)
    whead = jnp.concatenate(
        [w2[:, 5:6], zH3, w2[:, 0:3], w2[:, 0:3], w2[:, 3:5], w2[:, 5:6]], axis=1)   # (H,13)
    vhead = jnp.concatenate([v2, jnp.zeros((H, PACK_C - ID_OUT), f32)], axis=1)      # (H,13)
    bias_head = jnp.concatenate(
        [c2[:, 0:1] + b2[:, 5:6], c2[:, 1:4],
         b2[:, 0:3], b2[:, 0:3], b2[:, 3:5], b2[:, 5:6]], axis=1)                    # (1,13)

    # fused h1-consumer weight: [w_fuse | whead] -> (H, 77), bf16
    wh1_cat = jnp.concatenate([w_fuse, whead], axis=1).astype(bf16)

    w1b = w1.astype(bf16)
    v1b = v1.astype(bf16)
    vheadb = vhead.astype(bf16)

    # ---- pad the point axis only when needed ----
    # TODO(synk): production callers should pick tq | N (or use an in-kernel masked
    # tail) so this full jnp.pad copy of queries never materializes.
    n_pad = (-N) % tq
    q_in = jnp.pad(queries, ((0, 0), (0, n_pad), (0, 0))) if n_pad else queries
    Np = N + n_pad

    # point-tile axis first so both v7x TensorCores stay busy even at B == 1
    grid = (Np // tq, B)
    in_specs = [
        pl.BlockSpec((1, tq, 3), lambda i, b: (b, i, 0)),          # queries tile
        pl.BlockSpec((1, 1, H), lambda i, b: (b, 0, 0)),           # b0_eff (per batch)
        pl.BlockSpec((1, 1, H), lambda i, b: (b, 0, 0)),           # c0_eff (per batch)
        _const_spec(wq_cat.shape),
        _const_spec(w1b.shape), _const_spec(b1.shape),
        _const_spec(wh1_cat.shape),
        _const_spec(v1b.shape), _const_spec(c1.shape),
        _const_spec(vheadb.shape), _const_spec(bias_head.shape),
    ]
    out_spec = pl.BlockSpec((1, tq, PACK_C), lambda i, b: (b, i, 0))

    packed = pl.pallas_call(
        _nn3dmm_kernel,
        grid=grid,
        in_specs=in_specs,
        out_specs=out_spec,
        out_shape=jax.ShapeDtypeStruct((B, Np, PACK_C), jnp.float32),
        compiler_params=pltpu.CompilerParams(
            dimension_semantics=("parallel", "parallel")),
    )(q_in, b0_eff, c0_eff, wq_cat, w1b, b1, wh1_cat, v1b, c1, vheadb, bias_head)

    if n_pad:
        packed = packed[:, :N, :]
    return {
        'sdf': packed[..., 0:1],
        'color': packed[..., 1:4],
        'offsets': packed[..., 4:7],
        'queries_can': packed[..., 7:7 + ID_IN],
        'hyper_coords': packed[..., 10:10 + N_HYPER],
        'sdf_corrective': packed[..., 10 + N_HYPER:PACK_C],
    }


def ref_forward(queries, lat_ex, lat_geo, params):
    (w0x, w0l, b0, w1, b1, w2, b2,
     v0x, v0l, c0, v1, c1, v2, c2) = params
    relu = jax.nn.relu
    h = relu(jnp.einsum('bnd,dh->bnh', queries, w0x)
             + jnp.einsum('bl,lh->bh', lat_ex, w0l)[:, None, :] + b0[0])
    h = relu(jnp.einsum('bnh,hk->bnk', h, w1) + b1[0])
    out_ex = jnp.einsum('bnh,ho->bno', h, w2) + b2[0]
    offsets = out_ex[..., :3]
    hyper = out_ex[..., 3:3 + N_HYPER]
    sdf_corr = out_ex[..., 3 + N_HYPER:]
    q_can = queries + offsets
    q_can_full = jnp.concatenate([q_can, hyper], axis=-1)
    g = relu(jnp.einsum('bnd,dh->bnh', q_can_full, v0x)
             + jnp.einsum('bl,lh->bh', lat_geo, v0l)[:, None, :] + c0[0])
    g = relu(jnp.einsum('bnh,hk->bnk', g, v1) + c1[0])
    out_id = jnp.einsum('bnh,ho->bno', g, v2) + c2[0]
    sdf = out_id[..., :1] + sdf_corr
    color = out_id[..., 1:4]
    return {'sdf': sdf, 'color': color, 'offsets': offsets,
            'queries_can': q_can_full, 'hyper_coords': hyper,
            'sdf_corrective': sdf_corr}


def init_params(key):
    ks = jax.random.split(key, 14)
    s = 0.2
    w0x = s * jax.random.normal(ks[0], (3, HIDDEN), jnp.float32)
    w0l = s * jax.random.normal(ks[1], (LAT_EX, HIDDEN), jnp.float32)
    b0 = s * jax.random.normal(ks[2], (1, HIDDEN), jnp.float32)
    w1 = s * jax.random.normal(ks[3], (HIDDEN, HIDDEN), jnp.float32)
    b1 = s * jax.random.normal(ks[4], (1, HIDDEN), jnp.float32)
    w2 = s * jax.random.normal(ks[5], (HIDDEN, EX_OUT), jnp.float32)
    b2 = s * jax.random.normal(ks[6], (1, EX_OUT), jnp.float32)
    v0x = s * jax.random.normal(ks[7], (ID_IN, HIDDEN), jnp.float32)
    v0l = s * jax.random.normal(ks[8], (LAT_GEO, HIDDEN), jnp.float32)
    c0 = s * jax.random.normal(ks[9], (1, HIDDEN), jnp.float32)
    v1 = s * jax.random.normal(ks[10], (HIDDEN, HIDDEN), jnp.float32)
    c1 = s * jax.random.normal(ks[11], (1, HIDDEN), jnp.float32)
    v2 = s * jax.random.normal(ks[12], (HIDDEN, ID_OUT), jnp.float32)
    c2 = s * jax.random.normal(ks[13], (1, ID_OUT), jnp.float32)
    return (w0x, w0l, b0, w1, b1, w2, b2, v0x, v0l, c0, v1, c1, v2, c2)


if __name__ == "__main__":
    key = jax.random.PRNGKey(0)
    k_q, k_e, k_g, k_p = jax.random.split(key, 4)

    B, N = 2, 2048
    queries = jax.random.normal(k_q, (B, N, 3), jnp.float32)          # in_dict['queries']
    lat_ex = 0.1 * jax.random.normal(k_e, (B, LAT_EX), jnp.float32)   # cond['exp']
    lat_geo = 0.1 * jax.random.normal(k_g, (B, LAT_GEO), jnp.float32) # cond['geo']
    params = init_params(k_p)

    pred = jax.jit(nn3dmm_forward)(queries, lat_ex, lat_geo, params)
    jax.block_until_ready(pred)

    ref = ref_forward(queries, lat_ex, lat_geo, params)
    # bf16 matmuls vs f32 reference -> loosened tolerances (per review).
    for k in ('sdf', 'color', 'offsets', 'queries_can', 'hyper_coords', 'sdf_corrective'):
        np.testing.assert_allclose(np.asarray(pred[k]), np.asarray(ref[k]),
                                   rtol=5e-2, atol=5e-2)

    print("KERNEL_OK")
</pallas_src>

<mosaic_0001>
module attributes {stable_mosaic.version = 11 : i64} {
  func.func @_nn3dmm_kernel(%arg0: i32, %arg1: i32, %arg2: memref<1x1024x3xf32, #tpu.memory_space<vmem>>, %arg3: memref<1x1x64xf32, #tpu.memory_space<vmem>>, %arg4: memref<1x1x64xf32, #tpu.memory_space<vmem>>, %arg5: memref<3x128xbf16, #tpu.memory_space<vmem>>, %arg6: memref<64x64xbf16, #tpu.memory_space<vmem>>, %arg7: memref<1x64xf32, #tpu.memory_space<vmem>>, %arg8: memref<64x77xbf16, #tpu.memory_space<vmem>>, %arg9: memref<64x64xbf16, #tpu.memory_space<vmem>>, %arg10: memref<1x64xf32, #tpu.memory_space<vmem>>, %arg11: memref<64x13xbf16, #tpu.memory_space<vmem>>, %arg12: memref<1x13xf32, #tpu.memory_space<vmem>>, %arg13: memref<1x1024x13xf32, #tpu.memory_space<vmem>>) attributes {dimension_semantics = [#tpu.dimension_semantics<parallel>, #tpu.dimension_semantics<parallel>], iteration_bounds = array<i64: 2, 2>, scalar_prefetch = 0 : i64, scratch_operands = 0 : i64, tpu.core_type = #tpu.core_type<tc>, window_params = [{transform_indices = @transform_0, window_bounds = array<i64: 1, 1024, 3>}, {transform_indices = @transform_1, window_bounds = array<i64: 1, 1, 64>}, {transform_indices = @transform_2, window_bounds = array<i64: 1, 1, 64>}, {pipeline_mode = #tpu.pipeline_mode<synchronous>, transform_indices = @transform_3, window_bounds = array<i64: 3, 128>}, {pipeline_mode = #tpu.pipeline_mode<synchronous>, transform_indices = @transform_4, window_bounds = array<i64: 64, 64>}, {pipeline_mode = #tpu.pipeline_mode<synchronous>, transform_indices = @transform_5, window_bounds = array<i64: 1, 64>}, {pipeline_mode = #tpu.pipeline_mode<synchronous>, transform_indices = @transform_6, window_bounds = array<i64: 64, 77>}, {pipeline_mode = #tpu.pipeline_mode<synchronous>, transform_indices = @transform_7, window_bounds = array<i64: 64, 64>}, {pipeline_mode = #tpu.pipeline_mode<synchronous>, transform_indices = @transform_8, window_bounds = array<i64: 1, 64>}, {pipeline_mode = #tpu.pipeline_mode<synchronous>, transform_indices = @transform_9, window_bounds = array<i64: 64, 13>}, {pipeline_mode = #tpu.pipeline_mode<synchronous>, transform_indices = @transform_10, window_bounds = array<i64: 1, 13>}, {transform_indices = @transform_11, window_bounds = array<i64: 1, 1024, 13>}]} {
    %c0 = arith.constant 0 : index
    %c0_0 = arith.constant 0 : index
    %c0_1 = arith.constant 0 : index
    %0 = vector.load %arg2[%c0, %c0_0, %c0_1] : memref<1x1024x3xf32, #tpu.memory_space<vmem>>, vector<1x1024x3xf32>
    %1 = vector.shape_cast %0 : vector<1x1024x3xf32> to vector<1024x3xf32>
    %2 = arith.truncf %1 : vector<1024x3xf32> to vector<1024x3xbf16>
    %c0_2 = arith.constant 0 : index
    %c0_3 = arith.constant 0 : index
    %3 = vector.load %arg5[%c0_2, %c0_3] : memref<3x128xbf16, #tpu.memory_space<vmem>>, vector<3x128xbf16>
    %cst = arith.constant dense<0.000000e+00> : vector<1024x128xf32>
    %4 = tpu.matmul %2, %3, %cst {dimension_numbers = #tpu.dot_dimension_numbers<[1], [0], [0], [1], [0, 0, 1, 1], [], []>} : vector<1024x3xbf16>, vector<3x128xbf16>, vector<1024x128xf32> -> vector<1024x128xf32>
    %5 = vector.extract_strided_slice %4 {offsets = [0, 0], sizes = [1024, 64], strides = [1, 1]} : vector<1024x128xf32> to vector<1024x64xf32>
    %c0_4 = arith.constant 0 : index
    %c0_5 = arith.constant 0 : index
    %c0_6 = arith.constant 0 : index
    %6 = vector.load %arg3[%c0_4, %c0_5, %c0_6] : memref<1x1x64xf32, #tpu.memory_space<vmem>>, vector<1x1x64xf32>
    %7 = vector.shape_cast %6 : vector<1x1x64xf32> to vector<1x64xf32>
    %8 = vector.broadcast %7 : vector<1x64xf32> to vector<1024x64xf32>
    %9 = arith.addf %5, %8 : vector<1024x64xf32>
    %cst_7 = arith.constant 0.000000e+00 : f32
    %10 = vector.broadcast %cst_7 : f32 to vector<1024x64xf32>
    %11 = arith.maximumf %9, %10 : vector<1024x64xf32>
    %12 = vector.extract_strided_slice %4 {offsets = [0, 64], sizes = [1024, 64], strides = [1, 1]} : vector<1024x128xf32> to vector<1024x64xf32>
    %13 = arith.truncf %11 : vector<1024x64xf32> to vector<1024x64xbf16>
    %c0_8 = arith.constant 0 : index
    %c0_9 = arith.constant 0 : index
    %14 = vector.load %arg6[%c0_8, %c0_9] : memref<64x64xbf16, #tpu.memory_space<vmem>>, vector<64x64xbf16>
    %cst_10 = arith.constant dense<0.000000e+00> : vector<1024x64xf32>
    %15 = tpu.matmul %13, %14, %cst_10 {dimension_numbers = #tpu.dot_dimension_numbers<[1], [0], [0], [1], [0, 0, 1, 1], [], []>} : vector<1024x64xbf16>, vector<64x64xbf16>, vector<1024x64xf32> -> vector<1024x64xf32>
    %c0_11 = arith.constant 0 : index
    %c0_12 = arith.constant 0 : index
    %16 = vector.load %arg7[%c0_11, %c0_12] : memref<1x64xf32, #tpu.memory_space<vmem>>, vector<1x64xf32>
    %17 = vector.broadcast %16 : vector<1x64xf32> to vector<1024x64xf32>
    %18 = arith.addf %15, %17 : vector<1024x64xf32>
    %cst_13 = arith.constant 0.000000e+00 : f32
    %19 = vector.broadcast %cst_13 : f32 to vector<1024x64xf32>
    %20 = arith.maximumf %18, %19 : vector<1024x64xf32>
    %21 = arith.truncf %20 : vector<1024x64xf32> to vector<1024x64xbf16>
    %c0_14 = arith.constant 0 : index
    %c0_15 = arith.constant 0 : index
    %22 = vector.load %arg8[%c0_14, %c0_15] : memref<64x77xbf16, #tpu.memory_space<vmem>>, vector<64x77xbf16>
    %cst_16 = arith.constant dense<0.000000e+00> : vector<1024x77xf32>
    %23 = tpu.matmul %21, %22, %cst_16 {dimension_numbers = #tpu.dot_dimension_numbers<[1], [0], [0], [1], [0, 0, 1, 1], [], []>} : vector<1024x64xbf16>, vector<64x77xbf16>, vector<1024x77xf32> -> vector<1024x77xf32>
    %24 = vector.extract_strided_slice %23 {offsets = [0, 0], sizes = [1024, 64], strides = [1, 1]} : vector<1024x77xf32> to vector<1024x64xf32>
    %25 = arith.addf %12, %24 : vector<1024x64xf32>
    %c0_17 = arith.constant 0 : index
    %c0_18 = arith.constant 0 : index
    %c0_19 = arith.constant 0 : index
    %26 = vector.load %arg4[%c0_17, %c0_18, %c0_19] : memref<1x1x64xf32, #tpu.memory_space<vmem>>, vector<1x1x64xf32>
    %27 = vector.shape_cast %26 : vector<1x1x64xf32> to vector<1x64xf32>
    %28 = vector.broadcast %27 : vector<1x64xf32> to vector<1024x64xf32>
    %29 = arith.addf %25, %28 : vector<1024x64xf32>
    %cst_20 = arith.constant 0.000000e+00 : f32
    %30 = vector.broadcast %cst_20 : f32 to vector<1024x64xf32>
    %31 = arith.maximumf %29, %30 : vector<1024x64xf32>
    %32 = arith.truncf %31 : vector<1024x64xf32> to vector<1024x64xbf16>
    %c0_21 = arith.constant 0 : index
    %c0_22 = arith.constant 0 : index
    %33 = vector.load %arg9[%c0_21, %c0_22] : memref<64x64xbf16, #tpu.memory_space<vmem>>, vector<64x64xbf16>
    %cst_23 = arith.constant dense<0.000000e+00> : vector<1024x64xf32>
    %34 = tpu.matmul %32, %33, %cst_23 {dimension_numbers = #tpu.dot_dimension_numbers<[1], [0], [0], [1], [0, 0, 1, 1], [], []>} : vector<1024x64xbf16>, vector<64x64xbf16>, vector<1024x64xf32> -> vector<1024x64xf32>
    %c0_24 = arith.constant 0 : index
    %c0_25 = arith.constant 0 : index
    %35 = vector.load %arg10[%c0_24, %c0_25] : memref<1x64xf32, #tpu.memory_space<vmem>>, vector<1x64xf32>
    %36 = vector.broadcast %35 : vector<1x64xf32> to vector<1024x64xf32>
    %37 = arith.addf %34, %36 : vector<1024x64xf32>
    %cst_26 = arith.constant 0.000000e+00 : f32
    %38 = vector.broadcast %cst_26 : f32 to vector<1024x64xf32>
    %39 = arith.maximumf %37, %38 : vector<1024x64xf32>
    %40 = arith.truncf %39 : vector<1024x64xf32> to vector<1024x64xbf16>
    %c0_27 = arith.constant 0 : index
    %c0_28 = arith.constant 0 : index
    %41 = vector.load %arg11[%c0_27, %c0_28] : memref<64x13xbf16, #tpu.memory_space<vmem>>, vector<64x13xbf16>
    %cst_29 = arith.constant dense<0.000000e+00> : vector<1024x13xf32>
    %42 = tpu.matmul %40, %41, %cst_29 {dimension_numbers = #tpu.dot_dimension_numbers<[1], [0], [0], [1], [0, 0, 1, 1], [], []>} : vector<1024x64xbf16>, vector<64x13xbf16>, vector<1024x13xf32> -> vector<1024x13xf32>
    %43 = vector.extract_strided_slice %23 {offsets = [0, 64], sizes = [1024, 13], strides = [1, 1]} : vector<1024x77xf32> to vector<1024x13xf32>
    %44 = arith.addf %42, %43 : vector<1024x13xf32>
    %c0_30 = arith.constant 0 : index
    %c0_31 = arith.constant 0 : index
    %45 = vector.load %arg12[%c0_30, %c0_31] : memref<1x13xf32, #tpu.memory_space<vmem>>, vector<1x13xf32>
    %46 = vector.broadcast %45 : vector<1x13xf32> to vector<1024x13xf32>
    %47 = arith.addf %44, %46 : vector<1024x13xf32>
    %c0_32 = arith.constant 0 : index
    %c0_33 = arith.constant 0 : index
    %c0_34 = arith.constant 0 : index
    %48 = vector.load %arg13[%c0_32, %c0_33, %c0_34] : memref<1x1024x13xf32, #tpu.memory_space<vmem>>, vector<1x1024x13xf32>
    %49 = vector.shape_cast %48 : vector<1x1024x13xf32> to vector<1024x13xf32>
    %50 = vector.shape_cast %47 : vector<1024x13xf32> to vector<1x1024x13xf32>
    tpu.vector_store %arg13[%c0_32, %c0_33, %c0_34], %50 {strides = array<i32>} : memref<1x1024x13xf32, #tpu.memory_space<vmem>>, vector<1x1024x13xf32>,
    %51 = vector.extract_strided_slice %47 {offsets = [0, 7], sizes = [1024, 3], strides = [1, 1]} : vector<1024x13xf32> to vector<1024x3xf32>
    %52 = arith.addf %51, %1 : vector<1024x3xf32>
    %c0_35 = arith.constant 0 : index
    %c0_36 = arith.constant 0 : index
    %c7 = arith.constant 7 : index
    %53 = vector.load %arg13[%c0_35, %c0_36, %c7] : memref<1x1024x13xf32, #tpu.memory_space<vmem>>, vector<1x1024x3xf32>
    %54 = vector.shape_cast %53 : vector<1x1024x3xf32> to vector<1024x3xf32>
    %55 = vector.shape_cast %52 : vector<1024x3xf32> to vector<1x1024x3xf32>
    tpu.vector_store %arg13[%c0_35, %c0_36, %c7], %55 {strides = array<i32>} : memref<1x1024x13xf32, #tpu.memory_space<vmem>>, vector<1x1024x3xf32>,
    return
  }
  func.func @transform_0(%arg0: i32, %arg1: i32) -> (i32, i32, i32) {
    %c0_i32 = arith.constant 0 : i32
    %c0_i32_0 = arith.constant 0 : i32
    return %arg1, %arg0, %c0_i32 : i32, i32, i32
  }
  func.func @transform_1(%arg0: i32, %arg1: i32) -> (i32, i32, i32) {
    %c0_i32 = arith.constant 0 : i32
    %c0_i32_0 = arith.constant 0 : i32
    %c0_i32_1 = arith.constant 0 : i32
    return %arg1, %c0_i32, %c0_i32_0 : i32, i32, i32
  }
  func.func @transform_2(%arg0: i32, %arg1: i32) -> (i32, i32, i32) {
    %c0_i32 = arith.constant 0 : i32
    %c0_i32_0 = arith.constant 0 : i32
    %c0_i32_1 = arith.constant 0 : i32
    return %arg1, %c0_i32, %c0_i32_0 : i32, i32, i32
  }
  func.func @transform_3(%arg0: i32, %arg1: i32) -> (i32, i32) {
    %c0_i32 = arith.constant 0 : i32
    %c0_i32_0 = arith.constant 0 : i32
    %c0_i32_1 = arith.constant 0 : i32
    return %c0_i32, %c0_i32_0 : i32, i32
  }
  func.func @transform_4(%arg0: i32, %arg1: i32) -> (i32, i32) {
    %c0_i32 = arith.constant 0 : i32
    %c0_i32_0 = arith.constant 0 : i32
    %c0_i32_1 = arith.constant 0 : i32
    return %c0_i32, %c0_i32_0 : i32, i32
  }
  func.func @transform_5(%arg0: i32, %arg1: i32) -> (i32, i32) {
    %c0_i32 = arith.constant 0 : i32
    %c0_i32_0 = arith.constant 0 : i32
    %c0_i32_1 = arith.constant 0 : i32
    return %c0_i32, %c0_i32_0 : i32, i32
  }
  func.func @transform_6(%arg0: i32, %arg1: i32) -> (i32, i32) {
    %c0_i32 = arith.constant 0 : i32
    %c0_i32_0 = arith.constant 0 : i32
    %c0_i32_1 = arith.constant 0 : i32
    return %c0_i32, %c0_i32_0 : i32, i32
  }
  func.func @transform_7(%arg0: i32, %arg1: i32) -> (i32, i32) {
    %c0_i32 = arith.constant 0 : i32
    %c0_i32_0 = arith.constant 0 : i32
    %c0_i32_1 = arith.constant 0 : i32
    return %c0_i32, %c0_i32_0 : i32, i32
  }
  func.func @transform_8(%arg0: i32, %arg1: i32) -> (i32, i32) {
    %c0_i32 = arith.constant 0 : i32
    %c0_i32_0 = arith.constant 0 : i32
    %c0_i32_1 = arith.constant 0 : i32
    return %c0_i32, %c0_i32_0 : i32, i32
  }
  func.func @transform_9(%arg0: i32, %arg1: i32) -> (i32, i32) {
    %c0_i32 = arith.constant 0 : i32
    %c0_i32_0 = arith.constant 0 : i32
    %c0_i32_1 = arith.constant 0 : i32
    return %c0_i32, %c0_i32_0 : i32, i32
  }
  func.func @transform_10(%arg0: i32, %arg1: i32) -> (i32, i32) {
    %c0_i32 = arith.constant 0 : i32
    %c0_i32_0 = arith.constant 0 : i32
    %c0_i32_1 = arith.constant 0 : i32
    return %c0_i32, %c0_i32_0 : i32, i32
  }
  func.func @transform_11(%arg0: i32, %arg1: i32) -> (i32, i32, i32) {
    %c0_i32 = arith.constant 0 : i32
    %c0_i32_0 = arith.constant 0 : i32
    return %arg1, %arg0, %c0_i32 : i32, i32, i32
  }
}

</mosaic_0001>

<bundles_post_ra>
// kernel: nn3dmm_forward.1
= control target key start
LH: loop header
LB: loop body
LE: loop exit
PB: predicated region body
PF: predicated region fallthrough
CT: control target
= control target key end

     0   :  { %s9160_s17 = smov 0   ;;  %s9162_s18 = smov 0   ;;  %s12647_s0 = inlined_call_operand.vmem [shape: f32[2,2048,3], index: 0, kind: input, shape index: {}]   ;;  %s12648_s1 = inlined_call_operand.vmem [shape: f32[2,1,64], index: 1, kind: input, shape index: {}]   ;;  %s12649_s2 = inlined_call_operand.vmem [shape: f32[2,1,64], index: 2, kind: input, shape index: {}]   ;;  %s12650_s3 = inlined_call_operand.vmem [shape: bf16[3,128], index: 3, kind: input, shape index: {}]   ;;  %s12651_s4 = inlined_call_operand.vmem [shape: bf16[64,64], index: 4, kind: input, shape index: {}]   ;;  %s12652_s5 = inlined_call_operand.vmem [shape: f32[1,64], index: 5, kind: input, shape index: {}]   ;;  %s12653_s6 = inlined_call_operand.vmem [shape: bf16[64,77], index: 6, kind: input, shape index: {}]   ;;  %s12654_s7 = inlined_call_operand.vmem [shape: bf16[64,64], index: 7, kind: input, shape index: {}]   ;;  %s12655_s8 = inlined_call_operand.vmem [shape: f32[1,64], index: 8, kind: input, shape index: {}]   ;;  %s12656_s9 = inlined_call_operand.vmem [shape: bf16[64,13], index: 9, kind: input, shape index: {}]   ;;  %s12657_s10 = inlined_call_operand.vmem [shape: f32[1,13], index: 10, kind: input, shape index: {}]   ;;  %s12658_s11 = inlined_call_operand.vmem [shape: f32[2,2048,13], index: 11, kind: output, shape index: {}]  }
   0x1   :  { %s9164_s19 = smov 0   ;;  %s9166_s20 = smov 0  }
   0x2   :  { %s9168_s21 = smov 0  }
   0x3 LB: > { %s30_s22 = sadd.s32 1, %s9087_s19  ;;  %s33_s23 = sadd.s32 1, %s9091_s20  ;;  %s9095_s21 = sphi %s9168_s21, %s21_s21   ;;  %s9091_s20 = sphi %s9166_s20, %s13295_s20   ;;  %s9087_s19 = sphi %s9164_s19, %s13294_s19   ;;  %s9083_s18 = sphi %s9162_s18, %s13293_s18   ;;  %s9079_s17 = sphi %s9160_s17, %s13292_s17  }
   0x4   : > { %p31_p0 = scmp.ge.s32.totalorder %s30_s22, 2  ;;  %p7501_p1 = scmp.ge.s32.totalorder %s9095_s21, 1 }
   0x5   : > { %p374_p2 = scmp.lt.s32.totalorder %s9095_s21, 5 }
   0x6   : > { %s13297_s22 = smov (%p31_p0, %s30_s22), 0  ;;  %s13299_s23 = smov (!%p31_p0, %s33_s23), %s9091_s20 }
   0x7   : > { %p375_p3 = pnand %p7501_p1, %p374_p2  ;;  %p35_p4 = scmp.ge.s32.totalorder %s13299_s23, 2 }
   0x9   : > { %s13301_s23 = smov (%p35_p4, %s13299_s23), 0  ;;  %378 = sbr.rel (%p375_p3) target bundleno = 1630 (0x65e), region = 64 }
   0xe   : > { %v647_v0 = vld [vmem:[%s12650_s3] sm:$0x3]  ;;  %vm841_vm0 = vcmask 1040384   ;;  %vm842_vm1 = vcmask 1041408   ;;  %s7502_s26 = sshll.u32 %s9083_s18, 7  ;;  %v9097_v1 = vmov 65535  }
   0xf   : > { %v843_v2 = vsel %vm841_vm0, 4294967295, %v9097_v1  ;;  %p429_p5 = scmp.lt.s32.totalorder %s9079_s17, 1  ;;  %p431_p6 = scmp.lt.s32.totalorder %s7502_s26, 255  ;;  %v8907_v5 = vld [vmem:[%s12651_s4 + $0x18] sm:$0xff]   ;;  %vm648_vm2 = vcmask 23552   ;;  %v8908_v33 = vld [vmem:[%s12651_s4 + $0x10] sm:$0xff]  }
  0x10   : > { %v844_v3 = vsel %vm842_vm1, %v843_v2, 0  ;;  %v8909_v41 = vld [vmem:[%s12651_s4 + $0x8] sm:$0xff]   ;;  %v8910_v48 = vld [vmem:[%s12651_s4] sm:$0xff]   ;;  %vm1759_vm3 = vcmask 523264   ;;  %vm6491_vm4 = vcmask 105472   ;;  %vm7260_vm5 = vcmask 80952  }
  0x11   : > { %v846_v4 = vand.u32 %v844_v3, %v647_v0  ;;  %s13303_s17 = smov (!%p429_p5, %s9079_s17), 1  ;;  %s13305_s26 = smov (!%p431_p6, %s7502_s26), 255 }
  0x12   : > { %s7503_s29 = sshll.u32 %s13303_s17, 8  ;;  %s9420_s24 = scalar_lea.vmem %s12648_s1, %s13303_s17 }
  0x13   : > { %8188 = vmatprep.subr.bf16.mxu0 %v846_v4  ;;  %8862 = vmatprep.subr.bf16.mxu1 %v846_v4  ;;  %s9199_s30 = sadd.s32 %s7503_s29, %s13305_s26  ;;  %s443_s18 = scalar_lea.vmem %s12649_s2, %s13303_s17 }
  0x14   : > { %8189 = vmatpush3.bf16.msra.mxu0 %v846_v4  ;;  %8863 = vmatpush3.bf16.msra.mxu1 %v846_v4  ;;  %s7504_s12 = sshll.u32 %s9199_s30, 3  ;;  %s9099_s17 = smov 7  }
  0x15   : > { %8318 = vmatprep.subr.bf16.mxu1 %v8907_v5  ;;  %s9207_s15 = scalar_lea.vmem %s12647_s0, %s7504_s12  ;;  %s11493_s28 = scalar_lea.vmem %s12658_s11, %s7504_s12 }
  0x16   : > { %v455_v6 = vld [vmem:[%s9207_s15] sm:$0xff]  ;;  %v456_v7 = vld [vmem:[%s9207_s15 + $0x8] sm:$0xff]  ;;  %v457_v8 = vld [vmem:[%s9207_s15 + $0x10] sm:$0xff] }
  0x17   : > { %v583_v9 = vpack.c.bf16 %v456_v7, %v455_v6  ;;  %v458_v10 = vld [vmem:[%s9207_s15 + $0x18] sm:$0xff]  ;;  %v459_v11 = vld [vmem:[%s9207_s15 + $0x20] sm:$0xff]  ;;  %v460_v12 = vld [vmem:[%s9207_s15 + $0x28] sm:$0xff] }
  0x18   : > { %v584_v13 = vpack.c.bf16 %v458_v10, %v457_v8  ;;  %v585_v14 = vpack.c.bf16 %v460_v12, %v459_v11  ;;  %v461_v15 = vld [vmem:[%s9207_s15 + $0x30] sm:$0xff]  ;;  %v462_v16 = vld [vmem:[%s9207_s15 + $0x38] sm:$0xff]  ;;  %v463_v17 = vld [vmem:[%s9207_s15 + $0x40] sm:$0xff] }
  0x19   : > { %8190 = vmatprep.mubr.msk.bf16.mxu0 %vm648_vm2, %v583_v9  ;;  %v464_v18 = vld [vmem:[%s9207_s15 + $0x48] sm:$0xff]  ;;  %v586_v19 = vpack.c.bf16 %v462_v16, %v461_v15  ;;  %v465_v21 = vld [vmem:[%s9207_s15 + $0x50] sm:$0xff]  ;;  %v519_v22 = vld [vmem:[%s9207_s15 + $0x200] sm:$0xff] }
  0x1a   : > { %8191 = vmatmul.mubr.msk.bf16.vlgmr.msra.gmra.mxu0 %vm648_vm2, %v584_v13  ;;  %v587_v20 = vpack.c.bf16 %v464_v18, %v463_v17  ;;  %v466_v23 = vld [vmem:[%s9207_s15 + $0x58] sm:$0xff]  ;;  %v467_v24 = vld [vmem:[%s9207_s15 + $0x60] sm:$0xff]  ;;  %v520_v25 = vld [vmem:[%s9207_s15 + $0x208] sm:$0xff] }
  0x1b   : > { %8194 = vmatprep.mubr.msk.bf16.mxu0 %vm648_vm2, %v585_v14  ;;  %v468_v26 = vld [vmem:[%s9207_s15 + $0x68] sm:$0xff]  ;;  %v615_v27 = vpack.c.bf16 %v520_v25, %v519_v22  ;;  %v521_v28 = vld [vmem:[%s9207_s15 + $0x210] sm:$0xff]  ;;  %v522_v29 = vld [vmem:[%s9207_s15 + $0x218] sm:$0xff]  ;;  %v588_v34 = vpack.c.bf16 %v466_v23, %v465_v21 }
  0x1c   : > { %v616_v30 = vpack.c.bf16 %v522_v29, %v521_v28  ;;  %v523_v31 = vld [vmem:[%s9207_s15 + $0x220] sm:$0xff]  ;;  %v524_v32 = vld [vmem:[%s9207_s15 + $0x228] sm:$0xff]  ;;  %v589_v36 = vpack.c.bf16 %v468_v26, %v467_v24  ;;  %v525_v37 = vld [vmem:[%s9207_s15 + $0x230] sm:$0xff] }
  0x1d   : > { %8254 = vmatprep.mubr.msk.bf16.mxu1 %vm648_vm2, %v615_v27  ;;  %v617_v35 = vpack.c.bf16 %v524_v32, %v523_v31  ;;  %v526_v38 = vld [vmem:[%s9207_s15 + $0x238] sm:$0xff]  ;;  %v527_v39 = vld [vmem:[%s9207_s15 + $0x240] sm:$0xff]  ;;  %v528_v40 = vld [vmem:[%s9207_s15 + $0x248] sm:$0xff] }
  0x1e   : > { %8255 = vmatmul.mubr.msk.bf16.vlgmr.msra.gmra.mxu1 %vm648_vm2, %v616_v30  ;;  %v469_v42 = vld [vmem:[%s9207_s15 + $0x70] sm:$0xff]  ;;  %v470_v43 = vld [vmem:[%s9207_s15 + $0x78] sm:$0xff]  ;;  %v618_v44 = vpack.c.bf16 %v526_v38, %v525_v37  ;;  %v471_v45 = vld [vmem:[%s9207_s15 + $0x80] sm:$0xff]  ;;  %v619_v47 = vpack.c.bf16 %v528_v40, %v527_v39 }
  0x1f   : > { %8319 = vmatpush3.bf16.msra.mxu1 %v8907_v5  ;;  %8258 = vmatprep.mubr.msk.bf16.mxu1 %vm648_vm2, %v617_v35  ;;  %v472_v46 = vld [vmem:[%s9207_s15 + $0x88] sm:$0xff]  ;;  %v590_v49 = vpack.c.bf16 %v470_v43, %v469_v42  ;;  %v529_v51 = vld [vmem:[%s9207_s15 + $0x250] sm:$0xff]  ;;  %v530_v52 = vld [vmem:[%s9207_s15 + $0x258] sm:$0xff] }
  0x20   : > { %8320 = vmatprep.subr.bf16.mxu1 %v8908_v33  ;;  %v591_v50 = vpack.c.bf16 %v472_v46, %v471_v45  ;;  %v531_v53 = vld [vmem:[%s9207_s15 + $0x260] sm:$0xff]  ;;  %v532_v54 = vld [vmem:[%s9207_s15 + $0x268] sm:$0xff]  ;;  %v473_v55 = vld [vmem:[%s9207_s15 + $0x90] sm:$0xff]  ;;  %v620_v57 = vpack.c.bf16 %v530_v52, %v529_v51 }
  0x21   : > { %v474_v56 = vld [vmem:[%s9207_s15 + $0x98] sm:$0xff]  ;;  %v475_v58 = vld [vmem:[%s9207_s15 + $0xa0] sm:$0xff]  ;;  %v476_v59 = vld [vmem:[%s9207_s15 + $0xa8] sm:$0xff]  ;;  %v621_v60 = vpack.c.bf16 %v532_v54, %v531_v53 }
  0x22   : > { %8195 = vmatmul.mubr.msk.bf16.gmra.mxu0 %vm648_vm2, %v586_v19  ;;  %v592_v61 = vpack.c.bf16 %v474_v56, %v473_v55  ;;  %v593_v62 = vpack.c.bf16 %v476_v59, %v475_v58  ;;  %v533_v63 = vld [vmem:[%s9207_s15 + $0x270] sm:$0xff]  ;;  %v534_v0 = vld [vmem:[%s9207_s15 + $0x278] sm:$0xff]  ;;  %v535_v1 = vld [vmem:[%s9207_s15 + $0x280] sm:$0xff] }
  0x23   : > { %8198 = vmatprep.mubr.msk.bf16.mxu0 %vm648_vm2, %v587_v20  ;;  %8321 = vmatpush3.bf16.msra.mxu1 %v8908_v33  ;;  %v536_v2 = vld [vmem:[%s9207_s15 + $0x288] sm:$0xff]  ;;  %v477_v3 = vld [vmem:[%s9207_s15 + $0xb0] sm:$0xff]  ;;  %v478_v4 = vld [vmem:[%s9207_s15 + $0xb8] sm:$0xff]  ;;  %v622_v5 = vpack.c.bf16 %v534_v0, %v533_v63 }
  0x24   : > { %8322 = vmatprep.subr.bf16.mxu1 %v8909_v41  ;;  %v479_v6 = vld [vmem:[%s9207_s15 + $0xc0] sm:$0xff]  ;;  %v480_v7 = vld [vmem:[%s9207_s15 + $0xc8] sm:$0xff]  ;;  %v623_v8 = vpack.c.bf16 %v536_v2, %v535_v1  ;;  %v594_v9 = vpack.c.bf16 %v478_v4, %v477_v3  ;;  %v537_v10 = vld [vmem:[%s9207_s15 + $0x290] sm:$0xff] }
  0x25   : > { %v595_v11 = vpack.c.bf16 %v480_v7, %v479_v6  ;;  %v538_v12 = vld [vmem:[%s9207_s15 + $0x298] sm:$0xff]  ;;  %v539_v13 = vld [vmem:[%s9207_s15 + $0x2a0] sm:$0xff]  ;;  %v540_v14 = vld [vmem:[%s9207_s15 + $0x2a8] sm:$0xff] }
  0x26   : > { %8259 = vmatmul.mubr.msk.bf16.gmra.mxu1 %vm648_vm2, %v618_v44  ;;  %v481_v15 = vld [vmem:[%s9207_s15 + $0xd0] sm:$0xff]  ;;  %v482_v16 = vld [vmem:[%s9207_s15 + $0xd8] sm:$0xff]  ;;  %v483_v17 = vld [vmem:[%s9207_s15 + $0xe0] sm:$0xff]  ;;  %v624_v19 = vpack.c.bf16 %v538_v12, %v537_v10  ;;  %v625_v20 = vpack.c.bf16 %v540_v14, %v539_v13 }
  0x27   : > { %8262 = vmatprep.mubr.msk.bf16.mxu1 %vm648_vm2, %v619_v47  ;;  %8323 = vmatpush3.bf16.msra.mxu1 %v8909_v41  ;;  %v484_v18 = vld [vmem:[%s9207_s15 + $0xe8] sm:$0xff]  ;;  %v596_v21 = vpack.c.bf16 %v482_v16, %v481_v15  ;;  %v541_v23 = vld [vmem:[%s9207_s15 + $0x2b0] sm:$0xff]  ;;  %v542_v24 = vld [vmem:[%s9207_s15 + $0x2b8] sm:$0xff] }
  0x28   : > { %8324 = vmatprep.subr.bf16.mxu1 %v8910_v48  ;;  %v597_v22 = vpack.c.bf16 %v484_v18, %v483_v17  ;;  %v543_v25 = vld [vmem:[%s9207_s15 + $0x2c0] sm:$0xff]  ;;  %v544_v26 = vld [vmem:[%s9207_s15 + $0x2c8] sm:$0xff]  ;;  %v485_v27 = vld [vmem:[%s9207_s15 + $0xf0] sm:$0xff]  ;;  %v626_v29 = vpack.c.bf16 %v542_v24, %v541_v23 }
  0x29   : > { %v486_v28 = vld [vmem:[%s9207_s15 + $0xf8] sm:$0xff]  ;;  %v487_v30 = vld [vmem:[%s9207_s15 + $0x100] sm:$0xff]  ;;  %v488_v31 = vld [vmem:[%s9207_s15 + $0x108] sm:$0xff]  ;;  %v627_v32 = vpack.c.bf16 %v544_v26, %v543_v25 }
  0x2a   : > { %8199 = vmatmul.mubr.msk.bf16.gmra.mxu0 %vm648_vm2, %v588_v34  ;;  %v598_v33 = vpack.c.bf16 %v486_v28, %v485_v27  ;;  %v599_v34 = vpack.c.bf16 %v488_v31, %v487_v30  ;;  %v545_v35 = vld [vmem:[%s9207_s15 + $0x2d0] sm:$0xff]  ;;  %v547_v37 = vld [vmem:[%s9207_s15 + $0x2e0] sm:$0xff]  ;;  %v548_v38 = vld [vmem:[%s9207_s15 + $0x2e8] sm:$0xff] }
  0x2b   : > { %8202 = vmatprep.mubr.msk.bf16.mxu0 %vm648_vm2, %v589_v36  ;;  %8325 = vmatpush3.bf16.msra.mxu1 %v8910_v48  ;;  %v546_v36 = vld [vmem:[%s9207_s15 + $0x2d8] sm:$0xff]  ;;  %v489_v39 = vld [vmem:[%s9207_s15 + $0x110] sm:$0xff]  ;;  %v491_v42 = vld [vmem:[%s9207_s15 + $0x120] sm:$0xff]  ;;  %v629_v44 = vpack.c.bf16 %v548_v38, %v547_v37 }
  0x2c   : > { %v490_v40 = vld [vmem:[%s9207_s15 + $0x118] sm:$0xff]  ;;  %v628_v41 = vpack.c.bf16 %v546_v36, %v545_v35  ;;  %v492_v43 = vld [vmem:[%s9207_s15 + $0x128] sm:$0xff]  ;;  %v549_v47 = vld [vmem:[%s9207_s15 + $0x2f0] sm:$0xff] }
  0x2d   : > { %v600_v45 = vpack.c.bf16 %v490_v40, %v489_v39  ;;  %v601_v46 = vpack.c.bf16 %v492_v43, %v491_v42  ;;  %v550_v48 = vld [vmem:[%s9207_s15 + $0x2f8] sm:$0xff]  ;;  %v493_v51 = vld [vmem:[%s9207_s15 + $0x130] sm:$0xff]  ;;  %v495_v54 = vld [vmem:[%s9207_s15 + $0x140] sm:$0xff] }
  0x2e   : > { %8263 = vmatmul.mubr.msk.bf16.gmra.mxu1 %vm648_vm2, %v620_v57  ;;  %v494_v52 = vld [vmem:[%s9207_s15 + $0x138] sm:$0xff]  ;;  %v630_v53 = vpack.c.bf16 %v550_v48, %v549_v47  ;;  %v496_v55 = vld [vmem:[%s9207_s15 + $0x148] sm:$0xff]  ;;  %v553_v59 = vld [vmem:[%s9207_s15 + $0x310] sm:$0xff] }
  0x2f   : > { %8266 = vmatprep.mubr.msk.bf16.mxu1 %vm648_vm2, %v621_v60  ;;  %v602_v57 = vpack.c.bf16 %v494_v52, %v493_v51  ;;  %v603_v58 = vpack.c.bf16 %v496_v55, %v495_v54  ;;  %v554_v60 = vld [vmem:[%s9207_s15 + $0x318] sm:$0xff]  ;;  %v497_v63 = vld [vmem:[%s9207_s15 + $0x150] sm:$0xff]  ;;  %v499_v2 = vld [vmem:[%s9207_s15 + $0x160] sm:$0xff] }
  0x30   : > { %v498_v0 = vld [vmem:[%s9207_s15 + $0x158] sm:$0xff]  ;;  %v632_v1 = vpack.c.bf16 %v554_v60, %v553_v59  ;;  %v500_v3 = vld [vmem:[%s9207_s15 + $0x168] sm:$0xff]  ;;  %v557_v7 = vld [vmem:[%s9207_s15 + $0x330] sm:$0xff] }
  0x31   : > { %v605_v6 = vpack.c.bf16 %v500_v3, %v499_v2  ;;  %v560_v10 = vld [vmem:[%s9207_s15 + $0x348] sm:$0xff]  ;;  %v502_v12 = vld [vmem:[%s9207_s15 + $0x178] sm:$0xff]  ;;  %v503_v14 = vld [vmem:[%s9207_s15 + $0x180] sm:$0xff] }
  0x32   : > { %8203 = vmatmul.mubr.msk.bf16.gmra.mxu0 %vm648_vm2, %v590_v49  ;;  %v551_v49 = vld [vmem:[%s9207_s15 + $0x300] sm:$0xff]  ;;  %v504_v15 = vld [vmem:[%s9207_s15 + $0x188] sm:$0xff]  ;;  %v505_v23 = vld [vmem:[%s9207_s15 + $0x190] sm:$0xff] }
  0x33   : > { %8206 = vmatprep.mubr.msk.bf16.mxu0 %vm648_vm2, %v591_v50  ;;  %v552_v50 = vld [vmem:[%s9207_s15 + $0x308] sm:$0xff]  ;;  %v607_v18 = vpack.c.bf16 %v504_v15, %v503_v14  ;;  %v506_v24 = vld [vmem:[%s9207_s15 + $0x198] sm:$0xff]  ;;  %v507_v26 = vld [vmem:[%s9207_s15 + $0x1a0] sm:$0xff] }
  0x34   : > { %v631_v56 = vpack.c.bf16 %v552_v50, %v551_v49  ;;  %v508_v27 = vld [vmem:[%s9207_s15 + $0x1a8] sm:$0xff]  ;;  %v565_v31 = vld [vmem:[%s9207_s15 + $0x370] sm:$0xff]  ;;  %v510_v36 = vld [vmem:[%s9207_s15 + $0x1b8] sm:$0xff] }
  0x35   : > { %v609_v30 = vpack.c.bf16 %v508_v27, %v507_v26  ;;  %v509_v35 = vld [vmem:[%s9207_s15 + $0x1b0] sm:$0xff]  ;;  %v511_v38 = vld [vmem:[%s9207_s15 + $0x1c0] sm:$0xff]  ;;  %v512_v39 = vld [vmem:[%s9207_s15 + $0x1c8] sm:$0xff] }
  0x36   : > { %8267 = vmatmul.mubr.msk.bf16.gmra.mxu1 %vm648_vm2, %v622_v5  ;;  %v604_v5 = vpack.c.bf16 %v498_v0, %v497_v63  ;;  %v611_v42 = vpack.c.bf16 %v512_v39, %v511_v38  ;;  %v569_v43 = vld [vmem:[%s9207_s15 + $0x390] sm:$0xff]  ;;  %v514_v48 = vld [vmem:[%s9207_s15 + $0x1d8] sm:$0xff]  ;;  %v515_v50 = vld [vmem:[%s9207_s15 + $0x1e0] sm:$0xff] }
  0x37   : > { %8270 = vmatprep.mubr.msk.bf16.mxu1 %vm648_vm2, %v623_v8  ;;  %v558_v8 = vld [vmem:[%s9207_s15 + $0x338] sm:$0xff]  ;;  %v513_v47 = vld [vmem:[%s9207_s15 + $0x1d0] sm:$0xff]  ;;  %v516_v51 = vld [vmem:[%s9207_s15 + $0x1e8] sm:$0xff] }
  0x38   : > { %v634_v13 = vpack.c.bf16 %v558_v8, %v557_v7  ;;  %v613_v54 = vpack.c.bf16 %v516_v51, %v515_v50  ;;  %v573_v55 = vld [vmem:[%s9207_s15 + $0x3b0] sm:$0xff]  ;;  %v518_v60 = vld [vmem:[%s9207_s15 + $0x1f8] sm:$0xff]  ;;  %v579_v2 = vld [vmem:[%s9207_s15 + $0x3e0] sm:$0xff] }
  0x39   : > { %v517_v59 = vld [vmem:[%s9207_s15 + $0x1f0] sm:$0xff]  ;;  %v580_v3 = vld [vmem:[%s9207_s15 + $0x3e8] sm:$0xff]  ;;  %v582_v7 = vld [vmem:[%s9207_s15 + $0x3f8] sm:$0xff] }
  0x3a   : > { %8207 = vmatmul.mubr.msk.bf16.gmra.mxu0 %vm648_vm2, %v592_v61  ;;  %v555_v61 = vld [vmem:[%s9207_s15 + $0x320] sm:$0xff]  ;;  %v614_v63 = vpack.c.bf16 %v518_v60, %v517_v59  ;;  %v577_v0 = vld [vmem:[%s9207_s15 + $0x3d0] sm:$0xff] }
  0x3b   : > { %8210 = vmatprep.mubr.msk.bf16.mxu0 %vm648_vm2, %v593_v62  ;;  %v556_v62 = vld [vmem:[%s9207_s15 + $0x328] sm:$0xff] }
  0x3c   : > { %v633_v4 = vpack.c.bf16 %v556_v62, %v555_v61 }
  0x3e   : > { %8271 = vmatmul.mubr.msk.bf16.gmra.mxu1 %vm648_vm2, %v624_v19  ;;  %v561_v19 = vld [vmem:[%s9207_s15 + $0x350] sm:$0xff] }
  0x3f   : > { %8274 = vmatprep.mubr.msk.bf16.mxu1 %vm648_vm2, %v625_v20  ;;  %v562_v20 = vld [vmem:[%s9207_s15 + $0x358] sm:$0xff] }
  0x40   : > { %v636_v25 = vpack.c.bf16 %v562_v20, %v561_v19 }
  0x42   : > { %8211 = vmatmul.mubr.msk.bf16.gmra.mxu0 %vm648_vm2, %v594_v9  ;;  %v559_v9 = vld [vmem:[%s9207_s15 + $0x340] sm:$0xff] }
  0x43   : > { %8214 = vmatprep.mubr.msk.bf16.mxu0 %vm648_vm2, %v595_v11  ;;  %v501_v11 = vld [vmem:[%s9207_s15 + $0x170] sm:$0xff]  ;;  %v635_v16 = vpack.c.bf16 %v560_v10, %v559_v9  ;;  %v8911_v9 = vld [vmem:[%s12653_s6 + $0x18] sm:$0xff]  }
  0x44   : > { %v606_v17 = vpack.c.bf16 %v502_v12, %v501_v11  ;;  %8454 = vmatprep.subr.bf16.mxu0 %v8911_v9  ;;  %v8912_v10 = vld [vmem:[%s12653_s6 + $0x10] sm:$0xff]  }
  0x45   : > { %8455 = vmatpush3.bf16.msra.mxu0 %v8911_v9 }
  0x46   : > { %8275 = vmatmul.mubr.msk.bf16.gmra.mxu1 %vm648_vm2, %v626_v29  ;;  %v608_v29 = vpack.c.bf16 %v506_v24, %v505_v23  ;;  %8456 = vmatprep.subr.bf16.mxu0 %v8912_v10 }
  0x47   : > { %8278 = vmatprep.mubr.msk.bf16.mxu1 %vm648_vm2, %v627_v32  ;;  %v566_v32 = vld [vmem:[%s9207_s15 + $0x378] sm:$0xff] }
  0x48   : > { %v638_v37 = vpack.c.bf16 %v566_v32, %v565_v31 }
  0x49   : > { %8457 = vmatpush3.bf16.msra.mxu0 %v8912_v10 }
  0x4a   : > { %8215 = vmatmul.mubr.msk.bf16.gmra.mxu0 %vm648_vm2, %v596_v21  ;;  %v563_v21 = vld [vmem:[%s9207_s15 + $0x360] sm:$0xff] }
  0x4b   : > { %8218 = vmatprep.mubr.msk.bf16.mxu0 %vm648_vm2, %v597_v22  ;;  %v564_v22 = vld [vmem:[%s9207_s15 + $0x368] sm:$0xff] }
  0x4c   : > { %v637_v28 = vpack.c.bf16 %v564_v22, %v563_v21 }
  0x4e   : > { %8279 = vmatmul.mubr.msk.bf16.gmra.mxu1 %vm648_vm2, %v628_v41  ;;  %v610_v41 = vpack.c.bf16 %v510_v36, %v509_v35 }
  0x4f   : > { %8282 = vmatprep.mubr.msk.bf16.mxu1 %vm648_vm2, %v629_v44  ;;  %v570_v44 = vld [vmem:[%s9207_s15 + $0x398] sm:$0xff] }
  0x50   : > { %v640_v49 = vpack.c.bf16 %v570_v44, %v569_v43 }
  0x52   : > { %8219 = vmatmul.mubr.msk.bf16.gmra.mxu0 %vm648_vm2, %v598_v33  ;;  %v567_v33 = vld [vmem:[%s9207_s15 + $0x380] sm:$0xff] }
  0x53   : > { %8222 = vmatprep.mubr.msk.bf16.mxu0 %vm648_vm2, %v599_v34  ;;  %v568_v34 = vld [vmem:[%s9207_s15 + $0x388] sm:$0xff] }
  0x54   : > { %v639_v40 = vpack.c.bf16 %v568_v34, %v567_v33 }
  0x56   : > { %8283 = vmatmul.mubr.msk.bf16.gmra.mxu1 %vm648_vm2, %v630_v53  ;;  %v612_v53 = vpack.c.bf16 %v514_v48, %v513_v47 }
  0x57   : > { %8286 = vmatprep.mubr.msk.bf16.mxu1 %vm648_vm2, %v631_v56  ;;  %v574_v56 = vld [vmem:[%s9207_s15 + $0x3b8] sm:$0xff] }
  0x58   : > { %v642_v61 = vpack.c.bf16 %v574_v56, %v573_v55 }
  0x5a   : > { %8223 = vmatmul.mubr.msk.bf16.gmra.mxu0 %vm648_vm2, %v600_v45  ;;  %v571_v45 = vld [vmem:[%s9207_s15 + $0x3a0] sm:$0xff] }
  0x5b   : > { %8226 = vmatprep.mubr.msk.bf16.mxu0 %vm648_vm2, %v601_v46  ;;  %v572_v46 = vld [vmem:[%s9207_s15 + $0x3a8] sm:$0xff] }
  0x5c   : > { %v641_v52 = vpack.c.bf16 %v572_v46, %v571_v45 }
  0x5e   : > { %8287 = vmatmul.mubr.msk.bf16.gmra.mxu1 %vm648_vm2, %v632_v1  ;;  %v578_v1 = vld [vmem:[%s9207_s15 + $0x3d8] sm:$0xff] }
  0x5f   : > { %8290 = vmatprep.mubr.msk.bf16.mxu1 %vm648_vm2, %v633_v4  ;;  %v644_v4 = vpack.c.bf16 %v578_v1, %v577_v0 }
  0x62   : > { %8227 = vmatmul.mubr.msk.bf16.gmra.mxu0 %vm648_vm2, %v602_v57  ;;  %v575_v57 = vld [vmem:[%s9207_s15 + $0x3c0] sm:$0xff] }
  0x63   : > { %8230 = vmatprep.mubr.msk.bf16.mxu0 %vm648_vm2, %v603_v58  ;;  %v576_v58 = vld [vmem:[%s9207_s15 + $0x3c8] sm:$0xff] }
  0x64   : > { %v643_v62 = vpack.c.bf16 %v576_v58, %v575_v57 }
  0x66   : > { %8291 = vmatmul.mubr.msk.bf16.gmra.mxu1 %vm648_vm2, %v634_v13  ;;  %v9427_v13 = vld [vmem:[%s9420_s24] ss:$0 sm:$0xff] }
  0x67   : > { %8294 = vmatprep.mubr.msk.bf16.mxu1 %vm648_vm2, %v635_v16 }
  0x6a   : > { %8231 = vmatmul.mubr.msk.bf16.gmra.mxu0 %vm648_vm2, %v604_v5  ;;  %v645_v5 = vpack.c.bf16 %v580_v3, %v579_v2 }
  0x6b   : > { %8234 = vmatprep.mubr.msk.bf16.mxu0 %vm648_vm2, %v605_v6  ;;  %v581_v6 = vld [vmem:[%s9207_s15 + $0x3f0] sm:$0xff] }
  0x6c   : > { %v646_v8 = vpack.c.bf16 %v582_v7, %v581_v6 }
  0x6e   : > { %8295 = vmatmul.mubr.msk.bf16.gmra.mxu1 %vm648_vm2, %v636_v25 }
  0x6f   : > { %8298 = vmatprep.mubr.msk.bf16.mxu1 %vm648_vm2, %v637_v28 }
  0x72   : > { %8235 = vmatmul.mubr.msk.bf16.gmra.mxu0 %vm648_vm2, %v606_v17 }
  0x73   : > { %8238 = vmatprep.mubr.msk.bf16.mxu0 %vm648_vm2, %v607_v18 }
  0x76   : > { %8299 = vmatmul.mubr.msk.bf16.gmra.mxu1 %vm648_vm2, %v638_v37 }
  0x77   : > { %8302 = vmatprep.mubr.msk.bf16.mxu1 %vm648_vm2, %v639_v40 }
  0x7a   : > { %8239 = vmatmul.mubr.msk.bf16.gmra.mxu0 %vm648_vm2, %v608_v29 }
  0x7b   : > { %8242 = vmatprep.mubr.msk.bf16.mxu0 %vm648_vm2, %v609_v30 }
  0x7e   : > { %8303 = vmatmul.mubr.msk.bf16.gmra.mxu1 %vm648_vm2, %v640_v49 }
  0x7f   : > { %8306 = vmatprep.mubr.msk.bf16.mxu1 %vm648_vm2, %v641_v52 }
  0x82   : > { %8243 = vmatmul.mubr.msk.bf16.gmra.mxu0 %vm648_vm2, %v610_v41 }
  0x83   : > { %8246 = vmatprep.mubr.msk.bf16.mxu0 %vm648_vm2, %v611_v42 }
  0x86   : > { %8307 = vmatmul.mubr.msk.bf16.gmra.mxu1 %vm648_vm2, %v642_v61 }
  0x87   : > { %8310 = vmatprep.mubr.msk.bf16.mxu1 %vm648_vm2, %v643_v62 }
  0x8a   : > { %8247 = vmatmul.mubr.msk.bf16.gmra.mxu0 %vm648_vm2, %v612_v53 }
  0x8b   : > { %8250 = vmatprep.mubr.msk.bf16.mxu0 %vm648_vm2, %v613_v54  ;;  %v8913_v54 = vld [vmem:[%s12653_s6 + $0x8] sm:$0xff]  }
  0x8c   : > { %8458 = vmatprep.subr.bf16.mxu0 %v8913_v54 }
  0x8d   : > { %8459 = vmatpush3.bf16.msra.mxu0 %v8913_v54 }
  0x8e   : > { %8311 = vmatmul.mubr.msk.bf16.gmra.mxu1 %vm648_vm2, %v644_v4 }
  0x8f   : > { %8314 = vmatprep.mubr.msk.bf16.mxu1 %vm648_vm2, %v645_v5 }
  0x92   : > { %8251 = vmatmul.mubr.msk.bf16.gmra.mxu0 %vm648_vm2, %v614_v63 }
  0x96   : > { %8315 = vmatmul.mubr.msk.bf16.gmra.mxu1 %vm648_vm2, %v646_v8 }
  0xda   : > { %v9422_v11 = vpop.f32.mrf.mxu0 }
  0xdb   : > { %12870 = vst [vmem:[#allocation2_spill] sm:$0xff] %v9422_v11  ;;  %v1402_v17 = vadd.f32 %v9422_v11, %v9427_v13 }
  0xdc   : > { %v9424_v12 = vpop.f32.mrf.mxu0 }
  0xdd   : > { %12871 = vst [vmem:[#allocation3_spill] sm:$0xff] %v9424_v12  ;;  %v1400_v15 = vadd.f32 %v9427_v13, %v9424_v12  ;;  %v1530_v24 = vmax.f32 %v1402_v17, 0.0 }
  0xde   : > { %v9429_v14 = vpop.f32.mrf.mxu0  ;;  %v9452_v31 = vpop.f32.mrf.mxu1 }
  0xdf   : > { %v1403_v16 = vadd.f32 %v9429_v14, %v9427_v13  ;;  %v1528_v22 = vmax.f32 %v1400_v15, 0.0 }
  0xe0   : > { %v9437_v18 = vpop.f32.mrf.mxu0  ;;  %v9461_v35 = vpop.f32.mrf.mxu1 }
  0xe1   : > { %12872 = vst [vmem:[#allocation4_spill] sm:$0xff] %v9437_v18  ;;  %v1401_v19 = vadd.f32 %v9427_v13, %v9437_v18  ;;  %v1531_v20 = vmax.f32 %v1403_v16, 0.0  ;;  %12877 = vst [vmem:[#allocation9_spill] sm:$0xff] %v9461_v35 }
  0xe2   : > { %v9441_v21 = vpop.f32.mrf.mxu0  ;;  %v9465_v40 = vpop.f32.mrf.mxu1 }
  0xe3   : > { %12873 = vst [vmem:[#allocation5_spill] sm:$0xff] %v9441_v21  ;;  %v1529_v23 = vmax.f32 %v1401_v19, 0.0  ;;  %v1657_v27 = vpack.c.bf16 %v1531_v20, %v1530_v24  ;;  %v1406_v32 = vadd.f32 %v9441_v21, %v9427_v13 }
  0xe4   : > { %v9443_v25 = vpop.f32.mrf.mxu0  ;;  %v9469_v44 = vpop.f32.mrf.mxu1 }
  0xe5   : > { %12874 = vst [vmem:[#allocation6_spill] sm:$0xff] %v9443_v25  ;;  %v1656_v26 = vpack.c.bf16 %v1529_v23, %v1528_v22  ;;  %v1404_v29 = vadd.f32 %v9427_v13, %v9443_v25  ;;  %v1534_v41 = vmax.f32 %v1406_v32, 0.0  ;;  %12880 = vst [vmem:[#allocation12_spill] sm:$0xff] %v9469_v44 }
  0xe6   : > { %v9445_v28 = vpop.f32.mrf.mxu0  ;;  %v9478_v49 = vpop.f32.mrf.mxu1 }
  0xe7   : > { %12875 = vst [vmem:[#allocation7_spill] sm:$0xff] %v9445_v28  ;;  %v1407_v30 = vadd.f32 %v9445_v28, %v9427_v13  ;;  %8326 = vmatprep.mubr.msk.bf16.mxu1 %vm1759_vm3, %v1656_v26  ;;  %v1532_v38 = vmax.f32 %v1404_v29, 0.0 }
  0xe8   : > { %v9456_v33 = vpop.f32.mrf.mxu0  ;;  %8327 = vmatmul.mubr.msk.bf16.vlgmr.msra.gmra.mxu1 %vm1759_vm3, %v1657_v27  ;;  %v9487_v53 = vpop.f32.mrf.mxu1 }
  0xe9   : > { %12876 = vst [vmem:[#allocation8_spill] sm:$0xff] %v9456_v33  ;;  %v1405_v34 = vadd.f32 %v9427_v13, %v9456_v33  ;;  %v1535_v36 = vmax.f32 %v1407_v30, 0.0 }
  0xea   : > { %v9463_v37 = vpop.f32.mrf.mxu0  ;;  %v9494_v59 = vpop.f32.mrf.mxu1 }
  0xeb   : > { %12878 = vst [vmem:[#allocation10_spill] sm:$0xff] %v9463_v37  ;;  %v1533_v39 = vmax.f32 %v1405_v34, 0.0  ;;  %v1659_v45 = vpack.c.bf16 %v1535_v36, %v1534_v41  ;;  %v1410_v50 = vadd.f32 %v9463_v37, %v9427_v13 }
  0xec   : > { %v9467_v42 = vpop.f32.mrf.mxu0  ;;  %v9498_v63 = vpop.f32.mrf.mxu1 }
  0xed   : > { %12879 = vst [vmem:[#allocation11_spill] sm:$0xff] %v9467_v42  ;;  %v1658_v43 = vpack.c.bf16 %v1533_v39, %v1532_v38  ;;  %v1408_v47 = vadd.f32 %v9427_v13, %v9467_v42  ;;  %v1538_v60 = vmax.f32 %v1410_v50, 0.0 }
  0xee   : > { %v9471_v46 = vpop.f32.mrf.mxu0  ;;  %v9507_v4 = vpop.f32.mrf.mxu1 }
  0xef   : > { %12881 = vst [vmem:[#allocation13_spill] sm:$0xff] %v9471_v46  ;;  %v1411_v48 = vadd.f32 %v9471_v46, %v9427_v13  ;;  %8330 = vmatprep.mubr.msk.bf16.mxu1 %vm1759_vm3, %v1658_v43  ;;  %v1536_v57 = vmax.f32 %v1408_v47, 0.0 }
  0xf0   : > { %v9482_v51 = vpop.f32.mrf.mxu0  ;;  %8331 = vmatmul.mubr.msk.bf16.gmra.mxu1 %vm1759_vm3, %v1659_v45  ;;  %v9516_v8 = vpop.f32.mrf.mxu1 }
  0xf1   : > { %12882 = vst [vmem:[#allocation14_spill] sm:$0xff] %v9482_v51  ;;  %v1409_v52 = vadd.f32 %v9427_v13, %v9482_v51  ;;  %v1539_v55 = vmax.f32 %v1411_v48, 0.0  ;;  %12887 = vst [vmem:[#allocation19_spill] sm:$0xff] %v9516_v8 }
  0xf2   : > { %v9492_v56 = vpop.f32.mrf.mxu0  ;;  %v9520_v17 = vpop.f32.mrf.mxu1 }
  0xf3   : > { %12883 = vst [vmem:[#allocation15_spill] sm:$0xff] %v9492_v56  ;;  %v1537_v58 = vmax.f32 %v1409_v52, 0.0  ;;  %v1661_v0 = vpack.c.bf16 %v1539_v55, %v1538_v60  ;;  %v1414_v5 = vadd.f32 %v9492_v56, %v9427_v13 }
  0xf4   : > { %v9496_v61 = vpop.f32.mrf.mxu0  ;;  %v9524_v23 = vpop.f32.mrf.mxu1 }
  0xf5   : > { %12884 = vst [vmem:[#allocation16_spill] sm:$0xff] %v9496_v61  ;;  %v1660_v62 = vpack.c.bf16 %v1537_v58, %v1536_v57  ;;  %v1412_v2 = vadd.f32 %v9427_v13, %v9496_v61  ;;  %v1542_v19 = vmax.f32 %v1414_v5, 0.0 }
  0xf6   : > { %v9500_v1 = vpop.f32.mrf.mxu0  ;;  %v9533_v30 = vpop.f32.mrf.mxu1 }
  0xf7   : > { %12885 = vst [vmem:[#allocation17_spill] sm:$0xff] %v9500_v1  ;;  %v1415_v3 = vadd.f32 %v9500_v1, %v9427_v13  ;;  %8334 = vmatprep.mubr.msk.bf16.mxu1 %vm1759_vm3, %v1660_v62  ;;  %v1540_v15 = vmax.f32 %v1412_v2, 0.0 }
  0xf8   : > { %v9511_v6 = vpop.f32.mrf.mxu0  ;;  %8335 = vmatmul.mubr.msk.bf16.gmra.mxu1 %vm1759_vm3, %v1661_v0  ;;  %v9542_v38 = vpop.f32.mrf.mxu1 }
  0xf9   : > { %12886 = vst [vmem:[#allocation18_spill] sm:$0xff] %v9511_v6  ;;  %v1413_v7 = vadd.f32 %v9427_v13, %v9511_v6  ;;  %v1543_v9 = vmax.f32 %v1415_v3, 0.0  ;;  %12892 = vst [vmem:[#allocation24_spill] sm:$0xff] %v9542_v38 }
  0xfa   : > { %v9518_v10 = vpop.f32.mrf.mxu0  ;;  %v9546_v47 = vpop.f32.mrf.mxu1 }
  0xfb   : > { %12888 = vst [vmem:[#allocation20_spill] sm:$0xff] %v9518_v10  ;;  %v1541_v16 = vmax.f32 %v1413_v7, 0.0  ;;  %v1663_v24 = vpack.c.bf16 %v1543_v9, %v1542_v19  ;;  %v1418_v32 = vadd.f32 %v9518_v10, %v9427_v13 }
  0xfc   : > { %v9522_v20 = vpop.f32.mrf.mxu0  ;;  %v9550_v54 = vpop.f32.mrf.mxu1 }
  0xfd   : > { %12889 = vst [vmem:[#allocation21_spill] sm:$0xff] %v9522_v20  ;;  %v1662_v22 = vpack.c.bf16 %v1541_v16, %v1540_v15  ;;  %v1416_v27 = vadd.f32 %v9427_v13, %v9522_v20  ;;  %v1546_v48 = vmax.f32 %v1418_v32, 0.0  ;;  %12895 = vst [vmem:[#allocation27_spill] sm:$0xff] %v9550_v54 }
  0xfe   : > { %v9526_v26 = vpop.f32.mrf.mxu0  ;;  %v9559_v62 = vpop.f32.mrf.mxu1 }
  0xff   : > { %12890 = vst [vmem:[#allocation22_spill] sm:$0xff] %v9526_v26  ;;  %v1419_v29 = vadd.f32 %v9526_v26, %v9427_v13  ;;  %8338 = vmatprep.mubr.msk.bf16.mxu1 %vm1759_vm3, %v1662_v22  ;;  %v1544_v43 = vmax.f32 %v1416_v27, 0.0 }
 0x100   : > { %v9537_v34 = vpop.f32.mrf.mxu0  ;;  %8339 = vmatmul.mubr.msk.bf16.gmra.mxu1 %vm1759_vm3, %v1663_v24  ;;  %v9568_v5 = vpop.f32.mrf.mxu1 }
 0x101   : > { %12891 = vst [vmem:[#allocation23_spill] sm:$0xff] %v9537_v34  ;;  %v1417_v36 = vadd.f32 %v9427_v13, %v9537_v34  ;;  %v1547_v39 = vmax.f32 %v1419_v29, 0.0  ;;  %12898 = vst [vmem:[#allocation30_spill] sm:$0xff] %v9568_v5 }
 0x102   : > { %v9544_v41 = vpop.f32.mrf.mxu0  ;;  %v9572_v19 = vpop.f32.mrf.mxu1 }
 0x103   : > { %12893 = vst [vmem:[#allocation25_spill] sm:$0xff] %v9544_v41  ;;  %v1545_v45 = vmax.f32 %v1417_v36, 0.0  ;;  %v1665_v55 = vpack.c.bf16 %v1547_v39, %v1546_v48  ;;  %v1422_v0 = vadd.f32 %v9544_v41, %v9427_v13 }
 0x104   : > { %v9548_v50 = vpop.f32.mrf.mxu0  ;;  %v9576_v29 = vpop.f32.mrf.mxu1 }
 0x105   : > { %12894 = vst [vmem:[#allocation26_spill] sm:$0xff] %v9548_v50  ;;  %v1664_v52 = vpack.c.bf16 %v1545_v45, %v1544_v43  ;;  %v1420_v58 = vadd.f32 %v9427_v13, %v9548_v50  ;;  %v1550_v22 = vmax.f32 %v1422_v0, 0.0  ;;  %12901 = vst [vmem:[#allocation33_spill] sm:$0xff] %v9576_v29 }
 0x106   : > { %v9552_v57 = vpop.f32.mrf.mxu0  ;;  %v9585_v45 = vpop.f32.mrf.mxu1 }
 0x107   : > { %12896 = vst [vmem:[#allocation28_spill] sm:$0xff] %v9552_v57  ;;  %v1423_v60 = vadd.f32 %v9552_v57, %v9427_v13  ;;  %8342 = vmatprep.mubr.msk.bf16.mxu1 %vm1759_vm3, %v1664_v52  ;;  %v1548_v15 = vmax.f32 %v1420_v58, 0.0 }
 0x108   : > { %v9563_v2 = vpop.f32.mrf.mxu0  ;;  %8343 = vmatmul.mubr.msk.bf16.gmra.mxu1 %vm1759_vm3, %v1665_v55  ;;  %v9594_v58 = vpop.f32.mrf.mxu1 }
 0x109   : > { %12897 = vst [vmem:[#allocation29_spill] sm:$0xff] %v9563_v2  ;;  %v1421_v3 = vadd.f32 %v9427_v13, %v9563_v2  ;;  %v1551_v7 = vmax.f32 %v1423_v60, 0.0  ;;  %12904 = vst [vmem:[#allocation36_spill] sm:$0xff] %v9594_v58  ;;  %v8914_v60 = vld [vmem:[%s12653_s6] sm:$0xff]  }
 0x10a   : > { %v9570_v9 = vpop.f32.mrf.mxu0  ;;  %8460 = vmatprep.subr.bf16.mxu0 %v8914_v60 }
 0x10b   : > { %12899 = vst [vmem:[#allocation31_spill] sm:$0xff] %v9570_v9  ;;  %v1549_v16 = vmax.f32 %v1421_v3, 0.0  ;;  %v1667_v32 = vpack.c.bf16 %v1551_v7, %v1550_v22  ;;  %v1426_v48 = vadd.f32 %v9570_v9, %v9427_v13  ;;  %8461 = vmatpush3.bf16.msra.mxu0 %v8914_v60 }
 0x10c   : > { %v9574_v24 = vpop.f32.mrf.mxu0 }
 0x10d   : > { %12900 = vst [vmem:[#allocation32_spill] sm:$0xff] %v9574_v24  ;;  %v1666_v27 = vpack.c.bf16 %v1549_v16, %v1548_v15  ;;  %v1424_v39 = vadd.f32 %v9427_v13, %v9574_v24  ;;  %v9601_v16 = vpop.f32.mrf.mxu1  ;;  %v1554_v22 = vmax.f32 %v1426_v48, 0.0 }
 0x10e   : > { %v9578_v36 = vpop.f32.mrf.mxu0 }
 0x10f   : > { %12902 = vst [vmem:[#allocation34_spill] sm:$0xff] %v9578_v36  ;;  %v1427_v43 = vadd.f32 %v9578_v36, %v9427_v13  ;;  %8346 = vmatprep.mubr.msk.bf16.mxu1 %vm1759_vm3, %v1666_v27  ;;  %v1552_v7 = vmax.f32 %v1424_v39, 0.0  ;;  %v9605_v24 = vpop.f32.mrf.mxu1 }
 0x110   : > { %v9589_v52 = vpop.f32.mrf.mxu0  ;;  %8347 = vmatmul.mubr.msk.bf16.gmra.mxu1 %vm1759_vm3, %v1667_v32  ;;  %12907 = vst [vmem:[#allocation39_spill] sm:$0xff] %v9605_v24 }
 0x111   : > { %12903 = vst [vmem:[#allocation35_spill] sm:$0xff] %v9589_v52  ;;  %v1425_v55 = vadd.f32 %v9427_v13, %v9589_v52  ;;  %v1555_v0 = vmax.f32 %v1427_v43, 0.0 }
 0x112   : > { %v9599_v3 = vpop.f32.mrf.mxu0 }
 0x113   : > { %12905 = vst [vmem:[#allocation37_spill] sm:$0xff] %v9599_v3  ;;  %v1553_v15 = vmax.f32 %v1425_v55, 0.0  ;;  %v1669_v9 = vpack.c.bf16 %v1555_v0, %v1554_v22  ;;  %v9614_v55 = vpop.f32.mrf.mxu1  ;;  %v1430_v48 = vadd.f32 %v9599_v3, %v9427_v13 }
 0x114   : > { %v9603_v27 = vpop.f32.mrf.mxu0 }
 0x115   : > { %12906 = vst [vmem:[#allocation38_spill] sm:$0xff] %v9603_v27  ;;  %v1668_v32 = vpack.c.bf16 %v1553_v15, %v1552_v7  ;;  %v1428_v43 = vadd.f32 %v9427_v13, %v9603_v27  ;;  %v9623_v7 = vpop.f32.mrf.mxu1  ;;  %v1558_v36 = vmax.f32 %v1430_v48, 0.0 }
 0x116   : > { %v9607_v52 = vpop.f32.mrf.mxu0  ;;  %12910 = vst [vmem:[#allocation42_spill] sm:$0xff] %v9623_v7 }
 0x117   : > { %12908 = vst [vmem:[#allocation40_spill] sm:$0xff] %v9607_v52  ;;  %v1431_v39 = vadd.f32 %v9607_v52, %v9427_v13  ;;  %8350 = vmatprep.mubr.msk.bf16.mxu1 %vm1759_vm3, %v1668_v32  ;;  %v1556_v27 = vmax.f32 %v1428_v43, 0.0  ;;  %v9627_v32 = vpop.f32.mrf.mxu1 }
 0x118   : > { %v9618_v60 = vpop.f32.mrf.mxu0  ;;  %8351 = vmatmul.mubr.msk.bf16.gmra.mxu1 %vm1759_vm3, %v1669_v9 }
 0x119   : > { %12909 = vst [vmem:[#allocation41_spill] sm:$0xff] %v9618_v60  ;;  %v1429_v0 = vadd.f32 %v9427_v13, %v9618_v60  ;;  %v1559_v15 = vmax.f32 %v1431_v39, 0.0  ;;  %v9631_v41 = vpop.f32.mrf.mxu1 }
 0x11a   : > { %v9625_v22 = vpop.f32.mrf.mxu0  ;;  %12913 = vst [vmem:[#allocation45_spill] sm:$0xff] %v9631_v41 }
 0x11b   : > { %12911 = vst [vmem:[#allocation43_spill] sm:$0xff] %v9625_v22  ;;  %v1557_v52 = vmax.f32 %v1429_v0, 0.0  ;;  %v1671_v2 = vpack.c.bf16 %v1559_v15, %v1558_v36  ;;  %v9640_v43 = vpop.f32.mrf.mxu1  ;;  %v1434_v48 = vadd.f32 %v9625_v22, %v9427_v13 }
 0x11c   : > { %v9629_v50 = vpop.f32.mrf.mxu0  ;;  %12915 = vst [vmem:[#allocation47_spill] sm:$0xff] %v9640_v43 }
 0x11d   : > { %12912 = vst [vmem:[#allocation44_spill] sm:$0xff] %v9629_v50  ;;  %v1670_v3 = vpack.c.bf16 %v1557_v52, %v1556_v27  ;;  %v1432_v60 = vadd.f32 %v9427_v13, %v9629_v50  ;;  %v9649_v52 = vpop.f32.mrf.mxu1  ;;  %v1562_v57 = vmax.f32 %v1434_v48, 0.0 }
 0x11e   : > { %v9633_v9 = vpop.f32.mrf.mxu0  ;;  %12917 = vst [vmem:[#allocation49_spill] sm:$0xff] %v9649_v52 }
 0x11f   : > { %12914 = vst [vmem:[#allocation46_spill] sm:$0xff] %v9633_v9  ;;  %v1435_v39 = vadd.f32 %v9633_v9, %v9427_v13  ;;  %8354 = vmatprep.mubr.msk.bf16.mxu1 %vm1759_vm3, %v1670_v3  ;;  %v1560_v50 = vmax.f32 %v1432_v60, 0.0  ;;  %v9653_v3 = vpop.f32.mrf.mxu1 }
 0x120   : > { %v9644_v0 = vpop.f32.mrf.mxu0  ;;  %8355 = vmatmul.mubr.msk.bf16.gmra.mxu1 %vm1759_vm3, %v1671_v2  ;;  %12919 = vst [vmem:[#allocation51_spill] sm:$0xff] %v9653_v3 }
 0x121   : > { %12916 = vst [vmem:[#allocation48_spill] sm:$0xff] %v9644_v0  ;;  %v1433_v36 = vadd.f32 %v9427_v13, %v9644_v0  ;;  %v1563_v27 = vmax.f32 %v1435_v39, 0.0  ;;  %v9659_v2 = vpop.f32.mrf.mxu1 }
 0x122   : > { %v9651_v15 = vpop.f32.mrf.mxu0  ;;  %12922 = vst [vmem:[#allocation54_spill] sm:$0xff] %v9659_v2 }
 0x123   : > { %12918 = vst [vmem:[#allocation50_spill] sm:$0xff] %v9651_v15  ;;  %v1561_v9 = vmax.f32 %v1433_v36, 0.0  ;;  %v1673_v10 = vpack.c.bf16 %v1563_v27, %v1562_v57  ;;  %v1438_v60 = vadd.f32 %v9651_v15, %v9427_v13  ;;  %v9675_v36 = vpop.f32.mrf.mxu1 }
 0x124   : > { %v9655_v20 = vpop.f32.mrf.mxu0  ;;  %12925 = vst [vmem:[#allocation57_spill] sm:$0xff] %v9675_v36 }
 0x125   : > { %12920 = vst [vmem:[#allocation52_spill] sm:$0xff] %v9655_v20  ;;  %v1672_v22 = vpack.c.bf16 %v1561_v9, %v1560_v50  ;;  %v1436_v0 = vadd.f32 %v9427_v13, %v9655_v20  ;;  %v9681_v56 = vpop.f32.mrf.mxu1 }
 0x126   : > { %v9657_v34 = vpop.f32.mrf.mxu0  ;;  %12928 = vst [vmem:[#allocation60_spill] sm:$0xff] %v9681_v56 }
 0x127   : > { %12921 = vst [vmem:[#allocation53_spill] sm:$0xff] %v9657_v34  ;;  %v1439_v39 = vadd.f32 %v9657_v34, %v9427_v13  ;;  %8358 = vmatprep.mubr.msk.bf16.mxu1 %vm1759_vm3, %v1672_v22  ;;  %v1564_v27 = vmax.f32 %v1436_v0, 0.0  ;;  %v1566_v34 = vmax.f32 %v1438_v60, 0.0 }
 0x128   : > { %v9668_v48 = vpop.f32.mrf.mxu0  ;;  %8359 = vmatmul.mubr.msk.bf16.gmra.mxu1 %vm1759_vm3, %v1673_v10 }
 0x129   : > { %12923 = vst [vmem:[#allocation55_spill] sm:$0xff] %v9668_v48  ;;  %v1437_v50 = vadd.f32 %v9427_v13, %v9668_v48  ;;  %v1567_v57 = vmax.f32 %v1439_v39, 0.0 }
 0x12a   : > { %v9673_v9 = vpop.f32.mrf.mxu0 }
 0x12b   : > { %12924 = vst [vmem:[#allocation56_spill] sm:$0xff] %v9673_v9  ;;  %v1565_v20 = vmax.f32 %v1437_v50, 0.0  ;;  %v1675_v61 = vpack.c.bf16 %v1567_v57, %v1566_v34  ;;  %v1442_v0 = vadd.f32 %v9673_v9, %v9427_v13  ;;  %v9697_v57 = vpop.f32.mrf.mxu1 }
 0x12c   : > { %v9677_v26 = vpop.f32.mrf.mxu0  ;;  %12931 = vst [vmem:[#allocation63_spill] sm:$0xff] %v9697_v57 }
 0x12d   : > { %12926 = vst [vmem:[#allocation58_spill] sm:$0xff] %v9677_v26  ;;  %v1674_v22 = vpack.c.bf16 %v1565_v20, %v1564_v27  ;;  %v1440_v10 = vadd.f32 %v9427_v13, %v9677_v26  ;;  %v9703_v1 = vpop.f32.mrf.mxu1 }
 0x12e   : > { %v9679_v15 = vpop.f32.mrf.mxu0  ;;  %12934 = vst [vmem:[#allocation66_spill] sm:$0xff] %v9703_v1 }
 0x12f   : > { %12927 = vst [vmem:[#allocation59_spill] sm:$0xff] %v9679_v15  ;;  %v1443_v39 = vadd.f32 %v9679_v15, %v9427_v13  ;;  %8362 = vmatprep.mubr.msk.bf16.mxu1 %vm1759_vm3, %v1674_v22  ;;  %v1568_v27 = vmax.f32 %v1440_v10, 0.0  ;;  %v1570_v15 = vmax.f32 %v1442_v0, 0.0 }
 0x130   : > { %v9690_v60 = vpop.f32.mrf.mxu0  ;;  %8363 = vmatmul.mubr.msk.bf16.gmra.mxu1 %vm1759_vm3, %v1675_v61 }
 0x131   : > { %12929 = vst [vmem:[#allocation61_spill] sm:$0xff] %v9690_v60  ;;  %v1441_v20 = vadd.f32 %v9427_v13, %v9690_v60  ;;  %v1571_v34 = vmax.f32 %v1443_v39, 0.0 }
 0x132   : > { %v9695_v50 = vpop.f32.mrf.mxu0 }
 0x133   : > { %12930 = vst [vmem:[#allocation62_spill] sm:$0xff] %v9695_v50  ;;  %v1569_v26 = vmax.f32 %v1441_v20, 0.0  ;;  %v1677_v6 = vpack.c.bf16 %v1571_v34, %v1570_v15  ;;  %v1446_v10 = vadd.f32 %v9695_v50, %v9427_v13  ;;  %v9719_v34 = vpop.f32.mrf.mxu1 }
 0x134   : > { %v9699_v48 = vpop.f32.mrf.mxu0  ;;  %12937 = vst [vmem:[#allocation69_spill] sm:$0xff] %v9719_v34 }
 0x135   : > { %12932 = vst [vmem:[#allocation64_spill] sm:$0xff] %v9699_v48  ;;  %v1676_v22 = vpack.c.bf16 %v1569_v26, %v1568_v27  ;;  %v1444_v61 = vadd.f32 %v9427_v13, %v9699_v48  ;;  %v9725_v37 = vpop.f32.mrf.mxu1 }
 0x136   : > { %v9701_v9 = vpop.f32.mrf.mxu0  ;;  %12940 = vst [vmem:[#allocation72_spill] sm:$0xff] %v9725_v37 }
 0x137   : > { %12933 = vst [vmem:[#allocation65_spill] sm:$0xff] %v9701_v9  ;;  %v1447_v39 = vadd.f32 %v9701_v9, %v9427_v13  ;;  %8366 = vmatprep.mubr.msk.bf16.mxu1 %vm1759_vm3, %v1676_v22  ;;  %v1572_v27 = vmax.f32 %v1444_v61, 0.0  ;;  %v1574_v9 = vmax.f32 %v1446_v10, 0.0 }
 0x138   : > { %v9712_v0 = vpop.f32.mrf.mxu0  ;;  %8367 = vmatmul.mubr.msk.bf16.gmra.mxu1 %vm1759_vm3, %v1677_v6 }
 0x139   : > { %12935 = vst [vmem:[#allocation67_spill] sm:$0xff] %v9712_v0  ;;  %v1445_v26 = vadd.f32 %v9427_v13, %v9712_v0  ;;  %v1575_v15 = vmax.f32 %v1447_v39, 0.0 }
 0x13a   : > { %v9717_v20 = vpop.f32.mrf.mxu0 }
 0x13b   : > { %12936 = vst [vmem:[#allocation68_spill] sm:$0xff] %v9717_v20  ;;  %v1573_v48 = vmax.f32 %v1445_v26, 0.0  ;;  %v1679_v42 = vpack.c.bf16 %v1575_v15, %v1574_v9  ;;  %v1450_v61 = vadd.f32 %v9717_v20, %v9427_v13  ;;  %v9741_v15 = vpop.f32.mrf.mxu1 }
 0x13c   : > { %v9721_v60 = vpop.f32.mrf.mxu0  ;;  %12943 = vst [vmem:[#allocation75_spill] sm:$0xff] %v9741_v15 }
 0x13d   : > { %12938 = vst [vmem:[#allocation70_spill] sm:$0xff] %v9721_v60  ;;  %v1678_v22 = vpack.c.bf16 %v1573_v48, %v1572_v27  ;;  %v1448_v6 = vadd.f32 %v9427_v13, %v9721_v60  ;;  %v9747_v46 = vpop.f32.mrf.mxu1 }
 0x13e   : > { %v9723_v50 = vpop.f32.mrf.mxu0  ;;  %12946 = vst [vmem:[#allocation78_spill] sm:$0xff] %v9747_v46 }
 0x13f   : > { %12939 = vst [vmem:[#allocation71_spill] sm:$0xff] %v9723_v50  ;;  %v1451_v39 = vadd.f32 %v9723_v50, %v9427_v13  ;;  %8370 = vmatprep.mubr.msk.bf16.mxu1 %vm1759_vm3, %v1678_v22  ;;  %v1576_v27 = vmax.f32 %v1448_v6, 0.0  ;;  %v1578_v50 = vmax.f32 %v1450_v61, 0.0 }
 0x140   : > { %v9734_v10 = vpop.f32.mrf.mxu0  ;;  %8371 = vmatmul.mubr.msk.bf16.gmra.mxu1 %vm1759_vm3, %v1679_v42 }
 0x141   : > { %12941 = vst [vmem:[#allocation73_spill] sm:$0xff] %v9734_v10  ;;  %v1449_v48 = vadd.f32 %v9427_v13, %v9734_v10  ;;  %v1579_v9 = vmax.f32 %v1451_v39, 0.0 }
 0x142   : > { %v9739_v26 = vpop.f32.mrf.mxu0 }
 0x143   : > { %12942 = vst [vmem:[#allocation74_spill] sm:$0xff] %v9739_v26  ;;  %v1577_v60 = vmax.f32 %v1449_v48, 0.0  ;;  %v1681_v51 = vpack.c.bf16 %v1579_v9, %v1578_v50  ;;  %v1454_v6 = vadd.f32 %v9739_v26, %v9427_v13  ;;  %v9763_v9 = vpop.f32.mrf.mxu1 }
 0x144   : > { %v9743_v0 = vpop.f32.mrf.mxu0  ;;  %12949 = vst [vmem:[#allocation81_spill] sm:$0xff] %v9763_v9 }
 0x145   : > { %12944 = vst [vmem:[#allocation76_spill] sm:$0xff] %v9743_v0  ;;  %v1680_v22 = vpack.c.bf16 %v1577_v60, %v1576_v27  ;;  %v1452_v42 = vadd.f32 %v9427_v13, %v9743_v0  ;;  %v9769_v21 = vpop.f32.mrf.mxu1 }
 0x146   : > { %v9745_v20 = vpop.f32.mrf.mxu0  ;;  %12952 = vst [vmem:[#allocation84_spill] sm:$0xff] %v9769_v21 }
 0x147   : > { %12945 = vst [vmem:[#allocation77_spill] sm:$0xff] %v9745_v20  ;;  %v1455_v39 = vadd.f32 %v9745_v20, %v9427_v13  ;;  %8374 = vmatprep.mubr.msk.bf16.mxu1 %vm1759_vm3, %v1680_v22  ;;  %v1580_v27 = vmax.f32 %v1452_v42, 0.0  ;;  %v1582_v20 = vmax.f32 %v1454_v6, 0.0 }
 0x148   : > { %v9756_v61 = vpop.f32.mrf.mxu0  ;;  %8375 = vmatmul.mubr.msk.bf16.gmra.mxu1 %vm1759_vm3, %v1681_v51 }
 0x149   : > { %12947 = vst [vmem:[#allocation79_spill] sm:$0xff] %v9756_v61  ;;  %v1453_v60 = vadd.f32 %v9427_v13, %v9756_v61  ;;  %v1583_v50 = vmax.f32 %v1455_v39, 0.0 }
 0x14a   : > { %v9761_v48 = vpop.f32.mrf.mxu0 }
 0x14b   : > { %12948 = vst [vmem:[#allocation80_spill] sm:$0xff] %v9761_v48  ;;  %v1581_v0 = vmax.f32 %v1453_v60, 0.0  ;;  %v1683_v25 = vpack.c.bf16 %v1583_v50, %v1582_v20  ;;  %v1458_v42 = vadd.f32 %v9761_v48, %v9427_v13  ;;  %v9785_v50 = vpop.f32.mrf.mxu1 }
 0x14c   : > { %v9765_v10 = vpop.f32.mrf.mxu0  ;;  %12955 = vst [vmem:[#allocation87_spill] sm:$0xff] %v9785_v50 }
 0x14d   : > { %12950 = vst [vmem:[#allocation82_spill] sm:$0xff] %v9765_v10  ;;  %v1682_v22 = vpack.c.bf16 %v1581_v0, %v1580_v27  ;;  %v1456_v51 = vadd.f32 %v9427_v13, %v9765_v10  ;;  %v9791_v28 = vpop.f32.mrf.mxu1 }
 0x14e   : > { %v9767_v26 = vpop.f32.mrf.mxu0  ;;  %12958 = vst [vmem:[#allocation90_spill] sm:$0xff] %v9791_v28 }
 0x14f   : > { %12951 = vst [vmem:[#allocation83_spill] sm:$0xff] %v9767_v26  ;;  %v1459_v39 = vadd.f32 %v9767_v26, %v9427_v13  ;;  %8378 = vmatprep.mubr.msk.bf16.mxu1 %vm1759_vm3, %v1682_v22  ;;  %v1584_v27 = vmax.f32 %v1456_v51, 0.0  ;;  %v1586_v26 = vmax.f32 %v1458_v42, 0.0 }
 0x150   : > { %v9778_v6 = vpop.f32.mrf.mxu0  ;;  %8379 = vmatmul.mubr.msk.bf16.gmra.mxu1 %vm1759_vm3, %v1683_v25  ;;  %v1464_v25 = vadd.f32 %v9427_v13, %v9461_v35 }
 0x151   : > { %12953 = vst [vmem:[#allocation85_spill] sm:$0xff] %v9778_v6  ;;  %v1457_v0 = vadd.f32 %v9427_v13, %v9778_v6  ;;  %v1587_v20 = vmax.f32 %v1459_v39, 0.0  ;;  %v1465_v39 = vadd.f32 %v9427_v13, %v9469_v44 }
 0x152   : > { %v9783_v60 = vpop.f32.mrf.mxu0 }
 0x153   : > { %12954 = vst [vmem:[#allocation86_spill] sm:$0xff] %v9783_v60  ;;  %v1585_v10 = vmax.f32 %v1457_v0, 0.0  ;;  %v1685_v33 = vpack.c.bf16 %v1587_v20, %v1586_v26  ;;  %v9809_v20 = vpop.f32.mrf.mxu1  ;;  %v1593_v35 = vmax.f32 %v1465_v39, 0.0 }
 0x154   : > { %v9787_v61 = vpop.f32.mrf.mxu0 }
 0x155   : > { %12956 = vst [vmem:[#allocation88_spill] sm:$0xff] %v9787_v61  ;;  %v1684_v22 = vpack.c.bf16 %v1585_v10, %v1584_v27  ;;  %v1460_v6 = vadd.f32 %v9427_v13, %v9787_v61  ;;  %v1462_v10 = vadd.f32 %v9783_v60, %v9427_v13  ;;  %v1592_v27 = vmax.f32 %v1464_v25, 0.0 }
 0x156   : > { %v9789_v48 = vpop.f32.mrf.mxu0  ;;  %v1467_v60 = vadd.f32 %v9465_v40, %v9427_v13  ;;  %v1469_v25 = vadd.f32 %v9427_v13, %v9498_v63 }
 0x157   : > { %12957 = vst [vmem:[#allocation89_spill] sm:$0xff] %v9789_v48  ;;  %v1463_v51 = vadd.f32 %v9789_v48, %v9427_v13  ;;  %8382 = vmatprep.mubr.msk.bf16.mxu1 %vm1759_vm3, %v1684_v22  ;;  %v1588_v44 = vmax.f32 %v1460_v6, 0.0  ;;  %v1590_v48 = vmax.f32 %v1462_v10, 0.0  ;;  %v1466_v22 = vadd.f32 %v9452_v31, %v9427_v13 }
 0x158   : > { %v9804_v26 = vpop.f32.mrf.mxu0  ;;  %8383 = vmatmul.mubr.msk.bf16.gmra.mxu1 %vm1759_vm3, %v1685_v33  ;;  %v9815_v33 = vpop.f32.mrf.mxu1  ;;  %v1688_v11 = vpack.c.bf16 %v1593_v35, %v1592_v27  ;;  %v1597_v39 = vmax.f32 %v1469_v25, 0.0  ;;  %v1470_v35 = vadd.f32 %v9478_v49, %v9427_v13 }
 0x159   : > { %v1461_v42 = vadd.f32 %v9427_v13, %v9804_v26  ;;  %v1591_v0 = vmax.f32 %v1463_v51, 0.0  ;;  %12959 = vst [vmem:[#allocation91_spill] sm:$0xff] %v9815_v33  ;;  %v1468_v51 = vadd.f32 %v9427_v13, %v9487_v53 }
 0x15a   : > { %v9824_v6 = vpop.f32.mrf.mxu1 }
 0x15b   : > { %v1589_v61 = vmax.f32 %v1461_v42, 0.0  ;;  %v1687_v12 = vpack.c.bf16 %v1591_v0, %v1590_v48  ;;  %v1596_v48 = vmax.f32 %v1468_v51, 0.0  ;;  %v1471_v42 = vadd.f32 %v9494_v59, %v9427_v13 }
 0x15c   : > { %v9830_v0 = vpop.f32.mrf.mxu1 }
 0x15d   : > { %v1686_v18 = vpack.c.bf16 %v1589_v61, %v1588_v44  ;;  %v1594_v44 = vmax.f32 %v1466_v22, 0.0  ;;  %v1595_v61 = vmax.f32 %v1467_v60, 0.0  ;;  %12960 = vst [vmem:[#allocation92_spill] sm:$0xff] %v9830_v0  ;;  %v1598_v60 = vmax.f32 %v1470_v35, 0.0 }
 0x15e   : > { %v1599_v27 = vmax.f32 %v1471_v42, 0.0  ;;  %v9838_v22 = vpop.f32.mrf.mxu1  ;;  %v1477_v35 = vadd.f32 %v9427_v13, %v9550_v54 }
 0x15f   : > { %8386 = vmatprep.mubr.msk.bf16.mxu1 %vm1759_vm3, %v1686_v18  ;;  %v1689_v10 = vpack.c.bf16 %v1595_v61, %v1594_v44  ;;  %v1690_v18 = vpack.c.bf16 %v1597_v39, %v1596_v48  ;;  %v1474_v61 = vadd.f32 %v9507_v4, %v9427_v13  ;;  %v1475_v48 = vadd.f32 %v9520_v17, %v9427_v13 }
 0x160   : > { %8387 = vmatmul.mubr.msk.bf16.gmra.mxu1 %vm1759_vm3, %v1687_v12  ;;  %v1472_v12 = vadd.f32 %v9427_v13, %v9516_v8  ;;  %v1691_v44 = vpack.c.bf16 %v1599_v27, %v1598_v60  ;;  %v9844_v39 = vpop.f32.mrf.mxu1  ;;  %v1605_v60 = vmax.f32 %v1477_v35, 0.0 }
 0x161   : > { %8390 = vmatprep.mubr.msk.bf16.mxu1 %vm1759_vm3, %v1688_v11  ;;  %v1473_v11 = vadd.f32 %v9427_v13, %v9524_v23  ;;  %v1602_v42 = vmax.f32 %v1474_v61, 0.0 }
 0x162   : > { %v1600_v51 = vmax.f32 %v1472_v12, 0.0  ;;  %v9852_v12 = vpop.f32.mrf.mxu1 }
 0x163   : > { %v1601_v25 = vmax.f32 %v1473_v11, 0.0 }
 0x165   : > { %v1692_v8 = vpack.c.bf16 %v1601_v25, %v1600_v51  ;;  %v1478_v51 = vadd.f32 %v9533_v30, %v9427_v13  ;;  %v1479_v25 = vadd.f32 %v9546_v47, %v9427_v13 }
 0x167   : > { %v1606_v61 = vmax.f32 %v1478_v51, 0.0 }
 0x168   : > { %8391 = vmatmul.mubr.msk.bf16.gmra.mxu1 %vm1759_vm3, %v1689_v10  ;;  %v1476_v10 = vadd.f32 %v9427_v13, %v9542_v38  ;;  %v9858_v38 = vpop.f32.mrf.mxu1 }
 0x169   : > { %8394 = vmatprep.mubr.msk.bf16.mxu1 %vm1759_vm3, %v1690_v18  ;;  %v1603_v18 = vmax.f32 %v1475_v48, 0.0  ;;  %v1607_v48 = vmax.f32 %v1479_v25, 0.0 }
 0x16a   : > { %v1604_v11 = vmax.f32 %v1476_v10, 0.0  ;;  %v9866_v10 = vpop.f32.mrf.mxu1 }
 0x16b   : > { %v1693_v27 = vpack.c.bf16 %v1603_v18, %v1602_v42  ;;  %12961 = vst [vmem:[#allocation93_spill] sm:$0xff] %v9866_v10  ;;  %v1695_v18 = vpack.c.bf16 %v1607_v48, %v1606_v61 }
 0x16c   : > { %v1694_v54 = vpack.c.bf16 %v1605_v60, %v1604_v11  ;;  %v1482_v11 = vadd.f32 %v9559_v62, %v9427_v13  ;;  %v1483_v60 = vadd.f32 %v9572_v19, %v9427_v13 }
 0x16e   : > { %v1610_v51 = vmax.f32 %v1482_v11, 0.0  ;;  %v1611_v25 = vmax.f32 %v1483_v60, 0.0 }
 0x170   : > { %8395 = vmatmul.mubr.msk.bf16.gmra.mxu1 %vm1759_vm3, %v1691_v44  ;;  %v1480_v44 = vadd.f32 %v9427_v13, %v9568_v5  ;;  %v9872_v5 = vpop.f32.mrf.mxu1  ;;  %v1697_v48 = vpack.c.bf16 %v1611_v25, %v1610_v51 }
 0x171   : > { %8398 = vmatprep.mubr.msk.bf16.mxu1 %vm1759_vm3, %v1692_v8  ;;  %v1481_v8 = vadd.f32 %v9427_v13, %v9576_v29  ;;  %12962 = vst [vmem:[#allocation94_spill] sm:$0xff] %v9872_v5 }
 0x172   : > { %v1608_v35 = vmax.f32 %v1480_v44, 0.0  ;;  %v9880_v44 = vpop.f32.mrf.mxu1 }
 0x173   : > { %v1609_v42 = vmax.f32 %v1481_v8, 0.0  ;;  %12963 = vst [vmem:[#allocation95_spill] sm:$0xff] %v9880_v44 }
 0x175   : > { %v1696_v29 = vpack.c.bf16 %v1609_v42, %v1608_v35  ;;  %v1486_v35 = vadd.f32 %v9585_v45, %v9427_v13  ;;  %v1487_v42 = vadd.f32 %v9601_v16, %v9427_v13 }
 0x177   : > { %v1614_v11 = vmax.f32 %v1486_v35, 0.0  ;;  %v1615_v60 = vmax.f32 %v1487_v42, 0.0 }
 0x178   : > { %8399 = vmatmul.mubr.msk.bf16.gmra.mxu1 %vm1759_vm3, %v1693_v27  ;;  %v1484_v27 = vadd.f32 %v9427_v13, %v9594_v58  ;;  %v9886_v58 = vpop.f32.mrf.mxu1 }
 0x179   : > { %8402 = vmatprep.mubr.msk.bf16.mxu1 %vm1759_vm3, %v1694_v54  ;;  %v1485_v54 = vadd.f32 %v9427_v13, %v9605_v24  ;;  %12964 = vst [vmem:[#allocation96_spill] sm:$0xff] %v9886_v58  ;;  %v1699_v25 = vpack.c.bf16 %v1615_v60, %v1614_v11 }
 0x17a   : > { %v1612_v8 = vmax.f32 %v1484_v27, 0.0  ;;  %v9894_v27 = vpop.f32.mrf.mxu1 }
 0x17b   : > { %v1613_v61 = vmax.f32 %v1485_v54, 0.0  ;;  %12965 = vst [vmem:[#allocation97_spill] sm:$0xff] %v9894_v27 }
 0x17d   : > { %v1698_v24 = vpack.c.bf16 %v1613_v61, %v1612_v8  ;;  %v1490_v8 = vadd.f32 %v9614_v55, %v9427_v13  ;;  %v1491_v61 = vadd.f32 %v9627_v32, %v9427_v13 }
 0x17f   : > { %v1618_v35 = vmax.f32 %v1490_v8, 0.0  ;;  %v1619_v42 = vmax.f32 %v1491_v61, 0.0 }
 0x180   : > { %8403 = vmatmul.mubr.msk.bf16.gmra.mxu1 %vm1759_vm3, %v1695_v18  ;;  %v1488_v18 = vadd.f32 %v9427_v13, %v9623_v7  ;;  %v9900_v7 = vpop.f32.mrf.mxu1 }
 0x181   : > { %8406 = vmatprep.mubr.msk.bf16.mxu1 %vm1759_vm3, %v1696_v29  ;;  %v1489_v29 = vadd.f32 %v9427_v13, %v9631_v41  ;;  %12966 = vst [vmem:[#allocation98_spill] sm:$0xff] %v9900_v7  ;;  %v1701_v60 = vpack.c.bf16 %v1619_v42, %v1618_v35 }
 0x182   : > { %v1616_v54 = vmax.f32 %v1488_v18, 0.0  ;;  %v9908_v18 = vpop.f32.mrf.mxu1 }
 0x183   : > { %v1617_v51 = vmax.f32 %v1489_v29, 0.0  ;;  %12967 = vst [vmem:[#allocation99_spill] sm:$0xff] %v9908_v18 }
 0x185   : > { %v1700_v41 = vpack.c.bf16 %v1617_v51, %v1616_v54  ;;  %v1494_v54 = vadd.f32 %v9640_v43, %v9427_v13  ;;  %v1495_v51 = vadd.f32 %v9653_v3, %v9427_v13 }
 0x187   : > { %v1622_v8 = vmax.f32 %v1494_v54, 0.0  ;;  %v1623_v61 = vmax.f32 %v1495_v51, 0.0 }
 0x188   : > { %8407 = vmatmul.mubr.msk.bf16.gmra.mxu1 %vm1759_vm3, %v1697_v48  ;;  %v1492_v48 = vadd.f32 %v9427_v13, %v9649_v52  ;;  %v9914_v52 = vpop.f32.mrf.mxu1 }
 0x189   : > { %8410 = vmatprep.mubr.msk.bf16.mxu1 %vm1759_vm3, %v1698_v24  ;;  %v1493_v24 = vadd.f32 %v9427_v13, %v9659_v2  ;;  %12968 = vst [vmem:[#allocation100_spill] sm:$0xff] %v9914_v52  ;;  %v1703_v42 = vpack.c.bf16 %v1623_v61, %v1622_v8 }
 0x18a   : > { %v1620_v29 = vmax.f32 %v1492_v48, 0.0  ;;  %v9922_v48 = vpop.f32.mrf.mxu1 }
 0x18b   : > { %v1621_v11 = vmax.f32 %v1493_v24, 0.0  ;;  %12969 = vst [vmem:[#allocation101_spill] sm:$0xff] %v9922_v48 }
 0x18d   : > { %v1702_v2 = vpack.c.bf16 %v1621_v11, %v1620_v29  ;;  %v1498_v29 = vadd.f32 %v9675_v36, %v9427_v13  ;;  %v1499_v11 = vadd.f32 %v9697_v57, %v9427_v13 }
 0x18f   : > { %v1626_v54 = vmax.f32 %v1498_v29, 0.0  ;;  %v1627_v51 = vmax.f32 %v1499_v11, 0.0 }
 0x190   : > { %8411 = vmatmul.mubr.msk.bf16.gmra.mxu1 %vm1759_vm3, %v1699_v25  ;;  %v1496_v25 = vadd.f32 %v9427_v13, %v9681_v56  ;;  %v9928_v56 = vpop.f32.mrf.mxu1 }
 0x191   : > { %8414 = vmatprep.mubr.msk.bf16.mxu1 %vm1759_vm3, %v1700_v41  ;;  %v1497_v41 = vadd.f32 %v9427_v13, %v9703_v1  ;;  %12970 = vst [vmem:[#allocation102_spill] sm:$0xff] %v9928_v56  ;;  %v1705_v61 = vpack.c.bf16 %v1627_v51, %v1626_v54 }
 0x192   : > { %v1624_v24 = vmax.f32 %v1496_v25, 0.0  ;;  %v9936_v25 = vpop.f32.mrf.mxu1 }
 0x193   : > { %v1625_v35 = vmax.f32 %v1497_v41, 0.0  ;;  %12971 = vst [vmem:[#allocation103_spill] sm:$0xff] %v9936_v25 }
 0x195   : > { %v1704_v1 = vpack.c.bf16 %v1625_v35, %v1624_v24  ;;  %v1502_v24 = vadd.f32 %v9719_v34, %v9427_v13  ;;  %v1503_v35 = vadd.f32 %v9741_v15, %v9427_v13  ;;  %v1509_v34 = vadd.f32 %v9427_v13, %v9830_v0 }
 0x197   : > { %v1630_v11 = vmax.f32 %v1502_v24, 0.0  ;;  %v1637_v36 = vmax.f32 %v1509_v34, 0.0  ;;  %v1512_v34 = vadd.f32 %v9427_v13, %v9844_v39 }
 0x198   : > { %8415 = vmatmul.mubr.msk.bf16.gmra.mxu1 %vm1759_vm3, %v1701_v60  ;;  %v1500_v60 = vadd.f32 %v9427_v13, %v9725_v37  ;;  %v9942_v37 = vpop.f32.mrf.mxu1 }
 0x199   : > { %8418 = vmatprep.mubr.msk.bf16.mxu1 %vm1759_vm3, %v1702_v2  ;;  %v1501_v2 = vadd.f32 %v9427_v13, %v9747_v46  ;;  %12972 = vst [vmem:[#allocation104_spill] sm:$0xff] %v9942_v37 }
 0x19a   : > { %v1628_v41 = vmax.f32 %v1500_v60, 0.0  ;;  %v1631_v60 = vmax.f32 %v1503_v35, 0.0 }
 0x19b   : > { %v1629_v8 = vmax.f32 %v1501_v2, 0.0 }
 0x19c   : > { %v1707_v15 = vpack.c.bf16 %v1631_v60, %v1630_v11 }
 0x19d   : > { %v1706_v46 = vpack.c.bf16 %v1629_v8, %v1628_v41  ;;  %v9953_v41 = vld [vmem:[%s12652_s5] ss:$0 sm:$0xff] }
 0x1a0   : > { %8419 = vmatmul.mubr.msk.bf16.gmra.mxu1 %vm1759_vm3, %v1703_v42  ;;  %v1504_v42 = vadd.f32 %v9427_v13, %v9769_v21 }
 0x1a1   : > { %8422 = vmatprep.mubr.msk.bf16.mxu1 %vm1759_vm3, %v1704_v1  ;;  %v1505_v1 = vadd.f32 %v9427_v13, %v9791_v28 }
 0x1a2   : > { %v1632_v54 = vmax.f32 %v1504_v42, 0.0 }
 0x1a3   : > { %v1633_v51 = vmax.f32 %v1505_v1, 0.0  ;;  %v1508_v1 = vadd.f32 %v9427_v13, %v9815_v33 }
 0x1a5   : > { %v1708_v42 = vpack.c.bf16 %v1633_v51, %v1632_v54  ;;  %v1636_v51 = vmax.f32 %v1508_v1, 0.0 }
 0x1a8   : > { %v8328_v29 = vpop.f32.mrf.mxu1  ;;  %8423 = vmatmul.mubr.msk.bf16.gmra.mxu1 %vm1759_vm3, %v1705_v61  ;;  %v1506_v61 = vadd.f32 %v9763_v9, %v9427_v13 }
 0x1a9   : > { %8426 = vmatprep.mubr.msk.bf16.mxu1 %vm1759_vm3, %v1706_v46  ;;  %v1507_v46 = vadd.f32 %v9785_v50, %v9427_v13  ;;  %v1995_v24 = vadd.f32 %v8328_v29, %v9953_v41 }
 0x1aa   : > { %v1986_v2 = vpop.f32.mrf.mxu1  ;;  %v1634_v50 = vmax.f32 %v1506_v61, 0.0  ;;  %v1511_v61 = vadd.f32 %v9824_v6, %v9427_v13 }
 0x1ab   : > { %v1987_v21 = vadd.f32 %v9953_v41, %v1986_v2  ;;  %v1635_v29 = vmax.f32 %v1507_v46, 0.0  ;;  %v2499_v57 = vmax.f32 %v1995_v24, 0.0 }
 0x1ac   : > { %v8329_v8 = vpop.f32.mrf.mxu1 }
 0x1ad   : > { %v1998_v28 = vadd.f32 %v8329_v8, %v9953_v41  ;;  %v2497_v60 = vmax.f32 %v1987_v21, 0.0  ;;  %v1510_v21 = vadd.f32 %v9809_v20, %v9427_v13 }
 0x1ae   : > { %v1989_v35 = vpop.f32.mrf.mxu1 }
 0x1af   : > { %v1990_v2 = vadd.f32 %v9953_v41, %v1989_v35  ;;  %v2500_v8 = vmax.f32 %v1998_v28, 0.0  ;;  %v1638_v1 = vmax.f32 %v1510_v21, 0.0  ;;  %v1515_v21 = vadd.f32 %v9852_v12, %v9427_v13 }
 0x1b0   : > { %v8332_v11 = vpop.f32.mrf.mxu1  ;;  %8427 = vmatmul.mubr.msk.bf16.gmra.mxu1 %vm1759_vm3, %v1707_v15  ;;  %v1709_v15 = vpack.c.bf16 %v1635_v29, %v1634_v50 }
 0x1b1   : > { %v2498_v9 = vmax.f32 %v1990_v2, 0.0  ;;  %8430 = vmatprep.mubr.msk.bf16.mxu1 %vm1759_vm3, %v1708_v42  ;;  %v2626_v43 = vpack.c.bf16 %v2500_v8, %v2499_v57  ;;  %v2011_v46 = vadd.f32 %v8332_v11, %v9953_v41  ;;  %v1710_v57 = vpack.c.bf16 %v1637_v36, %v1636_v51 }
 0x1b2   : > { %v2002_v54 = vpop.f32.mrf.mxu1  ;;  %v1639_v2 = vmax.f32 %v1511_v61, 0.0  ;;  %v1640_v8 = vmax.f32 %v1512_v34, 0.0 }
 0x1b3   : > { %v2625_v33 = vpack.c.bf16 %v2498_v9, %v2497_v60  ;;  %v2003_v0 = vadd.f32 %v9953_v41, %v2002_v54 }
 0x1b4   : > { %v8333_v3 = vpop.f32.mrf.mxu1 }
 0x1b5   : > { %v2014_v28 = vadd.f32 %v8333_v3, %v9953_v41  ;;  %8462 = vmatprep.mubr.msk.bf16.mxu0 %vm1759_vm3, %v2625_v33  ;;  %v1513_v3 = vadd.f32 %v9427_v13, %v9858_v38  ;;  %v2501_v35 = vmax.f32 %v2003_v0, 0.0  ;;  %v1711_v0 = vpack.c.bf16 %v1639_v2, %v1638_v1 }
 0x1b6   : > { %v2005_v24 = vpop.f32.mrf.mxu1  ;;  %8463 = vmatmul.mubr.msk.bf16.vlgmr.msra.gmra.mxu0 %vm1759_vm3, %v2626_v43  ;;  %v2503_v43 = vmax.f32 %v2011_v46, 0.0  ;;  %v1643_v1 = vmax.f32 %v1515_v21, 0.0 }
 0x1b7   : > { %v2006_v9 = vadd.f32 %v9953_v41, %v2005_v24  ;;  %v2504_v50 = vmax.f32 %v2014_v28, 0.0  ;;  %v1641_v11 = vmax.f32 %v1513_v3, 0.0 }
 0x1b8   : > { %v8336_v33 = vpop.f32.mrf.mxu1  ;;  %8431 = vmatmul.mubr.msk.bf16.gmra.mxu1 %vm1759_vm3, %v1709_v15  ;;  %v1514_v15 = vadd.f32 %v9838_v22, %v9427_v13 }
 0x1b9   : > { %v2502_v42 = vmax.f32 %v2006_v9, 0.0  ;;  %8434 = vmatprep.mubr.msk.bf16.mxu1 %vm1759_vm3, %v1710_v57  ;;  %v2628_v29 = vpack.c.bf16 %v2504_v50, %v2503_v43  ;;  %v2027_v61 = vadd.f32 %v8336_v33, %v9953_v41  ;;  %v1712_v24 = vpack.c.bf16 %v1641_v11, %v1640_v8  ;;  %v9995_v57 = vld [vmem:[%s9420_s24] ss:$0 sm:$0xff]  ;;  %s9098_s24 = smov 64  }
 0x1ba   : > { %v2018_v36 = vpop.f32.mrf.mxu1  ;;  %v1516_v34 = vadd.f32 %v9995_v57, %v9872_v5  ;;  %v1517_v3 = vadd.f32 %v9995_v57, %v9886_v58  ;;  %v13056_v58 = vld [vmem:[#allocation44_spill] sm:$0xff] }
 0x1bb   : > { %v2627_v60 = vpack.c.bf16 %v2502_v42, %v2501_v35  ;;  %v2019_v51 = vadd.f32 %v9953_v41, %v2018_v36  ;;  %v1642_v42 = vmax.f32 %v1514_v15, 0.0  ;;  %v2507_v2 = vmax.f32 %v2027_v61, 0.0 }
 0x1bc   : > { %v8337_v54 = vpop.f32.mrf.mxu1  ;;  %v1644_v36 = vmax.f32 %v1516_v34, 0.0  ;;  %v1645_v8 = vmax.f32 %v1517_v3, 0.0  ;;  %v1519_v15 = vadd.f32 %v9995_v57, %v9880_v44  ;;  %v1521_v34 = vadd.f32 %v9995_v57, %v9914_v52  ;;  %v13028_v44 = vld [vmem:[#allocation26_spill] sm:$0xff] }
 0x1bd   : > { %v2030_v28 = vadd.f32 %v8337_v54, %v9953_v41  ;;  %8466 = vmatprep.mubr.msk.bf16.mxu0 %vm1759_vm3, %v2627_v60  ;;  %v2505_v13 = vmax.f32 %v2019_v51, 0.0  ;;  %v1518_v51 = vadd.f32 %v9995_v57, %v9866_v10  ;;  %v13038_v10 = vld [vmem:[#allocation32_spill] sm:$0xff] }
 0x1be   : > { %v2021_v46 = vpop.f32.mrf.mxu1  ;;  %8467 = vmatmul.mubr.msk.bf16.gmra.mxu0 %vm1759_vm3, %v2628_v29 }
 0x1bf   : > { %v2022_v9 = vadd.f32 %v9953_v41, %v2021_v46  ;;  %v2508_v50 = vmax.f32 %v2030_v28, 0.0  ;;  %v1714_v46 = vpack.c.bf16 %v1645_v8, %v1644_v36  ;;  %v1649_v36 = vmax.f32 %v1521_v34, 0.0 }
 0x1c0   : > { %v8340_v35 = vpop.f32.mrf.mxu1  ;;  %8435 = vmatmul.mubr.msk.bf16.gmra.mxu1 %vm1759_vm3, %v1711_v0  ;;  %v1713_v0 = vpack.c.bf16 %v1643_v1, %v1642_v42  ;;  %v1647_v42 = vmax.f32 %v1519_v15, 0.0 }
 0x1c1   : > { %v2506_v33 = vmax.f32 %v2022_v9, 0.0  ;;  %8438 = vmatprep.mubr.msk.bf16.mxu1 %vm1759_vm3, %v1712_v24  ;;  %v2630_v60 = vpack.c.bf16 %v2508_v50, %v2507_v2  ;;  %v2043_v21 = vadd.f32 %v8340_v35, %v9953_v41  ;;  %v1520_v24 = vadd.f32 %v9995_v57, %v9900_v7  ;;  %v13027_v7 = vld [vmem:[#allocation25_spill] sm:$0xff] }
 0x1c2   : > { %v2034_v43 = vpop.f32.mrf.mxu1  ;;  %v1646_v35 = vmax.f32 %v1518_v51, 0.0  ;;  %v1523_v51 = vadd.f32 %v9995_v57, %v9908_v18 }
 0x1c3   : > { %v2629_v11 = vpack.c.bf16 %v2506_v33, %v2505_v13  ;;  %v2035_v54 = vadd.f32 %v9953_v41, %v2034_v43  ;;  %v2511_v1 = vmax.f32 %v2043_v21, 0.0  ;;  %v1648_v43 = vmax.f32 %v1520_v24, 0.0 }
 0x1c4   : > { %v8341_v29 = vpop.f32.mrf.mxu1  ;;  %v1525_v24 = vadd.f32 %v9995_v57, %v9942_v37 }
 0x1c5   : > { %v2046_v28 = vadd.f32 %v8341_v29, %v9953_v41  ;;  %8470 = vmatprep.mubr.msk.bf16.mxu0 %vm1759_vm3, %v2629_v11  ;;  %v2509_v13 = vmax.f32 %v2035_v54, 0.0  ;;  %v1522_v54 = vadd.f32 %v9995_v57, %v9894_v27 }
 0x1c6   : > { %v2037_v61 = vpop.f32.mrf.mxu1  ;;  %8471 = vmatmul.mubr.msk.bf16.gmra.mxu0 %vm1759_vm3, %v2630_v60 }
 0x1c7   : > { %v2038_v3 = vadd.f32 %v9953_v41, %v2037_v61  ;;  %v2512_v9 = vmax.f32 %v2046_v28, 0.0  ;;  %v1716_v61 = vpack.c.bf16 %v1649_v36, %v1648_v43  ;;  %v1653_v43 = vmax.f32 %v1525_v24, 0.0 }
 0x1c8   : > { %v8344_v50 = vpop.f32.mrf.mxu1  ;;  %8439 = vmatmul.mubr.msk.bf16.gmra.mxu1 %vm1759_vm3, %v1713_v0  ;;  %v1715_v0 = vpack.c.bf16 %v1647_v42, %v1646_v35  ;;  %v1651_v35 = vmax.f32 %v1523_v51, 0.0 }
 0x1c9   : > { %v2510_v33 = vmax.f32 %v2038_v3, 0.0  ;;  %8442 = vmatprep.mubr.msk.bf16.mxu1 %vm1759_vm3, %v1714_v46  ;;  %v2632_v11 = vpack.c.bf16 %v2512_v9, %v2511_v1  ;;  %v2059_v15 = vadd.f32 %v8344_v50, %v9953_v41  ;;  %v1524_v46 = vadd.f32 %v9995_v57, %v9928_v56 }
 0x1ca   : > { %v2050_v2 = vpop.f32.mrf.mxu1  ;;  %v1650_v50 = vmax.f32 %v1522_v54, 0.0  ;;  %v1527_v54 = vadd.f32 %v9995_v57, %v9936_v25 }
 0x1cb   : > { %v2631_v8 = vpack.c.bf16 %v2510_v33, %v2509_v13  ;;  %v2051_v29 = vadd.f32 %v9953_v41, %v2050_v2  ;;  %v2515_v42 = vmax.f32 %v2059_v15, 0.0  ;;  %v1652_v2 = vmax.f32 %v1524_v46, 0.0 }
 0x1cc   : > { %v8345_v60 = vpop.f32.mrf.mxu1 }
 0x1cd   : > { %v2062_v28 = vadd.f32 %v8345_v60, %v9953_v41  ;;  %8474 = vmatprep.mubr.msk.bf16.mxu0 %vm1759_vm3, %v2631_v8  ;;  %v2513_v13 = vmax.f32 %v2051_v29, 0.0  ;;  %v1526_v29 = vadd.f32 %v9995_v57, %v9922_v48 }
 0x1ce   : > { %v2053_v21 = vpop.f32.mrf.mxu1  ;;  %8475 = vmatmul.mubr.msk.bf16.gmra.mxu0 %vm1759_vm3, %v2632_v11 }
 0x1cf   : > { %v2054_v34 = vadd.f32 %v9953_v41, %v2053_v21  ;;  %v2516_v3 = vmax.f32 %v2062_v28, 0.0  ;;  %v1718_v21 = vpack.c.bf16 %v1653_v43, %v1652_v2 }
 0x1d0   : > { %v8348_v9 = vpop.f32.mrf.mxu1  ;;  %8443 = vmatmul.mubr.msk.bf16.gmra.mxu1 %vm1759_vm3, %v1715_v0  ;;  %v1717_v0 = vpack.c.bf16 %v1651_v35, %v1650_v50 }
 0x1d1   : > { %v2514_v33 = vmax.f32 %v2054_v34, 0.0  ;;  %8446 = vmatprep.mubr.msk.bf16.mxu1 %vm1759_vm3, %v1716_v61  ;;  %v2634_v8 = vpack.c.bf16 %v2516_v3, %v2515_v42  ;;  %v2075_v51 = vadd.f32 %v8348_v9, %v9953_v41 }
 0x1d2   : > { %v2066_v1 = vpop.f32.mrf.mxu1 }
 0x1d3   : > { %v2633_v36 = vpack.c.bf16 %v2514_v33, %v2513_v13  ;;  %v2067_v60 = vadd.f32 %v9953_v41, %v2066_v1  ;;  %v1654_v13 = vmax.f32 %v1526_v29, 0.0  ;;  %v1655_v33 = vmax.f32 %v1527_v54, 0.0 }
 0x1d4   : > { %v8349_v11 = vpop.f32.mrf.mxu1  ;;  %v2519_v50 = vmax.f32 %v2075_v51, 0.0 }
 0x1d5   : > { %v2078_v28 = vadd.f32 %v8349_v11, %v9953_v41  ;;  %8478 = vmatprep.mubr.msk.bf16.mxu0 %vm1759_vm3, %v2633_v36  ;;  %v2517_v34 = vmax.f32 %v2067_v60, 0.0  ;;  %v1719_v43 = vpack.c.bf16 %v1655_v33, %v1654_v13 }
 0x1d6   : > { %v2069_v15 = vpop.f32.mrf.mxu1  ;;  %8479 = vmatmul.mubr.msk.bf16.gmra.mxu0 %vm1759_vm3, %v2634_v8 }
 0x1d7   : > { %v2070_v61 = vadd.f32 %v9953_v41, %v2069_v15  ;;  %v2520_v46 = vmax.f32 %v2078_v28, 0.0 }
 0x1d8   : > { %v8352_v24 = vpop.f32.mrf.mxu1  ;;  %8447 = vmatmul.mubr.msk.bf16.gmra.mxu1 %vm1759_vm3, %v1717_v0 }
 0x1d9   : > { %v2518_v3 = vmax.f32 %v2070_v61, 0.0  ;;  %8450 = vmatprep.mubr.msk.bf16.mxu1 %vm1759_vm3, %v1718_v21  ;;  %v2636_v9 = vpack.c.bf16 %v2520_v46, %v2519_v50  ;;  %v2091_v36 = vadd.f32 %v8352_v24, %v9953_v41 }
 0x1da   : > { %v2082_v57 = vpop.f32.mrf.mxu1 }
 0x1db   : > { %v2635_v35 = vpack.c.bf16 %v2518_v3, %v2517_v34  ;;  %v2083_v1 = vadd.f32 %v9953_v41, %v2082_v57  ;;  %v2523_v54 = vmax.f32 %v2091_v36, 0.0 }
 0x1dc   : > { %v8353_v42 = vpop.f32.mrf.mxu1 }
 0x1dd   : > { %v2094_v2 = vadd.f32 %v8353_v42, %v9953_v41  ;;  %8482 = vmatprep.mubr.msk.bf16.mxu0 %vm1759_vm3, %v2635_v35  ;;  %v2521_v0 = vmax.f32 %v2083_v1, 0.0 }
 0x1de   : > { %v2085_v8 = vpop.f32.mrf.mxu1  ;;  %8483 = vmatmul.mubr.msk.bf16.gmra.mxu0 %vm1759_vm3, %v2636_v9 }
 0x1df   : > { %v2086_v11 = vadd.f32 %v9953_v41, %v2085_v8  ;;  %v2524_v60 = vmax.f32 %v2094_v2, 0.0 }
 0x1e0   : > { %v8356_v28 = vpop.f32.mrf.mxu1  ;;  %8451 = vmatmul.mubr.msk.bf16.gmra.mxu1 %vm1759_vm3, %v1719_v43 }
 0x1e1   : > { %v2522_v29 = vmax.f32 %v2086_v11, 0.0  ;;  %v2638_v21 = vpack.c.bf16 %v2524_v60, %v2523_v54  ;;  %v2107_v34 = vadd.f32 %v8356_v28, %v9953_v41 }
 0x1e2   : > { %v2098_v51 = vpop.f32.mrf.mxu1 }
 0x1e3   : > { %v2637_v15 = vpack.c.bf16 %v2522_v29, %v2521_v0  ;;  %v2099_v46 = vadd.f32 %v9953_v41, %v2098_v51  ;;  %v2527_v9 = vmax.f32 %v2107_v34, 0.0  ;;  %v7710_v34 = vld [vmem:[%s443_s18] ss:$0 sm:$0xff] }
 0x1e4   : > { %v8357_v61 = vpop.f32.mrf.mxu1  ;;  %4104 = vrot.lane.b32.xlu0 %v7710_v34, %s9098_s24 }
 0x1e5   : > { %v2110_v24 = vadd.f32 %v8357_v61, %v9953_v41  ;;  %8486 = vmatprep.mubr.msk.bf16.mxu0 %vm1759_vm3, %v2637_v15  ;;  %v2525_v57 = vmax.f32 %v2099_v46, 0.0 }
 0x1e6   : > { %v2101_v3 = vpop.f32.mrf.mxu1  ;;  %8487 = vmatmul.mubr.msk.bf16.gmra.mxu0 %vm1759_vm3, %v2638_v21 }
 0x1e7   : > { %v2102_v13 = vadd.f32 %v9953_v41, %v2101_v3  ;;  %v2528_v33 = vmax.f32 %v2110_v24, 0.0 }
 0x1e8   : > { %v8360_v50 = vpop.f32.mrf.mxu1 }
 0x1e9   : > { %v2526_v35 = vmax.f32 %v2102_v13, 0.0  ;;  %v2640_v2 = vpack.c.bf16 %v2528_v33, %v2527_v9  ;;  %v2123_v11 = vadd.f32 %v8360_v50, %v9953_v41 }
 0x1ea   : > { %v2114_v42 = vpop.f32.mrf.mxu1 }
 0x1eb   : > { %v2639_v1 = vpack.c.bf16 %v2526_v35, %v2525_v57  ;;  %v2115_v36 = vadd.f32 %v9953_v41, %v2114_v42  ;;  %v2531_v15 = vmax.f32 %v2123_v11, 0.0 }
 0x1ec   : > { %v8361_v43 = vpop.f32.mrf.mxu1 }
 0x1ed   : > { %v2126_v8 = vadd.f32 %v8361_v43, %v9953_v41  ;;  %8490 = vmatprep.mubr.msk.bf16.mxu0 %vm1759_vm3, %v2639_v1  ;;  %v2529_v54 = vmax.f32 %v2115_v36, 0.0 }
 0x1ee   : > { %v2117_v60 = vpop.f32.mrf.mxu1  ;;  %8491 = vmatmul.mubr.msk.bf16.gmra.mxu0 %vm1759_vm3, %v2640_v2 }
 0x1ef   : > { %v2118_v28 = vadd.f32 %v9953_v41, %v2117_v60  ;;  %v2532_v0 = vmax.f32 %v2126_v8, 0.0 }
 0x1f0   : > { %v8364_v29 = vpop.f32.mrf.mxu1 }
 0x1f1   : > { %v2530_v51 = vmax.f32 %v2118_v28, 0.0  ;;  %v2642_v46 = vpack.c.bf16 %v2532_v0, %v2531_v15  ;;  %v2139_v33 = vadd.f32 %v8364_v29, %v9953_v41 }
 0x1f2   : > { %v2130_v21 = vpop.f32.mrf.mxu1 }
 0x1f3   : > { %v2641_v61 = vpack.c.bf16 %v2530_v51, %v2529_v54  ;;  %v2131_v3 = vadd.f32 %v9953_v41, %v2130_v21  ;;  %v2535_v2 = vmax.f32 %v2139_v33, 0.0 }
 0x1f4   : > { %v8365_v24 = vpop.f32.mrf.mxu1 }
 0x1f5   : > { %v2142_v13 = vadd.f32 %v8365_v24, %v9953_v41  ;;  %8494 = vmatprep.mubr.msk.bf16.mxu0 %vm1759_vm3, %v2641_v61  ;;  %v2533_v42 = vmax.f32 %v2131_v3, 0.0 }
 0x1f6   : > { %v2133_v50 = vpop.f32.mrf.mxu1  ;;  %8495 = vmatmul.mubr.msk.bf16.gmra.mxu0 %vm1759_vm3, %v2642_v46 }
 0x1f7   : > { %v2134_v57 = vadd.f32 %v9953_v41, %v2133_v50  ;;  %v2536_v35 = vmax.f32 %v2142_v13, 0.0 }
 0x1f8   : > { %v8368_v9 = vpop.f32.mrf.mxu1 }
 0x1f9   : > { %v2534_v1 = vmax.f32 %v2134_v57, 0.0  ;;  %v2644_v8 = vpack.c.bf16 %v2536_v35, %v2535_v2  ;;  %v2155_v0 = vadd.f32 %v8368_v9, %v9953_v41 }
 0x1fa   : > { %v2146_v43 = vpop.f32.mrf.mxu1 }
 0x1fb   : > { %v2643_v36 = vpack.c.bf16 %v2534_v1, %v2533_v42  ;;  %v2147_v60 = vadd.f32 %v9953_v41, %v2146_v43  ;;  %v2539_v46 = vmax.f32 %v2155_v0, 0.0 }
 0x1fc   : > { %v8369_v11 = vpop.f32.mrf.mxu1 }
 0x1fd   : > { %v2158_v28 = vadd.f32 %v8369_v11, %v9953_v41  ;;  %8498 = vmatprep.mubr.msk.bf16.mxu0 %vm1759_vm3, %v2643_v36  ;;  %v2537_v21 = vmax.f32 %v2147_v60, 0.0 }
 0x1fe   : > { %v2149_v29 = vpop.f32.mrf.mxu1  ;;  %8499 = vmatmul.mubr.msk.bf16.gmra.mxu0 %vm1759_vm3, %v2644_v8 }
 0x1ff   : > { %v2150_v54 = vadd.f32 %v9953_v41, %v2149_v29  ;;  %v2540_v51 = vmax.f32 %v2158_v28, 0.0 }
 0x200   : > { %v8372_v15 = vpop.f32.mrf.mxu1 }
 0x201   : > { %v2538_v61 = vmax.f32 %v2150_v54, 0.0  ;;  %v2646_v3 = vpack.c.bf16 %v2540_v51, %v2539_v46  ;;  %v2171_v57 = vadd.f32 %v8372_v15, %v9953_v41 }
 0x202   : > { %v2162_v24 = vpop.f32.mrf.mxu1 }
 0x203   : > { %v2645_v34 = vpack.c.bf16 %v2538_v61, %v2537_v21  ;;  %v2163_v33 = vadd.f32 %v9953_v41, %v2162_v24  ;;  %v2543_v36 = vmax.f32 %v2171_v57, 0.0 }
 0x204   : > { %v8373_v13 = vpop.f32.mrf.mxu1 }
 0x205   : > { %v2174_v50 = vadd.f32 %v8373_v13, %v9953_v41  ;;  %8502 = vmatprep.mubr.msk.bf16.mxu0 %vm1759_vm3, %v2645_v34  ;;  %v2541_v2 = vmax.f32 %v2163_v33, 0.0 }
 0x206   : > { %v2165_v35 = vpop.f32.mrf.mxu1  ;;  %8503 = vmatmul.mubr.msk.bf16.gmra.mxu0 %vm1759_vm3, %v2646_v3 }
 0x207   : > { %v2166_v9 = vadd.f32 %v9953_v41, %v2165_v35  ;;  %v2544_v42 = vmax.f32 %v2174_v50, 0.0 }
 0x208   : > { %v8376_v1 = vpop.f32.mrf.mxu1 }
 0x209   : > { %v2542_v43 = vmax.f32 %v2166_v9, 0.0  ;;  %v2648_v60 = vpack.c.bf16 %v2544_v42, %v2543_v36  ;;  %v2187_v54 = vadd.f32 %v8376_v1, %v9953_v41 }
 0x20a   : > { %v2178_v8 = vpop.f32.mrf.mxu1 }
 0x20b   : > { %v2647_v11 = vpack.c.bf16 %v2542_v43, %v2541_v2  ;;  %v2179_v0 = vadd.f32 %v9953_v41, %v2178_v8  ;;  %v2547_v34 = vmax.f32 %v2187_v54, 0.0 }
 0x20c   : > { %v8377_v28 = vpop.f32.mrf.mxu1 }
 0x20d   : > { %v2190_v29 = vadd.f32 %v8377_v28, %v9953_v41  ;;  %8506 = vmatprep.mubr.msk.bf16.mxu0 %vm1759_vm3, %v2647_v11  ;;  %v2545_v46 = vmax.f32 %v2179_v0, 0.0 }
 0x20e   : > { %v2181_v51 = vpop.f32.mrf.mxu1  ;;  %8507 = vmatmul.mubr.msk.bf16.gmra.mxu0 %vm1759_vm3, %v2648_v60 }
 0x20f   : > { %v2182_v15 = vadd.f32 %v9953_v41, %v2181_v51  ;;  %v2548_v21 = vmax.f32 %v2190_v29, 0.0 }
 0x210   : > { %v8380_v61 = vpop.f32.mrf.mxu1 }
 0x211   : > { %v2546_v24 = vmax.f32 %v2182_v15, 0.0  ;;  %v2650_v33 = vpack.c.bf16 %v2548_v21, %v2547_v34  ;;  %v2203_v9 = vadd.f32 %v8380_v61, %v9953_v41 }
 0x212   : > { %v2194_v3 = vpop.f32.mrf.mxu1 }
 0x213   : > { %v2649_v13 = vpack.c.bf16 %v2546_v24, %v2545_v46  ;;  %v2195_v57 = vadd.f32 %v9953_v41, %v2194_v3  ;;  %v2551_v11 = vmax.f32 %v2203_v9, 0.0 }
 0x214   : > { %v8381_v50 = vpop.f32.mrf.mxu1 }
 0x215   : > { %v2206_v35 = vadd.f32 %v8381_v50, %v9953_v41  ;;  %8510 = vmatprep.mubr.msk.bf16.mxu0 %vm1759_vm3, %v2649_v13  ;;  %v2549_v36 = vmax.f32 %v2195_v57, 0.0 }
 0x216   : > { %v2197_v42 = vpop.f32.mrf.mxu1  ;;  %8511 = vmatmul.mubr.msk.bf16.gmra.mxu0 %vm1759_vm3, %v2650_v33 }
 0x217   : > { %v2198_v1 = vadd.f32 %v9953_v41, %v2197_v42  ;;  %v2552_v2 = vmax.f32 %v2206_v35, 0.0 }
 0x218   : > { %v8384_v43 = vpop.f32.mrf.mxu1 }
 0x219   : > { %v2550_v8 = vmax.f32 %v2198_v1, 0.0  ;;  %v2652_v0 = vpack.c.bf16 %v2552_v2, %v2551_v11  ;;  %v2219_v15 = vadd.f32 %v8384_v43, %v9953_v41 }
 0x21a   : > { %v2210_v60 = vpop.f32.mrf.mxu1 }
 0x21b   : > { %v2651_v28 = vpack.c.bf16 %v2550_v8, %v2549_v36  ;;  %v2211_v54 = vadd.f32 %v9953_v41, %v2210_v60  ;;  %v2555_v13 = vmax.f32 %v2219_v15, 0.0 }
 0x21c   : > { %v8385_v29 = vpop.f32.mrf.mxu1 }
 0x21d   : > { %v2222_v51 = vadd.f32 %v8385_v29, %v9953_v41  ;;  %8514 = vmatprep.mubr.msk.bf16.mxu0 %vm1759_vm3, %v2651_v28  ;;  %v2553_v34 = vmax.f32 %v2211_v54, 0.0 }
 0x21e   : > { %v2213_v21 = vpop.f32.mrf.mxu1  ;;  %8515 = vmatmul.mubr.msk.bf16.gmra.mxu0 %vm1759_vm3, %v2652_v0 }
 0x21f   : > { %v2214_v61 = vadd.f32 %v9953_v41, %v2213_v21  ;;  %v2556_v46 = vmax.f32 %v2222_v51, 0.0 }
 0x220   : > { %v8388_v24 = vpop.f32.mrf.mxu1 }
 0x221   : > { %v2554_v3 = vmax.f32 %v2214_v61, 0.0  ;;  %v2654_v57 = vpack.c.bf16 %v2556_v46, %v2555_v13  ;;  %v2235_v1 = vadd.f32 %v8388_v24, %v9953_v41 }
 0x222   : > { %v2226_v33 = vpop.f32.mrf.mxu1 }
 0x223   : > { %v2653_v50 = vpack.c.bf16 %v2554_v3, %v2553_v34  ;;  %v2227_v9 = vadd.f32 %v9953_v41, %v2226_v33  ;;  %v2559_v28 = vmax.f32 %v2235_v1, 0.0 }
 0x224   : > { %v8389_v35 = vpop.f32.mrf.mxu1 }
 0x225   : > { %v2238_v42 = vadd.f32 %v8389_v35, %v9953_v41  ;;  %8518 = vmatprep.mubr.msk.bf16.mxu0 %vm1759_vm3, %v2653_v50  ;;  %v2557_v11 = vmax.f32 %v2227_v9, 0.0 }
 0x226   : > { %v2229_v2 = vpop.f32.mrf.mxu1  ;;  %8519 = vmatmul.mubr.msk.bf16.gmra.mxu0 %vm1759_vm3, %v2654_v57 }
 0x227   : > { %v2230_v43 = vadd.f32 %v9953_v41, %v2229_v2  ;;  %v2560_v36 = vmax.f32 %v2238_v42, 0.0 }
 0x228   : > { %v8392_v8 = vpop.f32.mrf.mxu1 }
 0x229   : > { %v2558_v60 = vmax.f32 %v2230_v43, 0.0  ;;  %v2656_v54 = vpack.c.bf16 %v2560_v36, %v2559_v28  ;;  %v2251_v61 = vadd.f32 %v8392_v8, %v9953_v41 }
 0x22a   : > { %v2242_v0 = vpop.f32.mrf.mxu1 }
 0x22b   : > { %v2655_v29 = vpack.c.bf16 %v2558_v60, %v2557_v11  ;;  %v2243_v15 = vadd.f32 %v9953_v41, %v2242_v0  ;;  %v2563_v50 = vmax.f32 %v2251_v61, 0.0 }
 0x22c   : > { %v8393_v51 = vpop.f32.mrf.mxu1 }
 0x22d   : > { %v2254_v21 = vadd.f32 %v8393_v51, %v9953_v41  ;;  %8522 = vmatprep.mubr.msk.bf16.mxu0 %vm1759_vm3, %v2655_v29  ;;  %v2561_v13 = vmax.f32 %v2243_v15, 0.0 }
 0x22e   : > { %v2245_v46 = vpop.f32.mrf.mxu1  ;;  %8523 = vmatmul.mubr.msk.bf16.gmra.mxu0 %vm1759_vm3, %v2656_v54 }
 0x22f   : > { %v2246_v24 = vadd.f32 %v9953_v41, %v2245_v46  ;;  %v2564_v34 = vmax.f32 %v2254_v21, 0.0 }
 0x230   : > { %v8396_v3 = vpop.f32.mrf.mxu1 }
 0x231   : > { %v2562_v33 = vmax.f32 %v2246_v24, 0.0  ;;  %v2658_v9 = vpack.c.bf16 %v2564_v34, %v2563_v50  ;;  %v2267_v43 = vadd.f32 %v8396_v3, %v9953_v41 }
 0x232   : > { %v2258_v57 = vpop.f32.mrf.mxu1 }
 0x233   : > { %v2657_v35 = vpack.c.bf16 %v2562_v33, %v2561_v13  ;;  %v2259_v1 = vadd.f32 %v9953_v41, %v2258_v57  ;;  %v2567_v29 = vmax.f32 %v2267_v43, 0.0 }
 0x234   : > { %v8397_v42 = vpop.f32.mrf.mxu1 }
 0x235   : > { %v2270_v2 = vadd.f32 %v8397_v42, %v9953_v41  ;;  %8526 = vmatprep.mubr.msk.bf16.mxu0 %vm1759_vm3, %v2657_v35  ;;  %v2565_v28 = vmax.f32 %v2259_v1, 0.0 }
 0x236   : > { %v2261_v36 = vpop.f32.mrf.mxu1  ;;  %8527 = vmatmul.mubr.msk.bf16.gmra.mxu0 %vm1759_vm3, %v2658_v9 }
 0x237   : > { %v2262_v8 = vadd.f32 %v9953_v41, %v2261_v36  ;;  %v2568_v11 = vmax.f32 %v2270_v2, 0.0 }
 0x238   : > { %v8400_v60 = vpop.f32.mrf.mxu1 }
 0x239   : > { %v2566_v0 = vmax.f32 %v2262_v8, 0.0  ;;  %v2660_v15 = vpack.c.bf16 %v2568_v11, %v2567_v29  ;;  %v2283_v24 = vadd.f32 %v8400_v60, %v9953_v41  ;;  %v8915_v29 = vld [vmem:[%s12654_s7 + $0x18] sm:$0xff]  }
 0x23a   : > { %v2274_v54 = vpop.f32.mrf.mxu1  ;;  %8590 = vmatprep.subr.bf16.mxu1 %v8915_v29 }
 0x23b   : > { %v2659_v51 = vpack.c.bf16 %v2566_v0, %v2565_v28  ;;  %v2275_v61 = vadd.f32 %v9953_v41, %v2274_v54  ;;  %v2571_v35 = vmax.f32 %v2283_v24, 0.0  ;;  %8591 = vmatpush3.bf16.msra.mxu1 %v8915_v29 }
 0x23c   : > { %v8401_v21 = vpop.f32.mrf.mxu1 }
 0x23d   : > { %v2286_v46 = vadd.f32 %v8401_v21, %v9953_v41  ;;  %8530 = vmatprep.mubr.msk.bf16.mxu0 %vm1759_vm3, %v2659_v51  ;;  %v2569_v50 = vmax.f32 %v2275_v61, 0.0 }
 0x23e   : > { %v2277_v34 = vpop.f32.mrf.mxu1  ;;  %8531 = vmatmul.mubr.msk.bf16.gmra.mxu0 %vm1759_vm3, %v2660_v15 }
 0x23f   : > { %v2278_v3 = vadd.f32 %v9953_v41, %v2277_v34  ;;  %v2572_v13 = vmax.f32 %v2286_v46, 0.0 }
 0x240   : > { %v8404_v33 = vpop.f32.mrf.mxu1 }
 0x241   : > { %v2570_v57 = vmax.f32 %v2278_v3, 0.0  ;;  %v2662_v1 = vpack.c.bf16 %v2572_v13, %v2571_v35  ;;  %v2299_v8 = vadd.f32 %v8404_v33, %v9953_v41 }
 0x242   : > { %v2290_v9 = vpop.f32.mrf.mxu1 }
 0x243   : > { %v2661_v42 = vpack.c.bf16 %v2570_v57, %v2569_v50  ;;  %v2291_v43 = vadd.f32 %v9953_v41, %v2290_v9  ;;  %v2575_v15 = vmax.f32 %v2299_v8, 0.0 }
 0x244   : > { %v8405_v2 = vpop.f32.mrf.mxu1 }
 0x245   : > { %v2302_v36 = vadd.f32 %v8405_v2, %v9953_v41  ;;  %8534 = vmatprep.mubr.msk.bf16.mxu0 %vm1759_vm3, %v2661_v42  ;;  %v2573_v54 = vmax.f32 %v2291_v43, 0.0 }
 0x246   : > { %v2293_v11 = vpop.f32.mrf.mxu1  ;;  %8535 = vmatmul.mubr.msk.bf16.gmra.mxu0 %vm1759_vm3, %v2662_v1 }
 0x247   : > { %v2294_v60 = vadd.f32 %v9953_v41, %v2293_v11  ;;  %v2576_v28 = vmax.f32 %v2302_v36, 0.0 }
 0x248   : > { %v8408_v0 = vpop.f32.mrf.mxu1 }
 0x249   : > { %v2574_v51 = vmax.f32 %v2294_v60, 0.0  ;;  %v2664_v46 = vpack.c.bf16 %v2576_v28, %v2575_v15  ;;  %v2315_v13 = vadd.f32 %v8408_v0, %v9953_v41 }
 0x24a   : > { %v2306_v21 = vpop.f32.mrf.mxu1 }
 0x24b   : > { %v2663_v61 = vpack.c.bf16 %v2574_v51, %v2573_v54  ;;  %v2307_v34 = vadd.f32 %v9953_v41, %v2306_v21  ;;  %v2579_v1 = vmax.f32 %v2315_v13, 0.0 }
 0x24c   : > { %v8409_v24 = vpop.f32.mrf.mxu1 }
 0x24d   : > { %v2318_v3 = vadd.f32 %v8409_v24, %v9953_v41  ;;  %8538 = vmatprep.mubr.msk.bf16.mxu0 %vm1759_vm3, %v2663_v61  ;;  %v2577_v9 = vmax.f32 %v2307_v34, 0.0 }
 0x24e   : > { %v2309_v33 = vpop.f32.mrf.mxu1  ;;  %8539 = vmatmul.mubr.msk.bf16.gmra.mxu0 %vm1759_vm3, %v2664_v46 }
 0x24f   : > { %v2310_v50 = vadd.f32 %v9953_v41, %v2309_v33  ;;  %v2580_v57 = vmax.f32 %v2318_v3, 0.0 }
 0x250   : > { %v8412_v35 = vpop.f32.mrf.mxu1 }
 0x251   : > { %v2578_v42 = vmax.f32 %v2310_v50, 0.0  ;;  %v2666_v36 = vpack.c.bf16 %v2580_v57, %v2579_v1  ;;  %v2331_v28 = vadd.f32 %v8412_v35, %v9953_v41 }
 0x252   : > { %v2322_v2 = vpop.f32.mrf.mxu1 }
 0x253   : > { %v2665_v43 = vpack.c.bf16 %v2578_v42, %v2577_v9  ;;  %v2323_v11 = vadd.f32 %v9953_v41, %v2322_v2  ;;  %v2583_v61 = vmax.f32 %v2331_v28, 0.0 }
 0x254   : > { %v8413_v8 = vpop.f32.mrf.mxu1 }
 0x255   : > { %v2334_v60 = vadd.f32 %v8413_v8, %v9953_v41  ;;  %8542 = vmatprep.mubr.msk.bf16.mxu0 %vm1759_vm3, %v2665_v43  ;;  %v2581_v15 = vmax.f32 %v2323_v11, 0.0 }
 0x256   : > { %v2325_v0 = vpop.f32.mrf.mxu1  ;;  %8543 = vmatmul.mubr.msk.bf16.gmra.mxu0 %vm1759_vm3, %v2666_v36 }
 0x257   : > { %v2326_v29 = vadd.f32 %v9953_v41, %v2325_v0  ;;  %v2584_v54 = vmax.f32 %v2334_v60, 0.0 }
 0x258   : > { %v8416_v51 = vpop.f32.mrf.mxu1 }
 0x259   : > { %v2582_v21 = vmax.f32 %v2326_v29, 0.0  ;;  %v2668_v34 = vpack.c.bf16 %v2584_v54, %v2583_v61  ;;  %v2347_v50 = vadd.f32 %v8416_v51, %v9953_v41 }
 0x25a   : > { %v2338_v46 = vpop.f32.mrf.mxu1 }
 0x25b   : > { %v2667_v24 = vpack.c.bf16 %v2582_v21, %v2581_v15  ;;  %v2339_v13 = vadd.f32 %v9953_v41, %v2338_v46  ;;  %v2587_v43 = vmax.f32 %v2347_v50, 0.0 }
 0x25c   : > { %v8417_v3 = vpop.f32.mrf.mxu1 }
 0x25d   : > { %v2350_v33 = vadd.f32 %v8417_v3, %v9953_v41  ;;  %8546 = vmatprep.mubr.msk.bf16.mxu0 %vm1759_vm3, %v2667_v24  ;;  %v2585_v1 = vmax.f32 %v2339_v13, 0.0 }
 0x25e   : > { %v2341_v57 = vpop.f32.mrf.mxu1  ;;  %8547 = vmatmul.mubr.msk.bf16.gmra.mxu0 %vm1759_vm3, %v2668_v34 }
 0x25f   : > { %v2342_v35 = vadd.f32 %v9953_v41, %v2341_v57  ;;  %v2588_v9 = vmax.f32 %v2350_v33, 0.0 }
 0x260   : > { %v8420_v42 = vpop.f32.mrf.mxu1 }
 0x261   : > { %v2586_v2 = vmax.f32 %v2342_v35, 0.0  ;;  %v2670_v11 = vpack.c.bf16 %v2588_v9, %v2587_v43  ;;  %v2363_v29 = vadd.f32 %v8420_v42, %v9953_v41 }
 0x262   : > { %v2354_v36 = vpop.f32.mrf.mxu1 }
 0x263   : > { %v2669_v8 = vpack.c.bf16 %v2586_v2, %v2585_v1  ;;  %v2355_v28 = vadd.f32 %v9953_v41, %v2354_v36  ;;  %v2591_v24 = vmax.f32 %v2363_v29, 0.0 }
 0x264   : > { %v8421_v60 = vpop.f32.mrf.mxu1 }
 0x265   : > { %v2366_v0 = vadd.f32 %v8421_v60, %v9953_v41  ;;  %8550 = vmatprep.mubr.msk.bf16.mxu0 %vm1759_vm3, %v2669_v8  ;;  %v2589_v61 = vmax.f32 %v2355_v28, 0.0 }
 0x266   : > { %v2357_v54 = vpop.f32.mrf.mxu1  ;;  %8551 = vmatmul.mubr.msk.bf16.gmra.mxu0 %vm1759_vm3, %v2670_v11 }
 0x267   : > { %v2358_v51 = vadd.f32 %v9953_v41, %v2357_v54  ;;  %v2592_v15 = vmax.f32 %v2366_v0, 0.0 }
 0x268   : > { %v8424_v21 = vpop.f32.mrf.mxu1 }
 0x269   : > { %v2590_v46 = vmax.f32 %v2358_v51, 0.0  ;;  %v2672_v13 = vpack.c.bf16 %v2592_v15, %v2591_v24  ;;  %v2379_v35 = vadd.f32 %v8424_v21, %v9953_v41 }
 0x26a   : > { %v2370_v34 = vpop.f32.mrf.mxu1 }
 0x26b   : > { %v2671_v3 = vpack.c.bf16 %v2590_v46, %v2589_v61  ;;  %v2371_v50 = vadd.f32 %v9953_v41, %v2370_v34  ;;  %v2595_v8 = vmax.f32 %v2379_v35, 0.0 }
 0x26c   : > { %v8425_v33 = vpop.f32.mrf.mxu1 }
 0x26d   : > { %v2382_v57 = vadd.f32 %v8425_v33, %v9953_v41  ;;  %8554 = vmatprep.mubr.msk.bf16.mxu0 %vm1759_vm3, %v2671_v3  ;;  %v2593_v43 = vmax.f32 %v2371_v50, 0.0 }
 0x26e   : > { %v2373_v9 = vpop.f32.mrf.mxu1  ;;  %8555 = vmatmul.mubr.msk.bf16.gmra.mxu0 %vm1759_vm3, %v2672_v13 }
 0x26f   : > { %v2374_v42 = vadd.f32 %v9953_v41, %v2373_v9  ;;  %v2596_v1 = vmax.f32 %v2382_v57, 0.0 }
 0x270   : > { %v8428_v2 = vpop.f32.mrf.mxu1 }
 0x271   : > { %v2594_v36 = vmax.f32 %v2374_v42, 0.0  ;;  %v2674_v28 = vpack.c.bf16 %v2596_v1, %v2595_v8  ;;  %v2395_v51 = vadd.f32 %v8428_v2, %v9953_v41 }
 0x272   : > { %v2386_v11 = vpop.f32.mrf.mxu1 }
 0x273   : > { %v2673_v60 = vpack.c.bf16 %v2594_v36, %v2593_v43  ;;  %v2387_v29 = vadd.f32 %v9953_v41, %v2386_v11  ;;  %v2599_v33 = vmax.f32 %v2395_v51, 0.0 }
 0x274   : > { %v8429_v0 = vpop.f32.mrf.mxu1 }
 0x275   : > { %v2398_v54 = vadd.f32 %v8429_v0, %v9953_v41  ;;  %8558 = vmatprep.mubr.msk.bf16.mxu0 %vm1759_vm3, %v2673_v60  ;;  %v2597_v3 = vmax.f32 %v2387_v29, 0.0 }
 0x276   : > { %v2389_v15 = vpop.f32.mrf.mxu1  ;;  %v8464_v21 = vpop.f32.mrf.mxu0  ;;  %8559 = vmatmul.mubr.msk.bf16.gmra.mxu0 %vm1759_vm3, %v2674_v28 }
 0x277   : > { %v2390_v61 = vadd.f32 %v9953_v41, %v2389_v15  ;;  %3590 = vrot.lane.b32.xlu1 %v8464_v21, %s9098_s24  ;;  %v2600_v46 = vmax.f32 %v2398_v54, 0.0 }
 0x278   : > { %v8432_v24 = vpop.f32.mrf.mxu1  ;;  %v2947_v34 = vpop.f32.mrf.mxu0 }
 0x279   : > { %v2598_v13 = vmax.f32 %v2390_v61, 0.0  ;;  %3586 = vrot.lane.b32.xlu0 %v2947_v34, %s9098_s24  ;;  %v2676_v9 = vpack.c.bf16 %v2600_v46, %v2599_v33  ;;  %v2411_v36 = vadd.f32 %v8432_v24, %v9953_v41 }
 0x27a   : > { %v2402_v50 = vpop.f32.mrf.mxu1  ;;  %v8465_v57 = vpop.f32.mrf.mxu0 }
 0x27b   : > { %v2675_v35 = vpack.c.bf16 %v2598_v13, %v2597_v3  ;;  %3592 = vrot.lane.b32.xlu1 %v8465_v57, %s9098_s24  ;;  %v2403_v2 = vadd.f32 %v9953_v41, %v2402_v50  ;;  %v2603_v15 = vmax.f32 %v2411_v36, 0.0 }
 0x27c   : > { %v8433_v42 = vpop.f32.mrf.mxu1  ;;  %v2950_v1 = vpop.f32.mrf.mxu0 }
 0x27d   : > { %v2414_v43 = vadd.f32 %v8433_v42, %v9953_v41  ;;  %3588 = vrot.lane.b32.xlu0 %v2950_v1, %s9098_s24  ;;  %8562 = vmatprep.mubr.msk.bf16.mxu0 %vm1759_vm3, %v2675_v35  ;;  %v2601_v54 = vmax.f32 %v2403_v2, 0.0 }
 0x27e   : > { %v2405_v8 = vpop.f32.mrf.mxu1  ;;  %v8468_v11 = vpop.f32.mrf.mxu0  ;;  %8563 = vmatmul.mubr.msk.bf16.gmra.mxu0 %vm1759_vm3, %v2676_v9 }
 0x27f   : > { %v2406_v60 = vadd.f32 %v9953_v41, %v2405_v8  ;;  %3598 = vrot.lane.b32.xlu1 %v8468_v11, %s9098_s24  ;;  %v2604_v28 = vmax.f32 %v2414_v43, 0.0  ;;  %v10193_v41 = vld [vmem:[%s12652_s5] ss:$0 sm:$0xff]  ;;  %v8916_v43 = vld [vmem:[%s12654_s7 + $0x10] sm:$0xff]  }
 0x280   : > { %v8436_v0 = vpop.f32.mrf.mxu1  ;;  %v2963_v29 = vpop.f32.mrf.mxu0  ;;  %8592 = vmatprep.subr.bf16.mxu1 %v8916_v43 }
 0x281   : > { %v2602_v51 = vmax.f32 %v2406_v60, 0.0  ;;  %v2678_v24 = vpack.c.bf16 %v2604_v28, %v2603_v15  ;;  %v2427_v50 = vadd.f32 %v10193_v41, %v8436_v0  ;;  %8593 = vmatpush3.bf16.msra.mxu1 %v8916_v43 }
 0x282   : > { %v2418_v21 = vpop.f32.mrf.mxu1  ;;  %v8469_v61 = vpop.f32.mrf.mxu0 }
 0x283   : > { %v2677_v46 = vpack.c.bf16 %v2602_v51, %v2601_v54  ;;  %3594 = vrot.lane.b32.xlu1 %v2963_v29, %s9098_s24  ;;  %3600 = vrot.lane.b32.xlu0 %v8469_v61, %s9098_s24  ;;  %v2419_v13 = vadd.f32 %v10193_v41, %v2418_v21  ;;  %v2607_v11 = vmax.f32 %v2427_v50, 0.0 }
 0x284   : > { %v8437_v34 = vpop.f32.mrf.mxu1  ;;  %v2966_v3 = vpop.f32.mrf.mxu0 }
 0x285   : > { %v2430_v33 = vadd.f32 %v10193_v41, %v8437_v34  ;;  %8566 = vmatprep.mubr.msk.bf16.mxu0 %vm1759_vm3, %v2677_v46  ;;  %v2605_v36 = vmax.f32 %v2419_v13, 0.0 }
 0x286   : > { %v2421_v57 = vpop.f32.mrf.mxu1  ;;  %v8472_v35 = vpop.f32.mrf.mxu0  ;;  %8567 = vmatmul.mubr.msk.bf16.gmra.mxu0 %vm1759_vm3, %v2678_v24 }
 0x287   : > { %v2422_v9 = vadd.f32 %v10193_v41, %v2421_v57  ;;  %3596 = vrot.lane.b32.xlu0 %v2966_v3, %s9098_s24  ;;  %3606 = vrot.lane.b32.xlu1 %v8472_v35, %s9098_s24  ;;  %v2608_v42 = vmax.f32 %v2430_v33, 0.0 }
 0x288   : > { %v8440_v1 = vpop.f32.mrf.mxu1  ;;  %v2979_v2 = vpop.f32.mrf.mxu0 }
 0x289   : > { %v2606_v8 = vmax.f32 %v2422_v9, 0.0  ;;  %v2680_v29 = vpack.c.bf16 %v2608_v42, %v2607_v11  ;;  %v2443_v61 = vadd.f32 %v10193_v41, %v8440_v1 }
 0x28a   : > { %v2434_v60 = vpop.f32.mrf.mxu1  ;;  %v8473_v28 = vpop.f32.mrf.mxu0 }
 0x28b   : > { %v2679_v0 = vpack.c.bf16 %v2606_v8, %v2605_v36  ;;  %3602 = vrot.lane.b32.xlu1 %v2979_v2, %s9098_s24  ;;  %3608 = vrot.lane.b32.xlu0 %v8473_v28, %s9098_s24  ;;  %v2435_v15 = vadd.f32 %v10193_v41, %v2434_v60  ;;  %v2611_v35 = vmax.f32 %v2443_v61, 0.0 }
 0x28c   : > { %v8441_v54 = vpop.f32.mrf.mxu1  ;;  %v2982_v51 = vpop.f32.mrf.mxu0 }
 0x28d   : > { %v2446_v21 = vadd.f32 %v10193_v41, %v8441_v54  ;;  %8570 = vmatprep.mubr.msk.bf16.mxu0 %vm1759_vm3, %v2679_v0  ;;  %v2609_v50 = vmax.f32 %v2435_v15, 0.0 }
 0x28e   : > { %v2437_v46 = vpop.f32.mrf.mxu1  ;;  %v8476_v24 = vpop.f32.mrf.mxu0  ;;  %8571 = vmatmul.mubr.msk.bf16.gmra.mxu0 %vm1759_vm3, %v2680_v29 }
 0x28f   : > { %v2438_v34 = vadd.f32 %v10193_v41, %v2437_v46  ;;  %3604 = vrot.lane.b32.xlu0 %v2982_v51, %s9098_s24  ;;  %3614 = vrot.lane.b32.xlu1 %v8476_v24, %s9098_s24  ;;  %v2612_v3 = vmax.f32 %v2446_v21, 0.0 }
 0x290   : > { %v8444_v13 = vpop.f32.mrf.mxu1  ;;  %v2995_v33 = vpop.f32.mrf.mxu0 }
 0x291   : > { %v2610_v57 = vmax.f32 %v2438_v34, 0.0  ;;  %v2682_v1 = vpack.c.bf16 %v2612_v3, %v2611_v35  ;;  %v2459_v60 = vadd.f32 %v10193_v41, %v8444_v13 }
 0x292   : > { %v2450_v9 = vpop.f32.mrf.mxu1  ;;  %v8477_v42 = vpop.f32.mrf.mxu0 }
 0x293   : > { %v2681_v2 = vpack.c.bf16 %v2610_v57, %v2609_v50  ;;  %3610 = vrot.lane.b32.xlu1 %v2995_v33, %s9098_s24  ;;  %3616 = vrot.lane.b32.xlu0 %v8477_v42, %s9098_s24  ;;  %v2451_v8 = vadd.f32 %v10193_v41, %v2450_v9  ;;  %v2615_v46 = vmax.f32 %v2459_v60, 0.0 }
 0x294   : > { %v8445_v43 = vpop.f32.mrf.mxu1  ;;  %v2998_v36 = vpop.f32.mrf.mxu0 }
 0x295   : > { %v2462_v11 = vadd.f32 %v10193_v41, %v8445_v43  ;;  %8574 = vmatprep.mubr.msk.bf16.mxu0 %vm1759_vm3, %v2681_v2  ;;  %v2613_v21 = vmax.f32 %v2451_v8, 0.0 }
 0x296   : > { %v2453_v28 = vpop.f32.mrf.mxu1  ;;  %v8480_v0 = vpop.f32.mrf.mxu0  ;;  %8575 = vmatmul.mubr.msk.bf16.gmra.mxu0 %vm1759_vm3, %v2682_v1 }
 0x297   : > { %v2454_v29 = vadd.f32 %v10193_v41, %v2453_v28  ;;  %3612 = vrot.lane.b32.xlu0 %v2998_v36, %s9098_s24  ;;  %3622 = vrot.lane.b32.xlu1 %v8480_v0, %s9098_s24  ;;  %v2616_v54 = vmax.f32 %v2462_v11, 0.0 }
 0x298   : > { %v8448_v51 = vpop.f32.mrf.mxu1  ;;  %v3011_v15 = vpop.f32.mrf.mxu0 }
 0x299   : > { %v2614_v61 = vmax.f32 %v2454_v29, 0.0  ;;  %v2684_v13 = vpack.c.bf16 %v2616_v54, %v2615_v46  ;;  %v2475_v9 = vadd.f32 %v10193_v41, %v8448_v51 }
 0x29a   : > { %v2466_v24 = vpop.f32.mrf.mxu1  ;;  %v8481_v34 = vpop.f32.mrf.mxu0 }
 0x29b   : > { %v2683_v3 = vpack.c.bf16 %v2614_v61, %v2613_v21  ;;  %3618 = vrot.lane.b32.xlu1 %v3011_v15, %s9098_s24  ;;  %3624 = vrot.lane.b32.xlu0 %v8481_v34, %s9098_s24  ;;  %v2467_v57 = vadd.f32 %v10193_v41, %v2466_v24  ;;  %v2619_v28 = vmax.f32 %v2475_v9, 0.0 }
 0x29c   : > { %v8449_v33 = vpop.f32.mrf.mxu1  ;;  %v3014_v50 = vpop.f32.mrf.mxu0 }
 0x29d   : > { %v2478_v35 = vadd.f32 %v10193_v41, %v8449_v33  ;;  %8578 = vmatprep.mubr.msk.bf16.mxu0 %vm1759_vm3, %v2683_v3  ;;  %v2617_v11 = vmax.f32 %v2467_v57, 0.0 }
 0x29e   : > { %v2469_v42 = vpop.f32.mrf.mxu1  ;;  %v8484_v2 = vpop.f32.mrf.mxu0  ;;  %8579 = vmatmul.mubr.msk.bf16.gmra.mxu0 %vm1759_vm3, %v2684_v13 }
 0x29f   : > { %v2470_v1 = vadd.f32 %v10193_v41, %v2469_v42  ;;  %3620 = vrot.lane.b32.xlu0 %v3014_v50, %s9098_s24  ;;  %3630 = vrot.lane.b32.xlu1 %v8484_v2, %s9098_s24  ;;  %v2620_v43 = vmax.f32 %v2478_v35, 0.0 }
 0x2a0   : > { %v8452_v36 = vpop.f32.mrf.mxu1  ;;  %v3027_v8 = vpop.f32.mrf.mxu0 }
 0x2a1   : > { %v2618_v60 = vmax.f32 %v2470_v1, 0.0  ;;  %v2686_v51 = vpack.c.bf16 %v2620_v43, %v2619_v28  ;;  %v2491_v24 = vadd.f32 %v10193_v41, %v8452_v36 }
 0x2a2   : > { %v2482_v0 = vpop.f32.mrf.mxu1  ;;  %v8485_v29 = vpop.f32.mrf.mxu0 }
 0x2a3   : > { %v2685_v54 = vpack.c.bf16 %v2618_v60, %v2617_v11  ;;  %3626 = vrot.lane.b32.xlu1 %v3027_v8, %s9098_s24  ;;  %3632 = vrot.lane.b32.xlu0 %v8485_v29, %s9098_s24  ;;  %v2483_v61 = vadd.f32 %v10193_v41, %v2482_v0  ;;  %v2623_v9 = vmax.f32 %v2491_v24, 0.0 }
 0x2a4   : > { %v8453_v15 = vpop.f32.mrf.mxu1  ;;  %v3030_v21 = vpop.f32.mrf.mxu0 }
 0x2a5   : > { %v2494_v46 = vadd.f32 %v10193_v41, %v8453_v15  ;;  %8582 = vmatprep.mubr.msk.bf16.mxu0 %vm1759_vm3, %v2685_v54  ;;  %v2621_v57 = vmax.f32 %v2483_v61, 0.0 }
 0x2a6   : > { %v2485_v34 = vpop.f32.mrf.mxu1  ;;  %v8488_v3 = vpop.f32.mrf.mxu0  ;;  %8583 = vmatmul.mubr.msk.bf16.gmra.mxu0 %vm1759_vm3, %v2686_v51 }
 0x2a7   : > { %v2486_v13 = vadd.f32 %v10193_v41, %v2485_v34  ;;  %3628 = vrot.lane.b32.xlu0 %v3030_v21, %s9098_s24  ;;  %3638 = vrot.lane.b32.xlu1 %v8488_v3, %s9098_s24  ;;  %v2624_v33 = vmax.f32 %v2494_v46, 0.0  ;;  %v8917_v34 = vld [vmem:[%s12654_s7 + $0x8] sm:$0xff]  }
 0x2a8   : > { %v3043_v50 = vpop.f32.mrf.mxu0  ;;  %8594 = vmatprep.subr.bf16.mxu1 %v8917_v34 }
 0x2a9   : > { %v2622_v35 = vmax.f32 %v2486_v13, 0.0  ;;  %v2688_v1 = vpack.c.bf16 %v2624_v33, %v2623_v9  ;;  %8595 = vmatpush3.bf16.msra.mxu1 %v8917_v34  ;;  %v12977_v34 = vld [vmem:[#allocation3_spill] sm:$0xff] }
 0x2aa   : > { %v8489_v42 = vpop.f32.mrf.mxu0 }
 0x2ab   : > { %v2687_v2 = vpack.c.bf16 %v2622_v35, %v2621_v57  ;;  %3634 = vrot.lane.b32.xlu1 %v3043_v50, %s9098_s24  ;;  %3640 = vrot.lane.b32.xlu0 %v8489_v42, %s9098_s24 }
 0x2ac   : > { %v3046_v43 = vpop.f32.mrf.mxu0 }
 0x2ad   : > { %8586 = vmatprep.mubr.msk.bf16.mxu0 %vm1759_vm3, %v2687_v2 }
 0x2ae   : > { %v8492_v41 = vpop.f32.mrf.mxu0  ;;  %8587 = vmatmul.mubr.msk.bf16.gmra.mxu0 %vm1759_vm3, %v2688_v1 }
 0x2af   : > { %3636 = vrot.lane.b32.xlu0 %v3046_v43, %s9098_s24  ;;  %3646 = vrot.lane.b32.xlu1 %v8492_v41, %s9098_s24 }
 0x2b0   : > { %v3059_v36 = vpop.f32.mrf.mxu0 }
 0x2b2   : > { %v8493_v8 = vpop.f32.mrf.mxu0 }
 0x2b3   : > { %3642 = vrot.lane.b32.xlu1 %v3059_v36, %s9098_s24  ;;  %3648 = vrot.lane.b32.xlu0 %v8493_v8, %s9098_s24  ;;  %v10281_v8 = vpop.permute.xlu0 %4104 }
 0x2b4   : > { %v3062_v11 = vpop.f32.mrf.mxu0 }
 0x2b6   : > { %v8496_v60 = vpop.f32.mrf.mxu0 }
 0x2b7   : > { %3644 = vrot.lane.b32.xlu0 %v3062_v11, %s9098_s24  ;;  %3654 = vrot.lane.b32.xlu1 %v8496_v60, %s9098_s24 }
 0x2b8   : > { %v3075_v28 = vpop.f32.mrf.mxu0 }
 0x2ba   : > { %v8497_v0 = vpop.f32.mrf.mxu0 }
 0x2bb   : > { %3650 = vrot.lane.b32.xlu1 %v3075_v28, %s9098_s24  ;;  %3656 = vrot.lane.b32.xlu0 %v8497_v0, %s9098_s24  ;;  %v8918_v0 = vld [vmem:[%s12654_s7] sm:$0xff]  }
 0x2bc   : > { %v3078_v29 = vpop.f32.mrf.mxu0  ;;  %8596 = vmatprep.subr.bf16.mxu1 %v8918_v0 }
 0x2bd   : > { %8597 = vmatpush3.bf16.msra.mxu1 %v8918_v0 }
 0x2be   : > { %v8500_v54 = vpop.f32.mrf.mxu0 }
 0x2bf   : > { %3652 = vrot.lane.b32.xlu0 %v3078_v29, %s9098_s24  ;;  %3662 = vrot.lane.b32.xlu1 %v8500_v54, %s9098_s24 }
 0x2c0   : > { %v3091_v51 = vpop.f32.mrf.mxu0 }
 0x2c2   : > { %v8501_v15 = vpop.f32.mrf.mxu0 }
 0x2c3   : > { %3658 = vrot.lane.b32.xlu1 %v3091_v51, %s9098_s24  ;;  %3664 = vrot.lane.b32.xlu0 %v8501_v15, %s9098_s24 }
 0x2c4   : > { %v3094_v21 = vpop.f32.mrf.mxu0 }
 0x2c6   : > { %v8504_v61 = vpop.f32.mrf.mxu0 }
 0x2c7   : > { %3660 = vrot.lane.b32.xlu0 %v3094_v21, %s9098_s24  ;;  %3670 = vrot.lane.b32.xlu1 %v8504_v61, %s9098_s24 }
 0x2c8   : > { %v3107_v46 = vpop.f32.mrf.mxu0 }
 0x2ca   : > { %v8505_v24 = vpop.f32.mrf.mxu0 }
 0x2cb   : > { %3666 = vrot.lane.b32.xlu1 %v3107_v46, %s9098_s24  ;;  %3672 = vrot.lane.b32.xlu0 %v8505_v24, %s9098_s24  ;;  %v12976_v46 = vld [vmem:[#allocation2_spill] sm:$0xff] }
 0x2cc   : > { %v3110_v3 = vpop.f32.mrf.mxu0 }
 0x2ce   : > { %v8508_v13 = vpop.f32.mrf.mxu0 }
 0x2cf   : > { %3668 = vrot.lane.b32.xlu0 %v3110_v3, %s9098_s24  ;;  %3678 = vrot.lane.b32.xlu1 %v8508_v13, %s9098_s24 }
 0x2d0   : > { %v3123_v33 = vpop.f32.mrf.mxu0 }
 0x2d2   : > { %v8509_v50 = vpop.f32.mrf.mxu0 }
 0x2d3   : > { %3674 = vrot.lane.b32.xlu1 %v3123_v33, %s9098_s24  ;;  %3680 = vrot.lane.b32.xlu0 %v8509_v50, %s9098_s24  ;;  %v12979_v33 = vld [vmem:[#allocation4_spill] sm:$0xff] }
 0x2d4   : > { %v3126_v57 = vpop.f32.mrf.mxu0 }
 0x2d6   : > { %v8512_v35 = vpop.f32.mrf.mxu0 }
 0x2d7   : > { %3676 = vrot.lane.b32.xlu0 %v3126_v57, %s9098_s24  ;;  %3686 = vrot.lane.b32.xlu1 %v8512_v35, %s9098_s24 }
 0x2d8   : > { %v3139_v9 = vpop.f32.mrf.mxu0 }
 0x2da   : > { %v8513_v42 = vpop.f32.mrf.mxu0 }
 0x2db   : > { %3682 = vrot.lane.b32.xlu1 %v3139_v9, %s9098_s24  ;;  %3688 = vrot.lane.b32.xlu0 %v8513_v42, %s9098_s24 }
 0x2dc   : > { %v3142_v2 = vpop.f32.mrf.mxu0 }
 0x2de   : > { %v8516_v1 = vpop.f32.mrf.mxu0 }
 0x2df   : > { %3684 = vrot.lane.b32.xlu0 %v3142_v2, %s9098_s24  ;;  %3694 = vrot.lane.b32.xlu1 %v8516_v1, %s9098_s24 }
 0x2e0   : > { %v3155_v43 = vpop.f32.mrf.mxu0 }
 0x2e2   : > { %v8517_v41 = vpop.f32.mrf.mxu0 }
 0x2e3   : > { %3690 = vrot.lane.b32.xlu1 %v3155_v43, %s9098_s24  ;;  %3696 = vrot.lane.b32.xlu0 %v8517_v41, %s9098_s24 }
 0x2e4   : > { %v3158_v36 = vpop.f32.mrf.mxu0 }
 0x2e6   : > { %v8520_v11 = vpop.f32.mrf.mxu0 }
 0x2e7   : > { %3692 = vrot.lane.b32.xlu0 %v3158_v36, %s9098_s24  ;;  %3702 = vrot.lane.b32.xlu1 %v8520_v11, %s9098_s24 }
 0x2e8   : > { %v3171_v60 = vpop.f32.mrf.mxu0 }
 0x2e9   : > { %v10285_v28 = vpop.permute.xlu1 %3590 }
 0x2ea   : > { %12973 = vst [vmem:[#allocation105_spill] sm:$0xff] %v10285_v28  ;;  %v8521_v29 = vpop.f32.mrf.mxu0  ;;  %v3972_v24 = vadd.f32 %v12976_v46, %v10285_v28 }
 0x2eb   : > { %v10290_v54 = vpop.permute.xlu0 %3586  ;;  %3698 = vrot.lane.b32.xlu1 %v3171_v60, %s9098_s24  ;;  %3704 = vrot.lane.b32.xlu0 %v8521_v29, %s9098_s24 }
 0x2ec   : > { %12974 = vst [vmem:[#allocation106_spill] sm:$0xff] %v10290_v54  ;;  %v3174_v51 = vpop.f32.mrf.mxu0  ;;  %v3970_v3 = vadd.f32 %v10290_v54, %v12977_v34  ;;  %v4109_v2 = vadd.f32 %v10281_v8, %v3972_v24 }
 0x2ed   : > { %v10294_v15 = vpop.permute.xlu1 %3592 }
 0x2ee   : > { %12975 = vst [vmem:[#allocation107_spill] sm:$0xff] %v10294_v15  ;;  %v3973_v21 = vadd.f32 %v9429_v14, %v10294_v15  ;;  %v8524_v61 = vpop.f32.mrf.mxu0  ;;  %v4107_v1 = vadd.f32 %v10281_v8, %v3970_v3  ;;  %v4237_v29 = vmax.f32 %v4109_v2, 0.0 }
 0x2ef   : > { %v10302_v13 = vpop.permute.xlu0 %3588  ;;  %3700 = vrot.lane.b32.xlu0 %v3174_v51, %s9098_s24  ;;  %3710 = vrot.lane.b32.xlu1 %v8524_v61, %s9098_s24  ;;  %v12983_v61 = vld [vmem:[#allocation7_spill] sm:$0xff] }
 0x2f0   : > { %12978 = vst [vmem:[#allocation2_spill] sm:$0xff] %v10302_v13  ;;  %v3971_v50 = vadd.f32 %v10302_v13, %v12979_v33  ;;  %v3187_v57 = vpop.f32.mrf.mxu0  ;;  %v4110_v35 = vadd.f32 %v10281_v8, %v3973_v21  ;;  %v4235_v51 = vmax.f32 %v4107_v1, 0.0 }
 0x2f1   : > { %v10309_v14 = vpop.permute.xlu1 %3598 }
 0x2f2   : > { %12980 = vst [vmem:[#allocation3_spill] sm:$0xff] %v10309_v14  ;;  %v4108_v9 = vadd.f32 %v10281_v8, %v3971_v50  ;;  %v8525_v42 = vpop.f32.mrf.mxu0  ;;  %v4238_v11 = vmax.f32 %v4110_v35, 0.0  ;;  %v12986_v50 = vld [vmem:[#allocation8_spill] sm:$0xff] }
 0x2f3   : > { %3706 = vrot.lane.b32.xlu1 %v3187_v57, %s9098_s24  ;;  %3712 = vrot.lane.b32.xlu0 %v8525_v42, %s9098_s24 }
 0x2f4   : > { %v3190_v43 = vpop.f32.mrf.mxu0  ;;  %v4236_v60 = vmax.f32 %v4108_v9, 0.0  ;;  %v4364_v3 = vpack.c.bf16 %v4238_v11, %v4237_v29  ;;  %v12987_v9 = vld [vmem:[#allocation5_spill] sm:$0xff] }
 0x2f5   : > { %v10316_v41 = vpop.permute.xlu1 %3594  ;;  %v10318_v36 = vpop.permute.xlu0 %3600  ;;  %v3976_v42 = vadd.f32 %v12987_v9, %v10309_v14 }
 0x2f6   : > { %12981 = vst [vmem:[#allocation4_spill] sm:$0xff] %v10316_v41  ;;  %12982 = vst [vmem:[#allocation108_spill] sm:$0xff] %v10318_v36  ;;  %v8528_v0 = vpop.f32.mrf.mxu0  ;;  %v3977_v46 = vadd.f32 %v12983_v61, %v10318_v36  ;;  %v4363_v33 = vpack.c.bf16 %v4236_v60, %v4235_v51 }
 0x2f7   : > { %3708 = vrot.lane.b32.xlu0 %v3190_v43, %s9098_s24  ;;  %3718 = vrot.lane.b32.xlu1 %v8528_v0, %s9098_s24  ;;  %v12988_v43 = vld [vmem:[#allocation6_spill] sm:$0xff]  ;;  %v4113_v61 = vadd.f32 %v10281_v8, %v3976_v42 }
 0x2f8   : > { %v3203_v21 = vpop.f32.mrf.mxu0  ;;  %v3974_v2 = vadd.f32 %v10316_v41, %v12988_v43  ;;  %v4114_v0 = vadd.f32 %v10281_v8, %v3977_v46  ;;  %v12994_v41 = vld [vmem:[#allocation14_spill] sm:$0xff] }
 0x2f9   : > { %v10324_v24 = vpop.permute.xlu0 %3596  ;;  %v10326_v34 = vpop.permute.xlu1 %3606 }
 0x2fa   : > { %12984 = vst [vmem:[#allocation7_spill] sm:$0xff] %v10324_v24  ;;  %12985 = vst [vmem:[#allocation109_spill] sm:$0xff] %v10326_v34  ;;  %v3975_v57 = vadd.f32 %v10324_v24, %v12986_v50  ;;  %v8529_v35 = vpop.f32.mrf.mxu0  ;;  %v4111_v50 = vadd.f32 %v10281_v8, %v3974_v2  ;;  %v4242_v46 = vmax.f32 %v4114_v0, 0.0  ;;  %v4241_v24 = vmax.f32 %v4113_v61, 0.0  ;;  %v12993_v2 = vld [vmem:[#allocation13_spill] sm:$0xff] }
 0x2fb   : > { %4508 = vrot.lane.b32.xlu0 %v4364_v3, %s9098_s24  ;;  %4506 = vrot.lane.b32.xlu1 %v4363_v33, %s9098_s24 }
 0x2fc   : > { %v3206_v1 = vpop.f32.mrf.mxu0  ;;  %v4112_v11 = vadd.f32 %v10281_v8, %v3975_v57  ;;  %v4239_v42 = vmax.f32 %v4111_v50, 0.0  ;;  %v4366_v0 = vpack.c.bf16 %v4242_v46, %v4241_v24 }
 0x2fd   : > { %v10338_v60 = vpop.permute.xlu1 %3602  ;;  %v10340_v29 = vpop.permute.xlu0 %3608 }
 0x2fe   : > { %12989 = vst [vmem:[#allocation8_spill] sm:$0xff] %v10338_v60  ;;  %12990 = vst [vmem:[#allocation5_spill] sm:$0xff] %v10340_v29  ;;  %v8532_v51 = vpop.f32.mrf.mxu0  ;;  %v4240_v57 = vmax.f32 %v4112_v11, 0.0 }
 0x2ff   : > { %3714 = vrot.lane.b32.xlu1 %v3203_v21, %s9098_s24  ;;  %3720 = vrot.lane.b32.xlu0 %v8529_v35, %s9098_s24  ;;  %v3981_v21 = vadd.f32 %v12993_v2, %v10340_v29 }
 0x300   : > { %v3219_v3 = vpop.f32.mrf.mxu0  ;;  %v4365_v11 = vpack.c.bf16 %v4240_v57, %v4239_v42 }
 0x301   : > { %v10346_v33 = vpop.permute.xlu0 %3604  ;;  %v10348_v9 = vpop.permute.xlu1 %3614 }
 0x302   : > { %12991 = vst [vmem:[#allocation6_spill] sm:$0xff] %v10346_v33  ;;  %12992 = vst [vmem:[#allocation110_spill] sm:$0xff] %v10348_v9  ;;  %v8533_v43 = vpop.f32.mrf.mxu0  ;;  %v3979_v35 = vadd.f32 %v10346_v33, %v12994_v41  ;;  %v4118_v41 = vadd.f32 %v10281_v8, %v3981_v21 }
 0x303   : > { %3716 = vrot.lane.b32.xlu0 %v3206_v1, %s9098_s24  ;;  %3726 = vrot.lane.b32.xlu1 %v8532_v51, %s9098_s24  ;;  %v12997_v1 = vld [vmem:[#allocation10_spill] sm:$0xff]  ;;  %v12998_v51 = vld [vmem:[#allocation11_spill] sm:$0xff] }
 0x304   : > { %v3222_v36 = vpop.f32.mrf.mxu0  ;;  %v3980_v54 = vadd.f32 %v12997_v1, %v10326_v34  ;;  %v3978_v61 = vadd.f32 %v10338_v60, %v12998_v51  ;;  %v4116_v2 = vadd.f32 %v10281_v8, %v3979_v35  ;;  %v4246_v21 = vmax.f32 %v4118_v41, 0.0  ;;  %v13004_v34 = vld [vmem:[#allocation18_spill] sm:$0xff] }
 0x305   : > { %v10356_v14 = vpop.permute.xlu1 %3610  ;;  %v10358_v13 = vpop.permute.xlu0 %3616 }
 0x306   : > { %12995 = vst [vmem:[#allocation13_spill] sm:$0xff] %v10356_v14  ;;  %12996 = vst [vmem:[#allocation14_spill] sm:$0xff] %v10358_v13  ;;  %v8536_v15 = vpop.f32.mrf.mxu0  ;;  %v4117_v57 = vadd.f32 %v10281_v8, %v3980_v54  ;;  %v4115_v42 = vadd.f32 %v10281_v8, %v3978_v61  ;;  %v4244_v35 = vmax.f32 %v4116_v2, 0.0  ;;  %v13003_v61 = vld [vmem:[#allocation17_spill] sm:$0xff] }
 0x307   : > { %4512 = vrot.lane.b32.xlu0 %v4366_v0, %s9098_s24  ;;  %4510 = vrot.lane.b32.xlu1 %v4365_v11, %s9098_s24 }
 0x308   : > { %v3235_v50 = vpop.f32.mrf.mxu0  ;;  %v4245_v29 = vmax.f32 %v4117_v57, 0.0  ;;  %v4243_v54 = vmax.f32 %v4115_v42, 0.0 }
 0x309   : > { %v10368_v33 = vpop.permute.xlu0 %3612  ;;  %v10370_v24 = vpop.permute.xlu1 %3622 }
 0x30a   : > { %12999 = vst [vmem:[#allocation10_spill] sm:$0xff] %v10368_v33  ;;  %13000 = vst [vmem:[#allocation11_spill] sm:$0xff] %v10370_v24  ;;  %v8537_v46 = vpop.f32.mrf.mxu0  ;;  %v4368_v41 = vpack.c.bf16 %v4246_v21, %v4245_v29  ;;  %v4367_v2 = vpack.c.bf16 %v4244_v35, %v4243_v54 }
 0x30b   : > { %3722 = vrot.lane.b32.xlu1 %v3219_v3, %s9098_s24  ;;  %3728 = vrot.lane.b32.xlu0 %v8533_v43, %s9098_s24  ;;  %v3985_v3 = vadd.f32 %v13003_v61, %v10358_v13  ;;  %v3983_v43 = vadd.f32 %v10368_v33, %v13004_v34  ;;  %v8919_v13 = vld [vmem:[%s12656_s9 + $0x18] sm:$0xff]  }
 0x30c   : > { %v3238_v0 = vpop.f32.mrf.mxu0  ;;  %8726 = vmatprep.subr.bf16.mxu0 %v8919_v13 }
 0x30d   : > { %v10376_v11 = vpop.permute.xlu1 %3618  ;;  %v10378_v1 = vpop.permute.xlu0 %3624  ;;  %v4122_v34 = vadd.f32 %v10281_v8, %v3985_v3  ;;  %v4120_v61 = vadd.f32 %v10281_v8, %v3983_v43  ;;  %8727 = vmatpush3.bf16.msra.mxu0 %v8919_v13 }
 0x30e   : > { %13001 = vst [vmem:[#allocation111_spill] sm:$0xff] %v10376_v11  ;;  %13002 = vst [vmem:[#allocation112_spill] sm:$0xff] %v10378_v1  ;;  %v8540_v51 = vpop.f32.mrf.mxu0 }
 0x30f   : > { %3724 = vrot.lane.b32.xlu0 %v3222_v36, %s9098_s24  ;;  %3734 = vrot.lane.b32.xlu1 %v8536_v15, %s9098_s24  ;;  %v13007_v36 = vld [vmem:[#allocation15_spill] sm:$0xff]  ;;  %v13008_v15 = vld [vmem:[#allocation16_spill] sm:$0xff]  ;;  %v4250_v3 = vmax.f32 %v4122_v34, 0.0  ;;  %v4248_v43 = vmax.f32 %v4120_v61, 0.0 }
 0x310   : > { %v3251_v60 = vpop.f32.mrf.mxu0  ;;  %v3984_v37 = vadd.f32 %v13007_v36, %v10348_v9  ;;  %v3982_v57 = vadd.f32 %v10356_v14, %v13008_v15  ;;  %v13014_v9 = vld [vmem:[#allocation23_spill] sm:$0xff] }
 0x311   : > { %v10386_v28 = vpop.permute.xlu0 %3620  ;;  %v10388_v25 = vpop.permute.xlu1 %3630 }
 0x312   : > { %13005 = vst [vmem:[#allocation17_spill] sm:$0xff] %v10386_v28  ;;  %13006 = vst [vmem:[#allocation18_spill] sm:$0xff] %v10388_v25  ;;  %v8541_v48 = vpop.f32.mrf.mxu0  ;;  %v4121_v35 = vadd.f32 %v10281_v8, %v3984_v37  ;;  %v4119_v54 = vadd.f32 %v10281_v8, %v3982_v57  ;;  %v3987_v34 = vadd.f32 %v10386_v28, %v13014_v9 }
 0x313   : > { %4516 = vrot.lane.b32.xlu0 %v4368_v41, %s9098_s24  ;;  %4514 = vrot.lane.b32.xlu1 %v4367_v2, %s9098_s24 }
 0x314   : > { %v3254_v42 = vpop.f32.mrf.mxu0  ;;  %v4249_v37 = vmax.f32 %v4121_v35, 0.0 }
 0x315   : > { %v10398_v33 = vpop.permute.xlu1 %3626  ;;  %v10400_v29 = vpop.permute.xlu0 %3632 }
 0x316   : > { %13009 = vst [vmem:[#allocation15_spill] sm:$0xff] %v10398_v33  ;;  %13010 = vst [vmem:[#allocation16_spill] sm:$0xff] %v10400_v29  ;;  %v8544_v21 = vpop.f32.mrf.mxu0  ;;  %v4370_v18 = vpack.c.bf16 %v4250_v3, %v4249_v37 }
 0x317   : > { %3730 = vrot.lane.b32.xlu1 %v3235_v50, %s9098_s24  ;;  %3736 = vrot.lane.b32.xlu0 %v8537_v46, %s9098_s24  ;;  %v4247_v50 = vmax.f32 %v4119_v54, 0.0  ;;  %v13013_v46 = vld [vmem:[#allocation22_spill] sm:$0xff]  ;;  %v13018_v54 = vld [vmem:[#allocation21_spill] sm:$0xff] }
 0x318   : > { %v3267_v41 = vpop.f32.mrf.mxu0  ;;  %v3989_v14 = vadd.f32 %v13013_v46, %v10378_v1  ;;  %v3986_v52 = vadd.f32 %v10376_v11, %v13018_v54  ;;  %v4124_v46 = vadd.f32 %v10281_v8, %v3987_v34  ;;  %v13024_v1 = vld [vmem:[#allocation29_spill] sm:$0xff] }
 0x319   : > { %v10406_v2 = vpop.permute.xlu0 %3628  ;;  %v10408_v36 = vpop.permute.xlu1 %3638  ;;  %v4369_v27 = vpack.c.bf16 %v4248_v43, %v4247_v50 }
 0x31a   : > { %13011 = vst [vmem:[#allocation113_spill] sm:$0xff] %v10406_v2  ;;  %13012 = vst [vmem:[#allocation114_spill] sm:$0xff] %v10408_v36  ;;  %v8545_v15 = vpop.f32.mrf.mxu0  ;;  %v4126_v9 = vadd.f32 %v10281_v8, %v3989_v14  ;;  %v4123_v37 = vadd.f32 %v10281_v8, %v3986_v52  ;;  %v4252_v50 = vmax.f32 %v4124_v46, 0.0 }
 0x31b   : > { %3732 = vrot.lane.b32.xlu0 %v3238_v0, %s9098_s24  ;;  %3742 = vrot.lane.b32.xlu1 %v8540_v51, %s9098_s24  ;;  %v13017_v51 = vld [vmem:[#allocation20_spill] sm:$0xff] }
 0x31c   : > { %v3270_v57 = vpop.f32.mrf.mxu0  ;;  %v3988_v35 = vadd.f32 %v13017_v51, %v10370_v24  ;;  %v4254_v14 = vmax.f32 %v4126_v9, 0.0  ;;  %v4251_v54 = vmax.f32 %v4123_v37, 0.0 }
 0x31d   : > { %v10419_v61 = vpop.permute.xlu1 %3634  ;;  %v10421_v56 = vpop.permute.xlu0 %3640 }
 0x31e   : > { %13015 = vst [vmem:[#allocation22_spill] sm:$0xff] %v10419_v61  ;;  %13016 = vst [vmem:[#allocation23_spill] sm:$0xff] %v10421_v56  ;;  %v8548_v0 = vpop.f32.mrf.mxu0  ;;  %v4125_v43 = vadd.f32 %v10281_v8, %v3988_v35  ;;  %v13023_v35 = vld [vmem:[#allocation28_spill] sm:$0xff]  ;;  %v4371_v9 = vpack.c.bf16 %v4252_v50, %v4251_v54 }
 0x31f   : > { %4520 = vrot.lane.b32.xlu0 %v4370_v18, %s9098_s24  ;;  %4518 = vrot.lane.b32.xlu1 %v4369_v27, %s9098_s24  ;;  %v3993_v52 = vadd.f32 %v13023_v35, %v10400_v29 }
 0x320   : > { %v3283_v13 = vpop.f32.mrf.mxu0  ;;  %v4253_v51 = vmax.f32 %v4125_v43, 0.0 }
 0x321   : > { %v10431_v28 = vpop.permute.xlu0 %3636  ;;  %v10433_v3 = vpop.permute.xlu1 %3646  ;;  %v4130_v43 = vadd.f32 %v10281_v8, %v3993_v52 }
 0x322   : > { %13019 = vst [vmem:[#allocation20_spill] sm:$0xff] %v10431_v28  ;;  %13020 = vst [vmem:[#allocation21_spill] sm:$0xff] %v10433_v3  ;;  %v8549_v34 = vpop.f32.mrf.mxu0  ;;  %v4372_v24 = vpack.c.bf16 %v4254_v14, %v4253_v51 }
 0x323   : > { %3738 = vrot.lane.b32.xlu1 %v3251_v60, %s9098_s24  ;;  %3744 = vrot.lane.b32.xlu0 %v8541_v48, %s9098_s24  ;;  %v3991_v60 = vadd.f32 %v10406_v2, %v13024_v1  ;;  %v4258_v51 = vmax.f32 %v4130_v43, 0.0  ;;  %v13034_v2 = vld [vmem:[#allocation35_spill] sm:$0xff] }
 0x324   : > { %v3286_v46 = vpop.f32.mrf.mxu0 }
 0x325   : > { %v10439_v18 = vpop.permute.xlu1 %3642  ;;  %v10441_v27 = vpop.permute.xlu0 %3648  ;;  %v4128_v1 = vadd.f32 %v10281_v8, %v3991_v60 }
 0x326   : > { %13021 = vst [vmem:[#allocation115_spill] sm:$0xff] %v10439_v18  ;;  %13022 = vst [vmem:[#allocation116_spill] sm:$0xff] %v10441_v27  ;;  %v8552_v14 = vpop.f32.mrf.mxu0 }
 0x327   : > { %3740 = vrot.lane.b32.xlu0 %v3254_v42, %s9098_s24  ;;  %3750 = vrot.lane.b32.xlu1 %v8544_v21, %s9098_s24  ;;  %v3992_v42 = vadd.f32 %v13027_v7, %v10388_v25  ;;  %v3990_v21 = vadd.f32 %v10398_v33, %v13028_v44  ;;  %v4256_v54 = vmax.f32 %v4128_v1, 0.0  ;;  %v13037_v25 = vld [vmem:[#allocation31_spill] sm:$0xff] }
 0x328   : > { %v3299_v52 = vpop.f32.mrf.mxu0 }
 0x329   : > { %v10449_v48 = vpop.permute.xlu0 %3644  ;;  %v10451_v11 = vpop.permute.xlu1 %3654  ;;  %v4129_v50 = vadd.f32 %v10281_v8, %v3992_v42  ;;  %v4127_v7 = vadd.f32 %v10281_v8, %v3990_v21  ;;  %v13033_v42 = vld [vmem:[#allocation34_spill] sm:$0xff] }
 0x32a   : > { %13025 = vst [vmem:[#allocation28_spill] sm:$0xff] %v10449_v48  ;;  %13026 = vst [vmem:[#allocation29_spill] sm:$0xff] %v10451_v11  ;;  %v3997_v21 = vadd.f32 %v13033_v42, %v10421_v56  ;;  %v8553_v1 = vpop.f32.mrf.mxu0 }
 0x32b   : > { %4524 = vrot.lane.b32.xlu0 %v4372_v24, %s9098_s24  ;;  %4522 = vrot.lane.b32.xlu1 %v4371_v9, %s9098_s24  ;;  %v4257_v60 = vmax.f32 %v4129_v50, 0.0  ;;  %v4255_v9 = vmax.f32 %v4127_v7, 0.0 }
 0x32c   : > { %v4134_v50 = vadd.f32 %v10281_v8, %v3997_v21 }
 0x32d   : > { %v10461_v37 = vpop.permute.xlu1 %3650  ;;  %v10463_v35 = vpop.permute.xlu0 %3656  ;;  %v4374_v33 = vpack.c.bf16 %v4258_v51, %v4257_v60  ;;  %v4373_v43 = vpack.c.bf16 %v4256_v54, %v4255_v9 }
 0x32e   : > { %13029 = vst [vmem:[#allocation25_spill] sm:$0xff] %v10461_v37  ;;  %13030 = vst [vmem:[#allocation26_spill] sm:$0xff] %v10463_v35  ;;  %v3302_v51 = vpop.f32.mrf.mxu0 }
 0x32f   : > { %3746 = vrot.lane.b32.xlu1 %v3267_v41, %s9098_s24  ;;  %3752 = vrot.lane.b32.xlu0 %v8545_v15, %s9098_s24  ;;  %v3995_v41 = vadd.f32 %v10431_v28, %v13034_v2  ;;  %v13044_v28 = vld [vmem:[#allocation41_spill] sm:$0xff] }
 0x330   : > { %v8556_v21 = vpop.f32.mrf.mxu0 }
 0x331   : > { %v10469_v44 = vpop.permute.xlu0 %3652  ;;  %v10471_v24 = vpop.permute.xlu1 %3662  ;;  %v4132_v2 = vadd.f32 %v10281_v8, %v3995_v41 }
 0x332   : > { %13031 = vst [vmem:[#allocation117_spill] sm:$0xff] %v10469_v44  ;;  %13032 = vst [vmem:[#allocation118_spill] sm:$0xff] %v10471_v24 }
 0x333   : > { %3748 = vrot.lane.b32.xlu0 %v3270_v57, %s9098_s24  ;;  %3758 = vrot.lane.b32.xlu1 %v8548_v0, %s9098_s24  ;;  %v3996_v57 = vadd.f32 %v13037_v25, %v10408_v36  ;;  %v3994_v0 = vadd.f32 %v10419_v61, %v13038_v10  ;;  %v4262_v10 = vmax.f32 %v4134_v50, 0.0  ;;  %v3315_v61 = vpop.f32.mrf.mxu0  ;;  %v13047_v36 = vld [vmem:[#allocation38_spill] sm:$0xff] }
 0x335   : > { %v10479_v15 = vpop.permute.xlu1 %3658  ;;  %v10481_v29 = vpop.permute.xlu0 %3664  ;;  %v4133_v54 = vadd.f32 %v10281_v8, %v3996_v57  ;;  %v4131_v25 = vadd.f32 %v10281_v8, %v3994_v0  ;;  %v13043_v57 = vld [vmem:[#allocation40_spill] sm:$0xff] }
 0x336   : > { %13035 = vst [vmem:[#allocation34_spill] sm:$0xff] %v10479_v15  ;;  %13036 = vst [vmem:[#allocation35_spill] sm:$0xff] %v10481_v29  ;;  %v4001_v0 = vadd.f32 %v13043_v57, %v10441_v27  ;;  %v13052_v27 = vld [vmem:[#allocation48_spill] sm:$0xff] }
 0x337   : > { %4528 = vrot.lane.b32.xlu0 %v4374_v33, %s9098_s24  ;;  %4526 = vrot.lane.b32.xlu1 %v4373_v43, %s9098_s24  ;;  %v4260_v33 = vmax.f32 %v4132_v2, 0.0  ;;  %v4261_v41 = vmax.f32 %v4133_v54, 0.0  ;;  %v4259_v43 = vmax.f32 %v4131_v25, 0.0  ;;  %v13046_v54 = vld [vmem:[#allocation37_spill] sm:$0xff] }
 0x338   : > { %v4000_v25 = vadd.f32 %v13046_v54, %v10433_v3 }
 0x339   : > { %v10491_v7 = vpop.permute.xlu0 %3660  ;;  %v10493_v42 = vpop.permute.xlu1 %3670  ;;  %v4376_v2 = vpack.c.bf16 %v4262_v10, %v4261_v41  ;;  %v4375_v56 = vpack.c.bf16 %v4260_v33, %v4259_v43 }
 0x33a   : > { %13039 = vst [vmem:[#allocation31_spill] sm:$0xff] %v10491_v7  ;;  %13040 = vst [vmem:[#allocation32_spill] sm:$0xff] %v10493_v42  ;;  %v8557_v10 = vpop.f32.mrf.mxu0  ;;  %v4137_v33 = vadd.f32 %v10281_v8, %v4000_v25  ;;  %v13051_v25 = vld [vmem:[#allocation46_spill] sm:$0xff] }
 0x33b   : > { %3754 = vrot.lane.b32.xlu1 %v3283_v13, %s9098_s24  ;;  %3760 = vrot.lane.b32.xlu0 %v8549_v34, %s9098_s24  ;;  %v3999_v13 = vadd.f32 %v10449_v48, %v13044_v28 }
 0x33d   : > { %v10499_v60 = vpop.permute.xlu1 %3666  ;;  %v10501_v9 = vpop.permute.xlu0 %3672  ;;  %v4136_v28 = vadd.f32 %v10281_v8, %v3999_v13 }
 0x33e   : > { %13041 = vst [vmem:[#allocation119_spill] sm:$0xff] %v10499_v60  ;;  %13042 = vst [vmem:[#allocation120_spill] sm:$0xff] %v10501_v9  ;;  %v3318_v13 = vpop.f32.mrf.mxu0 }
 0x33f   : > { %3756 = vrot.lane.b32.xlu0 %v3286_v46, %s9098_s24  ;;  %3766 = vrot.lane.b32.xlu1 %v8552_v14, %s9098_s24  ;;  %v3998_v46 = vadd.f32 %v10439_v18, %v13047_v36  ;;  %v4138_v14 = vadd.f32 %v10281_v8, %v4001_v0  ;;  %v4264_v43 = vmax.f32 %v4136_v28, 0.0 }
 0x340   : > { %v8560_v3 = vpop.f32.mrf.mxu0 }
 0x341   : > { %v10509_v34 = vpop.permute.xlu0 %3668  ;;  %v10511_v50 = vpop.permute.xlu1 %3678  ;;  %v4135_v41 = vadd.f32 %v10281_v8, %v3998_v46  ;;  %v4266_v36 = vmax.f32 %v4138_v14, 0.0  ;;  %v4005_v46 = vadd.f32 %v13051_v25, %v10463_v35 }
 0x342   : > { %13045 = vst [vmem:[#allocation40_spill] sm:$0xff] %v10509_v34 }
 0x343   : > { %4532 = vrot.lane.b32.xlu0 %v4376_v2, %s9098_s24  ;;  %4530 = vrot.lane.b32.xlu1 %v4375_v56, %s9098_s24  ;;  %v4265_v2 = vmax.f32 %v4137_v33, 0.0  ;;  %v4263_v54 = vmax.f32 %v4135_v41, 0.0  ;;  %v13055_v33 = vld [vmem:[#allocation43_spill] sm:$0xff] }
 0x344   : > { %v4004_v41 = vadd.f32 %v13055_v33, %v10451_v11  ;;  %v13059_v11 = vld [vmem:[#allocation52_spill] sm:$0xff] }
 0x345   : > { %v10521_v57 = vpop.permute.xlu1 %3674  ;;  %v10523_v48 = vpop.permute.xlu0 %3680  ;;  %v4378_v28 = vpack.c.bf16 %v4266_v36, %v4265_v2  ;;  %v4377_v18 = vpack.c.bf16 %v4264_v43, %v4263_v54 }
 0x346   : > { %13048 = vst [vmem:[#allocation41_spill] sm:$0xff] %v10521_v57  ;;  %13049 = vst [vmem:[#allocation37_spill] sm:$0xff] %v10523_v48  ;;  %v3331_v36 = vpop.f32.mrf.mxu0  ;;  %v4141_v43 = vadd.f32 %v10281_v8, %v4004_v41  ;;  %v4006_v41 = vadd.f32 %v10479_v15, %v13059_v11  ;;  %v8920_v11 = vld [vmem:[%s12656_s9 + $0x10] sm:$0xff]   ;;  %v13066_v15 = vld [vmem:[#allocation58_spill] sm:$0xff] }
 0x347   : > { %3762 = vrot.lane.b32.xlu1 %v3299_v52, %s9098_s24  ;;  %3768 = vrot.lane.b32.xlu0 %v8553_v1, %s9098_s24  ;;  %v4003_v52 = vadd.f32 %v10469_v44, %v13052_v27 }
 0x348   : > { %v8561_v33 = vpop.f32.mrf.mxu0  ;;  %v4269_v35 = vmax.f32 %v4141_v43, 0.0  ;;  %8728 = vmatprep.subr.bf16.mxu0 %v8920_v11 }
 0x349   : > { %v10529_v56 = vpop.permute.xlu0 %3676  ;;  %v10531_v0 = vpop.permute.xlu1 %3686  ;;  %v4140_v27 = vadd.f32 %v10281_v8, %v4003_v52  ;;  %8729 = vmatpush3.bf16.msra.mxu0 %v8920_v11  ;;  %v13068_v11 = vld [vmem:[#allocation59_spill] sm:$0xff] }
 0x34a   : > { %13050 = vst [vmem:[#allocation38_spill] sm:$0xff] %v10529_v56  ;;  %v3334_v43 = vpop.f32.mrf.mxu0 }
 0x34b   : > { %3764 = vrot.lane.b32.xlu0 %v3302_v51, %s9098_s24  ;;  %3774 = vrot.lane.b32.xlu1 %v8556_v21, %s9098_s24  ;;  %v4002_v51 = vadd.f32 %v10461_v37, %v13056_v58  ;;  %v4142_v21 = vadd.f32 %v10281_v8, %v4005_v46  ;;  %v4268_v54 = vmax.f32 %v4140_v27, 0.0 }
 0x34d   : > { %v10539_v1 = vpop.permute.xlu1 %3682  ;;  %v10541_v14 = vpop.permute.xlu0 %3688  ;;  %v4139_v2 = vadd.f32 %v10281_v8, %v4002_v51  ;;  %v4270_v58 = vmax.f32 %v4142_v21, 0.0 }
 0x34e   : > { %13053 = vst [vmem:[#allocation46_spill] sm:$0xff] %v10539_v1  ;;  %13054 = vst [vmem:[#allocation48_spill] sm:$0xff] %v10541_v14 }
 0x34f   : > { %4536 = vrot.lane.b32.xlu0 %v4378_v28, %s9098_s24  ;;  %4534 = vrot.lane.b32.xlu1 %v4377_v18, %s9098_s24  ;;  %v13058_v18 = vld [vmem:[#allocation55_spill] sm:$0xff]  ;;  %v4267_v37 = vmax.f32 %v4139_v2, 0.0 }
 0x350   : > { %v4007_v46 = vadd.f32 %v10491_v7, %v13058_v18  ;;  %v4380_v18 = vpack.c.bf16 %v4270_v58, %v4269_v35  ;;  %v13063_v35 = vld [vmem:[#allocation61_spill] sm:$0xff] }
 0x351   : > { %v10551_v25 = vpop.permute.xlu0 %3684  ;;  %v10553_v44 = vpop.permute.xlu1 %3694  ;;  %v4379_v7 = vpack.c.bf16 %v4268_v54, %v4267_v37  ;;  %v4011_v37 = vadd.f32 %v10509_v34, %v13063_v35 }
 0x352   : > { %13057 = vst [vmem:[#allocation43_spill] sm:$0xff] %v10551_v25  ;;  %v4144_v51 = vadd.f32 %v10281_v8, %v4007_v46 }
 0x353   : > { %3770 = vrot.lane.b32.xlu1 %v3315_v61, %s9098_s24  ;;  %3776 = vrot.lane.b32.xlu0 %v8557_v10, %s9098_s24  ;;  %v13060_v61 = vld [vmem:[#allocation53_spill] sm:$0xff] }
 0x354   : > { %v4009_v10 = vadd.f32 %v13060_v61, %v10481_v29  ;;  %v4272_v61 = vmax.f32 %v4144_v51, 0.0  ;;  %v8564_v29 = vpop.f32.mrf.mxu0 }
 0x355   : > { %v10561_v28 = vpop.permute.xlu1 %3690  ;;  %v10563_v52 = vpop.permute.xlu0 %3696 }
 0x356   : > { %v4146_v46 = vadd.f32 %v10281_v8, %v4009_v10  ;;  %v4148_v10 = vadd.f32 %v10281_v8, %v4011_v37 }
 0x357   : > { %3772 = vrot.lane.b32.xlu0 %v3318_v13, %s9098_s24  ;;  %3782 = vrot.lane.b32.xlu1 %v8560_v3, %s9098_s24  ;;  %v13062_v13 = vld [vmem:[#allocation50_spill] sm:$0xff]  ;;  %v4143_v3 = vadd.f32 %v10281_v8, %v4006_v41 }
 0x358   : > { %v4008_v2 = vadd.f32 %v13062_v13, %v10471_v24  ;;  %v4013_v24 = vadd.f32 %v13068_v11, %v10501_v9  ;;  %v13073_v9 = vld [vmem:[#allocation64_spill] sm:$0xff] }
 0x359   : > { %v10572_v21 = vpop.permute.xlu0 %3692  ;;  %v10574_v27 = vpop.permute.xlu1 %3702  ;;  %v4271_v41 = vmax.f32 %v4143_v3, 0.0 }
 0x35a   : > { %13061 = vst [vmem:[#allocation44_spill] sm:$0xff] %v10572_v21  ;;  %v4145_v13 = vadd.f32 %v10281_v8, %v4008_v2  ;;  %v3347_v2 = vpop.f32.mrf.mxu0 }
 0x35b   : > { %4540 = vrot.lane.b32.xlu0 %v4380_v18, %s9098_s24  ;;  %4538 = vrot.lane.b32.xlu1 %v4379_v7, %s9098_s24  ;;  %v4010_v18 = vadd.f32 %v10499_v60, %v13066_v15  ;;  %v4274_v7 = vmax.f32 %v4146_v46, 0.0  ;;  %v4381_v34 = vpack.c.bf16 %v4272_v61, %v4271_v41  ;;  %v13069_v15 = vld [vmem:[#allocation56_spill] sm:$0xff]  ;;  %v13070_v46 = vld [vmem:[#allocation67_spill] sm:$0xff] }
 0x35c   : > { %v4273_v3 = vmax.f32 %v4145_v13, 0.0  ;;  %v4015_v37 = vadd.f32 %v10529_v56, %v13070_v46  ;;  %v4150_v13 = vadd.f32 %v10281_v8, %v4013_v24  ;;  %v8565_v11 = vpop.f32.mrf.mxu0 }
 0x35d   : > { %v10587_v58 = vpop.permute.xlu1 %3698  ;;  %v10589_v54 = vpop.permute.xlu0 %3704  ;;  %v4147_v5 = vadd.f32 %v10281_v8, %v4010_v18 }
 0x35e   : > { %13064 = vst [vmem:[#allocation55_spill] sm:$0xff] %v10587_v58  ;;  %13065 = vst [vmem:[#allocation52_spill] sm:$0xff] %v10589_v54  ;;  %v4382_v41 = vpack.c.bf16 %v4274_v7, %v4273_v3  ;;  %v4278_v3 = vmax.f32 %v4150_v13, 0.0  ;;  %v3350_v24 = vpop.f32.mrf.mxu0 }
 0x35f   : > { %3778 = vrot.lane.b32.xlu1 %v3331_v36, %s9098_s24  ;;  %3784 = vrot.lane.b32.xlu0 %v8561_v33, %s9098_s24  ;;  %v4012_v36 = vadd.f32 %v13069_v15, %v10493_v42  ;;  %v4276_v33 = vmax.f32 %v4148_v10, 0.0  ;;  %v4275_v18 = vmax.f32 %v4147_v5, 0.0  ;;  %v4152_v10 = vadd.f32 %v10281_v8, %v4015_v37  ;;  %v13075_v5 = vld [vmem:[#allocation65_spill] sm:$0xff] }
 0x360   : > { %v4017_v56 = vadd.f32 %v13075_v5, %v10523_v48  ;;  %v8568_v48 = vpop.f32.mrf.mxu0 }
 0x361   : > { %v10597_v51 = vpop.permute.xlu0 %3700  ;;  %v10599_v35 = vpop.permute.xlu1 %3710  ;;  %v4383_v7 = vpack.c.bf16 %v4276_v33, %v4275_v18 }
 0x362   : > { %13067 = vst [vmem:[#allocation53_spill] sm:$0xff] %v10597_v51  ;;  %v4154_v18 = vadd.f32 %v10281_v8, %v4017_v56 }
 0x363   : > { %4542 = vrot.lane.b32.xlu1 %v4381_v34, %s9098_s24  ;;  %3780 = vrot.lane.b32.xlu0 %v3334_v43, %s9098_s24  ;;  %v4014_v34 = vadd.f32 %v10521_v57, %v13073_v9  ;;  %v4149_v43 = vadd.f32 %v10281_v8, %v4012_v36  ;;  %v13076_v36 = vld [vmem:[#allocation62_spill] sm:$0xff]  ;;  %v13077_v57 = vld [vmem:[#allocation73_spill] sm:$0xff] }
 0x364   : > { %v4016_v37 = vadd.f32 %v13076_v36, %v10511_v50  ;;  %v4019_v42 = vadd.f32 %v10551_v25, %v13077_v57 }
 0x365   : > { %v10610_v60 = vpop.permute.xlu1 %3706  ;;  %v10612_v61 = vpop.permute.xlu0 %3712  ;;  %v4151_v9 = vadd.f32 %v10281_v8, %v4014_v34 }
 0x366   : > { %13071 = vst [vmem:[#allocation50_spill] sm:$0xff] %v10610_v60  ;;  %13072 = vst [vmem:[#allocation61_spill] sm:$0xff] %v10612_v61  ;;  %v4156_v57 = vadd.f32 %v10281_v8, %v4019_v42 }
 0x367   : > { %4544 = vrot.lane.b32.xlu0 %v4382_v41, %s9098_s24  ;;  %3786 = vrot.lane.b32.xlu1 %v3347_v2, %s9098_s24  ;;  %v4277_v2 = vmax.f32 %v4149_v43, 0.0  ;;  %v4280_v41 = vmax.f32 %v4152_v10, 0.0  ;;  %v4279_v34 = vmax.f32 %v4151_v9, 0.0  ;;  %v4153_v43 = vadd.f32 %v10281_v8, %v4016_v37  ;;  %v13080_v37 = vld [vmem:[#allocation68_spill] sm:$0xff] }
 0x368   : > { %v4282_v9 = vmax.f32 %v4154_v18, 0.0  ;;  %v4284_v42 = vmax.f32 %v4156_v57, 0.0 }
 0x369   : > { %v10621_v15 = vpop.permute.xlu0 %3708  ;;  %v10623_v46 = vpop.permute.xlu1 %3718  ;;  %v4384_v5 = vpack.c.bf16 %v4278_v3, %v4277_v2  ;;  %v4385_v3 = vpack.c.bf16 %v4280_v41, %v4279_v34  ;;  %v13079_v2 = vld [vmem:[#allocation71_spill] sm:$0xff] }
 0x36a   : > { %13074 = vst [vmem:[#allocation58_spill] sm:$0xff] %v10621_v15  ;;  %v4021_v36 = vadd.f32 %v13079_v2, %v10541_v14 }
 0x36b   : > { %4546 = vrot.lane.b32.xlu1 %v4383_v7, %s9098_s24  ;;  %3788 = vrot.lane.b32.xlu0 %v3350_v24, %s9098_s24  ;;  %v13078_v7 = vld [vmem:[#allocation70_spill] sm:$0xff] }
 0x36c   : > { %v4018_v24 = vadd.f32 %v10539_v1, %v13078_v7  ;;  %v13081_v7 = vld [vmem:[#allocation79_spill] sm:$0xff]  ;;  %v4158_v34 = vadd.f32 %v10281_v8, %v4021_v36  ;;  %v13084_v36 = vld [vmem:[#allocation77_spill] sm:$0xff] }
 0x36d   : > { %v4509_v33 = vpop.permute.xlu0 %4508  ;;  %v4507_v13 = vpop.permute.xlu1 %4506  ;;  %v4023_v25 = vadd.f32 %v10572_v21, %v13081_v7 }
 0x36e   : > { %8598 = vmatprep.mubr.msk.bf16.mxu1 %vm1759_vm3, %v4507_v13  ;;  %v3363_v13 = vpop.f32.mrf.mxu0  ;;  %v4286_v1 = vmax.f32 %v4158_v34, 0.0 }
 0x36f   : > { %8599 = vmatmul.mubr.msk.bf16.vlgmr.msra.gmra.mxu1 %vm1759_vm3, %v4509_v33  ;;  %3790 = vrot.lane.b32.xlu1 %v8564_v29, %s9098_s24  ;;  %v4155_v33 = vadd.f32 %v10281_v8, %v4018_v24  ;;  %v4281_v29 = vmax.f32 %v4153_v43, 0.0  ;;  %v4160_v57 = vadd.f32 %v10281_v8, %v4023_v25 }
 0x370   : > { %4548 = vrot.lane.b32.xlu0 %v4384_v5, %s9098_s24  ;;  %v4020_v5 = vadd.f32 %v13080_v37, %v10531_v0  ;;  %v8569_v24 = vpop.f32.mrf.mxu0 }
 0x371   : > { %v10643_v10 = vpop.permute.xlu1 %3714  ;;  %v10645_v56 = vpop.permute.xlu0 %3720  ;;  %v4386_v2 = vpack.c.bf16 %v4282_v9, %v4281_v29  ;;  %v4283_v14 = vmax.f32 %v4155_v33, 0.0  ;;  %v4025_v9 = vadd.f32 %v13084_v36, %v10563_v52 }
 0x372   : > { %v3366_v33 = vpop.f32.mrf.mxu0 }
 0x373   : > { %4550 = vrot.lane.b32.xlu1 %v4385_v3, %s9098_s24  ;;  %v13083_v3 = vld [vmem:[#allocation76_spill] sm:$0xff]  ;;  %v4387_v21 = vpack.c.bf16 %v4284_v42, %v4283_v14  ;;  %v4288_v14 = vmax.f32 %v4160_v57, 0.0  ;;  %v13086_v42 = vld [vmem:[#allocation85_spill] sm:$0xff] }
 0x374   : > { %3792 = vrot.lane.b32.xlu0 %v8565_v11, %s9098_s24  ;;  %v4022_v43 = vadd.f32 %v10561_v28, %v13083_v3  ;;  %v4157_v11 = vadd.f32 %v10281_v8, %v4020_v5  ;;  %v13085_v5 = vld [vmem:[#allocation74_spill] sm:$0xff]  ;;  %v4027_v34 = vadd.f32 %v10597_v51, %v13086_v42 }
 0x375   : > { %v10656_v41 = vpop.permute.xlu0 %3716  ;;  %v10658_v18 = vpop.permute.xlu1 %3726  ;;  %v4024_v25 = vadd.f32 %v13085_v5, %v10553_v44 }
 0x376   : > { %13082 = vst [vmem:[#allocation59_spill] sm:$0xff] %v10656_v41  ;;  %v4159_v29 = vadd.f32 %v10281_v8, %v4022_v43  ;;  %v4162_v43 = vadd.f32 %v10281_v8, %v4025_v9  ;;  %v4164_v57 = vadd.f32 %v10281_v8, %v4027_v34 }
 0x377   : > { %3794 = vrot.lane.b32.xlu1 %v3363_v13, %s9098_s24  ;;  %v4285_v13 = vmax.f32 %v4157_v11, 0.0 }
 0x378   : > { %4552 = vrot.lane.b32.xlu0 %v4386_v2, %s9098_s24  ;;  %v4287_v36 = vmax.f32 %v4159_v29, 0.0  ;;  %v4290_v9 = vmax.f32 %v4162_v43, 0.0  ;;  %v4292_v34 = vmax.f32 %v4164_v57, 0.0 }
 0x379   : > { %v4513_v37 = vpop.permute.xlu0 %4512  ;;  %v4511_v7 = vpop.permute.xlu1 %4510 }
 0x37a   : > { %8602 = vmatprep.mubr.msk.bf16.mxu1 %vm1759_vm3, %v4511_v7  ;;  %v4388_v7 = vpack.c.bf16 %v4286_v1, %v4285_v13  ;;  %v4389_v51 = vpack.c.bf16 %v4288_v14, %v4287_v36  ;;  %v13088_v1 = vld [vmem:[#allocation83_spill] sm:$0xff] }
 0x37b   : > { %8603 = vmatmul.mubr.msk.bf16.gmra.mxu1 %vm1759_vm3, %v4513_v37  ;;  %4554 = vrot.lane.b32.xlu1 %v4387_v21, %s9098_s24  ;;  %v8572_v37 = vpop.f32.mrf.mxu0  ;;  %v13087_v21 = vld [vmem:[#allocation82_spill] sm:$0xff]  ;;  %v4029_v29 = vadd.f32 %v13088_v1, %v10589_v54 }
 0x37c   : > { %3796 = vrot.lane.b32.xlu0 %v3366_v33, %s9098_s24  ;;  %v4026_v11 = vadd.f32 %v10587_v58, %v13087_v21  ;;  %v4161_v33 = vadd.f32 %v10281_v8, %v4024_v25  ;;  %v13089_v25 = vld [vmem:[#allocation80_spill] sm:$0xff]  ;;  %v4031_v58 = vadd.f32 %v10621_v15, %v9804_v26 }
 0x37d   : > { %v10678_v2 = vpop.permute.xlu1 %3722  ;;  %v10680_v3 = vpop.permute.xlu0 %3728  ;;  %v4166_v36 = vadd.f32 %v10281_v8, %v4029_v29 }
 0x37e   : > { %v3379_v13 = vpop.f32.mrf.mxu0  ;;  %v4163_v21 = vadd.f32 %v10281_v8, %v4026_v11  ;;  %v4168_v26 = vadd.f32 %v10281_v8, %v4031_v58 }
 0x37f   : > { %3798 = vrot.lane.b32.xlu1 %v8568_v48, %s9098_s24  ;;  %v4289_v48 = vmax.f32 %v4161_v33, 0.0 }
 0x380   : > { %4556 = vrot.lane.b32.xlu0 %v4388_v7, %s9098_s24  ;;  %v4028_v7 = vadd.f32 %v13089_v25, %v10574_v27  ;;  %v8573_v11 = vpop.f32.mrf.mxu0  ;;  %v4291_v54 = vmax.f32 %v4163_v21, 0.0  ;;  %v13091_v21 = vld [vmem:[#allocation89_spill] sm:$0xff]  ;;  %v4296_v58 = vmax.f32 %v4168_v26, 0.0 }
 0x381   : > { %v10689_v5 = vpop.permute.xlu0 %3724  ;;  %v10691_v42 = vpop.permute.xlu1 %3734  ;;  %v4390_v1 = vpack.c.bf16 %v4290_v9, %v4289_v48  ;;  %v4294_v48 = vmax.f32 %v4166_v36, 0.0  ;;  %v4033_v25 = vadd.f32 %v13091_v21, %v10612_v61 }
 0x382   : > { %v4391_v9 = vpack.c.bf16 %v4292_v34, %v4291_v54 }
 0x383   : > { %4558 = vrot.lane.b32.xlu1 %v4389_v51, %s9098_s24  ;;  %v13090_v51 = vld [vmem:[#allocation88_spill] sm:$0xff]  ;;  %v4170_v36 = vadd.f32 %v10281_v8, %v4033_v25 }
 0x384   : > { %3800 = vrot.lane.b32.xlu0 %v8569_v24, %s9098_s24  ;;  %v4030_v33 = vadd.f32 %v10610_v60, %v13090_v51  ;;  %v4165_v24 = vadd.f32 %v10281_v8, %v4028_v7  ;;  %v13092_v7 = vld [vmem:[#allocation86_spill] sm:$0xff]  ;;  %v13093_v51 = vld [vmem:[#allocation12_spill] sm:$0xff] }
 0x385   : > { %v4517_v14 = vpop.permute.xlu0 %4516  ;;  %v4515_v43 = vpop.permute.xlu1 %4514  ;;  %v4035_v15 = vadd.f32 %v10656_v41, %v13093_v51  ;;  %v4298_v60 = vmax.f32 %v4170_v36, 0.0 }
 0x386   : > { %8606 = vmatprep.mubr.msk.bf16.mxu1 %vm1759_vm3, %v4515_v43  ;;  %v3382_v43 = vpop.f32.mrf.mxu0 }
 0x387   : > { %8607 = vmatmul.mubr.msk.bf16.gmra.mxu1 %vm1759_vm3, %v4517_v14  ;;  %3802 = vrot.lane.b32.xlu1 %v3379_v13, %s9098_s24  ;;  %v4167_v14 = vadd.f32 %v10281_v8, %v4030_v33  ;;  %v4293_v13 = vmax.f32 %v4165_v24, 0.0  ;;  %v4172_v26 = vadd.f32 %v10281_v8, %v4035_v15  ;;  %v4036_v15 = vadd.f32 %v9452_v31, %v10623_v46 }
 0x388   : > { %4560 = vrot.lane.b32.xlu0 %v4390_v1, %s9098_s24  ;;  %v4032_v1 = vadd.f32 %v13092_v7, %v10599_v35  ;;  %v8576_v33 = vpop.f32.mrf.mxu0 }
 0x389   : > { %v10711_v57 = vpop.permute.xlu1 %3730  ;;  %v10713_v29 = vpop.permute.xlu0 %3736  ;;  %v4392_v21 = vpack.c.bf16 %v4294_v48, %v4293_v13  ;;  %v4295_v61 = vmax.f32 %v4167_v14, 0.0  ;;  %v4037_v48 = vadd.f32 %v9465_v40, %v10645_v56  ;;  %v4039_v13 = vadd.f32 %v10689_v5, %v9498_v63 }
 0x38a   : > { %v3395_v25 = vpop.f32.mrf.mxu0  ;;  %v4173_v31 = vadd.f32 %v10281_v8, %v4036_v15 }
 0x38b   : > { %4562 = vrot.lane.b32.xlu1 %v4391_v9, %s9098_s24  ;;  %v13094_v9 = vld [vmem:[#allocation9_spill] sm:$0xff]  ;;  %v4393_v41 = vpack.c.bf16 %v4296_v58, %v4295_v61  ;;  %v4300_v61 = vmax.f32 %v4172_v26, 0.0  ;;  %v4174_v58 = vadd.f32 %v10281_v8, %v4037_v48  ;;  %v4176_v63 = vadd.f32 %v10281_v8, %v4039_v13 }
 0x38c   : > { %3804 = vrot.lane.b32.xlu0 %v3382_v43, %s9098_s24  ;;  %v4034_v24 = vadd.f32 %v10643_v10, %v13094_v9  ;;  %v4169_v43 = vadd.f32 %v10281_v8, %v4032_v1  ;;  %v4301_v48 = vmax.f32 %v4173_v31, 0.0 }
 0x38d   : > { %v10724_v54 = vpop.permute.xlu0 %3732  ;;  %v10726_v34 = vpop.permute.xlu1 %3742  ;;  %v4302_v26 = vmax.f32 %v4174_v58, 0.0 }
 0x38e   : > { %v4171_v14 = vadd.f32 %v10281_v8, %v4034_v24 }
 0x38f   : > { %3806 = vrot.lane.b32.xlu1 %v8572_v37, %s9098_s24  ;;  %v4297_v37 = vmax.f32 %v4169_v43, 0.0  ;;  %v4396_v13 = vpack.c.bf16 %v4302_v26, %v4301_v48 }
 0x390   : > { %4564 = vrot.lane.b32.xlu0 %v4392_v21, %s9098_s24  ;;  %v8577_v21 = vpop.f32.mrf.mxu0  ;;  %v4299_v9 = vmax.f32 %v4171_v14, 0.0  ;;  %v4304_v14 = vmax.f32 %v4176_v63, 0.0 }
 0x391   : > { %v4521_v7 = vpop.permute.xlu0 %4520  ;;  %v4519_v51 = vpop.permute.xlu1 %4518  ;;  %v4394_v36 = vpack.c.bf16 %v4298_v60, %v4297_v37  ;;  %v4041_v60 = vadd.f32 %v9494_v59, %v10680_v3  ;;  %v4043_v37 = vadd.f32 %v10724_v54, %v9524_v23 }
 0x392   : > { %8610 = vmatprep.mubr.msk.bf16.mxu1 %vm1759_vm3, %v4519_v51  ;;  %v4395_v43 = vpack.c.bf16 %v4300_v61, %v4299_v9  ;;  %v8921_v51 = vld [vmem:[%s12656_s9 + $0x8] sm:$0xff]  }
 0x393   : > { %8611 = vmatmul.mubr.msk.bf16.gmra.mxu1 %vm1759_vm3, %v4521_v7  ;;  %4566 = vrot.lane.b32.xlu1 %v4393_v41, %s9098_s24  ;;  %v4038_v41 = vadd.f32 %v10678_v2, %v9487_v53  ;;  %v3398_v7 = vpop.f32.mrf.mxu0  ;;  %v4178_v61 = vadd.f32 %v10281_v8, %v4041_v60  ;;  %v13098_v9 = vld [vmem:[#allocation19_spill] sm:$0xff]  ;;  %v4045_v60 = vadd.f32 %v9520_v17, %v10713_v29 }
 0x394   : > { %3808 = vrot.lane.b32.xlu0 %v8573_v11, %s9098_s24  ;;  %8730 = vmatprep.subr.bf16.mxu0 %v8921_v51 }
 0x395   : > { %v10746_v40 = vpop.permute.xlu1 %3738  ;;  %v10748_v1 = vpop.permute.xlu0 %3744  ;;  %v4175_v53 = vadd.f32 %v10281_v8, %v4038_v41  ;;  %8731 = vmatpush3.bf16.msra.mxu0 %v8921_v51  ;;  %v4180_v41 = vadd.f32 %v10281_v8, %v4043_v37  ;;  %v4306_v26 = vmax.f32 %v4178_v61, 0.0  ;;  %v4044_v51 = vadd.f32 %v9507_v4, %v10691_v42 }
 0x396   : > { %13095 = vst [vmem:[#allocation56_spill] sm:$0xff] %v10748_v1  ;;  %v8580_v58 = vpop.f32.mrf.mxu0  ;;  %v4182_v17 = vadd.f32 %v10281_v8, %v4045_v60 }
 0x397   : > { %3810 = vrot.lane.b32.xlu1 %v3395_v25, %s9098_s24  ;;  %v4040_v25 = vadd.f32 %v9478_v49, %v10658_v18  ;;  %v4042_v49 = vadd.f32 %v10711_v57, %v13098_v9  ;;  %v4308_v48 = vmax.f32 %v4180_v41, 0.0  ;;  %v4181_v4 = vadd.f32 %v10281_v8, %v4044_v51 }
 0x398   : > { %4568 = vrot.lane.b32.xlu0 %v4394_v36, %s9098_s24  ;;  %v4303_v36 = vmax.f32 %v4175_v53, 0.0 }
 0x399   : > { %v10757_v11 = vpop.permute.xlu0 %3740  ;;  %v10759_v24 = vpop.permute.xlu1 %3750  ;;  %v4177_v23 = vadd.f32 %v10281_v8, %v4040_v25  ;;  %v4179_v53 = vadd.f32 %v10281_v8, %v4042_v49  ;;  %v13101_v25 = vld [vmem:[#allocation27_spill] sm:$0xff] }
 0x39a   : > { %13096 = vst [vmem:[#allocation67_spill] sm:$0xff] %v10757_v11  ;;  %13097 = vst [vmem:[#allocation64_spill] sm:$0xff] %v10759_v24  ;;  %v4047_v37 = vadd.f32 %v10757_v11, %v13101_v25 }
 0x39b   : > { %4570 = vrot.lane.b32.xlu1 %v4395_v43, %s9098_s24  ;;  %v4397_v43 = vpack.c.bf16 %v4304_v14, %v4303_v36  ;;  %v13104_v36 = vld [vmem:[#allocation24_spill] sm:$0xff] }
 0x39c   : > { %3812 = vrot.lane.b32.xlu0 %v3398_v7, %s9098_s24  ;;  %v3411_v7 = vpop.f32.mrf.mxu0  ;;  %v4046_v9 = vadd.f32 %v10746_v40, %v13104_v36 }
 0x39d   : > { %v4525_v59 = vpop.permute.xlu0 %4524  ;;  %v4523_v15 = vpop.permute.xlu1 %4522 }
 0x39e   : > { %8614 = vmatprep.mubr.msk.bf16.mxu1 %vm1759_vm3, %v4523_v15  ;;  %v8581_v61 = vpop.f32.mrf.mxu0 }
 0x39f   : > { %8615 = vmatmul.mubr.msk.bf16.gmra.mxu1 %vm1759_vm3, %v4525_v59  ;;  %3814 = vrot.lane.b32.xlu1 %v8576_v33, %s9098_s24  ;;  %v4305_v33 = vmax.f32 %v4177_v23, 0.0 }
 0x3a0   : > { %4572 = vrot.lane.b32.xlu0 %v4396_v13, %s9098_s24  ;;  %v4307_v13 = vmax.f32 %v4179_v53, 0.0  ;;  %v3414_v60 = vpop.f32.mrf.mxu0  ;;  %v4183_v53 = vadd.f32 %v10281_v8, %v4046_v9  ;;  %v13108_v9 = vld [vmem:[#allocation30_spill] sm:$0xff] }
 0x3a1   : > { %v10782_v31 = vpop.permute.xlu1 %3746  ;;  %v10784_v63 = vpop.permute.xlu0 %3752  ;;  %v4398_v15 = vpack.c.bf16 %v4306_v26, %v4305_v33  ;;  %v4049_v26 = vadd.f32 %v9546_v47, %v10748_v1  ;;  %v4048_v33 = vadd.f32 %v9533_v30, %v10726_v34  ;;  %v9022_v1 = vld [vmem:[%s9207_s15 + $0x2f8] sm:$0xff] }
 0x3a2   : > { %13099 = vst [vmem:[#allocation65_spill] sm:$0xff] %v10782_v31  ;;  %13100 = vst [vmem:[#allocation62_spill] sm:$0xff] %v10784_v63  ;;  %v4399_v41 = vpack.c.bf16 %v4308_v48, %v4307_v13  ;;  %v13105_v48 = vld [vmem:[#allocation33_spill] sm:$0xff]  ;;  %v8584_v13 = vpop.f32.mrf.mxu0  ;;  %v4311_v36 = vmax.f32 %v4183_v53, 0.0 }
 0x3a3   : > { %4574 = vrot.lane.b32.xlu1 %v4397_v43, %s9098_s24  ;;  %v4310_v43 = vmax.f32 %v4182_v17, 0.0  ;;  %v4186_v17 = vadd.f32 %v10281_v8, %v4049_v26  ;;  %v4185_v30 = vadd.f32 %v10281_v8, %v4048_v33 }
 0x3a4   : > { %3816 = vrot.lane.b32.xlu0 %v8577_v21, %s9098_s24  ;;  %v4184_v21 = vadd.f32 %v10281_v8, %v4047_v37 }
 0x3a5   : > { %v10795_v14 = vpop.permute.xlu0 %3748  ;;  %v10797_v59 = vpop.permute.xlu1 %3758  ;;  %v4314_v26 = vmax.f32 %v4186_v17, 0.0 }
 0x3a6   : > { %13102 = vst [vmem:[#allocation73_spill] sm:$0xff] %v10795_v14  ;;  %13103 = vst [vmem:[#allocation70_spill] sm:$0xff] %v10797_v59  ;;  %v4312_v51 = vmax.f32 %v4184_v21, 0.0  ;;  %v4051_v25 = vadd.f32 %v10795_v14, %v13105_v48  ;;  %v13111_v48 = vld [vmem:[#allocation39_spill] sm:$0xff] }
 0x3a7   : > { %3818 = vrot.lane.b32.xlu1 %v3411_v7, %s9098_s24  ;;  %v4309_v7 = vmax.f32 %v4181_v4, 0.0  ;;  %v4050_v4 = vadd.f32 %v10782_v31, %v13108_v9 }
 0x3a8   : > { %4576 = vrot.lane.b32.xlu0 %v4398_v15, %s9098_s24  ;;  %v4188_v21 = vadd.f32 %v10281_v8, %v4051_v25 }
 0x3a9   : > { %v4529_v49 = vpop.permute.xlu0 %4528  ;;  %v4527_v23 = vpop.permute.xlu1 %4526  ;;  %v4400_v15 = vpack.c.bf16 %v4310_v43, %v4309_v7  ;;  %v4053_v43 = vadd.f32 %v9572_v19, %v10784_v63  ;;  %v4187_v53 = vadd.f32 %v10281_v8, %v4050_v4  ;;  %v4052_v7 = vadd.f32 %v9559_v62, %v10759_v24  ;;  %v13112_v4 = vld [vmem:[#allocation36_spill] sm:$0xff]  ;;  %v9016_v63 = vld [vmem:[%s9207_s15 + $0x2c8] sm:$0xff] }
 0x3aa   : > { %8618 = vmatprep.mubr.msk.bf16.mxu1 %vm1759_vm3, %v4527_v23  ;;  %v4316_v33 = vmax.f32 %v4188_v21, 0.0  ;;  %v13190_v24 = vld [vmem:[#allocation108_spill] sm:$0xff] }
 0x3ab   : > { %8619 = vmatmul.mubr.msk.bf16.gmra.mxu1 %vm1759_vm3, %v4529_v49  ;;  %4578 = vrot.lane.b32.xlu1 %v4399_v41, %s9098_s24  ;;  %v4401_v41 = vpack.c.bf16 %v4312_v51, %v4311_v36  ;;  %v4315_v9 = vmax.f32 %v4187_v53, 0.0  ;;  %v4189_v62 = vadd.f32 %v10281_v8, %v4052_v7 }
 0x3ac   : > { %3820 = vrot.lane.b32.xlu0 %v3414_v60, %s9098_s24  ;;  %v3427_v60 = vpop.f32.mrf.mxu0 }
 0x3ad   : > { %v10817_v47 = vpop.permute.xlu1 %3754  ;;  %v10819_v37 = vpop.permute.xlu0 %3760 }
 0x3ae   : > { %13106 = vst [vmem:[#allocation71_spill] sm:$0xff] %v10817_v47  ;;  %13107 = vst [vmem:[#allocation68_spill] sm:$0xff] %v10819_v37  ;;  %v8585_v36 = vpop.f32.mrf.mxu0 }
 0x3af   : > { %3822 = vrot.lane.b32.xlu1 %v8580_v58, %s9098_s24  ;;  %v4313_v58 = vmax.f32 %v4185_v30, 0.0  ;;  %v4054_v30 = vadd.f32 %v10817_v47, %v13112_v4 }
 0x3b0   : > { %4580 = vrot.lane.b32.xlu0 %v4400_v15, %s9098_s24  ;;  %v4190_v15 = vadd.f32 %v10281_v8, %v4053_v43  ;;  %v4403_v43 = vpack.c.bf16 %v4316_v33, %v4315_v9 }
 0x3b1   : > { %v10828_v49 = vpop.permute.xlu0 %3756  ;;  %v10830_v23 = vpop.permute.xlu1 %3766  ;;  %v4402_v19 = vpack.c.bf16 %v4314_v26, %v4313_v58  ;;  %v4057_v58 = vadd.f32 %v9601_v16, %v10819_v37  ;;  %v4191_v7 = vadd.f32 %v10281_v8, %v4054_v30 }
 0x3b2   : > { %13109 = vst [vmem:[#allocation79_spill] sm:$0xff] %v10828_v49  ;;  %13110 = vst [vmem:[#allocation76_spill] sm:$0xff] %v10830_v23  ;;  %v4055_v25 = vadd.f32 %v10828_v49, %v13111_v48  ;;  %v4318_v53 = vmax.f32 %v4190_v15, 0.0  ;;  %v4317_v48 = vmax.f32 %v4189_v62, 0.0  ;;  %v13117_v15 = vld [vmem:[#allocation45_spill] sm:$0xff] }
 0x3b3   : > { %4582 = vrot.lane.b32.xlu1 %v4401_v41, %s9098_s24  ;;  %v4194_v16 = vadd.f32 %v10281_v8, %v4057_v58  ;;  %v4319_v30 = vmax.f32 %v4191_v7, 0.0 }
 0x3b4   : > { %3824 = vrot.lane.b32.xlu0 %v8581_v61, %s9098_s24  ;;  %v8922_v61 = vld [vmem:[%s12656_s9] sm:$0xff]   ;;  %v4192_v21 = vadd.f32 %v10281_v8, %v4055_v25  ;;  %v4056_v25 = vadd.f32 %v9585_v45, %v10797_v59  ;;  %v4404_v9 = vpack.c.bf16 %v4318_v53, %v4317_v48 }
 0x3b5   : > { %v4533_v51 = vpop.permute.xlu0 %4532  ;;  %v4531_v17 = vpop.permute.xlu1 %4530  ;;  %8732 = vmatprep.subr.bf16.mxu0 %v8922_v61  ;;  %v4322_v49 = vmax.f32 %v4194_v16, 0.0 }
 0x3b6   : > { %8622 = vmatprep.mubr.msk.bf16.mxu1 %vm1759_vm3, %v4531_v17  ;;  %8733 = vmatpush3.bf16.msra.mxu0 %v8922_v61  ;;  %v13118_v61 = vld [vmem:[#allocation42_spill] sm:$0xff]  ;;  %v4193_v45 = vadd.f32 %v10281_v8, %v4056_v25  ;;  %v4060_v25 = vadd.f32 %v9614_v55, %v10830_v23  ;;  %v13122_v55 = vld [vmem:[#allocation51_spill] sm:$0xff] }
 0x3b7   : > { %8623 = vmatmul.mubr.msk.bf16.gmra.mxu1 %vm1759_vm3, %v4533_v51  ;;  %3826 = vrot.lane.b32.xlu1 %v3427_v60, %s9098_s24  ;;  %v3430_v60 = vpop.f32.mrf.mxu0  ;;  %v4320_v51 = vmax.f32 %v4192_v21, 0.0 }
 0x3b8   : > { %4584 = vrot.lane.b32.xlu0 %v4402_v19, %s9098_s24 }
 0x3b9   : > { %v10853_v41 = vpop.permute.xlu1 %3762  ;;  %v10855_v26 = vpop.permute.xlu0 %3768  ;;  %v4405_v58 = vpack.c.bf16 %v4320_v51, %v4319_v30 }
 0x3ba   : > { %13113 = vst [vmem:[#allocation77_spill] sm:$0xff] %v10853_v41  ;;  %13114 = vst [vmem:[#allocation74_spill] sm:$0xff] %v10855_v26  ;;  %v8588_v4 = vpop.f32.mrf.mxu0  ;;  %v4058_v62 = vadd.f32 %v10853_v41, %v13118_v61  ;;  %v4061_v53 = vadd.f32 %v9627_v32, %v10855_v26  ;;  %v9009_v26 = vld [vmem:[%s9207_s15 + $0x298] sm:$0xff] }
 0x3bb   : > { %4586 = vrot.lane.b32.xlu1 %v4403_v43, %s9098_s24 }
 0x3bc   : > { %3828 = vrot.lane.b32.xlu0 %v3430_v60, %s9098_s24  ;;  %v3443_v7 = vpop.f32.mrf.mxu0  ;;  %v4195_v48 = vadd.f32 %v10281_v8, %v4058_v62  ;;  %v4198_v32 = vadd.f32 %v10281_v8, %v4061_v53 }
 0x3bd   : > { %v10864_v17 = vpop.permute.xlu0 %3764  ;;  %v10866_v33 = vpop.permute.xlu1 %3774 }
 0x3be   : > { %13115 = vst [vmem:[#allocation85_spill] sm:$0xff] %v10864_v17  ;;  %13116 = vst [vmem:[#allocation82_spill] sm:$0xff] %v10866_v33  ;;  %v4059_v19 = vadd.f32 %v10864_v17, %v13117_v15  ;;  %v8589_v61 = vpop.f32.mrf.mxu0  ;;  %v4323_v62 = vmax.f32 %v4195_v48, 0.0 }
 0x3bf   : > { %3830 = vrot.lane.b32.xlu1 %v8584_v13, %s9098_s24  ;;  %v4321_v13 = vmax.f32 %v4193_v45, 0.0  ;;  %v4197_v45 = vadd.f32 %v10281_v8, %v4060_v25 }
 0x3c0   : > { %4588 = vrot.lane.b32.xlu0 %v4404_v9, %s9098_s24  ;;  %v4196_v21 = vadd.f32 %v10281_v8, %v4059_v19  ;;  %v13121_v19 = vld [vmem:[#allocation49_spill] sm:$0xff] }
 0x3c1   : > { %v4537_v43 = vpop.permute.xlu0 %4536  ;;  %v4535_v60 = vpop.permute.xlu1 %4534  ;;  %v4406_v30 = vpack.c.bf16 %v4322_v49, %v4321_v13  ;;  %v13125_v49 = vld [vmem:[#allocation54_spill] sm:$0xff] }
 0x3c2   : > { %8626 = vmatprep.mubr.msk.bf16.mxu1 %vm1759_vm3, %v4535_v60  ;;  %v4324_v51 = vmax.f32 %v4196_v21, 0.0  ;;  %v3446_v13 = vpop.f32.mrf.mxu0 }
 0x3c3   : > { %8627 = vmatmul.mubr.msk.bf16.gmra.mxu1 %vm1759_vm3, %v4537_v43  ;;  %4590 = vrot.lane.b32.xlu1 %v4405_v58, %s9098_s24  ;;  %v4326_v58 = vmax.f32 %v4198_v32, 0.0 }
 0x3c4   : > { %3832 = vrot.lane.b32.xlu0 %v8585_v36, %s9098_s24  ;;  %v4407_v60 = vpack.c.bf16 %v4324_v51, %v4323_v62 }
 0x3c5   : > { %v10886_v16 = vpop.permute.xlu1 %3770  ;;  %v10888_v15 = vpop.permute.xlu0 %3776 }
 0x3c6   : > { %13119 = vst [vmem:[#allocation83_spill] sm:$0xff] %v10886_v16  ;;  %13120 = vst [vmem:[#allocation80_spill] sm:$0xff] %v10888_v15  ;;  %v4062_v9 = vadd.f32 %v10886_v16, %v13121_v19  ;;  %v4065_v36 = vadd.f32 %v13122_v55, %v10888_v15  ;;  %v4325_v19 = vmax.f32 %v4197_v45, 0.0  ;;  %v13127_v15 = vld [vmem:[#allocation57_spill] sm:$0xff]  ;;  %v9006_v16 = vld [vmem:[%s9207_s15 + $0x290] sm:$0xff] }
 0x3c7   : > { %3834 = vrot.lane.b32.xlu1 %v3443_v7, %s9098_s24  ;;  %v13126_v7 = vld [vmem:[#allocation47_spill] sm:$0xff] }
 0x3c8   : > { %4592 = vrot.lane.b32.xlu0 %v4406_v30, %s9098_s24  ;;  %v4199_v53 = vadd.f32 %v10281_v8, %v4062_v9  ;;  %v4064_v25 = vadd.f32 %v13126_v7, %v10866_v33  ;;  %v4202_v55 = vadd.f32 %v10281_v8, %v4065_v36 }
 0x3c9   : > { %v10898_v21 = vpop.permute.xlu0 %3772  ;;  %v10900_v43 = vpop.permute.xlu1 %3782 }
 0x3ca   : > { %13123 = vst [vmem:[#allocation88_spill] sm:$0xff] %v10898_v21  ;;  %13124 = vst [vmem:[#allocation89_spill] sm:$0xff] %v10900_v43  ;;  %v4063_v48 = vadd.f32 %v10898_v21, %v13125_v49  ;;  %v4327_v62 = vmax.f32 %v4199_v53, 0.0  ;;  %v4068_v49 = vadd.f32 %v13127_v15, %v10900_v43  ;;  %v4408_v21 = vpack.c.bf16 %v4326_v58, %v4325_v19  ;;  %v13130_v15 = vld [vmem:[#allocation60_spill] sm:$0xff]  ;;  %v13131_v58 = vld [vmem:[#allocation63_spill] sm:$0xff] }
 0x3cb   : > { %4594 = vrot.lane.b32.xlu1 %v4407_v60, %s9098_s24  ;;  %v4201_v7 = vadd.f32 %v10281_v8, %v4064_v25  ;;  %v4330_v36 = vmax.f32 %v4202_v55, 0.0 }
 0x3cc   : > { %v4200_v30 = vadd.f32 %v10281_v8, %v4063_v48  ;;  %3836 = vrot.lane.b32.xlu0 %v3446_v13, %s9098_s24  ;;  %v4205_v48 = vadd.f32 %v10281_v8, %v4068_v49 }
 0x3cd   : > { %v4541_v51 = vpop.permute.xlu0 %4540  ;;  %v4539_v32 = vpop.permute.xlu1 %4538  ;;  %v4329_v19 = vmax.f32 %v4201_v7, 0.0 }
 0x3ce   : > { %v4328_v9 = vmax.f32 %v4200_v30, 0.0  ;;  %8630 = vmatprep.mubr.msk.bf16.mxu1 %vm1759_vm3, %v4539_v32 }
 0x3cf   : > { %8631 = vmatmul.mubr.msk.bf16.gmra.mxu1 %vm1759_vm3, %v4541_v51  ;;  %3838 = vrot.lane.b32.xlu1 %v8588_v4, %s9098_s24  ;;  %v4410_v55 = vpack.c.bf16 %v4330_v36, %v4329_v19  ;;  %v4333_v51 = vmax.f32 %v4205_v48, 0.0  ;;  %v13135_v36 = vld [vmem:[#allocation72_spill] sm:$0xff] }
 0x3d0   : > { %4596 = vrot.lane.b32.xlu0 %v4408_v21, %s9098_s24  ;;  %v4409_v45 = vpack.c.bf16 %v4328_v9, %v4327_v62  ;;  %v13133_v9 = vld [vmem:[#allocation66_spill] sm:$0xff] }
 0x3d1   : > { %v10918_v60 = vpop.permute.xlu1 %3778  ;;  %v10920_v53 = vpop.permute.xlu0 %3784 }
 0x3d2   : > { %13128 = vst [vmem:[#allocation86_spill] sm:$0xff] %v10918_v60  ;;  %13129 = vst [vmem:[#allocation12_spill] sm:$0xff] %v10920_v53  ;;  %v4066_v13 = vadd.f32 %v10918_v60, %v13130_v15  ;;  %v4069_v25 = vadd.f32 %v13131_v58, %v10920_v53  ;;  %v9001_v53 = vld [vmem:[%s9207_s15 + $0x258] sm:$0xff] }
 0x3d3   : > { %4598 = vrot.lane.b32.xlu1 %v4409_v45, %s9098_s24 }
 0x3d4   : > { %v4206_v4 = vadd.f32 %v10281_v8, %v4069_v25  ;;  %3840 = vrot.lane.b32.xlu0 %v8589_v61, %s9098_s24  ;;  %v4203_v32 = vadd.f32 %v10281_v8, %v4066_v13 }
 0x3d5   : > { %v4543_v21 = vpop.permute.xlu1 %4542  ;;  %v10930_v30 = vpop.permute.xlu0 %3780 }
 0x3d6   : > { %13132 = vst [vmem:[#allocation9_spill] sm:$0xff] %v10930_v30  ;;  %v4334_v62 = vmax.f32 %v4206_v4, 0.0  ;;  %v4067_v49 = vadd.f32 %v10930_v30, %v13133_v9  ;;  %8634 = vmatprep.mubr.msk.bf16.mxu1 %vm1759_vm3, %v4543_v21  ;;  %v4331_v58 = vmax.f32 %v4203_v32, 0.0 }
 0x3d8   : > { %v4204_v7 = vadd.f32 %v10281_v8, %v4067_v49  ;;  %4600 = vrot.lane.b32.xlu0 %v4410_v55, %s9098_s24  ;;  %v4412_v45 = vpack.c.bf16 %v4334_v62, %v4333_v51  ;;  %v13137_v55 = vld [vmem:[#allocation78_spill] sm:$0xff] }
 0x3d9   : > { %v4545_v15 = vpop.permute.xlu0 %4544  ;;  %v10938_v61 = vpop.permute.xlu1 %3786 }
 0x3da   : > { %13134 = vst [vmem:[#allocation19_spill] sm:$0xff] %v10938_v61  ;;  %v4332_v25 = vmax.f32 %v4204_v7, 0.0  ;;  %v4070_v48 = vadd.f32 %v10938_v61, %v13135_v36  ;;  %8635 = vmatmul.mubr.msk.bf16.gmra.mxu1 %vm1759_vm3, %v4545_v15  ;;  %v13177_v61 = vld [vmem:[#allocation102_spill] sm:$0xff] }
 0x3dc   : > { %4604 = vrot.lane.b32.xlu0 %v4412_v45, %s9098_s24  ;;  %v4411_v13 = vpack.c.bf16 %v4332_v25, %v4331_v58  ;;  %v4207_v21 = vadd.f32 %v10281_v8, %v4070_v48  ;;  %v13139_v45 = vld [vmem:[#allocation69_spill] sm:$0xff] }
 0x3dd   : > { %v4547_v19 = vpop.permute.xlu1 %4546  ;;  %v10944_v4 = vpop.permute.xlu0 %3788 }
 0x3de   : > { %13136 = vst [vmem:[#allocation27_spill] sm:$0xff] %v10944_v4  ;;  %v4071_v51 = vadd.f32 %v10944_v4, %v13137_v55  ;;  %8638 = vmatprep.mubr.msk.bf16.mxu1 %vm1759_vm3, %v4547_v19  ;;  %4602 = vrot.lane.b32.xlu1 %v4411_v13, %s9098_s24  ;;  %v4335_v9 = vmax.f32 %v4207_v21, 0.0  ;;  %v13141_v13 = vld [vmem:[#allocation75_spill] sm:$0xff] }
 0x3e0   : > { %v4208_v32 = vadd.f32 %v10281_v8, %v4071_v51 }
 0x3e1   : > { %v10952_v62 = vpop.permute.xlu1 %3790 }
 0x3e2   : > { %13138 = vst [vmem:[#allocation24_spill] sm:$0xff] %v10952_v62  ;;  %v4336_v49 = vmax.f32 %v4208_v32, 0.0  ;;  %v4549_v7 = vpop.permute.xlu0 %4548  ;;  %v4072_v15 = vadd.f32 %v13139_v45, %v10952_v62 }
 0x3e3   : > { %8639 = vmatmul.mubr.msk.bf16.gmra.mxu1 %vm1759_vm3, %v4549_v7 }
 0x3e4   : > { %v4413_v58 = vpack.c.bf16 %v4336_v49, %v4335_v9  ;;  %v4209_v48 = vadd.f32 %v10281_v8, %v4072_v15  ;;  %v13143_v9 = vld [vmem:[#allocation84_spill] sm:$0xff] }
 0x3e5   : > { %v4551_v25 = vpop.permute.xlu1 %4550 }
 0x3e6   : > { %v10957_v36 = vpop.permute.xlu0 %3792  ;;  %8642 = vmatprep.mubr.msk.bf16.mxu1 %vm1759_vm3, %v4551_v25  ;;  %4606 = vrot.lane.b32.xlu1 %v4413_v58, %s9098_s24  ;;  %v4337_v32 = vmax.f32 %v4209_v48, 0.0 }
 0x3e7   : > { %13140 = vst [vmem:[#allocation33_spill] sm:$0xff] %v10957_v36  ;;  %v4073_v19 = vadd.f32 %v13141_v13, %v10957_v36  ;;  %v13145_v13 = vld [vmem:[#allocation90_spill] sm:$0xff] }
 0x3e9   : > { %v4210_v21 = vadd.f32 %v10281_v8, %v4073_v19  ;;  %v10965_v55 = vpop.permute.xlu1 %3794 }
 0x3ea   : > { %13142 = vst [vmem:[#allocation30_spill] sm:$0xff] %v10965_v55  ;;  %v4553_v51 = vpop.permute.xlu0 %4552  ;;  %v4074_v49 = vadd.f32 %v10965_v55, %v13143_v9 }
 0x3eb   : > { %v4338_v7 = vmax.f32 %v4210_v21, 0.0  ;;  %8643 = vmatmul.mubr.msk.bf16.gmra.mxu1 %vm1759_vm3, %v4553_v51 }
 0x3ec   : > { %v4211_v15 = vadd.f32 %v10281_v8, %v4074_v49 }
 0x3ed   : > { %v4555_v45 = vpop.permute.xlu1 %4554  ;;  %v4414_v25 = vpack.c.bf16 %v4338_v7, %v4337_v32  ;;  %v13147_v32 = vld [vmem:[#allocation81_spill] sm:$0xff] }
 0x3ee   : > { %v10970_v58 = vpop.permute.xlu0 %3796  ;;  %8646 = vmatprep.mubr.msk.bf16.mxu1 %vm1759_vm3, %v4555_v45  ;;  %v4339_v55 = vmax.f32 %v4211_v15, 0.0 }
 0x3ef   : > { %13144 = vst [vmem:[#allocation39_spill] sm:$0xff] %v10970_v58  ;;  %v4075_v19 = vadd.f32 %v10970_v58, %v13145_v13  ;;  %4608 = vrot.lane.b32.xlu0 %v4414_v25, %s9098_s24  ;;  %v13149_v13 = vld [vmem:[#allocation87_spill] sm:$0xff] }
 0x3f1   : > { %v4212_v48 = vadd.f32 %v10281_v8, %v4075_v19  ;;  %v10978_v21 = vpop.permute.xlu1 %3798 }
 0x3f2   : > { %13146 = vst [vmem:[#allocation36_spill] sm:$0xff] %v10978_v21  ;;  %v4557_v9 = vpop.permute.xlu0 %4556  ;;  %v4076_v7 = vadd.f32 %v13147_v32, %v10978_v21  ;;  %v13151_v21 = vld [vmem:[#allocation91_spill] sm:$0xff] }
 0x3f3   : > { %v4340_v51 = vmax.f32 %v4212_v48, 0.0  ;;  %8647 = vmatmul.mubr.msk.bf16.gmra.mxu1 %vm1759_vm3, %v4557_v9 }
 0x3f4   : > { %v4213_v25 = vadd.f32 %v10281_v8, %v4076_v7 }
 0x3f5   : > { %v4559_v45 = vpop.permute.xlu1 %4558  ;;  %v4415_v4 = vpack.c.bf16 %v4340_v51, %v4339_v55 }
 0x3f6   : > { %v10983_v49 = vpop.permute.xlu0 %3800  ;;  %8650 = vmatprep.mubr.msk.bf16.mxu1 %vm1759_vm3, %v4559_v45  ;;  %v4341_v58 = vmax.f32 %v4213_v25, 0.0 }
 0x3f7   : > { %13148 = vst [vmem:[#allocation45_spill] sm:$0xff] %v10983_v49  ;;  %v4077_v19 = vadd.f32 %v13149_v13, %v10983_v49  ;;  %4610 = vrot.lane.b32.xlu1 %v4415_v4, %s9098_s24  ;;  %v13153_v13 = vld [vmem:[#allocation92_spill] sm:$0xff] }
 0x3f9   : > { %v4214_v15 = vadd.f32 %v10281_v8, %v4077_v19  ;;  %v10991_v48 = vpop.permute.xlu1 %3802 }
 0x3fa   : > { %13150 = vst [vmem:[#allocation42_spill] sm:$0xff] %v10991_v48  ;;  %v4561_v32 = vpop.permute.xlu0 %4560  ;;  %v4078_v55 = vadd.f32 %v10991_v48, %v13151_v21 }
 0x3fb   : > { %v4342_v9 = vmax.f32 %v4214_v15, 0.0  ;;  %8651 = vmatmul.mubr.msk.bf16.gmra.mxu1 %vm1759_vm3, %v4561_v32 }
 0x3fc   : > { %v4215_v4 = vadd.f32 %v10281_v8, %v4078_v55 }
 0x3fd   : > { %v4563_v51 = vpop.permute.xlu1 %4562  ;;  %v4416_v45 = vpack.c.bf16 %v4342_v9, %v4341_v58 }
 0x3fe   : > { %v10996_v7 = vpop.permute.xlu0 %3804  ;;  %8654 = vmatprep.mubr.msk.bf16.mxu1 %vm1759_vm3, %v4563_v51  ;;  %v4343_v48 = vmax.f32 %v4215_v4, 0.0 }
 0x3ff   : > { %13152 = vst [vmem:[#allocation49_spill] sm:$0xff] %v10996_v7  ;;  %v4079_v19 = vadd.f32 %v10996_v7, %v13153_v13  ;;  %4612 = vrot.lane.b32.xlu0 %v4416_v45, %s9098_s24 }
 0x401   : > { %v4216_v25 = vadd.f32 %v10281_v8, %v4079_v19  ;;  %v11004_v15 = vpop.permute.xlu1 %3806 }
 0x402   : > { %13154 = vst [vmem:[#allocation51_spill] sm:$0xff] %v11004_v15  ;;  %v4565_v21 = vpop.permute.xlu0 %4564  ;;  %v4080_v58 = vadd.f32 %v9809_v20, %v11004_v15 }
 0x403   : > { %v4344_v32 = vmax.f32 %v4216_v25, 0.0  ;;  %8655 = vmatmul.mubr.msk.bf16.gmra.mxu1 %vm1759_vm3, %v4565_v21 }
 0x404   : > { %v4217_v45 = vadd.f32 %v10281_v8, %v4080_v58 }
 0x405   : > { %v4567_v9 = vpop.permute.xlu1 %4566  ;;  %v4417_v51 = vpack.c.bf16 %v4344_v32, %v4343_v48 }
 0x406   : > { %v11009_v55 = vpop.permute.xlu0 %3808  ;;  %8658 = vmatprep.mubr.msk.bf16.mxu1 %vm1759_vm3, %v4567_v9  ;;  %v4345_v25 = vmax.f32 %v4217_v45, 0.0 }
 0x407   : > { %13155 = vst [vmem:[#allocation54_spill] sm:$0xff] %v11009_v55  ;;  %v4081_v13 = vadd.f32 %v9824_v6, %v11009_v55  ;;  %4614 = vrot.lane.b32.xlu1 %v4417_v51, %s9098_s24 }
 0x409   : > { %v4218_v4 = vadd.f32 %v10281_v8, %v4081_v13  ;;  %v11017_v19 = vpop.permute.xlu1 %3810 }
 0x40a   : > { %13156 = vst [vmem:[#allocation47_spill] sm:$0xff] %v11017_v19  ;;  %v4569_v20 = vpop.permute.xlu0 %4568  ;;  %v4082_v48 = vadd.f32 %v11017_v19, %v9844_v39 }
 0x40b   : > { %v4346_v21 = vmax.f32 %v4218_v4, 0.0  ;;  %8659 = vmatmul.mubr.msk.bf16.gmra.mxu1 %vm1759_vm3, %v4569_v20 }
 0x40c   : > { %v4219_v6 = vadd.f32 %v10281_v8, %v4082_v48 }
 0x40d   : > { %v4571_v32 = vpop.permute.xlu1 %4570  ;;  %v4418_v9 = vpack.c.bf16 %v4346_v21, %v4345_v25 }
 0x40e   : > { %v11022_v58 = vpop.permute.xlu0 %3812  ;;  %8662 = vmatprep.mubr.msk.bf16.mxu1 %vm1759_vm3, %v4571_v32  ;;  %v4347_v4 = vmax.f32 %v4219_v6, 0.0 }
 0x40f   : > { %13157 = vst [vmem:[#allocation57_spill] sm:$0xff] %v11022_v58  ;;  %v4083_v51 = vadd.f32 %v11022_v58, %v9858_v38  ;;  %4616 = vrot.lane.b32.xlu0 %v4418_v9, %s9098_s24  ;;  %v13161_v58 = vld [vmem:[#allocation94_spill] sm:$0xff] }
 0x411   : > { %v4220_v45 = vadd.f32 %v10281_v8, %v4083_v51  ;;  %v11030_v13 = vpop.permute.xlu1 %3814 }
 0x412   : > { %13158 = vst [vmem:[#allocation60_spill] sm:$0xff] %v11030_v13  ;;  %v4573_v39 = vpop.permute.xlu0 %4572  ;;  %v4084_v25 = vadd.f32 %v9838_v22, %v11030_v13 }
 0x413   : > { %v4348_v20 = vmax.f32 %v4220_v45, 0.0  ;;  %8663 = vmatmul.mubr.msk.bf16.gmra.mxu1 %vm1759_vm3, %v4573_v39 }
 0x414   : > { %v4221_v38 = vadd.f32 %v10281_v8, %v4084_v25 }
 0x415   : > { %v4575_v21 = vpop.permute.xlu1 %4574  ;;  %v4419_v32 = vpack.c.bf16 %v4348_v20, %v4347_v4 }
 0x416   : > { %v11035_v48 = vpop.permute.xlu0 %3816  ;;  %8666 = vmatprep.mubr.msk.bf16.mxu1 %vm1759_vm3, %v4575_v21  ;;  %v4349_v45 = vmax.f32 %v4221_v38, 0.0 }
 0x417   : > { %13159 = vst [vmem:[#allocation63_spill] sm:$0xff] %v11035_v48  ;;  %v4085_v9 = vadd.f32 %v9852_v12, %v11035_v48  ;;  %4618 = vrot.lane.b32.xlu1 %v4419_v32, %s9098_s24  ;;  %v13163_v32 = vld [vmem:[#allocation96_spill] sm:$0xff] }
 0x419   : > { %v4222_v6 = vadd.f32 %v10281_v8, %v4085_v9  ;;  %v11043_v51 = vpop.permute.xlu1 %3818 }
 0x41a   : > { %13160 = vst [vmem:[#allocation66_spill] sm:$0xff] %v11043_v51  ;;  %v4577_v22 = vpop.permute.xlu0 %4576  ;;  %v4086_v4 = vadd.f32 %v11043_v51, %v13161_v58 }
 0x41b   : > { %v4350_v39 = vmax.f32 %v4222_v6, 0.0  ;;  %8667 = vmatmul.mubr.msk.bf16.gmra.mxu1 %vm1759_vm3, %v4577_v22 }
 0x41c   : > { %v4223_v12 = vadd.f32 %v10281_v8, %v4086_v4 }
 0x41d   : > { %v4579_v20 = vpop.permute.xlu1 %4578  ;;  %v4420_v21 = vpack.c.bf16 %v4350_v39, %v4349_v45  ;;  %v13165_v45 = vld [vmem:[#allocation93_spill] sm:$0xff] }
 0x41e   : > { %v11048_v25 = vpop.permute.xlu0 %3820  ;;  %8670 = vmatprep.mubr.msk.bf16.mxu1 %vm1759_vm3, %v4579_v20  ;;  %v4351_v51 = vmax.f32 %v4223_v12, 0.0 }
 0x41f   : > { %13162 = vst [vmem:[#allocation72_spill] sm:$0xff] %v11048_v25  ;;  %v4087_v9 = vadd.f32 %v11048_v25, %v13163_v32  ;;  %4620 = vrot.lane.b32.xlu0 %v4420_v21, %s9098_s24  ;;  %v13167_v32 = vld [vmem:[#allocation95_spill] sm:$0xff] }
 0x421   : > { %v4224_v38 = vadd.f32 %v10281_v8, %v4087_v9  ;;  %v11056_v6 = vpop.permute.xlu1 %3822 }
 0x422   : > { %13164 = vst [vmem:[#allocation78_spill] sm:$0xff] %v11056_v6  ;;  %v4581_v58 = vpop.permute.xlu0 %4580  ;;  %v4088_v39 = vadd.f32 %v13165_v45, %v11056_v6  ;;  %v13169_v6 = vld [vmem:[#allocation98_spill] sm:$0xff] }
 0x423   : > { %v4352_v22 = vmax.f32 %v4224_v38, 0.0  ;;  %8671 = vmatmul.mubr.msk.bf16.gmra.mxu1 %vm1759_vm3, %v4581_v58 }
 0x424   : > { %v4225_v21 = vadd.f32 %v10281_v8, %v4088_v39 }
 0x425   : > { %v4583_v20 = vpop.permute.xlu1 %4582  ;;  %v4421_v48 = vpack.c.bf16 %v4352_v22, %v4351_v51 }
 0x426   : > { %v11061_v4 = vpop.permute.xlu0 %3824  ;;  %8674 = vmatprep.mubr.msk.bf16.mxu1 %vm1759_vm3, %v4583_v20  ;;  %v4353_v25 = vmax.f32 %v4225_v21, 0.0 }
 0x427   : > { %13166 = vst [vmem:[#allocation69_spill] sm:$0xff] %v11061_v4  ;;  %v4089_v9 = vadd.f32 %v13167_v32, %v11061_v4  ;;  %4622 = vrot.lane.b32.xlu1 %v4421_v48, %s9098_s24  ;;  %v13171_v32 = vld [vmem:[#allocation100_spill] sm:$0xff] }
 0x429   : > { %v4226_v12 = vadd.f32 %v10281_v8, %v4089_v9  ;;  %v11069_v38 = vpop.permute.xlu1 %3826 }
 0x42a   : > { %13168 = vst [vmem:[#allocation75_spill] sm:$0xff] %v11069_v38  ;;  %v4585_v45 = vpop.permute.xlu0 %4584  ;;  %v4090_v51 = vadd.f32 %v11069_v38, %v13169_v6 }
 0x42b   : > { %v4354_v58 = vmax.f32 %v4226_v12, 0.0  ;;  %8675 = vmatmul.mubr.msk.bf16.gmra.mxu1 %vm1759_vm3, %v4585_v45 }
 0x42c   : > { %v4227_v48 = vadd.f32 %v10281_v8, %v4090_v51  ;;  %v13173_v51 = vld [vmem:[#allocation97_spill] sm:$0xff] }
 0x42d   : > { %v4587_v22 = vpop.permute.xlu1 %4586  ;;  %v4422_v20 = vpack.c.bf16 %v4354_v58, %v4353_v25  ;;  %v11087_v25 = vld [vmem:[%s12655_s8] ss:$0 sm:$0xff] }
 0x42e   : > { %v11074_v39 = vpop.permute.xlu0 %3828  ;;  %8678 = vmatprep.mubr.msk.bf16.mxu1 %vm1759_vm3, %v4587_v22  ;;  %v4355_v58 = vmax.f32 %v4227_v48, 0.0 }
 0x42f   : > { %13170 = vst [vmem:[#allocation84_spill] sm:$0xff] %v11074_v39  ;;  %v4091_v9 = vadd.f32 %v11074_v39, %v13171_v32  ;;  %4624 = vrot.lane.b32.xlu0 %v4422_v20, %s9098_s24  ;;  %v8600_v21 = vpop.f32.mrf.mxu1 }
 0x430   : > { %v4893_v39 = vadd.f32 %v8600_v21, %v11087_v25 }
 0x431   : > { %v4228_v12 = vadd.f32 %v10281_v8, %v4091_v9  ;;  %v4884_v4 = vpop.f32.mrf.mxu1  ;;  %v11082_v6 = vpop.permute.xlu1 %3830 }
 0x432   : > { %13172 = vst [vmem:[#allocation90_spill] sm:$0xff] %v11082_v6  ;;  %v4589_v45 = vpop.permute.xlu0 %4588  ;;  %v4092_v38 = vadd.f32 %v13173_v51, %v11082_v6  ;;  %v4885_v32 = vadd.f32 %v11087_v25, %v4884_v4  ;;  %v5397_v21 = vmax.f32 %v4893_v39, 0.0 }
 0x433   : > { %v4356_v22 = vmax.f32 %v4228_v12, 0.0  ;;  %8679 = vmatmul.mubr.msk.bf16.gmra.mxu1 %vm1759_vm3, %v4589_v45  ;;  %v8601_v20 = vpop.f32.mrf.mxu1  ;;  %v13175_v45 = vld [vmem:[#allocation99_spill] sm:$0xff] }
 0x434   : > { %v4896_v9 = vadd.f32 %v8601_v20, %v11087_v25  ;;  %v4229_v48 = vadd.f32 %v10281_v8, %v4092_v38  ;;  %v5395_v4 = vmax.f32 %v4885_v32, 0.0 }
 0x435   : > { %v4887_v19 = vpop.f32.mrf.mxu1  ;;  %v4591_v13 = vpop.permute.xlu1 %4590  ;;  %v4423_v7 = vpack.c.bf16 %v4356_v22, %v4355_v58 }
 0x436   : > { %v4888_v55 = vadd.f32 %v11087_v25, %v4887_v19  ;;  %v11096_v15 = vpop.permute.xlu0 %3832  ;;  %8682 = vmatprep.mubr.msk.bf16.mxu1 %vm1759_vm3, %v4591_v13  ;;  %v5398_v12 = vmax.f32 %v4896_v9, 0.0  ;;  %v4357_v49 = vmax.f32 %v4229_v48, 0.0 }
 0x437   : > { %13174 = vst [vmem:[#allocation81_spill] sm:$0xff] %v11096_v15  ;;  %v4093_v51 = vadd.f32 %v13175_v45, %v11096_v15  ;;  %4626 = vrot.lane.b32.xlu1 %v4423_v7, %s9098_s24 }
 0x438   : > { %v5396_v20 = vmax.f32 %v4888_v55, 0.0  ;;  %v5524_v36 = vpack.c.bf16 %v5398_v12, %v5397_v21 }
 0x439   : > { %v4230_v6 = vadd.f32 %v10281_v8, %v4093_v51  ;;  %v11104_v58 = vpop.permute.xlu1 %3834 }
 0x43a   : > { %13176 = vst [vmem:[#allocation87_spill] sm:$0xff] %v11104_v58  ;;  %v5523_v19 = vpack.c.bf16 %v5396_v20, %v5395_v4  ;;  %v4593_v22 = vpop.permute.xlu0 %4592  ;;  %v4094_v38 = vadd.f32 %v11104_v58, %v13177_v61 }
 0x43b   : > { %v4358_v13 = vmax.f32 %v4230_v6, 0.0  ;;  %8683 = vmatmul.mubr.msk.bf16.gmra.mxu1 %vm1759_vm3, %v4593_v22  ;;  %v8604_v9 = vpop.f32.mrf.mxu1  ;;  %v13179_v6 = vld [vmem:[#allocation104_spill] sm:$0xff] }
 0x43c   : > { %8734 = vmatprep.mubr.msk.bf16.mxu0 %vm1759_vm3, %v5523_v19  ;;  %v4231_v48 = vadd.f32 %v10281_v8, %v4094_v38 }
 0x43d   : > { %v4900_v7 = vpop.f32.mrf.mxu1  ;;  %8735 = vmatmul.mubr.msk.bf16.vlgmr.msra.gmra.mxu0 %vm1759_vm3, %v5524_v36  ;;  %v4595_v55 = vpop.permute.xlu1 %4594  ;;  %v4424_v39 = vpack.c.bf16 %v4358_v13, %v4357_v49  ;;  %v4909_v36 = vadd.f32 %v8604_v9, %v11087_v25 }
 0x43e   : > { %v11111_v32 = vpop.permute.xlu0 %3836  ;;  %8686 = vmatprep.mubr.msk.bf16.mxu1 %vm1759_vm3, %v4595_v55  ;;  %v4901_v45 = vadd.f32 %v11087_v25, %v4900_v7  ;;  %v4359_v22 = vmax.f32 %v4231_v48, 0.0  ;;  %v13181_v55 = vld [vmem:[#allocation101_spill] sm:$0xff] }
 0x43f   : > { %13178 = vst [vmem:[#allocation91_spill] sm:$0xff] %v11111_v32  ;;  %v4095_v12 = vadd.f32 %v11111_v32, %v13179_v6  ;;  %4628 = vrot.lane.b32.xlu0 %v4424_v39, %s9098_s24  ;;  %v8605_v61 = vpop.f32.mrf.mxu1 }
 0x440   : > { %v4912_v51 = vadd.f32 %v8605_v61, %v11087_v25  ;;  %v5399_v7 = vmax.f32 %v4901_v45, 0.0  ;;  %v5401_v61 = vmax.f32 %v4909_v36, 0.0 }
 0x441   : > { %v4232_v49 = vadd.f32 %v10281_v8, %v4095_v12  ;;  %v4903_v4 = vpop.f32.mrf.mxu1  ;;  %v11122_v20 = vpop.permute.xlu1 %3838 }
 0x442   : > { %13180 = vst [vmem:[#allocation92_spill] sm:$0xff] %v11122_v20  ;;  %v4904_v21 = vadd.f32 %v11087_v25, %v4903_v4  ;;  %v4597_v19 = vpop.permute.xlu0 %4596  ;;  %v5402_v38 = vmax.f32 %v4912_v51, 0.0  ;;  %v4096_v39 = vadd.f32 %v13181_v55, %v11122_v20  ;;  %v13183_v51 = vld [vmem:[#allocation103_spill] sm:$0xff]  ;;  %v8925_v55 = vld [vmem:[%s9207_s15] sm:$0xff] }
 0x443   : > { %v4360_v13 = vmax.f32 %v4232_v49, 0.0  ;;  %8687 = vmatmul.mubr.msk.bf16.gmra.mxu1 %vm1759_vm3, %v4597_v19 }
 0x444   : > { %v5400_v6 = vmax.f32 %v4904_v21, 0.0  ;;  %v5526_v4 = vpack.c.bf16 %v5402_v38, %v5401_v61  ;;  %v4233_v48 = vadd.f32 %v10281_v8, %v4096_v39 }
 0x445   : > { %v4599_v9 = vpop.permute.xlu1 %4598  ;;  %v4425_v32 = vpack.c.bf16 %v4360_v13, %v4359_v22 }
 0x446   : > { %v5525_v12 = vpack.c.bf16 %v5400_v6, %v5399_v7  ;;  %v11128_v58 = vpop.permute.xlu0 %3840  ;;  %8690 = vmatprep.mubr.msk.bf16.mxu1 %vm1759_vm3, %v4599_v9  ;;  %v4361_v22 = vmax.f32 %v4233_v48, 0.0 }
 0x447   : > { %13182 = vst [vmem:[#allocation94_spill] sm:$0xff] %v11128_v58  ;;  %v4097_v49 = vadd.f32 %v13183_v51, %v11128_v58  ;;  %4630 = vrot.lane.b32.xlu1 %v4425_v32, %s9098_s24  ;;  %v8608_v19 = vpop.f32.mrf.mxu1 }
 0x448   : > { %8738 = vmatprep.mubr.msk.bf16.mxu0 %vm1759_vm3, %v5525_v12  ;;  %v8926_v12 = vld [vmem:[%s9207_s15 + $0x10] sm:$0xff] }
 0x449   : > { %v4234_v45 = vadd.f32 %v10281_v8, %v4097_v49  ;;  %v4916_v36 = vpop.f32.mrf.mxu1  ;;  %8739 = vmatmul.mubr.msk.bf16.gmra.mxu0 %vm1759_vm3, %v5526_v4  ;;  %v4925_v8 = vadd.f32 %v8608_v19, %v11087_v25 }
 0x44a   : > { %v4601_v21 = vpop.permute.xlu0 %4600  ;;  %v4917_v32 = vadd.f32 %v11087_v25, %v4916_v36 }
 0x44b   : > { %v4362_v13 = vmax.f32 %v4234_v45, 0.0  ;;  %8691 = vmatmul.mubr.msk.bf16.gmra.mxu1 %vm1759_vm3, %v4601_v21  ;;  %v8609_v38 = vpop.f32.mrf.mxu1  ;;  %6748 = vrot.lane.b32.xlu1 %v8925_v55, %s9099_s17  ;;  %v5405_v49 = vmax.f32 %v4925_v8, 0.0 }
 0x44c   : > { %v4928_v39 = vadd.f32 %v8609_v38, %v11087_v25  ;;  %v5403_v4 = vmax.f32 %v4917_v32, 0.0  ;;  %v8929_v32 = vld [vmem:[%s9207_s15 + $0x18] sm:$0xff] }
 0x44d   : > { %v4919_v7 = vpop.f32.mrf.mxu1  ;;  %v4426_v6 = vpack.c.bf16 %v4362_v13, %v4361_v22  ;;  %v8927_v22 = vld [vmem:[%s9207_s15 + $0x8] sm:$0xff]  ;;  %v8928_v13 = vld [vmem:[%s9207_s15 + $0x20] sm:$0xff] }
 0x44e   : > { %v4920_v61 = vadd.f32 %v11087_v25, %v4919_v7  ;;  %v5406_v9 = vmax.f32 %v4928_v39, 0.0  ;;  %v4605_v45 = vpop.permute.xlu0 %4604 }
 0x44f   : > { %4632 = vrot.lane.b32.xlu0 %v4426_v6, %s9098_s24  ;;  %6752 = vrot.lane.b32.xlu1 %v8926_v12, %s9099_s17  ;;  %v8930_v6 = vld [vmem:[%s9207_s15 + $0x30] sm:$0xff] }
 0x450   : > { %v5404_v48 = vmax.f32 %v4920_v61, 0.0  ;;  %v4603_v51 = vpop.permute.xlu1 %4602  ;;  %v5528_v36 = vpack.c.bf16 %v5406_v9, %v5405_v49 }
 0x451   : > { %8694 = vmatprep.mubr.msk.bf16.mxu1 %vm1759_vm3, %v4603_v51 }
 0x452   : > { %v5527_v19 = vpack.c.bf16 %v5404_v48, %v5403_v4  ;;  %v8931_v48 = vld [vmem:[%s9207_s15 + $0x28] sm:$0xff] }
 0x453   : > { %8695 = vmatmul.mubr.msk.bf16.gmra.mxu1 %vm1759_vm3, %v4605_v45  ;;  %v8612_v21 = vpop.f32.mrf.mxu1  ;;  %6750 = vrot.lane.b32.xlu0 %v8927_v22, %s9099_s17 }
 0x454   : > { %8742 = vmatprep.mubr.msk.bf16.mxu0 %vm1759_vm3, %v5527_v19  ;;  %6756 = vrot.lane.b32.xlu1 %v8928_v13, %s9099_s17  ;;  %v4941_v61 = vadd.f32 %v8612_v21, %v11087_v25  ;;  %v8932_v19 = vld [vmem:[%s9207_s15 + $0x40] sm:$0xff]  ;;  %v8933_v13 = vld [vmem:[%s9207_s15 + $0x38] sm:$0xff] }
 0x455   : > { %v4932_v38 = vpop.f32.mrf.mxu1  ;;  %8743 = vmatmul.mubr.msk.bf16.gmra.mxu0 %vm1759_vm3, %v5528_v36 }
 0x456   : > { %v4933_v39 = vadd.f32 %v11087_v25, %v4932_v38  ;;  %v5409_v45 = vmax.f32 %v4941_v61, 0.0  ;;  %v8934_v38 = vld [vmem:[%s9207_s15 + $0x50] sm:$0xff]  ;;  %v8936_v61 = vld [vmem:[%s9207_s15 + $0x60] sm:$0xff] }
 0x457   : > { %v8613_v55 = vpop.f32.mrf.mxu1  ;;  %6754 = vrot.lane.b32.xlu0 %v8929_v32, %s9099_s17 }
 0x458   : > { %v4944_v8 = vadd.f32 %v8613_v55, %v11087_v25  ;;  %v4607_v7 = vpop.permute.xlu1 %4606  ;;  %6760 = vrot.lane.b32.xlu1 %v8930_v6, %s9099_s17  ;;  %v5407_v51 = vmax.f32 %v4933_v39, 0.0 }
 0x459   : > { %v4935_v9 = vpop.f32.mrf.mxu1  ;;  %8698 = vmatprep.mubr.msk.bf16.mxu1 %vm1759_vm3, %v4607_v7 }
 0x45a   : > { %v4936_v12 = vadd.f32 %v11087_v25, %v4935_v9  ;;  %v5410_v4 = vmax.f32 %v4944_v8, 0.0  ;;  %v8935_v8 = vld [vmem:[%s9207_s15 + $0x48] sm:$0xff] }
 0x45b   : > { %6758 = vrot.lane.b32.xlu0 %v8931_v48, %s9099_s17 }
 0x45c   : > { %v5408_v49 = vmax.f32 %v4936_v12, 0.0  ;;  %6764 = vrot.lane.b32.xlu1 %v8932_v19, %s9099_s17  ;;  %v5530_v22 = vpack.c.bf16 %v5410_v4, %v5409_v45  ;;  %v8938_v45 = vld [vmem:[%s9207_s15 + $0x70] sm:$0xff] }
 0x45e   : > { %v5529_v36 = vpack.c.bf16 %v5408_v49, %v5407_v51  ;;  %v8937_v51 = vld [vmem:[%s9207_s15 + $0x58] sm:$0xff] }
 0x45f   : > { %v8616_v21 = vpop.f32.mrf.mxu1  ;;  %6762 = vrot.lane.b32.xlu0 %v8933_v13, %s9099_s17 }
 0x460   : > { %8746 = vmatprep.mubr.msk.bf16.mxu0 %vm1759_vm3, %v5529_v36  ;;  %6768 = vrot.lane.b32.xlu1 %v8934_v38, %s9099_s17  ;;  %v4957_v9 = vadd.f32 %v8616_v21, %v11087_v25 }
 0x461   : > { %v4609_v55 = vpop.permute.xlu0 %4608  ;;  %v4948_v32 = vpop.f32.mrf.mxu1  ;;  %8747 = vmatmul.mubr.msk.bf16.gmra.mxu0 %vm1759_vm3, %v5530_v22 }
 0x462   : > { %8699 = vmatmul.mubr.msk.bf16.gmra.mxu1 %vm1759_vm3, %v4609_v55  ;;  %v4949_v7 = vadd.f32 %v11087_v25, %v4948_v32  ;;  %v5413_v36 = vmax.f32 %v4957_v9, 0.0  ;;  %v8939_v55 = vld [vmem:[%s9207_s15 + $0x68] sm:$0xff]  ;;  %v8940_v32 = vld [vmem:[%s9207_s15 + $0x80] sm:$0xff]  ;;  %v8942_v9 = vld [vmem:[%s9207_s15 + $0x90] sm:$0xff] }
 0x463   : > { %v8617_v39 = vpop.f32.mrf.mxu1  ;;  %6766 = vrot.lane.b32.xlu0 %v8935_v8, %s9099_s17 }
 0x464   : > { %v4960_v6 = vadd.f32 %v8617_v39, %v11087_v25  ;;  %6772 = vrot.lane.b32.xlu1 %v8936_v61, %s9099_s17  ;;  %v5411_v49 = vmax.f32 %v4949_v7, 0.0  ;;  %v8941_v7 = vld [vmem:[%s9207_s15 + $0x78] sm:$0xff] }
 0x465   : > { %v4951_v12 = vpop.f32.mrf.mxu1 }
 0x466   : > { %v4952_v4 = vadd.f32 %v11087_v25, %v4951_v12  ;;  %v5414_v48 = vmax.f32 %v4960_v6, 0.0 }
 0x467   : > { %6770 = vrot.lane.b32.xlu0 %v8937_v51, %s9099_s17 }
 0x468   : > { %v5412_v19 = vmax.f32 %v4952_v4, 0.0  ;;  %6776 = vrot.lane.b32.xlu1 %v8938_v45, %s9099_s17  ;;  %v5532_v21 = vpack.c.bf16 %v5414_v48, %v5413_v36 }
 0x469   : > { %v4611_v22 = vpop.permute.xlu1 %4610 }
 0x46a   : > { %v5531_v13 = vpack.c.bf16 %v5412_v19, %v5411_v49  ;;  %8702 = vmatprep.mubr.msk.bf16.mxu1 %vm1759_vm3, %v4611_v22  ;;  %v8943_v19 = vld [vmem:[%s9207_s15 + $0x88] sm:$0xff]  ;;  %v8944_v22 = vld [vmem:[%s9207_s15 + $0xa0] sm:$0xff] }
 0x46b   : > { %v8620_v38 = vpop.f32.mrf.mxu1  ;;  %6774 = vrot.lane.b32.xlu0 %v8939_v55, %s9099_s17 }
 0x46c   : > { %8750 = vmatprep.mubr.msk.bf16.mxu0 %vm1759_vm3, %v5531_v13  ;;  %6780 = vrot.lane.b32.xlu1 %v8940_v32, %s9099_s17  ;;  %v4973_v12 = vadd.f32 %v8620_v38, %v11087_v25  ;;  %v8945_v32 = vld [vmem:[%s9207_s15 + $0x98] sm:$0xff] }
 0x46d   : > { %v4964_v39 = vpop.f32.mrf.mxu1  ;;  %8751 = vmatmul.mubr.msk.bf16.gmra.mxu0 %vm1759_vm3, %v5532_v21 }
 0x46e   : > { %v4965_v6 = vadd.f32 %v11087_v25, %v4964_v39  ;;  %v5417_v13 = vmax.f32 %v4973_v12, 0.0  ;;  %v8946_v39 = vld [vmem:[%s9207_s15 + $0xb0] sm:$0xff] }
 0x46f   : > { %v8621_v8 = vpop.f32.mrf.mxu1  ;;  %6778 = vrot.lane.b32.xlu0 %v8941_v7, %s9099_s17 }
 0x470   : > { %v4976_v61 = vadd.f32 %v8621_v8, %v11087_v25  ;;  %6784 = vrot.lane.b32.xlu1 %v8942_v9, %s9099_s17  ;;  %v5415_v45 = vmax.f32 %v4965_v6, 0.0 }
 0x471   : > { %v4613_v4 = vpop.permute.xlu0 %4612  ;;  %v4967_v48 = vpop.f32.mrf.mxu1 }
 0x472   : > { %v4968_v51 = vadd.f32 %v11087_v25, %v4967_v48  ;;  %8703 = vmatmul.mubr.msk.bf16.gmra.mxu1 %vm1759_vm3, %v4613_v4  ;;  %v5418_v49 = vmax.f32 %v4976_v61, 0.0  ;;  %v8947_v61 = vld [vmem:[%s9207_s15 + $0xa8] sm:$0xff]  ;;  %v8948_v4 = vld [vmem:[%s9207_s15 + $0xc0] sm:$0xff] }
 0x473   : > { %6782 = vrot.lane.b32.xlu0 %v8943_v19, %s9099_s17 }
 0x474   : > { %v5416_v36 = vmax.f32 %v4968_v51, 0.0  ;;  %6788 = vrot.lane.b32.xlu1 %v8944_v22, %s9099_s17  ;;  %v5534_v38 = vpack.c.bf16 %v5418_v49, %v5417_v13  ;;  %v8950_v13 = vld [vmem:[%s9207_s15 + $0xd0] sm:$0xff] }
 0x476   : > { %v5533_v21 = vpack.c.bf16 %v5416_v36, %v5415_v45  ;;  %v8949_v45 = vld [vmem:[%s9207_s15 + $0xb8] sm:$0xff] }
 0x477   : > { %v8624_v55 = vpop.f32.mrf.mxu1  ;;  %6786 = vrot.lane.b32.xlu0 %v8945_v32, %s9099_s17 }
 0x478   : > { %8754 = vmatprep.mubr.msk.bf16.mxu0 %vm1759_vm3, %v5533_v21  ;;  %6792 = vrot.lane.b32.xlu1 %v8946_v39, %s9099_s17  ;;  %v4989_v48 = vadd.f32 %v8624_v55, %v11087_v25 }
 0x479   : > { %v4615_v8 = vpop.permute.xlu1 %4614  ;;  %v4980_v7 = vpop.f32.mrf.mxu1  ;;  %8755 = vmatmul.mubr.msk.bf16.gmra.mxu0 %vm1759_vm3, %v5534_v38 }
 0x47a   : > { %8706 = vmatprep.mubr.msk.bf16.mxu1 %vm1759_vm3, %v4615_v8  ;;  %v4981_v9 = vadd.f32 %v11087_v25, %v4980_v7  ;;  %v5421_v21 = vmax.f32 %v4989_v48, 0.0  ;;  %v8951_v8 = vld [vmem:[%s9207_s15 + $0xc8] sm:$0xff]  ;;  %v8952_v7 = vld [vmem:[%s9207_s15 + $0xe0] sm:$0xff]  ;;  %v8954_v48 = vld [vmem:[%s9207_s15 + $0xf0] sm:$0xff] }
 0x47b   : > { %v8625_v6 = vpop.f32.mrf.mxu1  ;;  %6790 = vrot.lane.b32.xlu0 %v8947_v61, %s9099_s17 }
 0x47c   : > { %v4992_v12 = vadd.f32 %v8625_v6, %v11087_v25  ;;  %6796 = vrot.lane.b32.xlu1 %v8948_v4, %s9099_s17  ;;  %v5419_v36 = vmax.f32 %v4981_v9, 0.0  ;;  %v8953_v9 = vld [vmem:[%s9207_s15 + $0xd8] sm:$0xff] }
 0x47d   : > { %v4983_v51 = vpop.f32.mrf.mxu1 }
 0x47e   : > { %v4984_v49 = vadd.f32 %v11087_v25, %v4983_v51  ;;  %v5422_v19 = vmax.f32 %v4992_v12, 0.0 }
 0x47f   : > { %6794 = vrot.lane.b32.xlu0 %v8949_v45, %s9099_s17 }
 0x480   : > { %v5420_v22 = vmax.f32 %v4984_v49, 0.0  ;;  %6800 = vrot.lane.b32.xlu1 %v8950_v13, %s9099_s17  ;;  %v5536_v55 = vpack.c.bf16 %v5422_v19, %v5421_v21 }
 0x481   : > { %v4617_v38 = vpop.permute.xlu0 %4616 }
 0x482   : > { %v5535_v32 = vpack.c.bf16 %v5420_v22, %v5419_v36  ;;  %8707 = vmatmul.mubr.msk.bf16.gmra.mxu1 %vm1759_vm3, %v4617_v38  ;;  %v8955_v22 = vld [vmem:[%s9207_s15 + $0xe8] sm:$0xff]  ;;  %v8956_v38 = vld [vmem:[%s9207_s15 + $0x100] sm:$0xff] }
 0x483   : > { %v8628_v39 = vpop.f32.mrf.mxu1  ;;  %6798 = vrot.lane.b32.xlu0 %v8951_v8, %s9099_s17 }
 0x484   : > { %8758 = vmatprep.mubr.msk.bf16.mxu0 %vm1759_vm3, %v5535_v32  ;;  %6804 = vrot.lane.b32.xlu1 %v8952_v7, %s9099_s17  ;;  %v5005_v51 = vadd.f32 %v8628_v39, %v11087_v25  ;;  %v8957_v7 = vld [vmem:[%s9207_s15 + $0xf8] sm:$0xff] }
 0x485   : > { %v4996_v6 = vpop.f32.mrf.mxu1  ;;  %8759 = vmatmul.mubr.msk.bf16.gmra.mxu0 %vm1759_vm3, %v5536_v55 }
 0x486   : > { %v4997_v12 = vadd.f32 %v11087_v25, %v4996_v6  ;;  %v5425_v32 = vmax.f32 %v5005_v51, 0.0  ;;  %v8958_v6 = vld [vmem:[%s9207_s15 + $0x110] sm:$0xff] }
 0x487   : > { %v8629_v61 = vpop.f32.mrf.mxu1  ;;  %6802 = vrot.lane.b32.xlu0 %v8953_v9, %s9099_s17 }
 0x488   : > { %v5008_v4 = vadd.f32 %v8629_v61, %v11087_v25  ;;  %6808 = vrot.lane.b32.xlu1 %v8954_v48, %s9099_s17  ;;  %v5423_v13 = vmax.f32 %v4997_v12, 0.0 }
 0x489   : > { %v4619_v49 = vpop.permute.xlu1 %4618  ;;  %v4999_v19 = vpop.f32.mrf.mxu1 }
 0x48a   : > { %v5000_v45 = vadd.f32 %v11087_v25, %v4999_v19  ;;  %8710 = vmatprep.mubr.msk.bf16.mxu1 %vm1759_vm3, %v4619_v49  ;;  %v5426_v36 = vmax.f32 %v5008_v4, 0.0  ;;  %v8959_v4 = vld [vmem:[%s9207_s15 + $0x108] sm:$0xff]  ;;  %v8960_v49 = vld [vmem:[%s9207_s15 + $0x120] sm:$0xff] }
 0x48b   : > { %6806 = vrot.lane.b32.xlu0 %v8955_v22, %s9099_s17 }
 0x48c   : > { %v5424_v21 = vmax.f32 %v5000_v45, 0.0  ;;  %6812 = vrot.lane.b32.xlu1 %v8956_v38, %s9099_s17  ;;  %v5538_v39 = vpack.c.bf16 %v5426_v36, %v5425_v32  ;;  %v8962_v32 = vld [vmem:[%s9207_s15 + $0x130] sm:$0xff] }
 0x48e   : > { %v5537_v55 = vpack.c.bf16 %v5424_v21, %v5423_v13  ;;  %v8961_v13 = vld [vmem:[%s9207_s15 + $0x118] sm:$0xff] }
 0x48f   : > { %v8632_v8 = vpop.f32.mrf.mxu1  ;;  %6810 = vrot.lane.b32.xlu0 %v8957_v7, %s9099_s17 }
 0x490   : > { %8762 = vmatprep.mubr.msk.bf16.mxu0 %vm1759_vm3, %v5537_v55  ;;  %6816 = vrot.lane.b32.xlu1 %v8958_v6, %s9099_s17  ;;  %v5021_v19 = vadd.f32 %v8632_v8, %v11087_v25 }
 0x491   : > { %v4621_v61 = vpop.permute.xlu0 %4620  ;;  %v5012_v9 = vpop.f32.mrf.mxu1  ;;  %8763 = vmatmul.mubr.msk.bf16.gmra.mxu0 %vm1759_vm3, %v5538_v39 }
 0x492   : > { %8711 = vmatmul.mubr.msk.bf16.gmra.mxu1 %vm1759_vm3, %v4621_v61  ;;  %v5013_v48 = vadd.f32 %v11087_v25, %v5012_v9  ;;  %v5429_v55 = vmax.f32 %v5021_v19, 0.0  ;;  %v8963_v61 = vld [vmem:[%s9207_s15 + $0x128] sm:$0xff] }
 0x493   : > { %v8633_v12 = vpop.f32.mrf.mxu1  ;;  %6814 = vrot.lane.b32.xlu0 %v8959_v4, %s9099_s17 }
 0x494   : > { %v5024_v51 = vadd.f32 %v8633_v12, %v11087_v25  ;;  %6820 = vrot.lane.b32.xlu1 %v8960_v49, %s9099_s17  ;;  %v5427_v21 = vmax.f32 %v5013_v48, 0.0  ;;  %v8964_v12 = vld [vmem:[%s9207_s15 + $0x140] sm:$0xff]  ;;  %v8965_v49 = vld [vmem:[%s9207_s15 + $0x138] sm:$0xff] }
 0x495   : > { %v5015_v45 = vpop.f32.mrf.mxu1 }
 0x496   : > { %v5016_v36 = vadd.f32 %v11087_v25, %v5015_v45  ;;  %v5430_v22 = vmax.f32 %v5024_v51, 0.0 }
 0x497   : > { %6818 = vrot.lane.b32.xlu0 %v8961_v13, %s9099_s17 }
 0x498   : > { %v5428_v38 = vmax.f32 %v5016_v36, 0.0  ;;  %6824 = vrot.lane.b32.xlu1 %v8962_v32, %s9099_s17  ;;  %v5540_v6 = vpack.c.bf16 %v5430_v22, %v5429_v55  ;;  %v8966_v36 = vld [vmem:[%s9207_s15 + $0x150] sm:$0xff] }
 0x499   : > { %v4623_v39 = vpop.permute.xlu1 %4622 }
 0x49a   : > { %v5539_v7 = vpack.c.bf16 %v5428_v38, %v5427_v21  ;;  %8714 = vmatprep.mubr.msk.bf16.mxu1 %vm1759_vm3, %v4623_v39  ;;  %v8636_v8 = vpop.f32.mrf.mxu1  ;;  %v8967_v39 = vld [vmem:[%s9207_s15 + $0x148] sm:$0xff] }
 0x49b   : > { %6822 = vrot.lane.b32.xlu0 %v8963_v61, %s9099_s17  ;;  %v5037_v19 = vadd.f32 %v8636_v8, %v11087_v25  ;;  %v8968_v8 = vld [vmem:[%s9207_s15 + $0x160] sm:$0xff] }
 0x49c   : > { %v5028_v9 = vpop.f32.mrf.mxu1  ;;  %8766 = vmatprep.mubr.msk.bf16.mxu0 %vm1759_vm3, %v5539_v7  ;;  %6828 = vrot.lane.b32.xlu1 %v8964_v12, %s9099_s17 }
 0x49d   : > { %8767 = vmatmul.mubr.msk.bf16.gmra.mxu0 %vm1759_vm3, %v5540_v6  ;;  %v5029_v48 = vadd.f32 %v11087_v25, %v5028_v9  ;;  %v5433_v7 = vmax.f32 %v5037_v19, 0.0 }
 0x49e   : > { %v8637_v4 = vpop.f32.mrf.mxu1 }
 0x49f   : > { %v5040_v51 = vadd.f32 %v8637_v4, %v11087_v25  ;;  %6826 = vrot.lane.b32.xlu0 %v8965_v49, %s9099_s17  ;;  %v5431_v38 = vmax.f32 %v5029_v48, 0.0  ;;  %v8969_v4 = vld [vmem:[%s9207_s15 + $0x158] sm:$0xff]  ;;  %v8970_v49 = vld [vmem:[%s9207_s15 + $0x170] sm:$0xff] }
 0x4a0   : > { %v5031_v45 = vpop.f32.mrf.mxu1  ;;  %6832 = vrot.lane.b32.xlu1 %v8966_v36, %s9099_s17 }
 0x4a1   : > { %v5032_v22 = vadd.f32 %v11087_v25, %v5031_v45  ;;  %v4625_v13 = vpop.permute.xlu0 %4624  ;;  %v5434_v21 = vmax.f32 %v5040_v51, 0.0 }
 0x4a2   : > { %8715 = vmatmul.mubr.msk.bf16.gmra.mxu1 %vm1759_vm3, %v4625_v13 }
 0x4a3   : > { %v5432_v32 = vmax.f32 %v5032_v22, 0.0  ;;  %v8640_v55 = vpop.f32.mrf.mxu1  ;;  %6830 = vrot.lane.b32.xlu0 %v8967_v39, %s9099_s17  ;;  %v5542_v9 = vpack.c.bf16 %v5434_v21, %v5433_v7  ;;  %v8972_v7 = vld [vmem:[%s9207_s15 + $0x180] sm:$0xff] }
 0x4a4   : > { %6836 = vrot.lane.b32.xlu1 %v8968_v8, %s9099_s17  ;;  %v5053_v19 = vadd.f32 %v8640_v55, %v11087_v25 }
 0x4a5   : > { %v5541_v6 = vpack.c.bf16 %v5432_v32, %v5431_v38  ;;  %v5044_v61 = vpop.f32.mrf.mxu1  ;;  %v8971_v38 = vld [vmem:[%s9207_s15 + $0x168] sm:$0xff] }
 0x4a6   : > { %v5045_v48 = vadd.f32 %v11087_v25, %v5044_v61  ;;  %v5437_v8 = vmax.f32 %v5053_v19, 0.0 }
 0x4a7   : > { %v8641_v12 = vpop.f32.mrf.mxu1  ;;  %8770 = vmatprep.mubr.msk.bf16.mxu0 %vm1759_vm3, %v5541_v6  ;;  %6834 = vrot.lane.b32.xlu0 %v8969_v4, %s9099_s17 }
 0x4a8   : > { %v5056_v51 = vadd.f32 %v8641_v12, %v11087_v25  ;;  %8771 = vmatmul.mubr.msk.bf16.gmra.mxu0 %vm1759_vm3, %v5542_v9  ;;  %6840 = vrot.lane.b32.xlu1 %v8970_v49, %s9099_s17  ;;  %v5435_v32 = vmax.f32 %v5045_v48, 0.0  ;;  %v8973_v12 = vld [vmem:[%s9207_s15 + $0x178] sm:$0xff]  ;;  %v8974_v48 = vld [vmem:[%s9207_s15 + $0x190] sm:$0xff] }
 0x4a9   : > { %v5047_v45 = vpop.f32.mrf.mxu1  ;;  %v4627_v36 = vpop.permute.xlu1 %4626 }
 0x4aa   : > { %v5048_v22 = vadd.f32 %v11087_v25, %v5047_v45  ;;  %8718 = vmatprep.mubr.msk.bf16.mxu1 %vm1759_vm3, %v4627_v36  ;;  %v5438_v13 = vmax.f32 %v5056_v51, 0.0 }
 0x4ab   : > { %v8644_v21 = vpop.f32.mrf.mxu1  ;;  %6838 = vrot.lane.b32.xlu0 %v8971_v38, %s9099_s17  ;;  %v8975_v38 = vld [vmem:[%s9207_s15 + $0x188] sm:$0xff] }
 0x4ac   : > { %v5436_v39 = vmax.f32 %v5048_v22, 0.0  ;;  %6844 = vrot.lane.b32.xlu1 %v8972_v7, %s9099_s17  ;;  %v5544_v61 = vpack.c.bf16 %v5438_v13, %v5437_v8  ;;  %v5069_v49 = vadd.f32 %v8644_v21, %v11087_v25  ;;  %v8976_v7 = vld [vmem:[%s9207_s15 + $0x1a0] sm:$0xff] }
 0x4ad   : > { %v5060_v55 = vpop.f32.mrf.mxu1 }
 0x4ae   : > { %v5543_v6 = vpack.c.bf16 %v5436_v39, %v5435_v32  ;;  %v5061_v4 = vadd.f32 %v11087_v25, %v5060_v55  ;;  %v5441_v21 = vmax.f32 %v5069_v49, 0.0 }
 0x4af   : > { %v8645_v9 = vpop.f32.mrf.mxu1  ;;  %6842 = vrot.lane.b32.xlu0 %v8973_v12, %s9099_s17 }
 0x4b0   : > { %v5072_v51 = vadd.f32 %v8645_v9, %v11087_v25  ;;  %8774 = vmatprep.mubr.msk.bf16.mxu0 %vm1759_vm3, %v5543_v6  ;;  %6848 = vrot.lane.b32.xlu1 %v8974_v48, %s9099_s17  ;;  %v5439_v32 = vmax.f32 %v5061_v4, 0.0  ;;  %v8977_v9 = vld [vmem:[%s9207_s15 + $0x198] sm:$0xff]  ;;  %v8978_v4 = vld [vmem:[%s9207_s15 + $0x1b0] sm:$0xff] }
 0x4b1   : > { %v5063_v19 = vpop.f32.mrf.mxu1  ;;  %8775 = vmatmul.mubr.msk.bf16.gmra.mxu0 %vm1759_vm3, %v5544_v61  ;;  %v4629_v45 = vpop.permute.xlu0 %4628 }
 0x4b2   : > { %v5064_v36 = vadd.f32 %v11087_v25, %v5063_v19  ;;  %8719 = vmatmul.mubr.msk.bf16.gmra.mxu1 %vm1759_vm3, %v4629_v45  ;;  %v5442_v22 = vmax.f32 %v5072_v51, 0.0 }
 0x4b3   : > { %v8648_v13 = vpop.f32.mrf.mxu1  ;;  %6846 = vrot.lane.b32.xlu0 %v8975_v38, %s9099_s17  ;;  %v8979_v38 = vld [vmem:[%s9207_s15 + $0x1a8] sm:$0xff] }
 0x4b4   : > { %v5440_v39 = vmax.f32 %v5064_v36, 0.0  ;;  %6852 = vrot.lane.b32.xlu1 %v8976_v7, %s9099_s17  ;;  %v5546_v6 = vpack.c.bf16 %v5442_v22, %v5441_v21  ;;  %v5085_v48 = vadd.f32 %v8648_v13, %v11087_v25  ;;  %v8980_v7 = vld [vmem:[%s9207_s15 + $0x1c0] sm:$0xff] }
 0x4b5   : > { %v5076_v8 = vpop.f32.mrf.mxu1 }
 0x4b6   : > { %v5545_v55 = vpack.c.bf16 %v5440_v39, %v5439_v32  ;;  %v5077_v12 = vadd.f32 %v11087_v25, %v5076_v8  ;;  %v5445_v13 = vmax.f32 %v5085_v48, 0.0 }
 0x4b7   : > { %v8649_v61 = vpop.f32.mrf.mxu1  ;;  %6850 = vrot.lane.b32.xlu0 %v8977_v9, %s9099_s17 }
 0x4b8   : > { %v5088_v51 = vadd.f32 %v8649_v61, %v11087_v25  ;;  %8778 = vmatprep.mubr.msk.bf16.mxu0 %vm1759_vm3, %v5545_v55  ;;  %6856 = vrot.lane.b32.xlu1 %v8978_v4, %s9099_s17  ;;  %v5443_v32 = vmax.f32 %v5077_v12, 0.0  ;;  %v8981_v61 = vld [vmem:[%s9207_s15 + $0x1b8] sm:$0xff]  ;;  %v8982_v12 = vld [vmem:[%s9207_s15 + $0x1d0] sm:$0xff] }
 0x4b9   : > { %v5079_v49 = vpop.f32.mrf.mxu1  ;;  %8779 = vmatmul.mubr.msk.bf16.gmra.mxu0 %vm1759_vm3, %v5546_v6  ;;  %v4631_v19 = vpop.permute.xlu1 %4630 }
 0x4ba   : > { %v5080_v45 = vadd.f32 %v11087_v25, %v5079_v49  ;;  %8722 = vmatprep.mubr.msk.bf16.mxu1 %vm1759_vm3, %v4631_v19  ;;  %v5446_v36 = vmax.f32 %v5088_v51, 0.0 }
 0x4bb   : > { %v8652_v22 = vpop.f32.mrf.mxu1  ;;  %6854 = vrot.lane.b32.xlu0 %v8979_v38, %s9099_s17  ;;  %v8983_v38 = vld [vmem:[%s9207_s15 + $0x1c8] sm:$0xff] }
 0x4bc   : > { %v5444_v39 = vmax.f32 %v5080_v45, 0.0  ;;  %6860 = vrot.lane.b32.xlu1 %v8980_v7, %s9099_s17  ;;  %v5548_v55 = vpack.c.bf16 %v5446_v36, %v5445_v13  ;;  %v5101_v4 = vadd.f32 %v8652_v22, %v11087_v25  ;;  %v8984_v7 = vld [vmem:[%s9207_s15 + $0x1e0] sm:$0xff] }
 0x4bd   : > { %v5092_v21 = vpop.f32.mrf.mxu1 }
 0x4be   : > { %v5547_v8 = vpack.c.bf16 %v5444_v39, %v5443_v32  ;;  %v5093_v9 = vadd.f32 %v11087_v25, %v5092_v21  ;;  %v5449_v22 = vmax.f32 %v5101_v4, 0.0 }
 0x4bf   : > { %v8653_v6 = vpop.f32.mrf.mxu1  ;;  %6858 = vrot.lane.b32.xlu0 %v8981_v61, %s9099_s17 }
 0x4c0   : > { %v5104_v51 = vadd.f32 %v8653_v6, %v11087_v25  ;;  %8782 = vmatprep.mubr.msk.bf16.mxu0 %vm1759_vm3, %v5547_v8  ;;  %6864 = vrot.lane.b32.xlu1 %v8982_v12, %s9099_s17  ;;  %v5447_v32 = vmax.f32 %v5093_v9, 0.0  ;;  %v8985_v6 = vld [vmem:[%s9207_s15 + $0x1d8] sm:$0xff]  ;;  %v8986_v9 = vld [vmem:[%s9207_s15 + $0x1f0] sm:$0xff] }
 0x4c1   : > { %v5095_v48 = vpop.f32.mrf.mxu1  ;;  %8783 = vmatmul.mubr.msk.bf16.gmra.mxu0 %vm1759_vm3, %v5548_v55  ;;  %v4633_v49 = vpop.permute.xlu0 %4632 }
 0x4c2   : > { %v5096_v19 = vadd.f32 %v11087_v25, %v5095_v48  ;;  %8723 = vmatmul.mubr.msk.bf16.gmra.mxu1 %vm1759_vm3, %v4633_v49  ;;  %v5450_v45 = vmax.f32 %v5104_v51, 0.0 }
 0x4c3   : > { %v8656_v36 = vpop.f32.mrf.mxu1  ;;  %6862 = vrot.lane.b32.xlu0 %v8983_v38, %s9099_s17 }
 0x4c4   : > { %v5448_v39 = vmax.f32 %v5096_v19, 0.0  ;;  %6868 = vrot.lane.b32.xlu1 %v8984_v7, %s9099_s17  ;;  %v5550_v8 = vpack.c.bf16 %v5450_v45, %v5449_v22  ;;  %v5117_v12 = vadd.f32 %v8656_v36, %v11087_v25  ;;  %v8987_v45 = vld [vmem:[%s9207_s15 + $0x1e8] sm:$0xff] }
 0x4c5   : > { %v5108_v13 = vpop.f32.mrf.mxu1 }
 0x4c6   : > { %v5549_v21 = vpack.c.bf16 %v5448_v39, %v5447_v32  ;;  %v5109_v61 = vadd.f32 %v11087_v25, %v5108_v13  ;;  %v8988_v39 = vld [vmem:[%s9207_s15 + $0x200] sm:$0xff]  ;;  %v5453_v7 = vmax.f32 %v5117_v12, 0.0  ;;  %v11360_v13 = vpop.permute.xlu1 %6748 }
 0x4c7   : > { %v8657_v55 = vpop.f32.mrf.mxu1  ;;  %6866 = vrot.lane.b32.xlu0 %v8985_v6, %s9099_s17 }
 0x4c8   : > { %v5120_v51 = vadd.f32 %v8657_v55, %v11087_v25  ;;  %8786 = vmatprep.mubr.msk.bf16.mxu0 %vm1759_vm3, %v5549_v21  ;;  %6872 = vrot.lane.b32.xlu1 %v8986_v9, %s9099_s17  ;;  %v5451_v38 = vmax.f32 %v5109_v61, 0.0  ;;  %v8989_v55 = vld [vmem:[%s9207_s15 + $0x1f8] sm:$0xff]  ;;  %v8990_v61 = vld [vmem:[%s9207_s15 + $0x210] sm:$0xff] }
 0x4c9   : > { %v5111_v4 = vpop.f32.mrf.mxu1  ;;  %8787 = vmatmul.mubr.msk.bf16.gmra.mxu0 %vm1759_vm3, %v5550_v8 }
 0x4ca   : > { %v5112_v48 = vadd.f32 %v11087_v25, %v5111_v4  ;;  %v5454_v49 = vmax.f32 %v5120_v51, 0.0 }
 0x4cb   : > { %v8660_v19 = vpop.f32.mrf.mxu1  ;;  %6870 = vrot.lane.b32.xlu0 %v8987_v45, %s9099_s17 }
 0x4cc   : > { %v5452_v32 = vmax.f32 %v5112_v48, 0.0  ;;  %6876 = vrot.lane.b32.xlu1 %v8988_v39, %s9099_s17  ;;  %v5552_v21 = vpack.c.bf16 %v5454_v49, %v5453_v7  ;;  %v5133_v9 = vadd.f32 %v8660_v19, %v11087_v25  ;;  %v11372_v48 = vpop.permute.xlu0 %6750  ;;  %v11376_v7 = vpop.permute.xlu1 %6752 }
 0x4cd   : > { %v5124_v22 = vpop.f32.mrf.mxu1 }
 0x4ce   : > { %v5551_v36 = vpack.c.bf16 %v5452_v32, %v5451_v38  ;;  %v5125_v6 = vadd.f32 %v11087_v25, %v5124_v22  ;;  %v8991_v38 = vld [vmem:[%s9207_s15 + $0x208] sm:$0xff]  ;;  %v8992_v22 = vld [vmem:[%s9207_s15 + $0x220] sm:$0xff]  ;;  %v5457_v19 = vmax.f32 %v5133_v9, 0.0  ;;  %v8994_v9 = vld [vmem:[%s9207_s15 + $0x230] sm:$0xff] }
 0x4cf   : > { %v8661_v8 = vpop.f32.mrf.mxu1  ;;  %6874 = vrot.lane.b32.xlu0 %v8989_v55, %s9099_s17 }
 0x4d0   : > { %v5136_v51 = vadd.f32 %v8661_v8, %v11087_v25  ;;  %8790 = vmatprep.mubr.msk.bf16.mxu0 %vm1759_vm3, %v5551_v36  ;;  %6880 = vrot.lane.b32.xlu1 %v8990_v61, %s9099_s17  ;;  %v5455_v32 = vmax.f32 %v5125_v6, 0.0  ;;  %v8993_v61 = vld [vmem:[%s9207_s15 + $0x218] sm:$0xff] }
 0x4d1   : > { %v5127_v12 = vpop.f32.mrf.mxu1  ;;  %8791 = vmatmul.mubr.msk.bf16.gmra.mxu0 %vm1759_vm3, %v5552_v21 }
 0x4d2   : > { %v5128_v4 = vadd.f32 %v11087_v25, %v5127_v12  ;;  %v5458_v49 = vmax.f32 %v5136_v51, 0.0  ;;  %v11385_v12 = vpop.permute.xlu0 %6754 }
 0x4d3   : > { %v8664_v45 = vpop.f32.mrf.mxu1  ;;  %6878 = vrot.lane.b32.xlu0 %v8991_v38, %s9099_s17 }
 0x4d4   : > { %v5456_v39 = vmax.f32 %v5128_v4, 0.0  ;;  %6884 = vrot.lane.b32.xlu1 %v8992_v22, %s9099_s17  ;;  %v5554_v8 = vpack.c.bf16 %v5458_v49, %v5457_v19  ;;  %v11387_v4 = vpop.permute.xlu1 %6756  ;;  %v5149_v49 = vadd.f32 %v8664_v45, %v11087_v25  ;;  %v8995_v19 = vld [vmem:[%s9207_s15 + $0x228] sm:$0xff] }
 0x4d5   : > { %v5140_v36 = vpop.f32.mrf.mxu1 }
 0x4d6   : > { %v5553_v21 = vpack.c.bf16 %v5456_v39, %v5455_v32  ;;  %v5141_v51 = vadd.f32 %v11087_v25, %v5140_v36  ;;  %v5461_v45 = vmax.f32 %v5149_v49, 0.0 }
 0x4d7   : > { %v8665_v55 = vpop.f32.mrf.mxu1  ;;  %6882 = vrot.lane.b32.xlu0 %v8993_v61, %s9099_s17  ;;  %v8996_v61 = vld [vmem:[%s9207_s15 + $0x240] sm:$0xff] }
 0x4d8   : > { %v5152_v6 = vadd.f32 %v8665_v55, %v11087_v25  ;;  %8794 = vmatprep.mubr.msk.bf16.mxu0 %vm1759_vm3, %v5553_v21  ;;  %6888 = vrot.lane.b32.xlu1 %v8994_v9, %s9099_s17  ;;  %v5459_v36 = vmax.f32 %v5141_v51, 0.0  ;;  %v11396_v55 = vpop.permute.xlu0 %6758 }
 0x4d9   : > { %v5143_v38 = vpop.f32.mrf.mxu1  ;;  %8795 = vmatmul.mubr.msk.bf16.gmra.mxu0 %vm1759_vm3, %v5554_v8  ;;  %v11400_v8 = vpop.permute.xlu1 %6760 }
 0x4da   : > { %v5144_v32 = vadd.f32 %v11087_v25, %v5143_v38  ;;  %v5462_v39 = vmax.f32 %v5152_v6, 0.0  ;;  %v8997_v6 = vld [vmem:[%s9207_s15 + $0x238] sm:$0xff] }
 0x4db   : > { %v8668_v22 = vpop.f32.mrf.mxu1  ;;  %6886 = vrot.lane.b32.xlu0 %v8995_v19, %s9099_s17  ;;  %v8998_v19 = vld [vmem:[%s9207_s15 + $0x250] sm:$0xff] }
 0x4dc   : > { %v5460_v21 = vmax.f32 %v5144_v32, 0.0  ;;  %6892 = vrot.lane.b32.xlu1 %v8996_v61, %s9099_s17  ;;  %v5556_v38 = vpack.c.bf16 %v5462_v39, %v5461_v45  ;;  %v5165_v49 = vadd.f32 %v8668_v22, %v11087_v25 }
 0x4dd   : > { %v5156_v9 = vpop.f32.mrf.mxu1  ;;  %v11414_v61 = vpop.permute.xlu1 %6764 }
 0x4de   : > { %v5555_v58 = vpack.c.bf16 %v5460_v21, %v5459_v36  ;;  %v5157_v51 = vadd.f32 %v11087_v25, %v5156_v9  ;;  %v11412_v21 = vpop.permute.xlu0 %6762  ;;  %v8999_v9 = vld [vmem:[%s9207_s15 + $0x248] sm:$0xff]  ;;  %v5465_v22 = vmax.f32 %v5165_v49, 0.0  ;;  %v9002_v49 = vld [vmem:[%s9207_s15 + $0x270] sm:$0xff] }
 0x4df   : > { %v8669_v20 = vpop.f32.mrf.mxu1  ;;  %6890 = vrot.lane.b32.xlu0 %v8997_v6, %s9099_s17 }
 0x4e0   : > { %v5168_v32 = vadd.f32 %v8669_v20, %v11087_v25  ;;  %8798 = vmatprep.mubr.msk.bf16.mxu0 %vm1759_vm3, %v5555_v58  ;;  %6896 = vrot.lane.b32.xlu1 %v8998_v19, %s9099_s17  ;;  %v5463_v58 = vmax.f32 %v5157_v51, 0.0  ;;  %v9000_v19 = vld [vmem:[%s9207_s15 + $0x260] sm:$0xff] }
 0x4e1   : > { %v5159_v36 = vpop.f32.mrf.mxu1  ;;  %8799 = vmatmul.mubr.msk.bf16.gmra.mxu0 %vm1759_vm3, %v5556_v38 }
 0x4e2   : > { %v5160_v39 = vadd.f32 %v11087_v25, %v5159_v36  ;;  %v5466_v45 = vmax.f32 %v5168_v32, 0.0  ;;  %v11420_v36 = vpop.permute.xlu0 %6766 }
 0x4e3   : > { %v8672_v20 = vpop.f32.mrf.mxu1  ;;  %6894 = vrot.lane.b32.xlu0 %v8999_v9, %s9099_s17 }
 0x4e4   : > { %v5464_v6 = vmax.f32 %v5160_v39, 0.0  ;;  %6900 = vrot.lane.b32.xlu1 %v9000_v19, %s9099_s17  ;;  %v5558_v62 = vpack.c.bf16 %v5466_v45, %v5465_v22  ;;  %v11427_v39 = vpop.permute.xlu1 %6768  ;;  %v5181_v9 = vadd.f32 %v8672_v20, %v11087_v25  ;;  %v9003_v19 = vld [vmem:[%s9207_s15 + $0x268] sm:$0xff] }
 0x4e5   : > { %v5172_v38 = vpop.f32.mrf.mxu1 }
 0x4e6   : > { %v5557_v15 = vpack.c.bf16 %v5464_v6, %v5463_v58  ;;  %v5173_v32 = vadd.f32 %v11087_v25, %v5172_v38  ;;  %v11436_v22 = vpop.permute.xlu0 %6770  ;;  %v5469_v20 = vmax.f32 %v5181_v9, 0.0 }
 0x4e7   : > { %v8673_v30 = vpop.f32.mrf.mxu1  ;;  %6898 = vrot.lane.b32.xlu0 %v9001_v53, %s9099_s17 }
 0x4e8   : > { %v5184_v51 = vadd.f32 %v8673_v30, %v11087_v25  ;;  %8802 = vmatprep.mubr.msk.bf16.mxu0 %vm1759_vm3, %v5557_v15  ;;  %6904 = vrot.lane.b32.xlu1 %v9002_v49, %s9099_s17  ;;  %v5467_v30 = vmax.f32 %v5173_v32, 0.0  ;;  %v11438_v38 = vpop.permute.xlu1 %6772  ;;  %v9004_v49 = vld [vmem:[%s9207_s15 + $0x280] sm:$0xff] }
 0x4e9   : > { %v5175_v45 = vpop.f32.mrf.mxu1  ;;  %8803 = vmatmul.mubr.msk.bf16.gmra.mxu0 %vm1759_vm3, %v5558_v62 }
 0x4ea   : > { %v5176_v58 = vadd.f32 %v11087_v25, %v5175_v45  ;;  %v5470_v53 = vmax.f32 %v5184_v51, 0.0  ;;  %v9005_v51 = vld [vmem:[%s9207_s15 + $0x278] sm:$0xff] }
 0x4eb   : > { %v8676_v6 = vpop.f32.mrf.mxu1  ;;  %6902 = vrot.lane.b32.xlu0 %v9003_v19, %s9099_s17  ;;  %v11447_v19 = vpop.permute.xlu0 %6774 }
 0x4ec   : > { %v5468_v15 = vmax.f32 %v5176_v58, 0.0  ;;  %6908 = vrot.lane.b32.xlu1 %v9004_v49, %s9099_s17  ;;  %v5560_v45 = vpack.c.bf16 %v5470_v53, %v5469_v20  ;;  %v5197_v9 = vadd.f32 %v8676_v6, %v11087_v25  ;;  %v9007_v20 = vld [vmem:[%s9207_s15 + $0x288] sm:$0xff] }
 0x4ed   : > { %v5188_v62 = vpop.f32.mrf.mxu1 }
 0x4ee   : > { %v5559_v60 = vpack.c.bf16 %v5468_v15, %v5467_v30  ;;  %v5189_v32 = vadd.f32 %v11087_v25, %v5188_v62  ;;  %v11454_v15 = vpop.permute.xlu1 %6776 }
 0x4ef   : > { %v8677_v43 = vpop.f32.mrf.mxu1  ;;  %6906 = vrot.lane.b32.xlu0 %v9005_v51, %s9099_s17  ;;  %v9008_v51 = vld [vmem:[%s9207_s15 + $0x2a0] sm:$0xff] }
 0x4f0   : > { %v5200_v58 = vadd.f32 %v8677_v43, %v11087_v25  ;;  %8806 = vmatprep.mubr.msk.bf16.mxu0 %vm1759_vm3, %v5559_v60  ;;  %6912 = vrot.lane.b32.xlu1 %v9006_v16, %s9099_s17  ;;  %v5471_v60 = vmax.f32 %v5189_v32, 0.0  ;;  %v5473_v16 = vmax.f32 %v5197_v9, 0.0  ;;  %v9010_v9 = vld [vmem:[%s9207_s15 + $0x2b0] sm:$0xff] }
 0x4f1   : > { %v5191_v53 = vpop.f32.mrf.mxu1  ;;  %8807 = vmatmul.mubr.msk.bf16.gmra.mxu0 %vm1759_vm3, %v5560_v45  ;;  %v11460_v45 = vpop.permute.xlu0 %6778 }
 0x4f2   : > { %v5192_v30 = vadd.f32 %v11087_v25, %v5191_v53  ;;  %v5474_v49 = vmax.f32 %v5200_v58, 0.0  ;;  %v11462_v53 = vpop.permute.xlu1 %6780 }
 0x4f3   : > { %v8680_v43 = vpop.f32.mrf.mxu1  ;;  %6910 = vrot.lane.b32.xlu0 %v9007_v20, %s9099_s17 }
 0x4f4   : > { %v5472_v62 = vmax.f32 %v5192_v30, 0.0  ;;  %6916 = vrot.lane.b32.xlu1 %v9008_v51, %s9099_s17  ;;  %v5562_v17 = vpack.c.bf16 %v5474_v49, %v5473_v16  ;;  %v5213_v20 = vadd.f32 %v8680_v43, %v11087_v25  ;;  %v9011_v16 = vld [vmem:[%s9207_s15 + $0x2a8] sm:$0xff] }
 0x4f5   : > { %v5204_v6 = vpop.f32.mrf.mxu1 }
 0x4f6   : > { %v5561_v33 = vpack.c.bf16 %v5472_v62, %v5471_v60  ;;  %v5205_v32 = vadd.f32 %v11087_v25, %v5204_v6  ;;  %v11474_v62 = vpop.permute.xlu0 %6782  ;;  %v5477_v43 = vmax.f32 %v5213_v20, 0.0  ;;  %v11498_v20 = vld [vmem:[%s12655_s8] ss:$0 sm:$0xff] }
 0x4f7   : > { %v8681_v58 = vpop.f32.mrf.mxu1  ;;  %6914 = vrot.lane.b32.xlu0 %v9009_v26, %s9099_s17 }
 0x4f8   : > { %v5216_v30 = vadd.f32 %v8681_v58, %v11087_v25  ;;  %8810 = vmatprep.mubr.msk.bf16.mxu0 %vm1759_vm3, %v5561_v33  ;;  %6920 = vrot.lane.b32.xlu1 %v9010_v9, %s9099_s17  ;;  %v5475_v6 = vmax.f32 %v5205_v32, 0.0  ;;  %v11478_v58 = vpop.permute.xlu1 %6784  ;;  %v9012_v9 = vld [vmem:[%s9207_s15 + $0x2c0] sm:$0xff] }
 0x4f9   : > { %v5207_v60 = vpop.f32.mrf.mxu1  ;;  %8811 = vmatmul.mubr.msk.bf16.gmra.mxu0 %vm1759_vm3, %v5562_v17 }
 0x4fa   : > { %v5208_v49 = vadd.f32 %v11087_v25, %v5207_v60  ;;  %v5478_v26 = vmax.f32 %v5216_v30, 0.0  ;;  %v11485_v25 = vld [vmem:[%s12657_s10] ss:$0 sm:$0xff]  ;;  %v13184_v60 = vld [vmem:[#allocation105_spill] sm:$0xff] }
 0x4fb   : > { %v8684_v51 = vpop.f32.mrf.mxu1  ;;  %6918 = vrot.lane.b32.xlu0 %v9011_v16, %s9099_s17 }
 0x4fc   : > { %v5476_v33 = vmax.f32 %v5208_v49, 0.0  ;;  %6924 = vrot.lane.b32.xlu1 %v9012_v9, %s9099_s17  ;;  %v5564_v32 = vpack.c.bf16 %v5478_v26, %v5477_v43  ;;  %v11507_v43 = vpop.permute.xlu0 %6786  ;;  %v11509_v37 = vpop.permute.xlu1 %6788  ;;  %v5229_v47 = vadd.f32 %v11498_v20, %v8684_v51 }
 0x4fd   : > { %v5220_v17 = vpop.f32.mrf.mxu1  ;;  %v8736_v41 = vpop.f32.mrf.mxu0 }
 0x4fe   : > { %v5563_v30 = vpack.c.bf16 %v5476_v33, %v5475_v6  ;;  %v5854_v23 = vadd.f32 %v8736_v41, %v13184_v60  ;;  %v5221_v49 = vadd.f32 %v11498_v20, %v5220_v17  ;;  %v9014_v41 = vld [vmem:[%s9207_s15 + $0x2b8] sm:$0xff]  ;;  %v13185_v60 = vld [vmem:[#allocation106_spill] sm:$0xff]  ;;  %v9015_v17 = vld [vmem:[%s9207_s15 + $0x2d0] sm:$0xff] }
 0x4ff   : > { %v8685_v16 = vpop.f32.mrf.mxu1  ;;  %v5845_v6 = vpop.f32.mrf.mxu0  ;;  %6922 = vrot.lane.b32.xlu0 %v9014_v41, %s9099_s17 }
 0x500   : > { %v6365_v33 = vadd.f32 %v11485_v25, %v5854_v23  ;;  %v5232_v9 = vadd.f32 %v11498_v20, %v8685_v16  ;;  %v5846_v26 = vadd.f32 %v5845_v6, %v13185_v60  ;;  %8814 = vmatprep.mubr.msk.bf16.mxu0 %vm1759_vm3, %v5563_v30  ;;  %6928 = vrot.lane.b32.xlu1 %v9015_v17, %s9099_s17  ;;  %v13186_v17 = vld [vmem:[#allocation107_spill] sm:$0xff] }
 0x501   : > { %v5223_v41 = vpop.f32.mrf.mxu1  ;;  %8815 = vmatmul.mubr.msk.bf16.gmra.mxu0 %vm1759_vm3, %v5564_v32  ;;  %v8737_v23 = vpop.f32.mrf.mxu0  ;;  %v5479_v32 = vmax.f32 %v5221_v49, 0.0 }
 0x502   : > { %6494 = vst.msk [vmem:[%s11493_s28 + $0x10] sm:$0xff] %vm6491_vm4, %v6365_v33  ;;  %v6363_v30 = vadd.f32 %v11485_v25, %v5846_v26  ;;  %v5224_v16 = vadd.f32 %v11498_v20, %v5223_v41  ;;  %v7134_v6 = vadd.f32 %v11376_v7, %v6365_v33  ;;  %v5482_v60 = vmax.f32 %v5232_v9, 0.0  ;;  %v11528_v7 = vpop.permute.xlu0 %6790  ;;  %v9017_v33 = vld [vmem:[%s9207_s15 + $0x2e0] sm:$0xff] }
 0x503   : > { %v5857_v59 = vadd.f32 %v8737_v23, %v13186_v17  ;;  %v8688_v51 = vpop.f32.mrf.mxu1  ;;  %v5848_v14 = vpop.f32.mrf.mxu0  ;;  %6926 = vrot.lane.b32.xlu0 %v9016_v63, %s9099_s17  ;;  %v5481_v9 = vmax.f32 %v5229_v47, 0.0  ;;  %v13187_v23 = vld [vmem:[#allocation2_spill] sm:$0xff] }
 0x504   : > { %6492 = vst.msk [vmem:[%s11493_s28] sm:$0xff] %vm6491_vm4, %v6363_v30  ;;  %v7132_v31 = vadd.f32 %v11360_v13, %v6363_v30  ;;  %v5480_v26 = vmax.f32 %v5224_v16, 0.0  ;;  %6932 = vrot.lane.b32.xlu1 %v9017_v33, %s9099_s17  ;;  %v5849_v63 = vadd.f32 %v5848_v14, %v13187_v23  ;;  %v11536_v30 = vpop.permute.xlu1 %6792 }
 0x505   : > { %7263 = vst.msk [vmem:[%s11493_s28 + $0x10] sm:$0xff] %vm7260_vm5, %v7134_v6  ;;  %v6366_v41 = vadd.f32 %v11485_v25, %v5857_v59  ;;  %v5236_v49 = vpop.f32.mrf.mxu1  ;;  %v5566_v16 = vpack.c.bf16 %v5482_v60, %v5481_v9  ;;  %v9018_v59 = vld [vmem:[%s9207_s15 + $0x2d8] sm:$0xff]  ;;  %v5245_v60 = vadd.f32 %v11498_v20, %v8688_v51 }
 0x506   : > { %7261 = vst.msk [vmem:[%s11493_s28] sm:$0xff] %vm7260_vm5, %v7132_v31  ;;  %v5565_v13 = vpack.c.bf16 %v5480_v26, %v5479_v32  ;;  %v6364_v6 = vadd.f32 %v11485_v25, %v5849_v63  ;;  %v5237_v14 = vadd.f32 %v11498_v20, %v5236_v49  ;;  %v9019_v32 = vld [vmem:[%s9207_s15 + $0x2f0] sm:$0xff]  ;;  %v11558_v63 = vpop.permute.xlu0 %6794 }
 0x507   : > { %6495 = vst.msk [vmem:[%s11493_s28 + $0x18] sm:$0xff] %vm6491_vm4, %v6366_v41  ;;  %v7135_v47 = vadd.f32 %v11385_v12, %v6366_v41  ;;  %v8689_v17 = vpop.f32.mrf.mxu1  ;;  %6930 = vrot.lane.b32.xlu0 %v9018_v59, %s9099_s17  ;;  %v13188_v41 = vld [vmem:[#allocation3_spill] sm:$0xff]  ;;  %v9021_v59 = vld [vmem:[%s9207_s15 + $0x300] sm:$0xff] }
 0x508   : > { %v5248_v31 = vadd.f32 %v11498_v20, %v8689_v17  ;;  %8818 = vmatprep.mubr.msk.bf16.mxu0 %vm1759_vm3, %v5565_v13  ;;  %6936 = vrot.lane.b32.xlu1 %v9019_v32, %s9099_s17  ;;  %6493 = vst.msk [vmem:[%s11493_s28 + $0x8] sm:$0xff] %vm6491_vm4, %v6364_v6  ;;  %v7133_v12 = vadd.f32 %v11372_v48, %v6364_v6  ;;  %v11560_v49 = vpop.permute.xlu1 %6796  ;;  %v9020_v6 = vld [vmem:[%s9207_s15 + $0x2e8] sm:$0xff]  ;;  %v5485_v32 = vmax.f32 %v5245_v60, 0.0 }
 0x509   : > { %7264 = vst.msk [vmem:[%s11493_s28 + $0x18] sm:$0xff] %vm7260_vm5, %v7135_v47  ;;  %v5239_v26 = vpop.f32.mrf.mxu1  ;;  %8819 = vmatmul.mubr.msk.bf16.gmra.mxu0 %vm1759_vm3, %v5566_v16  ;;  %v8740_v33 = vpop.f32.mrf.mxu0  ;;  %v5483_v47 = vmax.f32 %v5237_v14, 0.0 }
 0x50a   : > { %v5240_v9 = vadd.f32 %v11498_v20, %v5239_v26  ;;  %v5870_v23 = vadd.f32 %v8740_v33, %v13188_v41  ;;  %7262 = vst.msk [vmem:[%s11493_s28 + $0x8] sm:$0xff] %vm7260_vm5, %v7133_v12  ;;  %v5486_v51 = vmax.f32 %v5248_v31, 0.0  ;;  %v13189_v26 = vld [vmem:[#allocation4_spill] sm:$0xff]  ;;  %v11573_v14 = vpop.permute.xlu0 %6798 }
 0x50b   : > { %v8692_v48 = vpop.f32.mrf.mxu1  ;;  %v5861_v13 = vpop.f32.mrf.mxu0  ;;  %6934 = vrot.lane.b32.xlu0 %v9020_v6, %s9099_s17 }
 0x50c   : > { %v5484_v16 = vmax.f32 %v5240_v9, 0.0  ;;  %v6369_v17 = vadd.f32 %v11485_v25, %v5870_v23  ;;  %6940 = vrot.lane.b32.xlu1 %v9021_v59, %s9099_s17  ;;  %v5862_v33 = vadd.f32 %v5861_v13, %v13189_v26  ;;  %v5568_v9 = vpack.c.bf16 %v5486_v51, %v5485_v32 }
 0x50d   : > { %v5252_v12 = vpop.f32.mrf.mxu1  ;;  %v8741_v41 = vpop.f32.mrf.mxu0 }
 0x50e   : > { %v5567_v31 = vpack.c.bf16 %v5484_v16, %v5483_v47  ;;  %6498 = vst.msk [vmem:[%s11493_s28 + $0x30] sm:$0xff] %vm6491_vm4, %v6369_v17  ;;  %v7138_v6 = vadd.f32 %v11400_v8, %v6369_v17  ;;  %v6367_v23 = vadd.f32 %v11485_v25, %v5862_v33  ;;  %v5873_v59 = vadd.f32 %v8741_v41, %v13190_v24  ;;  %v13191_v47 = vld [vmem:[#allocation7_spill] sm:$0xff]  ;;  %v11585_v16 = vpop.permute.xlu1 %6800  ;;  %v9023_v24 = vld [vmem:[%s9207_s15 + $0x310] sm:$0xff] }
 0x50f   : > { %v8693_v60 = vpop.f32.mrf.mxu1  ;;  %v5864_v11 = vpop.f32.mrf.mxu0  ;;  %6938 = vrot.lane.b32.xlu0 %v9022_v1, %s9099_s17  ;;  %v5253_v13 = vadd.f32 %v11498_v20, %v5252_v12  ;;  %v5261_v1 = vadd.f32 %v11498_v20, %v8692_v48  ;;  %v9024_v41 = vld [vmem:[%s9207_s15 + $0x308] sm:$0xff] }
 0x510   : > { %7267 = vst.msk [vmem:[%s11493_s28 + $0x30] sm:$0xff] %vm7260_vm5, %v7138_v6  ;;  %v5264_v8 = vadd.f32 %v11498_v20, %v8693_v60  ;;  %v5865_v51 = vadd.f32 %v5864_v11, %v13191_v47  ;;  %8822 = vmatprep.mubr.msk.bf16.mxu0 %vm1759_vm3, %v5567_v31  ;;  %6944 = vrot.lane.b32.xlu1 %v9023_v24, %s9099_s17  ;;  %v9025_v60 = vld [vmem:[%s9207_s15 + $0x320] sm:$0xff] }
 0x511   : > { %6496 = vst.msk [vmem:[%s11493_s28 + $0x20] sm:$0xff] %vm6491_vm4, %v6367_v23  ;;  %v7136_v17 = vadd.f32 %v11387_v4, %v6367_v23  ;;  %v6370_v32 = vadd.f32 %v11485_v25, %v5873_v59  ;;  %v5255_v26 = vpop.f32.mrf.mxu1  ;;  %8823 = vmatmul.mubr.msk.bf16.gmra.mxu0 %vm1759_vm3, %v5568_v9  ;;  %v5487_v31 = vmax.f32 %v5253_v13, 0.0  ;;  %v11607_v23 = vpop.permute.xlu0 %6802 }
 0x512   : > { %v6368_v11 = vadd.f32 %v11485_v25, %v5865_v51  ;;  %v5256_v33 = vadd.f32 %v11498_v20, %v5255_v26  ;;  %v5490_v48 = vmax.f32 %v5264_v8, 0.0  ;;  %v11609_v59 = vpop.permute.xlu1 %6804  ;;  %v13192_v51 = vld [vmem:[#allocation109_spill] sm:$0xff] }
 0x513   : > { %7265 = vst.msk [vmem:[%s11493_s28 + $0x20] sm:$0xff] %vm7260_vm5, %v7136_v17  ;;  %v7139_v12 = vadd.f32 %v11412_v21, %v6370_v32  ;;  %v8696_v4 = vpop.f32.mrf.mxu1  ;;  %6942 = vrot.lane.b32.xlu0 %v9024_v41, %s9099_s17  ;;  %v5489_v21 = vmax.f32 %v5261_v1, 0.0 }
 0x514   : > { %6499 = vst.msk [vmem:[%s11493_s28 + $0x38] sm:$0xff] %vm6491_vm4, %v6370_v32  ;;  %6497 = vst.msk [vmem:[%s11493_s28 + $0x28] sm:$0xff] %vm6491_vm4, %v6368_v11  ;;  %v7137_v6 = vadd.f32 %v11396_v55, %v6368_v11  ;;  %v5488_v9 = vmax.f32 %v5256_v33, 0.0  ;;  %6948 = vrot.lane.b32.xlu1 %v9025_v60, %s9099_s17  ;;  %v9026_v11 = vld [vmem:[%s9207_s15 + $0x318] sm:$0xff] }
 0x515   : > { %7268 = vst.msk [vmem:[%s11493_s28 + $0x38] sm:$0xff] %vm7260_vm5, %v7139_v12  ;;  %v5268_v8 = vpop.f32.mrf.mxu1  ;;  %v8744_v47 = vpop.f32.mrf.mxu0  ;;  %v5570_v24 = vpack.c.bf16 %v5490_v48, %v5489_v21  ;;  %v13193_v12 = vld [vmem:[#allocation8_spill] sm:$0xff] }
 0x516   : > { %7266 = vst.msk [vmem:[%s11493_s28 + $0x28] sm:$0xff] %vm7260_vm5, %v7137_v6  ;;  %v5569_v13 = vpack.c.bf16 %v5488_v9, %v5487_v31  ;;  %v5886_v55 = vadd.f32 %v8744_v47, %v13192_v51  ;;  %v5269_v17 = vadd.f32 %v11498_v20, %v5268_v8  ;;  %v11625_v31 = vpop.permute.xlu0 %6806  ;;  %v9027_v48 = vld [vmem:[%s9207_s15 + $0x330] sm:$0xff]  ;;  %v5277_v6 = vadd.f32 %v11498_v20, %v8696_v4  ;;  %v13194_v51 = vld [vmem:[#allocation5_spill] sm:$0xff]  ;;  %v11637_v4 = vpop.permute.xlu1 %6808 }
 0x517   : > { %v8697_v32 = vpop.f32.mrf.mxu1  ;;  %v5877_v26 = vpop.f32.mrf.mxu0  ;;  %6946 = vrot.lane.b32.xlu0 %v9026_v11, %s9099_s17 }
 0x518   : > { %v6373_v1 = vadd.f32 %v11485_v25, %v5886_v55  ;;  %v5280_v33 = vadd.f32 %v11498_v20, %v8697_v32  ;;  %v5878_v41 = vadd.f32 %v5877_v26, %v13193_v12  ;;  %8826 = vmatprep.mubr.msk.bf16.mxu0 %vm1759_vm3, %v5569_v13  ;;  %6952 = vrot.lane.b32.xlu1 %v9027_v48, %s9099_s17  ;;  %v9028_v26 = vld [vmem:[%s9207_s15 + $0x328] sm:$0xff] }
 0x519   : > { %v5271_v9 = vpop.f32.mrf.mxu1  ;;  %8827 = vmatmul.mubr.msk.bf16.gmra.mxu0 %vm1759_vm3, %v5570_v24  ;;  %v8745_v60 = vpop.f32.mrf.mxu0  ;;  %v5491_v24 = vmax.f32 %v5269_v17, 0.0 }
 0x51a   : > { %6502 = vst.msk [vmem:[%s11493_s28 + $0x50] sm:$0xff] %vm6491_vm4, %v6373_v1  ;;  %v6371_v21 = vadd.f32 %v11485_v25, %v5878_v41  ;;  %v5272_v8 = vadd.f32 %v11498_v20, %v5271_v9  ;;  %v7142_v47 = vadd.f32 %v11427_v39, %v6373_v1  ;;  %v5494_v13 = vmax.f32 %v5280_v33, 0.0  ;;  %v13195_v39 = vld [vmem:[#allocation6_spill] sm:$0xff] }
 0x51b   : > { %v5889_v55 = vadd.f32 %v8745_v60, %v13194_v51  ;;  %v5880_v32 = vpop.f32.mrf.mxu0  ;;  %6950 = vrot.lane.b32.xlu0 %v9028_v26, %s9099_s17  ;;  %v9029_v33 = vld [vmem:[%s9207_s15 + $0x340] sm:$0xff]  ;;  %v5493_v41 = vmax.f32 %v5277_v6, 0.0  ;;  %v9030_v6 = vld [vmem:[%s9207_s15 + $0x338] sm:$0xff] }
 0x51c   : > { %6500 = vst.msk [vmem:[%s11493_s28 + $0x40] sm:$0xff] %vm6491_vm4, %v6371_v21  ;;  %v7140_v11 = vadd.f32 %v11414_v61, %v6371_v21  ;;  %v5492_v12 = vmax.f32 %v5272_v8, 0.0  ;;  %v5881_v1 = vadd.f32 %v5880_v32, %v13195_v39  ;;  %6956 = vrot.lane.b32.xlu1 %v9029_v33, %s9099_s17  ;;  %v11656_v21 = vpop.permute.xlu0 %6810  ;;  %v11658_v8 = vpop.permute.xlu1 %6812  ;;  %v13197_v39 = vld [vmem:[#allocation13_spill] sm:$0xff]  ;;  %v9033_v33 = vld [vmem:[%s9207_s15 + $0x360] sm:$0xff] }
 0x51d   : > { %7271 = vst.msk [vmem:[%s11493_s28 + $0x50] sm:$0xff] %vm7260_vm5, %v7142_v47  ;;  %v6374_v48 = vadd.f32 %v11485_v25, %v5889_v55  ;;  %v5572_v9 = vpack.c.bf16 %v5494_v13, %v5493_v41  ;;  %v9031_v13 = vld [vmem:[%s9207_s15 + $0x350] sm:$0xff]  ;;  %v13196_v55 = vld [vmem:[#allocation110_spill] sm:$0xff] }
 0x51e   : > { %7269 = vst.msk [vmem:[%s11493_s28 + $0x40] sm:$0xff] %vm7260_vm5, %v7140_v11  ;;  %v5571_v17 = vpack.c.bf16 %v5492_v12, %v5491_v24  ;;  %v6372_v61 = vadd.f32 %v11485_v25, %v5881_v1 }
 0x51f   : > { %6503 = vst.msk [vmem:[%s11493_s28 + $0x58] sm:$0xff] %vm6491_vm4, %v6374_v48  ;;  %v7143_v60 = vadd.f32 %v11436_v22, %v6374_v48  ;;  %6954 = vrot.lane.b32.xlu0 %v9030_v6, %s9099_s17 }
 0x520   : > { %6501 = vst.msk [vmem:[%s11493_s28 + $0x48] sm:$0xff] %vm6491_vm4, %v6372_v61  ;;  %v7141_v47 = vadd.f32 %v11420_v36, %v6372_v61  ;;  %8830 = vmatprep.mubr.msk.bf16.mxu0 %vm1759_vm3, %v5571_v17  ;;  %6960 = vrot.lane.b32.xlu1 %v9031_v13, %s9099_s17  ;;  %v11674_v24 = vpop.permute.xlu0 %6814  ;;  %v9032_v36 = vld [vmem:[%s9207_s15 + $0x348] sm:$0xff]  ;;  %v11682_v48 = vpop.permute.xlu1 %6816 }
 0x521   : > { %7272 = vst.msk [vmem:[%s11493_s28 + $0x58] sm:$0xff] %vm7260_vm5, %v7143_v60  ;;  %8831 = vmatmul.mubr.msk.bf16.gmra.mxu0 %vm1759_vm3, %v5572_v9  ;;  %v8748_v22 = vpop.f32.mrf.mxu0  ;;  %v13198_v60 = vld [vmem:[#allocation14_spill] sm:$0xff] }
 0x522   : > { %7270 = vst.msk [vmem:[%s11493_s28 + $0x48] sm:$0xff] %vm7260_vm5, %v7141_v47  ;;  %v8700_v51 = vpop.f32.mrf.mxu1  ;;  %v5902_v32 = vadd.f32 %v8748_v22, %v13196_v55  ;;  %v9034_v55 = vld [vmem:[%s9207_s15 + $0x358] sm:$0xff] }
 0x523   : > { %v5893_v26 = vpop.f32.mrf.mxu0  ;;  %6958 = vrot.lane.b32.xlu0 %v9032_v36, %s9099_s17 }
 0x524   : > { %v6377_v11 = vadd.f32 %v11485_v25, %v5902_v32  ;;  %v5284_v12 = vpop.f32.mrf.mxu1  ;;  %v5894_v1 = vadd.f32 %v5893_v26, %v13197_v39  ;;  %6964 = vrot.lane.b32.xlu1 %v9033_v33, %s9099_s17  ;;  %v5293_v32 = vadd.f32 %v11498_v20, %v8700_v51  ;;  %v9035_v39 = vld [vmem:[%s9207_s15 + $0x370] sm:$0xff]  ;;  %v11704_v51 = vpop.permute.xlu0 %6818 }
 0x525   : > { %v8749_v41 = vpop.f32.mrf.mxu0  ;;  %v5285_v47 = vadd.f32 %v11498_v20, %v5284_v12  ;;  %v11706_v33 = vpop.permute.xlu1 %6820 }
 0x526   : > { %6506 = vst.msk [vmem:[%s11493_s28 + $0x70] sm:$0xff] %vm6491_vm4, %v6377_v11  ;;  %v6375_v17 = vadd.f32 %v11485_v25, %v5894_v1  ;;  %v7146_v61 = vadd.f32 %v11454_v15, %v6377_v11  ;;  %v8701_v9 = vpop.f32.mrf.mxu1  ;;  %v5905_v6 = vadd.f32 %v8749_v41, %v13198_v60  ;;  %v13199_v11 = vld [vmem:[#allocation10_spill] sm:$0xff]  ;;  %v9036_v60 = vld [vmem:[%s9207_s15 + $0x368] sm:$0xff] }
 0x527   : > { %v5296_v13 = vadd.f32 %v11498_v20, %v8701_v9  ;;  %v5896_v22 = vpop.f32.mrf.mxu0  ;;  %6962 = vrot.lane.b32.xlu0 %v9034_v55, %s9099_s17 }
 0x528   : > { %6504 = vst.msk [vmem:[%s11493_s28 + $0x60] sm:$0xff] %vm6491_vm4, %v6375_v17  ;;  %v7144_v26 = vadd.f32 %v11438_v38, %v6375_v17  ;;  %v6378_v15 = vadd.f32 %v11485_v25, %v5905_v6  ;;  %v5287_v36 = vpop.f32.mrf.mxu1  ;;  %v5897_v12 = vadd.f32 %v5896_v22, %v13199_v11  ;;  %6968 = vrot.lane.b32.xlu1 %v9035_v39, %s9099_s17  ;;  %v5497_v6 = vmax.f32 %v5293_v32, 0.0  ;;  %v9038_v11 = vld [vmem:[%s9207_s15 + $0x378] sm:$0xff]  ;;  %v13201_v39 = vld [vmem:[#allocation111_spill] sm:$0xff] }
 0x529   : > { %7275 = vst.msk [vmem:[%s11493_s28 + $0x70] sm:$0xff] %vm7260_vm5, %v7146_v61  ;;  %v5288_v1 = vadd.f32 %v11498_v20, %v5287_v36  ;;  %v5498_v38 = vmax.f32 %v5296_v13, 0.0  ;;  %v5495_v61 = vmax.f32 %v5285_v47, 0.0  ;;  %v9037_v13 = vld [vmem:[%s9207_s15 + $0x380] sm:$0xff] }
 0x52a   : > { %7273 = vst.msk [vmem:[%s11493_s28 + $0x60] sm:$0xff] %vm7260_vm5, %v7144_v26  ;;  %v6376_v41 = vadd.f32 %v11485_v25, %v5897_v12  ;;  %v7147_v17 = vadd.f32 %v11460_v45, %v6378_v15  ;;  %v11723_v45 = vpop.permute.xlu0 %6822 }
 0x52b   : > { %6507 = vst.msk [vmem:[%s11493_s28 + $0x78] sm:$0xff] %vm6491_vm4, %v6378_v15  ;;  %v5496_v9 = vmax.f32 %v5288_v1, 0.0  ;;  %6966 = vrot.lane.b32.xlu0 %v9036_v60, %s9099_s17  ;;  %v5574_v47 = vpack.c.bf16 %v5498_v38, %v5497_v6  ;;  %v13200_v15 = vld [vmem:[#allocation11_spill] sm:$0xff]  ;;  %v9039_v38 = vld [vmem:[%s9207_s15 + $0x390] sm:$0xff] }
 0x52c   : > { %6505 = vst.msk [vmem:[%s11493_s28 + $0x68] sm:$0xff] %vm6491_vm4, %v6376_v41  ;;  %v7145_v22 = vadd.f32 %v11447_v19, %v6376_v41  ;;  %6972 = vrot.lane.b32.xlu1 %v9037_v13, %s9099_s17  ;;  %v11729_v19 = vpop.permute.xlu1 %6824  ;;  %v13202_v60 = vld [vmem:[#allocation112_spill] sm:$0xff] }
 0x52d   : > { %7276 = vst.msk [vmem:[%s11493_s28 + $0x78] sm:$0xff] %vm7260_vm5, %v7147_v17  ;;  %v5573_v55 = vpack.c.bf16 %v5496_v9, %v5495_v61  ;;  %v8752_v26 = vpop.f32.mrf.mxu0 }
 0x52e   : > { %7274 = vst.msk [vmem:[%s11493_s28 + $0x68] sm:$0xff] %vm7260_vm5, %v7145_v22  ;;  %v5918_v32 = vadd.f32 %v8752_v26, %v13200_v15  ;;  %v11743_v13 = vpop.permute.xlu0 %6826  ;;  %v13203_v15 = vld [vmem:[#allocation17_spill] sm:$0xff] }
 0x52f   : > { %8834 = vmatprep.mubr.msk.bf16.mxu0 %vm1759_vm3, %v5573_v55  ;;  %v5909_v36 = vpop.f32.mrf.mxu0  ;;  %6970 = vrot.lane.b32.xlu0 %v9038_v11, %s9099_s17  ;;  %v9040_v55 = vld [vmem:[%s9207_s15 + $0x388] sm:$0xff] }
 0x530   : > { %v6381_v12 = vadd.f32 %v11485_v25, %v5918_v32  ;;  %v5910_v1 = vadd.f32 %v5909_v36, %v13201_v39  ;;  %8835 = vmatmul.mubr.msk.bf16.gmra.mxu0 %vm1759_vm3, %v5574_v47  ;;  %6976 = vrot.lane.b32.xlu1 %v9039_v38, %s9099_s17  ;;  %v9041_v36 = vld [vmem:[%s9207_s15 + $0x3a0] sm:$0xff]  ;;  %v11756_v11 = vpop.permute.xlu1 %6828 }
 0x531   : > { %v8753_v41 = vpop.f32.mrf.mxu0 }
 0x532   : > { %6510 = vst.msk [vmem:[%s11493_s28 + $0x90] sm:$0xff] %vm6491_vm4, %v6381_v12  ;;  %v6379_v17 = vadd.f32 %v11485_v25, %v5910_v1  ;;  %v7150_v61 = vadd.f32 %v11478_v58, %v6381_v12  ;;  %v8704_v9 = vpop.f32.mrf.mxu1  ;;  %v5921_v6 = vadd.f32 %v8753_v41, %v13202_v60  ;;  %v9042_v41 = vld [vmem:[%s9207_s15 + $0x398] sm:$0xff] }
 0x533   : > { %v5912_v22 = vpop.f32.mrf.mxu0  ;;  %6974 = vrot.lane.b32.xlu0 %v9040_v55, %s9099_s17  ;;  %v11777_v55 = vpop.permute.xlu0 %6830 }
 0x534   : > { %6508 = vst.msk [vmem:[%s11493_s28 + $0x80] sm:$0xff] %vm6491_vm4, %v6379_v17  ;;  %v7148_v26 = vadd.f32 %v11462_v53, %v6379_v17  ;;  %v6382_v58 = vadd.f32 %v11485_v25, %v5921_v6  ;;  %v5300_v47 = vpop.f32.mrf.mxu1  ;;  %v5913_v32 = vadd.f32 %v5912_v22, %v13203_v15  ;;  %6980 = vrot.lane.b32.xlu1 %v9041_v36, %s9099_s17  ;;  %v9043_v6 = vld [vmem:[%s9207_s15 + $0x3b0] sm:$0xff]  ;;  %v9044_v36 = vld [vmem:[%s9207_s15 + $0x3a8] sm:$0xff] }
 0x535   : > { %7279 = vst.msk [vmem:[%s11493_s28 + $0x90] sm:$0xff] %vm7260_vm5, %v7150_v61  ;;  %v5301_v1 = vadd.f32 %v11498_v20, %v5300_v47  ;;  %v5309_v17 = vadd.f32 %v11498_v20, %v8704_v9 }
 0x536   : > { %7277 = vst.msk [vmem:[%s11493_s28 + $0x80] sm:$0xff] %vm7260_vm5, %v7148_v26  ;;  %v6380_v53 = vadd.f32 %v11485_v25, %v5913_v32  ;;  %v8705_v12 = vpop.f32.mrf.mxu1  ;;  %v7151_v39 = vadd.f32 %v11507_v43, %v6382_v58  ;;  %v13204_v26 = vld [vmem:[#allocation18_spill] sm:$0xff]  ;;  %v11782_v32 = vpop.permute.xlu1 %6832 }
 0x537   : > { %6511 = vst.msk [vmem:[%s11493_s28 + $0x98] sm:$0xff] %vm6491_vm4, %v6382_v58  ;;  %v5312_v38 = vadd.f32 %v11498_v20, %v8705_v12  ;;  %6978 = vrot.lane.b32.xlu0 %v9042_v41, %s9099_s17  ;;  %v5499_v47 = vmax.f32 %v5301_v1, 0.0 }
 0x538   : > { %6509 = vst.msk [vmem:[%s11493_s28 + $0x88] sm:$0xff] %vm6491_vm4, %v6380_v53  ;;  %v7149_v61 = vadd.f32 %v11474_v62, %v6380_v53  ;;  %v5303_v60 = vpop.f32.mrf.mxu1  ;;  %6984 = vrot.lane.b32.xlu1 %v9043_v6, %s9099_s17  ;;  %v5501_v53 = vmax.f32 %v5309_v17, 0.0  ;;  %v13206_v17 = vld [vmem:[#allocation16_spill] sm:$0xff] }
 0x539   : > { %7280 = vst.msk [vmem:[%s11493_s28 + $0x98] sm:$0xff] %vm7260_vm5, %v7151_v39  ;;  %v5304_v43 = vadd.f32 %v11498_v20, %v5303_v60  ;;  %v8756_v22 = vpop.f32.mrf.mxu0  ;;  %v5502_v9 = vmax.f32 %v5312_v38, 0.0  ;;  %v13205_v39 = vld [vmem:[#allocation15_spill] sm:$0xff] }
 0x53a   : > { %7278 = vst.msk [vmem:[%s11493_s28 + $0x88] sm:$0xff] %vm7260_vm5, %v7149_v61  ;;  %v5934_v58 = vadd.f32 %v8756_v22, %v13204_v26  ;;  %v9045_v61 = vld [vmem:[%s9207_s15 + $0x3c0] sm:$0xff] }
 0x53b   : > { %v5500_v62 = vmax.f32 %v5304_v43, 0.0  ;;  %v5925_v15 = vpop.f32.mrf.mxu0  ;;  %6982 = vrot.lane.b32.xlu0 %v9044_v36, %s9099_s17  ;;  %v5576_v60 = vpack.c.bf16 %v5502_v9, %v5501_v53  ;;  %v9047_v36 = vld [vmem:[%s9207_s15 + $0x3d0] sm:$0xff]  ;;  %v11810_v53 = vpop.permute.xlu1 %6836 }
 0x53c   : > { %v6385_v12 = vadd.f32 %v11485_v25, %v5934_v58  ;;  %v5926_v41 = vadd.f32 %v5925_v15, %v13205_v39  ;;  %6988 = vrot.lane.b32.xlu1 %v9045_v61, %s9099_s17  ;;  %v11796_v58 = vpop.permute.xlu0 %6834  ;;  %v9046_v15 = vld [vmem:[%s9207_s15 + $0x3b8] sm:$0xff] }
 0x53d   : > { %v5575_v38 = vpack.c.bf16 %v5500_v62, %v5499_v47  ;;  %v8757_v1 = vpop.f32.mrf.mxu0  ;;  %v13207_v47 = vld [vmem:[#allocation113_spill] sm:$0xff] }
 0x53e   : > { %6514 = vst.msk [vmem:[%s11493_s28 + $0xb0] sm:$0xff] %vm6491_vm4, %v6385_v12  ;;  %v6383_v6 = vadd.f32 %v11485_v25, %v5926_v41  ;;  %v7154_v43 = vadd.f32 %v11536_v30, %v6385_v12  ;;  %v5937_v22 = vadd.f32 %v8757_v1, %v13206_v17  ;;  %v9048_v41 = vld [vmem:[%s9207_s15 + $0x3c8] sm:$0xff]  ;;  %v9049_v1 = vld [vmem:[%s9207_s15 + $0x3e0] sm:$0xff] }
 0x53f   : > { %8838 = vmatprep.mubr.msk.bf16.mxu0 %vm1759_vm3, %v5575_v38  ;;  %v5928_v26 = vpop.f32.mrf.mxu0  ;;  %6986 = vrot.lane.b32.xlu0 %v9046_v15, %s9099_s17  ;;  %v11834_v15 = vpop.permute.xlu1 %6840 }
 0x540   : > { %6512 = vst.msk [vmem:[%s11493_s28 + $0xa0] sm:$0xff] %vm6491_vm4, %v6383_v6  ;;  %v7152_v9 = vadd.f32 %v11509_v37, %v6383_v6  ;;  %v6386_v30 = vadd.f32 %v11485_v25, %v5937_v22  ;;  %v5929_v62 = vadd.f32 %v5928_v26, %v13207_v47  ;;  %8839 = vmatmul.mubr.msk.bf16.gmra.mxu0 %vm1759_vm3, %v5576_v60  ;;  %v11827_v6 = vpop.permute.xlu0 %6838 }
 0x541   : > { %7283 = vst.msk [vmem:[%s11493_s28 + $0xb0] sm:$0xff] %vm7260_vm5, %v7154_v43  ;;  %6992 = vrot.lane.b32.xlu1 %v9047_v36, %s9099_s17  ;;  %v13208_v43 = vld [vmem:[#allocation114_spill] sm:$0xff] }
 0x542   : > { %7281 = vst.msk [vmem:[%s11493_s28 + $0xa0] sm:$0xff] %vm7260_vm5, %v7152_v9  ;;  %v6384_v37 = vadd.f32 %v11485_v25, %v5929_v62  ;;  %v8708_v12 = vpop.f32.mrf.mxu1  ;;  %v7155_v39 = vadd.f32 %v11558_v63, %v6386_v30  ;;  %v9050_v9 = vld [vmem:[%s9207_s15 + $0x3d8] sm:$0xff]  ;;  %v13209_v36 = vld [vmem:[#allocation22_spill] sm:$0xff] }
 0x543   : > { %6515 = vst.msk [vmem:[%s11493_s28 + $0xb8] sm:$0xff] %vm6491_vm4, %v6386_v30  ;;  %6990 = vrot.lane.b32.xlu0 %v9048_v41, %s9099_s17  ;;  %v5325_v30 = vadd.f32 %v11498_v20, %v8708_v12 }
 0x544   : > { %6513 = vst.msk [vmem:[%s11493_s28 + $0xa8] sm:$0xff] %vm6491_vm4, %v6384_v37  ;;  %v7153_v61 = vadd.f32 %v11528_v7, %v6384_v37  ;;  %v5316_v38 = vpop.f32.mrf.mxu1 }
 0x545   : > { %7284 = vst.msk [vmem:[%s11493_s28 + $0xb8] sm:$0xff] %vm7260_vm5, %v7155_v39  ;;  %6996 = vrot.lane.b32.xlu1 %v9049_v1, %s9099_s17  ;;  %v8760_v60 = vpop.f32.mrf.mxu0  ;;  %v5317_v22 = vadd.f32 %v11498_v20, %v5316_v38  ;;  %v9051_v39 = vld [vmem:[%s9207_s15 + $0x3f0] sm:$0xff] }
 0x546   : > { %7282 = vst.msk [vmem:[%s11493_s28 + $0xa8] sm:$0xff] %vm7260_vm5, %v7153_v61  ;;  %v8709_v63 = vpop.f32.mrf.mxu1  ;;  %v5950_v17 = vadd.f32 %v8760_v60, %v13208_v43  ;;  %v13210_v60 = vld [vmem:[#allocation23_spill] sm:$0xff] }
 0x547   : > { %v5328_v7 = vadd.f32 %v11498_v20, %v8709_v63  ;;  %v5941_v26 = vpop.f32.mrf.mxu0  ;;  %6994 = vrot.lane.b32.xlu0 %v9050_v9, %s9099_s17  ;;  %v5503_v43 = vmax.f32 %v5317_v22, 0.0  ;;  %v11849_v9 = vpop.permute.xlu0 %6842  ;;  %v13211_v22 = vld [vmem:[#allocation20_spill] sm:$0xff] }
 0x548   : > { %v6389_v47 = vadd.f32 %v11485_v25, %v5950_v17  ;;  %v5319_v62 = vpop.f32.mrf.mxu1  ;;  %v5942_v37 = vadd.f32 %v5941_v26, %v13209_v36  ;;  %v9052_v36 = vld [vmem:[%s9207_s15 + $0x3e8] sm:$0xff] }
 0x549   : > { %7000 = vrot.lane.b32.xlu1 %v9051_v39, %s9099_s17  ;;  %v5320_v41 = vadd.f32 %v11498_v20, %v5319_v62  ;;  %v8761_v61 = vpop.f32.mrf.mxu0  ;;  %v5506_v38 = vmax.f32 %v5328_v7, 0.0  ;;  %v5505_v7 = vmax.f32 %v5325_v30, 0.0  ;;  %v11860_v39 = vpop.permute.xlu1 %6844 }
 0x54a   : > { %6518 = vst.msk [vmem:[%s11493_s28 + $0xd0] sm:$0xff] %vm6491_vm4, %v6389_v47  ;;  %v6387_v1 = vadd.f32 %v11485_v25, %v5942_v37  ;;  %v7158_v12 = vadd.f32 %v11585_v16, %v6389_v47  ;;  %v5953_v63 = vadd.f32 %v8761_v61, %v13210_v60  ;;  %v9053_v61 = vld [vmem:[%s9207_s15 + $0x3f8] sm:$0xff] }
 0x54b   : > { %v5504_v17 = vmax.f32 %v5320_v41, 0.0  ;;  %v5944_v26 = vpop.f32.mrf.mxu0  ;;  %6998 = vrot.lane.b32.xlu0 %v9052_v36, %s9099_s17  ;;  %v5578_v41 = vpack.c.bf16 %v5506_v38, %v5505_v7  ;;  %v13212_v60 = vld [vmem:[#allocation21_spill] sm:$0xff]  ;;  %v13213_v36 = vld [vmem:[#allocation115_spill] sm:$0xff] }
 0x54c   : > { %6516 = vst.msk [vmem:[%s11493_s28 + $0xc0] sm:$0xff] %vm6491_vm4, %v6387_v1  ;;  %v7156_v62 = vadd.f32 %v11560_v49, %v6387_v1  ;;  %v6390_v16 = vadd.f32 %v11485_v25, %v5953_v63  ;;  %v5945_v47 = vadd.f32 %v5944_v26, %v13211_v22 }
 0x54d   : > { %7287 = vst.msk [vmem:[%s11493_s28 + $0xd0] sm:$0xff] %vm7260_vm5, %v7158_v12  ;;  %v5577_v37 = vpack.c.bf16 %v5504_v17, %v5503_v43  ;;  %v11877_v12 = vpop.permute.xlu0 %6846  ;;  %v11882_v17 = vpop.permute.xlu1 %6848 }
 0x54e   : > { %7285 = vst.msk [vmem:[%s11493_s28 + $0xc0] sm:$0xff] %vm7260_vm5, %v7156_v62  ;;  %v6388_v30 = vadd.f32 %v11485_v25, %v5945_v47  ;;  %v7159_v49 = vadd.f32 %v11607_v23, %v6390_v16 }
 0x54f   : > { %6519 = vst.msk [vmem:[%s11493_s28 + $0xd8] sm:$0xff] %vm6491_vm4, %v6390_v16  ;;  %8842 = vmatprep.mubr.msk.bf16.mxu0 %vm1759_vm3, %v5577_v37  ;;  %7002 = vrot.lane.b32.xlu0 %v9053_v61, %s9099_s17  ;;  %v13214_v37 = vld [vmem:[#allocation116_spill] sm:$0xff] }
 0x550   : > { %6517 = vst.msk [vmem:[%s11493_s28 + $0xc8] sm:$0xff] %vm6491_vm4, %v6388_v30  ;;  %v7157_v1 = vadd.f32 %v11573_v14, %v6388_v30  ;;  %8843 = vmatmul.mubr.msk.bf16.gmra.mxu0 %vm1759_vm3, %v5578_v41 }
 0x551   : > { %7288 = vst.msk [vmem:[%s11493_s28 + $0xd8] sm:$0xff] %vm7260_vm5, %v7159_v49  ;;  %v8764_v38 = vpop.f32.mrf.mxu0 }
 0x552   : > { %7286 = vst.msk [vmem:[%s11493_s28 + $0xc8] sm:$0xff] %vm7260_vm5, %v7157_v1  ;;  %v8712_v23 = vpop.f32.mrf.mxu1  ;;  %v5966_v63 = vadd.f32 %v8764_v38, %v13212_v60  ;;  %v11893_v1 = vpop.permute.xlu0 %6850 }
 0x553   : > { %v5957_v43 = vpop.f32.mrf.mxu0  ;;  %v5341_v38 = vadd.f32 %v11498_v20, %v8712_v23 }
 0x554   : > { %v5332_v26 = vpop.f32.mrf.mxu1  ;;  %v5958_v14 = vadd.f32 %v5957_v43, %v13213_v36  ;;  %v6393_v7 = vadd.f32 %v11485_v25, %v5966_v63  ;;  %v13215_v63 = vld [vmem:[#allocation28_spill] sm:$0xff] }
 0x555   : > { %v8765_v62 = vpop.f32.mrf.mxu0  ;;  %v5333_v30 = vadd.f32 %v11498_v20, %v5332_v26 }
 0x556   : > { %v6391_v16 = vadd.f32 %v11485_v25, %v5958_v14  ;;  %6522 = vst.msk [vmem:[%s11493_s28 + $0xf0] sm:$0xff] %vm6491_vm4, %v6393_v7  ;;  %v7162_v22 = vadd.f32 %v11637_v4, %v6393_v7  ;;  %v8713_v47 = vpop.f32.mrf.mxu1  ;;  %v5969_v41 = vadd.f32 %v8765_v62, %v13214_v37  ;;  %v11904_v14 = vpop.permute.xlu1 %6852 }
 0x557   : > { %v5344_v49 = vadd.f32 %v11498_v20, %v8713_v47  ;;  %v5960_v61 = vpop.f32.mrf.mxu0  ;;  %v5507_v62 = vmax.f32 %v5333_v30, 0.0 }
 0x558   : > { %6520 = vst.msk [vmem:[%s11493_s28 + $0xe0] sm:$0xff] %vm6491_vm4, %v6391_v16  ;;  %v7160_v60 = vadd.f32 %v11609_v59, %v6391_v16  ;;  %v5335_v4 = vpop.f32.mrf.mxu1  ;;  %v5961_v43 = vadd.f32 %v5960_v61, %v13215_v63  ;;  %v6394_v26 = vadd.f32 %v11485_v25, %v5969_v41  ;;  %v11917_v61 = vpop.permute.xlu0 %6854 }
 0x559   : > { %7291 = vst.msk [vmem:[%s11493_s28 + $0xf0] sm:$0xff] %vm7260_vm5, %v7162_v22  ;;  %v5336_v36 = vadd.f32 %v11498_v20, %v5335_v4  ;;  %v5510_v23 = vmax.f32 %v5344_v49, 0.0  ;;  %v5509_v22 = vmax.f32 %v5341_v38, 0.0 }
 0x55a   : > { %7289 = vst.msk [vmem:[%s11493_s28 + $0xe0] sm:$0xff] %vm7260_vm5, %v7160_v60  ;;  %v6392_v7 = vadd.f32 %v11485_v25, %v5961_v43  ;;  %v7163_v59 = vadd.f32 %v11656_v21, %v6394_v26  ;;  %v13216_v60 = vld [vmem:[#allocation29_spill] sm:$0xff]  ;;  %v11923_v38 = vpop.permute.xlu1 %6856 }
 0x55b   : > { %6523 = vst.msk [vmem:[%s11493_s28 + $0xf8] sm:$0xff] %vm6491_vm4, %v6394_v26  ;;  %v5508_v16 = vmax.f32 %v5336_v36, 0.0  ;;  %v5580_v49 = vpack.c.bf16 %v5510_v23, %v5509_v22 }
 0x55c   : > { %6521 = vst.msk [vmem:[%s11493_s28 + $0xe8] sm:$0xff] %vm6491_vm4, %v6392_v7  ;;  %v7161_v47 = vadd.f32 %v11625_v31, %v6392_v7  ;;  %v13217_v31 = vld [vmem:[#allocation25_spill] sm:$0xff]  ;;  %v13218_v7 = vld [vmem:[#allocation26_spill] sm:$0xff] }
 0x55d   : > { %7292 = vst.msk [vmem:[%s11493_s28 + $0xf8] sm:$0xff] %vm7260_vm5, %v7163_v59  ;;  %v5579_v37 = vpack.c.bf16 %v5508_v16, %v5507_v62  ;;  %v8768_v41 = vpop.f32.mrf.mxu0  ;;  %v11933_v16 = vpop.permute.xlu0 %6858 }
 0x55e   : > { %7290 = vst.msk [vmem:[%s11493_s28 + $0xe8] sm:$0xff] %vm7260_vm5, %v7161_v47  ;;  %v5982_v21 = vadd.f32 %v8768_v41, %v13216_v60 }
 0x55f   : > { %8846 = vmatprep.mubr.msk.bf16.mxu0 %vm1759_vm3, %v5579_v37  ;;  %v5973_v30 = vpop.f32.mrf.mxu0  ;;  %v13219_v37 = vld [vmem:[#allocation117_spill] sm:$0xff] }
 0x560   : > { %v5974_v4 = vadd.f32 %v5973_v30, %v13217_v31  ;;  %8847 = vmatmul.mubr.msk.bf16.gmra.mxu0 %vm1759_vm3, %v5580_v49  ;;  %v6397_v63 = vadd.f32 %v11485_v25, %v5982_v21 }
 0x561   : > { %v8769_v43 = vpop.f32.mrf.mxu0 }
 0x562   : > { %v6395_v26 = vadd.f32 %v11485_v25, %v5974_v4  ;;  %6526 = vst.msk [vmem:[%s11493_s28 + $0x110] sm:$0xff] %vm6491_vm4, %v6397_v63  ;;  %v7166_v36 = vadd.f32 %v11682_v48, %v6397_v63  ;;  %v8716_v23 = vpop.f32.mrf.mxu1  ;;  %v5985_v59 = vadd.f32 %v8769_v43, %v13218_v7  ;;  %v11942_v48 = vpop.permute.xlu1 %6860  ;;  %v13220_v7 = vld [vmem:[#allocation118_spill] sm:$0xff] }
 0x563   : > { %v5976_v62 = vpop.f32.mrf.mxu0  ;;  %v5357_v4 = vadd.f32 %v11498_v20, %v8716_v23 }
 0x564   : > { %6524 = vst.msk [vmem:[%s11493_s28 + $0x100] sm:$0xff] %vm6491_vm4, %v6395_v26  ;;  %v7164_v22 = vadd.f32 %v11658_v8, %v6395_v26  ;;  %v5348_v47 = vpop.f32.mrf.mxu1  ;;  %v5977_v41 = vadd.f32 %v5976_v62, %v13219_v37  ;;  %v6398_v49 = vadd.f32 %v11485_v25, %v5985_v59 }
 0x565   : > { %7295 = vst.msk [vmem:[%s11493_s28 + $0x110] sm:$0xff] %vm7260_vm5, %v7166_v36  ;;  %v5349_v30 = vadd.f32 %v11498_v20, %v5348_v47 }
 0x566   : > { %7293 = vst.msk [vmem:[%s11493_s28 + $0x100] sm:$0xff] %vm7260_vm5, %v7164_v22  ;;  %v6396_v60 = vadd.f32 %v11485_v25, %v5977_v41  ;;  %v8717_v21 = vpop.f32.mrf.mxu1  ;;  %v7167_v8 = vadd.f32 %v11704_v51, %v6398_v49  ;;  %v11960_v51 = vpop.permute.xlu0 %6862 }
 0x567   : > { %6527 = vst.msk [vmem:[%s11493_s28 + $0x118] sm:$0xff] %vm6491_vm4, %v6398_v49  ;;  %v5360_v31 = vadd.f32 %v11498_v20, %v8717_v21  ;;  %v5511_v22 = vmax.f32 %v5349_v30, 0.0  ;;  %v11966_v49 = vpop.permute.xlu1 %6864  ;;  %v13222_v30 = vld [vmem:[#allocation35_spill] sm:$0xff] }
 0x568   : > { %6525 = vst.msk [vmem:[%s11493_s28 + $0x108] sm:$0xff] %vm6491_vm4, %v6396_v60  ;;  %v7165_v63 = vadd.f32 %v11674_v24, %v6396_v60  ;;  %v5351_v43 = vpop.f32.mrf.mxu1  ;;  %v8772_v26 = vpop.f32.mrf.mxu0  ;;  %v13221_v24 = vld [vmem:[#allocation34_spill] sm:$0xff]  ;;  %v5513_v60 = vmax.f32 %v5357_v4, 0.0  ;;  %v13223_v4 = vld [vmem:[#allocation31_spill] sm:$0xff] }
 0x569   : > { %7296 = vst.msk [vmem:[%s11493_s28 + $0x118] sm:$0xff] %vm7260_vm5, %v7167_v8  ;;  %v5352_v36 = vadd.f32 %v11498_v20, %v5351_v43  ;;  %v5998_v59 = vadd.f32 %v8772_v26, %v13220_v7  ;;  %v5514_v62 = vmax.f32 %v5360_v31, 0.0 }
 0x56a   : > { %7294 = vst.msk [vmem:[%s11493_s28 + $0x108] sm:$0xff] %vm7260_vm5, %v7165_v63  ;;  %v5989_v23 = vpop.f32.mrf.mxu0 }
 0x56b   : > { %v5512_v47 = vmax.f32 %v5352_v36, 0.0  ;;  %v5990_v37 = vadd.f32 %v5989_v23, %v13221_v24  ;;  %v6401_v41 = vadd.f32 %v11485_v25, %v5998_v59  ;;  %v5582_v26 = vpack.c.bf16 %v5514_v62, %v5513_v60  ;;  %v13224_v24 = vld [vmem:[#allocation32_spill] sm:$0xff] }
 0x56c   : > { %v8773_v21 = vpop.f32.mrf.mxu0 }
 0x56d   : > { %v5581_v8 = vpack.c.bf16 %v5512_v47, %v5511_v22  ;;  %v6399_v43 = vadd.f32 %v11485_v25, %v5990_v37  ;;  %6530 = vst.msk [vmem:[%s11493_s28 + $0x130] sm:$0xff] %vm6491_vm4, %v6401_v41  ;;  %v7170_v31 = vadd.f32 %v11729_v19, %v6401_v41  ;;  %v6001_v63 = vadd.f32 %v8773_v21, %v13222_v30  ;;  %v11981_v22 = vpop.permute.xlu0 %6866  ;;  %v11990_v47 = vpop.permute.xlu1 %6868 }
 0x56e   : > { %v5992_v36 = vpop.f32.mrf.mxu0 }
 0x56f   : > { %6528 = vst.msk [vmem:[%s11493_s28 + $0x120] sm:$0xff] %vm6491_vm4, %v6399_v43  ;;  %v7168_v7 = vadd.f32 %v11706_v33, %v6399_v43  ;;  %v5993_v59 = vadd.f32 %v5992_v36, %v13223_v4  ;;  %8850 = vmatprep.mubr.msk.bf16.mxu0 %vm1759_vm3, %v5581_v8  ;;  %v6402_v23 = vadd.f32 %v11485_v25, %v6001_v63  ;;  %v13225_v8 = vld [vmem:[#allocation119_spill] sm:$0xff]  ;;  %v13226_v36 = vld [vmem:[#allocation120_spill] sm:$0xff] }
 0x570   : > { %7299 = vst.msk [vmem:[%s11493_s28 + $0x130] sm:$0xff] %vm7260_vm5, %v7170_v31  ;;  %8851 = vmatmul.mubr.msk.bf16.gmra.mxu0 %vm1759_vm3, %v5582_v26 }
 0x571   : > { %7297 = vst.msk [vmem:[%s11493_s28 + $0x120] sm:$0xff] %vm7260_vm5, %v7168_v7  ;;  %v6400_v19 = vadd.f32 %v11485_v25, %v5993_v59  ;;  %v7171_v33 = vadd.f32 %v11743_v13, %v6402_v23  ;;  %v8776_v62 = vpop.f32.mrf.mxu0  ;;  %v12002_v63 = vpop.permute.xlu0 %6870 }
 0x572   : > { %6531 = vst.msk [vmem:[%s11493_s28 + $0x138] sm:$0xff] %vm6491_vm4, %v6402_v23  ;;  %v6014_v37 = vadd.f32 %v8776_v62, %v13224_v24  ;;  %v8720_v41 = vpop.f32.mrf.mxu1 }
 0x573   : > { %6529 = vst.msk [vmem:[%s11493_s28 + $0x128] sm:$0xff] %vm6491_vm4, %v6400_v19  ;;  %v7169_v60 = vadd.f32 %v11723_v45, %v6400_v19  ;;  %v6005_v21 = vpop.f32.mrf.mxu0  ;;  %v5373_v62 = vadd.f32 %v11498_v20, %v8720_v41 }
 0x574   : > { %7300 = vst.msk [vmem:[%s11493_s28 + $0x138] sm:$0xff] %vm7260_vm5, %v7171_v33  ;;  %v6006_v43 = vadd.f32 %v6005_v21, %v13225_v8  ;;  %v5364_v31 = vpop.f32.mrf.mxu1  ;;  %v6405_v13 = vadd.f32 %v11485_v25, %v6014_v37  ;;  %v12011_v33 = vpop.permute.xlu1 %6872 }
 0x575   : > { %7298 = vst.msk [vmem:[%s11493_s28 + $0x128] sm:$0xff] %vm7260_vm5, %v7169_v60  ;;  %v8777_v30 = vpop.f32.mrf.mxu0  ;;  %v5365_v59 = vadd.f32 %v11498_v20, %v5364_v31 }
 0x576   : > { %v6403_v26 = vadd.f32 %v11485_v25, %v6006_v43  ;;  %6534 = vst.msk [vmem:[%s11493_s28 + $0x150] sm:$0xff] %vm6491_vm4, %v6405_v13  ;;  %v7174_v45 = vadd.f32 %v11782_v32, %v6405_v13  ;;  %v6017_v7 = vadd.f32 %v8777_v30, %v13226_v36  ;;  %v8721_v4 = vpop.f32.mrf.mxu1  ;;  %v13227_v32 = vld [vmem:[#allocation40_spill] sm:$0xff]  ;;  %v12029_v36 = vpop.permute.xlu0 %6874 }
 0x577   : > { %v5376_v23 = vadd.f32 %v11498_v20, %v8721_v4  ;;  %v6008_v19 = vpop.f32.mrf.mxu0  ;;  %v5515_v30 = vmax.f32 %v5365_v59, 0.0 }
 0x578   : > { %6532 = vst.msk [vmem:[%s11493_s28 + $0x140] sm:$0xff] %vm6491_vm4, %v6403_v26  ;;  %v7172_v24 = vadd.f32 %v11756_v11, %v6403_v26  ;;  %v6009_v37 = vadd.f32 %v6008_v19, %v13227_v32  ;;  %v5367_v60 = vpop.f32.mrf.mxu1  ;;  %v6406_v21 = vadd.f32 %v11485_v25, %v6017_v7  ;;  %v12043_v19 = vpop.permute.xlu1 %6876  ;;  %v13229_v32 = vld [vmem:[#allocation37_spill] sm:$0xff] }
 0x579   : > { %7303 = vst.msk [vmem:[%s11493_s28 + $0x150] sm:$0xff] %vm7260_vm5, %v7174_v45  ;;  %v5368_v8 = vadd.f32 %v11498_v20, %v5367_v60  ;;  %v8780_v43 = vpop.f32.mrf.mxu0  ;;  %v5518_v31 = vmax.f32 %v5376_v23, 0.0  ;;  %v5517_v20 = vmax.f32 %v5373_v62, 0.0 }
 0x57a   : > { %7301 = vst.msk [vmem:[%s11493_s28 + $0x140] sm:$0xff] %vm7260_vm5, %v7172_v24  ;;  %v6404_v41 = vadd.f32 %v11485_v25, %v6009_v37  ;;  %v7175_v11 = vadd.f32 %v11796_v58, %v6406_v21  ;;  %v6030_v13 = vadd.f32 %v8780_v43, %v10511_v50  ;;  %v13228_v25 = vld [vmem:[#allocation41_spill] sm:$0xff]  ;;  %v12040_v50 = vld [vmem:[%s12657_s10] ss:$0 sm:$0xff] }
 0x57b   : > { %6535 = vst.msk [vmem:[%s11493_s28 + $0x158] sm:$0xff] %vm6491_vm4, %v6406_v21  ;;  %v5516_v26 = vmax.f32 %v5368_v8, 0.0  ;;  %v6021_v45 = vpop.f32.mrf.mxu0  ;;  %v5584_v62 = vpack.c.bf16 %v5518_v31, %v5517_v20  ;;  %v13230_v8 = vld [vmem:[#allocation38_spill] sm:$0xff] }
 0x57c   : > { %6533 = vst.msk [vmem:[%s11493_s28 + $0x148] sm:$0xff] %vm6491_vm4, %v6404_v41  ;;  %v7173_v7 = vadd.f32 %v11777_v55, %v6404_v41  ;;  %v6022_v4 = vadd.f32 %v6021_v45, %v13228_v25  ;;  %v6409_v58 = vadd.f32 %v12040_v50, %v6030_v13  ;;  %v12061_v41 = vpop.permute.xlu0 %6878  ;;  %v12070_v45 = vpop.permute.xlu1 %6880 }
 0x57d   : > { %7304 = vst.msk [vmem:[%s11493_s28 + $0x158] sm:$0xff] %vm7260_vm5, %v7175_v11  ;;  %v5583_v59 = vpack.c.bf16 %v5516_v26, %v5515_v30  ;;  %v8781_v23 = vpop.f32.mrf.mxu0 }
 0x57e   : > { %7302 = vst.msk [vmem:[%s11493_s28 + $0x148] sm:$0xff] %vm7260_vm5, %v7173_v7  ;;  %v6407_v55 = vadd.f32 %v12040_v50, %v6022_v4  ;;  %v7178_v24 = vadd.f32 %v11834_v15, %v6409_v58  ;;  %v6033_v37 = vadd.f32 %v8781_v23, %v13229_v32  ;;  %v13231_v7 = vld [vmem:[#allocation46_spill] sm:$0xff]  ;;  %v13232_v23 = vld [vmem:[#allocation48_spill] sm:$0xff] }
 0x57f   : > { %6538 = vst.msk [vmem:[%s11493_s28 + $0x170] sm:$0xff] %vm6491_vm4, %v6409_v58  ;;  %v6024_v60 = vpop.f32.mrf.mxu0  ;;  %8854 = vmatprep.mubr.msk.bf16.mxu0 %vm1759_vm3, %v5583_v59 }
 0x580   : > { %6536 = vst.msk [vmem:[%s11493_s28 + $0x160] sm:$0xff] %vm6491_vm4, %v6407_v55  ;;  %v7176_v21 = vadd.f32 %v11810_v53, %v6407_v55  ;;  %v6025_v43 = vadd.f32 %v6024_v60, %v13230_v8  ;;  %8855 = vmatmul.mubr.msk.bf16.gmra.mxu0 %vm1759_vm3, %v5584_v62  ;;  %v6410_v31 = vadd.f32 %v12040_v50, %v6033_v37  ;;  %v9055_v55 = vld [vmem:[%s12655_s8] ss:$0 sm:$0xff]  ;;  %v12089_v60 = vpop.permute.xlu0 %6882 }
 0x581   : > { %7307 = vst.msk [vmem:[%s11493_s28 + $0x170] sm:$0xff] %vm7260_vm5, %v7178_v24  ;;  %v8784_v15 = vpop.f32.mrf.mxu0 }
 0x582   : > { %7305 = vst.msk [vmem:[%s11493_s28 + $0x160] sm:$0xff] %vm7260_vm5, %v7176_v21  ;;  %v6408_v11 = vadd.f32 %v12040_v50, %v6025_v43  ;;  %v7179_v53 = vadd.f32 %v11849_v9, %v6410_v31  ;;  %v6046_v13 = vadd.f32 %v8784_v15, %v10531_v0  ;;  %v8724_v30 = vpop.f32.mrf.mxu1 }
 0x583   : > { %6539 = vst.msk [vmem:[%s11493_s28 + $0x178] sm:$0xff] %vm6491_vm4, %v6410_v31  ;;  %v6037_v26 = vpop.f32.mrf.mxu0  ;;  %v5389_v21 = vadd.f32 %v9055_v55, %v8724_v30 }
 0x584   : > { %6537 = vst.msk [vmem:[%s11493_s28 + $0x168] sm:$0xff] %vm6491_vm4, %v6408_v11  ;;  %v7177_v20 = vadd.f32 %v11827_v6, %v6408_v11  ;;  %v6038_v25 = vadd.f32 %v6037_v26, %v13231_v7  ;;  %v5380_v4 = vpop.f32.mrf.mxu1  ;;  %v6413_v58 = vadd.f32 %v12040_v50, %v6046_v13  ;;  %v12098_v13 = vpop.permute.xlu1 %6884 }
 0x585   : > { %7308 = vst.msk [vmem:[%s11493_s28 + $0x178] sm:$0xff] %vm7260_vm5, %v7179_v53  ;;  %v8785_v9 = vpop.f32.mrf.mxu0  ;;  %v5381_v24 = vadd.f32 %v9055_v55, %v5380_v4 }
 0x586   : > { %7306 = vst.msk [vmem:[%s11493_s28 + $0x168] sm:$0xff] %vm7260_vm5, %v7177_v20  ;;  %v6411_v0 = vadd.f32 %v12040_v50, %v6038_v25  ;;  %v7182_v59 = vadd.f32 %v11882_v17, %v6413_v58  ;;  %v6049_v6 = vadd.f32 %v8785_v9, %v13232_v23  ;;  %v8725_v62 = vpop.f32.mrf.mxu1  ;;  %v13233_v17 = vld [vmem:[#allocation43_spill] sm:$0xff] }
 0x587   : > { %6542 = vst.msk [vmem:[%s11493_s28 + $0x190] sm:$0xff] %vm6491_vm4, %v6413_v58  ;;  %v5392_v32 = vadd.f32 %v9055_v55, %v8725_v62  ;;  %v6040_v37 = vpop.f32.mrf.mxu0  ;;  %v5519_v7 = vmax.f32 %v5381_v24, 0.0  ;;  %v5521_v58 = vmax.f32 %v5389_v21, 0.0 }
 0x588   : > { %6540 = vst.msk [vmem:[%s11493_s28 + $0x180] sm:$0xff] %vm6491_vm4, %v6411_v0  ;;  %v7180_v8 = vadd.f32 %v11860_v39, %v6411_v0  ;;  %v6041_v43 = vadd.f32 %v6040_v37, %v13233_v17  ;;  %v5383_v31 = vpop.f32.mrf.mxu1  ;;  %v6414_v15 = vadd.f32 %v12040_v50, %v6049_v6  ;;  %v12124_v24 = vpop.permute.xlu1 %6888  ;;  %v13234_v37 = vld [vmem:[#allocation44_spill] sm:$0xff] }
 0x589   : > { %7311 = vst.msk [vmem:[%s11493_s28 + $0x190] sm:$0xff] %vm7260_vm5, %v7182_v59  ;;  %v5384_v11 = vadd.f32 %v9055_v55, %v5383_v31  ;;  %v8788_v53 = vpop.f32.mrf.mxu0  ;;  %v5522_v30 = vmax.f32 %v5392_v32, 0.0 }
 0x58a   : > { %7309 = vst.msk [vmem:[%s11493_s28 + $0x180] sm:$0xff] %vm7260_vm5, %v7180_v8  ;;  %v6412_v26 = vadd.f32 %v12040_v50, %v6041_v43  ;;  %v7183_v39 = vadd.f32 %v11893_v1, %v6414_v15  ;;  %v6062_v20 = vadd.f32 %v8788_v53, %v10553_v44  ;;  %v12114_v44 = vpop.permute.xlu0 %6886 }
 0x58b   : > { %6543 = vst.msk [vmem:[%s11493_s28 + $0x198] sm:$0xff] %vm6491_vm4, %v6414_v15  ;;  %v5520_v25 = vmax.f32 %v5384_v11, 0.0  ;;  %v6053_v4 = vpop.f32.mrf.mxu0  ;;  %v5586_v6 = vpack.c.bf16 %v5522_v30, %v5521_v58  ;;  %v13235_v11 = vld [vmem:[#allocation55_spill] sm:$0xff] }
 0x58c   : > { %6541 = vst.msk [vmem:[%s11493_s28 + $0x188] sm:$0xff] %vm6491_vm4, %v6412_v26  ;;  %v7181_v9 = vadd.f32 %v11877_v12, %v6412_v26  ;;  %v6054_v0 = vadd.f32 %v6053_v4, %v10561_v28  ;;  %v6417_v59 = vadd.f32 %v12040_v50, %v6062_v20  ;;  %v13237_v4 = vld [vmem:[#allocation53_spill] sm:$0xff] }
 0x58d   : > { %7312 = vst.msk [vmem:[%s11493_s28 + $0x198] sm:$0xff] %vm7260_vm5, %v7183_v39  ;;  %v5585_v1 = vpack.c.bf16 %v5520_v25, %v5519_v7  ;;  %v8789_v23 = vpop.f32.mrf.mxu0 }
 0x58e   : > { %7310 = vst.msk [vmem:[%s11493_s28 + $0x188] sm:$0xff] %vm7260_vm5, %v7181_v9  ;;  %v6415_v62 = vadd.f32 %v12040_v50, %v6054_v0  ;;  %v7186_v12 = vadd.f32 %v11923_v38, %v6417_v59  ;;  %v6065_v28 = vadd.f32 %v8789_v23, %v10563_v52  ;;  %v12141_v31 = vpop.permute.xlu0 %6890 }
 0x58f   : > { %6546 = vst.msk [vmem:[%s11493_s28 + $0x1b0] sm:$0xff] %vm6491_vm4, %v6417_v59  ;;  %v6056_v55 = vpop.f32.mrf.mxu0  ;;  %8858 = vmatprep.mubr.msk.bf16.mxu0 %vm1759_vm3, %v5585_v1 }
 0x590   : > { %6544 = vst.msk [vmem:[%s11493_s28 + $0x1a0] sm:$0xff] %vm6491_vm4, %v6415_v62  ;;  %v7184_v32 = vadd.f32 %v11904_v14, %v6415_v62  ;;  %v6057_v21 = vadd.f32 %v6056_v55, %v13234_v37  ;;  %8859 = vmatmul.mubr.msk.bf16.gmra.mxu0 %vm1759_vm3, %v5586_v6  ;;  %v6418_v38 = vadd.f32 %v12040_v50, %v6065_v28  ;;  %v13239_v37 = vld [vmem:[#allocation61_spill] sm:$0xff] }
 0x591   : > { %7315 = vst.msk [vmem:[%s11493_s28 + $0x1b0] sm:$0xff] %vm7260_vm5, %v7186_v12  ;;  %v8792_v52 = vpop.f32.mrf.mxu0  ;;  %v13238_v12 = vld [vmem:[#allocation50_spill] sm:$0xff] }
 0x592   : > { %7313 = vst.msk [vmem:[%s11493_s28 + $0x1a0] sm:$0xff] %vm7260_vm5, %v7184_v32  ;;  %v6416_v8 = vadd.f32 %v12040_v50, %v6057_v21  ;;  %v7187_v17 = vadd.f32 %v11933_v16, %v6418_v38  ;;  %v6078_v14 = vadd.f32 %v8792_v52, %v10574_v27  ;;  %v12150_v16 = vpop.permute.xlu1 %6892  ;;  %v12166_v59 = vpop.permute.xlu0 %6894 }
 0x593   : > { %6547 = vst.msk [vmem:[%s11493_s28 + $0x1b8] sm:$0xff] %vm6491_vm4, %v6418_v38  ;;  %v6069_v43 = vpop.f32.mrf.mxu0 }
 0x594   : > { %6545 = vst.msk [vmem:[%s11493_s28 + $0x1a8] sm:$0xff] %vm6491_vm4, %v6416_v8  ;;  %v7185_v15 = vadd.f32 %v11917_v61, %v6416_v8  ;;  %v6070_v53 = vadd.f32 %v6069_v43, %v13235_v11  ;;  %v6421_v30 = vadd.f32 %v12040_v50, %v6078_v14  ;;  %v13236_v61 = vld [vmem:[#allocation52_spill] sm:$0xff]  ;;  %v13240_v8 = vld [vmem:[#allocation58_spill] sm:$0xff] }
 0x595   : > { %7316 = vst.msk [vmem:[%s11493_s28 + $0x1b8] sm:$0xff] %vm7260_vm5, %v7187_v17  ;;  %v8793_v26 = vpop.f32.mrf.mxu0 }
 0x596   : > { %7314 = vst.msk [vmem:[%s11493_s28 + $0x1a8] sm:$0xff] %vm7260_vm5, %v7185_v15  ;;  %v6419_v27 = vadd.f32 %v12040_v50, %v6070_v53  ;;  %v7190_v39 = vadd.f32 %v11966_v49, %v6421_v30  ;;  %v6081_v20 = vadd.f32 %v8793_v26, %v13236_v61  ;;  %v12175_v6 = vpop.permute.xlu1 %6896  ;;  %v12191_v38 = vpop.permute.xlu0 %6898 }
 0x597   : > { %6550 = vst.msk [vmem:[%s11493_s28 + $0x1d0] sm:$0xff] %vm6491_vm4, %v6421_v30  ;;  %v6072_v7 = vpop.f32.mrf.mxu0 }
 0x598   : > { %6548 = vst.msk [vmem:[%s11493_s28 + $0x1c0] sm:$0xff] %vm6491_vm4, %v6419_v27  ;;  %v7188_v25 = vadd.f32 %v11942_v48, %v6419_v27  ;;  %v6073_v58 = vadd.f32 %v6072_v7, %v13237_v4  ;;  %v6422_v9 = vadd.f32 %v12040_v50, %v6081_v20 }
 0x599   : > { %7319 = vst.msk [vmem:[%s11493_s28 + $0x1d0] sm:$0xff] %vm7260_vm5, %v7190_v39  ;;  %v8796_v0 = vpop.f32.mrf.mxu0 }
 0x59a   : > { %7317 = vst.msk [vmem:[%s11493_s28 + $0x1c0] sm:$0xff] %vm7260_vm5, %v7188_v25  ;;  %v6420_v49 = vadd.f32 %v12040_v50, %v6073_v58  ;;  %v7191_v1 = vadd.f32 %v11981_v22, %v6422_v9  ;;  %v6094_v48 = vadd.f32 %v8796_v0, %v10599_v35  ;;  %v12216_v61 = vpop.permute.xlu0 %6902  ;;  %v13241_v25 = vld [vmem:[#allocation59_spill] sm:$0xff] }
 0x59b   : > { %6551 = vst.msk [vmem:[%s11493_s28 + $0x1d8] sm:$0xff] %vm6491_vm4, %v6422_v9  ;;  %v6085_v23 = vpop.f32.mrf.mxu0 }
 0x59c   : > { %6549 = vst.msk [vmem:[%s11493_s28 + $0x1c8] sm:$0xff] %vm6491_vm4, %v6420_v49  ;;  %v7189_v62 = vadd.f32 %v11960_v51, %v6420_v49  ;;  %v6086_v28 = vadd.f32 %v6085_v23, %v13238_v12  ;;  %v6425_v55 = vadd.f32 %v12040_v50, %v6094_v48 }
 0x59d   : > { %7320 = vst.msk [vmem:[%s11493_s28 + $0x1d8] sm:$0xff] %vm7260_vm5, %v7191_v1  ;;  %v8797_v32 = vpop.f32.mrf.mxu0 }
 0x59e   : > { %7318 = vst.msk [vmem:[%s11493_s28 + $0x1c8] sm:$0xff] %vm7260_vm5, %v7189_v62  ;;  %v6423_v35 = vadd.f32 %v12040_v50, %v6086_v28  ;;  %v7194_v22 = vadd.f32 %v12011_v33, %v6425_v55  ;;  %v6097_v21 = vadd.f32 %v8797_v32, %v13239_v37  ;;  %v12200_v33 = vpop.permute.xlu1 %6900  ;;  %v12241_v49 = vpop.permute.xlu0 %6906 }
 0x59f   : > { %6554 = vst.msk [vmem:[%s11493_s28 + $0x1f0] sm:$0xff] %vm6491_vm4, %v6425_v55  ;;  %v6088_v51 = vpop.f32.mrf.mxu0 }
 0x5a0   : > { %6552 = vst.msk [vmem:[%s11493_s28 + $0x1e0] sm:$0xff] %vm6491_vm4, %v6423_v35  ;;  %v7192_v52 = vadd.f32 %v11990_v47, %v6423_v35  ;;  %v6089_v17 = vadd.f32 %v6088_v51, %v13240_v8  ;;  %v6426_v14 = vadd.f32 %v12040_v50, %v6097_v21 }
 0x5a1   : > { %7323 = vst.msk [vmem:[%s11493_s28 + $0x1f0] sm:$0xff] %vm7260_vm5, %v7194_v22  ;;  %v8800_v43 = vpop.f32.mrf.mxu0 }
 0x5a2   : > { %7321 = vst.msk [vmem:[%s11493_s28 + $0x1e0] sm:$0xff] %vm7260_vm5, %v7192_v52  ;;  %v6424_v15 = vadd.f32 %v12040_v50, %v6089_v17  ;;  %v7195_v11 = vadd.f32 %v12029_v36, %v6426_v14  ;;  %v6110_v47 = vadd.f32 %v8800_v43, %v10623_v46  ;;  %v12266_v22 = vpop.permute.xlu0 %6910 }
 0x5a3   : > { %6555 = vst.msk [vmem:[%s11493_s28 + $0x1f8] sm:$0xff] %vm6491_vm4, %v6426_v14  ;;  %v6101_v53 = vpop.f32.mrf.mxu0 }
 0x5a4   : > { %6553 = vst.msk [vmem:[%s11493_s28 + $0x1e8] sm:$0xff] %vm6491_vm4, %v6424_v15  ;;  %v7193_v30 = vadd.f32 %v12002_v63, %v6424_v15  ;;  %v6102_v26 = vadd.f32 %v6101_v53, %v10643_v10  ;;  %v6429_v27 = vadd.f32 %v12040_v50, %v6110_v47  ;;  %v12225_v10 = vpop.permute.xlu1 %6904 }
 0x5a5   : > { %7324 = vst.msk [vmem:[%s11493_s28 + $0x1f8] sm:$0xff] %vm7260_vm5, %v7195_v11  ;;  %v8801_v39 = vpop.f32.mrf.mxu0 }
 0x5a6   : > { %7322 = vst.msk [vmem:[%s11493_s28 + $0x1e8] sm:$0xff] %vm7260_vm5, %v7193_v30  ;;  %v6427_v46 = vadd.f32 %v12040_v50, %v6102_v26  ;;  %v7198_v36 = vadd.f32 %v12070_v45, %v6429_v27  ;;  %v6113_v63 = vadd.f32 %v8801_v39, %v10645_v56  ;;  %v12291_v14 = vpop.permute.xlu0 %6914 }
 0x5a7   : > { %6558 = vst.msk [vmem:[%s11493_s28 + $0x210] sm:$0xff] %vm6491_vm4, %v6429_v27  ;;  %v6104_v20 = vpop.f32.mrf.mxu0 }
 0x5a8   : > { %6556 = vst.msk [vmem:[%s11493_s28 + $0x200] sm:$0xff] %vm6491_vm4, %v6427_v46  ;;  %v7196_v7 = vadd.f32 %v12043_v19, %v6427_v46  ;;  %v6105_v4 = vadd.f32 %v6104_v20, %v13241_v25  ;;  %v6430_v58 = vadd.f32 %v12040_v50, %v6113_v63  ;;  %v13243_v20 = vld [vmem:[#allocation67_spill] sm:$0xff] }
 0x5a9   : > { %7327 = vst.msk [vmem:[%s11493_s28 + $0x210] sm:$0xff] %vm7260_vm5, %v7198_v36  ;;  %v8804_v9 = vpop.f32.mrf.mxu0 }
 0x5aa   : > { %7325 = vst.msk [vmem:[%s11493_s28 + $0x200] sm:$0xff] %vm7260_vm5, %v7196_v7  ;;  %v6428_v56 = vadd.f32 %v12040_v50, %v6105_v4  ;;  %v7199_v45 = vadd.f32 %v12089_v60, %v6430_v58  ;;  %v6126_v0 = vadd.f32 %v8804_v9, %v10658_v18  ;;  %v12250_v60 = vpop.permute.xlu1 %6908  ;;  %v12316_v39 = vpop.permute.xlu0 %6918  ;;  %v13244_v9 = vld [vmem:[#allocation64_spill] sm:$0xff] }
 0x5ab   : > { %6559 = vst.msk [vmem:[%s11493_s28 + $0x218] sm:$0xff] %vm6491_vm4, %v6430_v58  ;;  %v6117_v19 = vpop.f32.mrf.mxu0 }
 0x5ac   : > { %6557 = vst.msk [vmem:[%s11493_s28 + $0x208] sm:$0xff] %vm6491_vm4, %v6428_v56  ;;  %v7197_v1 = vadd.f32 %v12061_v41, %v6428_v56  ;;  %v6118_v48 = vadd.f32 %v6117_v19, %v10678_v2  ;;  %v6433_v23 = vadd.f32 %v12040_v50, %v6126_v0  ;;  %v13245_v19 = vld [vmem:[#allocation65_spill] sm:$0xff] }
 0x5ad   : > { %7328 = vst.msk [vmem:[%s11493_s28 + $0x218] sm:$0xff] %vm7260_vm5, %v7199_v45  ;;  %v8805_v62 = vpop.f32.mrf.mxu0 }
 0x5ae   : > { %7326 = vst.msk [vmem:[%s11493_s28 + $0x208] sm:$0xff] %vm7260_vm5, %v7197_v1  ;;  %v6431_v18 = vadd.f32 %v12040_v50, %v6118_v48  ;;  %v7202_v12 = vadd.f32 %v12124_v24, %v6433_v23  ;;  %v6129_v41 = vadd.f32 %v8805_v62, %v10680_v3  ;;  %v6923_v45 = vpop.permute.xlu0 %6922 }
 0x5af   : > { %6562 = vst.msk [vmem:[%s11493_s28 + $0x230] sm:$0xff] %vm6491_vm4, %v6433_v23  ;;  %v6120_v28 = vpop.f32.mrf.mxu0 }
 0x5b0   : > { %6560 = vst.msk [vmem:[%s11493_s28 + $0x220] sm:$0xff] %vm6491_vm4, %v6431_v18  ;;  %v7200_v2 = vadd.f32 %v12098_v13, %v6431_v18  ;;  %v6121_v55 = vadd.f32 %v6120_v28, %v10689_v5  ;;  %v6434_v32 = vadd.f32 %v12040_v50, %v6129_v41  ;;  %v12275_v5 = vpop.permute.xlu1 %6912 }
 0x5b1   : > { %7331 = vst.msk [vmem:[%s11493_s28 + $0x230] sm:$0xff] %vm7260_vm5, %v7202_v12  ;;  %v8808_v35 = vpop.f32.mrf.mxu0  ;;  %v13246_v12 = vld [vmem:[#allocation62_spill] sm:$0xff] }
 0x5b2   : > { %7329 = vst.msk [vmem:[%s11493_s28 + $0x220] sm:$0xff] %vm7260_vm5, %v7200_v2  ;;  %v6432_v3 = vadd.f32 %v12040_v50, %v6121_v55  ;;  %v7203_v24 = vadd.f32 %v12141_v31, %v6434_v32  ;;  %v6142_v13 = vadd.f32 %v8808_v35, %v10691_v42  ;;  %v13247_v2 = vld [vmem:[#allocation73_spill] sm:$0xff] }
 0x5b3   : > { %6563 = vst.msk [vmem:[%s11493_s28 + $0x238] sm:$0xff] %vm6491_vm4, %v6434_v32  ;;  %v6133_v37 = vpop.f32.mrf.mxu0 }
 0x5b4   : > { %6561 = vst.msk [vmem:[%s11493_s28 + $0x228] sm:$0xff] %vm6491_vm4, %v6432_v3  ;;  %v7201_v21 = vadd.f32 %v12114_v44, %v6432_v3  ;;  %v6134_v51 = vadd.f32 %v6133_v37, %v10711_v57  ;;  %v6437_v52 = vadd.f32 %v12040_v50, %v6142_v13  ;;  %v6927_v3 = vpop.permute.xlu0 %6926  ;;  %v13248_v37 = vld [vmem:[#allocation70_spill] sm:$0xff] }
 0x5b5   : > { %7332 = vst.msk [vmem:[%s11493_s28 + $0x238] sm:$0xff] %vm7260_vm5, %v7203_v24  ;;  %v8809_v8 = vpop.f32.mrf.mxu0 }
 0x5b6   : > { %7330 = vst.msk [vmem:[%s11493_s28 + $0x228] sm:$0xff] %vm7260_vm5, %v7201_v21  ;;  %v6435_v42 = vadd.f32 %v12040_v50, %v6134_v51  ;;  %v7206_v31 = vadd.f32 %v12175_v6, %v6437_v52  ;;  %v6145_v17 = vadd.f32 %v8809_v8, %v10713_v29  ;;  %v12300_v6 = vpop.permute.xlu1 %6916 }
 0x5b7   : > { %6566 = vst.msk [vmem:[%s11493_s28 + $0x250] sm:$0xff] %vm6491_vm4, %v6437_v52  ;;  %v6136_v44 = vpop.f32.mrf.mxu0  ;;  %v13249_v52 = vld [vmem:[#allocation71_spill] sm:$0xff] }
 0x5b8   : > { %6564 = vst.msk [vmem:[%s11493_s28 + $0x240] sm:$0xff] %vm6491_vm4, %v6435_v42  ;;  %v7204_v57 = vadd.f32 %v12150_v16, %v6435_v42  ;;  %v6137_v43 = vadd.f32 %v6136_v44, %v10724_v54  ;;  %v6438_v15 = vadd.f32 %v12040_v50, %v6145_v17 }
 0x5b9   : > { %7335 = vst.msk [vmem:[%s11493_s28 + $0x250] sm:$0xff] %vm7260_vm5, %v7206_v31  ;;  %v8812_v11 = vpop.f32.mrf.mxu0 }
 0x5ba   : > { %7333 = vst.msk [vmem:[%s11493_s28 + $0x240] sm:$0xff] %vm7260_vm5, %v7204_v57  ;;  %v6436_v29 = vadd.f32 %v12040_v50, %v6137_v43  ;;  %v7207_v47 = vadd.f32 %v12191_v38, %v6438_v15  ;;  %v6158_v16 = vadd.f32 %v8812_v11, %v10726_v34  ;;  %v6931_v43 = vpop.permute.xlu0 %6930  ;;  %v13251_v11 = vld [vmem:[#allocation79_spill] sm:$0xff] }
 0x5bb   : > { %6567 = vst.msk [vmem:[%s11493_s28 + $0x258] sm:$0xff] %vm6491_vm4, %v6438_v15  ;;  %v6149_v53 = vpop.f32.mrf.mxu0 }
 0x5bc   : > { %6565 = vst.msk [vmem:[%s11493_s28 + $0x248] sm:$0xff] %vm6491_vm4, %v6436_v29  ;;  %v7205_v54 = vadd.f32 %v12166_v59, %v6436_v29  ;;  %v6150_v30 = vadd.f32 %v6149_v53, %v10746_v40  ;;  %v6441_v26 = vadd.f32 %v12040_v50, %v6158_v16  ;;  %v13242_v59 = vld [vmem:[#allocation56_spill] sm:$0xff]  ;;  %v6921_v40 = vpop.permute.xlu1 %6920 }
 0x5bd   : > { %7336 = vst.msk [vmem:[%s11493_s28 + $0x258] sm:$0xff] %vm7260_vm5, %v7207_v47  ;;  %v8813_v27 = vpop.f32.mrf.mxu0 }
 0x5be   : > { %7334 = vst.msk [vmem:[%s11493_s28 + $0x248] sm:$0xff] %vm7260_vm5, %v7205_v54  ;;  %v6439_v34 = vadd.f32 %v12040_v50, %v6150_v30  ;;  %v7210_v38 = vadd.f32 %v12225_v10, %v6441_v26  ;;  %v6161_v46 = vadd.f32 %v8813_v27, %v13242_v59 }
 0x5bf   : > { %6570 = vst.msk [vmem:[%s11493_s28 + $0x270] sm:$0xff] %vm6491_vm4, %v6441_v26  ;;  %v6152_v36 = vpop.f32.mrf.mxu0  ;;  %v13252_v26 = vld [vmem:[#allocation76_spill] sm:$0xff] }
 0x5c0   : > { %6568 = vst.msk [vmem:[%s11493_s28 + $0x260] sm:$0xff] %vm6491_vm4, %v6439_v34  ;;  %v7208_v63 = vadd.f32 %v12200_v33, %v6439_v34  ;;  %v6153_v7 = vadd.f32 %v6152_v36, %v13243_v20  ;;  %v6442_v25 = vadd.f32 %v12040_v50, %v6161_v46  ;;  %v6925_v62 = vpop.permute.xlu1 %6924 }
 0x5c1   : > { %7339 = vst.msk [vmem:[%s11493_s28 + $0x270] sm:$0xff] %vm7260_vm5, %v7210_v38  ;;  %v8816_v4 = vpop.f32.mrf.mxu0  ;;  %v13253_v38 = vld [vmem:[#allocation77_spill] sm:$0xff] }
 0x5c2   : > { %7337 = vst.msk [vmem:[%s11493_s28 + $0x260] sm:$0xff] %vm7260_vm5, %v7208_v63  ;;  %v6440_v10 = vadd.f32 %v12040_v50, %v6153_v7  ;;  %v7211_v58 = vadd.f32 %v12241_v49, %v6442_v25  ;;  %v6174_v56 = vadd.f32 %v8816_v4, %v13244_v9  ;;  %v13254_v7 = vld [vmem:[#allocation74_spill] sm:$0xff] }
 0x5c3   : > { %6571 = vst.msk [vmem:[%s11493_s28 + $0x278] sm:$0xff] %vm6491_vm4, %v6442_v25  ;;  %v6165_v33 = vpop.f32.mrf.mxu0 }
 0x5c4   : > { %6569 = vst.msk [vmem:[%s11493_s28 + $0x268] sm:$0xff] %vm6491_vm4, %v6440_v10  ;;  %v7209_v0 = vadd.f32 %v12216_v61, %v6440_v10  ;;  %v6166_v1 = vadd.f32 %v6165_v33, %v13245_v19  ;;  %v6445_v48 = vadd.f32 %v12040_v50, %v6174_v56  ;;  %v6929_v21 = vpop.permute.xlu1 %6928  ;;  %v13256_v19 = vld [vmem:[#allocation82_spill] sm:$0xff] }
 0x5c5   : > { %7340 = vst.msk [vmem:[%s11493_s28 + $0x278] sm:$0xff] %vm7260_vm5, %v7211_v58  ;;  %v8817_v23 = vpop.f32.mrf.mxu0  ;;  %v13255_v58 = vld [vmem:[#allocation85_spill] sm:$0xff] }
 0x5c6   : > { %7338 = vst.msk [vmem:[%s11493_s28 + $0x268] sm:$0xff] %vm7260_vm5, %v7209_v0  ;;  %v6443_v49 = vadd.f32 %v12040_v50, %v6166_v1  ;;  %v7214_v18 = vadd.f32 %v12275_v5, %v6445_v48  ;;  %v6177_v61 = vadd.f32 %v8817_v23, %v13246_v12 }
 0x5c7   : > { %6574 = vst.msk [vmem:[%s11493_s28 + $0x290] sm:$0xff] %vm6491_vm4, %v6445_v48  ;;  %v6168_v41 = vpop.f32.mrf.mxu0 }
 0x5c8   : > { %6572 = vst.msk [vmem:[%s11493_s28 + $0x280] sm:$0xff] %vm6491_vm4, %v6443_v49  ;;  %v7212_v28 = vadd.f32 %v12250_v60, %v6443_v49  ;;  %v6169_v55 = vadd.f32 %v6168_v41, %v13247_v2  ;;  %v6446_v32 = vadd.f32 %v12040_v50, %v6177_v61  ;;  %v6933_v53 = vpop.permute.xlu1 %6932  ;;  %v13257_v49 = vld [vmem:[#allocation83_spill] sm:$0xff] }
 0x5c9   : > { %7343 = vst.msk [vmem:[%s11493_s28 + $0x290] sm:$0xff] %vm7260_vm5, %v7214_v18  ;;  %v8820_v35 = vpop.f32.mrf.mxu0 }
 0x5ca   : > { %7341 = vst.msk [vmem:[%s11493_s28 + $0x280] sm:$0xff] %vm7260_vm5, %v7212_v28  ;;  %v6444_v24 = vadd.f32 %v12040_v50, %v6169_v55  ;;  %v7215_v13 = vadd.f32 %v12291_v14, %v6446_v32  ;;  %v6190_v60 = vadd.f32 %v8820_v35, %v13248_v37  ;;  %v13250_v14 = vld [vmem:[#allocation68_spill] sm:$0xff] }
 0x5cb   : > { %6575 = vst.msk [vmem:[%s11493_s28 + $0x298] sm:$0xff] %vm6491_vm4, %v6446_v32  ;;  %v6181_v5 = vpop.f32.mrf.mxu0  ;;  %v13258_v55 = vld [vmem:[#allocation80_spill] sm:$0xff] }
 0x5cc   : > { %6573 = vst.msk [vmem:[%s11493_s28 + $0x288] sm:$0xff] %vm6491_vm4, %v6444_v24  ;;  %v7213_v51 = vadd.f32 %v12266_v22, %v6444_v24  ;;  %v6182_v8 = vadd.f32 %v6181_v5, %v13249_v52  ;;  %v6449_v42 = vadd.f32 %v12040_v50, %v6190_v60  ;;  %v6937_v4 = vpop.permute.xlu1 %6936  ;;  %v13259_v24 = vld [vmem:[#allocation88_spill] sm:$0xff]  ;;  %v13260_v52 = vld [vmem:[#allocation89_spill] sm:$0xff] }
 0x5cd   : > { %7344 = vst.msk [vmem:[%s11493_s28 + $0x298] sm:$0xff] %vm7260_vm5, %v7215_v13  ;;  %v8821_v31 = vpop.f32.mrf.mxu0 }
 0x5ce   : > { %7342 = vst.msk [vmem:[%s11493_s28 + $0x288] sm:$0xff] %vm7260_vm5, %v7213_v51  ;;  %v6447_v17 = vadd.f32 %v12040_v50, %v6182_v8  ;;  %v7218_v44 = vadd.f32 %v6921_v40, %v6449_v42  ;;  %v6193_v57 = vadd.f32 %v8821_v31, %v13250_v14  ;;  %v6935_v40 = vpop.permute.xlu0 %6934 }
 0x5cf   : > { %6578 = vst.msk [vmem:[%s11493_s28 + $0x2b0] sm:$0xff] %vm6491_vm4, %v6449_v42  ;;  %v6184_v22 = vpop.f32.mrf.mxu0 }
 0x5d0   : > { %6576 = vst.msk [vmem:[%s11493_s28 + $0x2a0] sm:$0xff] %vm6491_vm4, %v6447_v17  ;;  %v7216_v15 = vadd.f32 %v12300_v6, %v6447_v17  ;;  %v6185_v29 = vadd.f32 %v6184_v22, %v13251_v11  ;;  %v6450_v47 = vadd.f32 %v12040_v50, %v6193_v57  ;;  %v6941_v41 = vpop.permute.xlu1 %6940  ;;  %v13262_v11 = vld [vmem:[#allocation12_spill] sm:$0xff] }
 0x5d1   : > { %7347 = vst.msk [vmem:[%s11493_s28 + $0x2b0] sm:$0xff] %vm7260_vm5, %v7218_v44  ;;  %v8824_v16 = vpop.f32.mrf.mxu0  ;;  %v13261_v44 = vld [vmem:[#allocation86_spill] sm:$0xff] }
 0x5d2   : > { %7345 = vst.msk [vmem:[%s11493_s28 + $0x2a0] sm:$0xff] %vm7260_vm5, %v7216_v15  ;;  %v6448_v54 = vadd.f32 %v12040_v50, %v6185_v29  ;;  %v7219_v30 = vadd.f32 %v6923_v45, %v6450_v47  ;;  %v6206_v27 = vadd.f32 %v8824_v16, %v13252_v26  ;;  %v6939_v23 = vpop.permute.xlu0 %6938 }
 0x5d3   : > { %6579 = vst.msk [vmem:[%s11493_s28 + $0x2b8] sm:$0xff] %vm6491_vm4, %v6450_v47  ;;  %v6197_v6 = vpop.f32.mrf.mxu0 }
 0x5d4   : > { %6577 = vst.msk [vmem:[%s11493_s28 + $0x2a8] sm:$0xff] %vm6491_vm4, %v6448_v54  ;;  %v7217_v34 = vadd.f32 %v12316_v39, %v6448_v54  ;;  %v6198_v59 = vadd.f32 %v6197_v6, %v13253_v38  ;;  %v6453_v46 = vadd.f32 %v12040_v50, %v6206_v27  ;;  %v6945_v31 = vpop.permute.xlu1 %6944  ;;  %v13263_v54 = vld [vmem:[#allocation9_spill] sm:$0xff] }
 0x5d5   : > { %7348 = vst.msk [vmem:[%s11493_s28 + $0x2b8] sm:$0xff] %vm7260_vm5, %v7219_v30  ;;  %v8825_v36 = vpop.f32.mrf.mxu0 }
 0x5d6   : > { %7346 = vst.msk [vmem:[%s11493_s28 + $0x2a8] sm:$0xff] %vm7260_vm5, %v7217_v34  ;;  %v6451_v63 = vadd.f32 %v12040_v50, %v6198_v59  ;;  %v7222_v20 = vadd.f32 %v6929_v21, %v6453_v46  ;;  %v6209_v25 = vadd.f32 %v8825_v36, %v13254_v7  ;;  %v6943_v5 = vpop.permute.xlu0 %6942  ;;  %v13264_v36 = vld [vmem:[#allocation24_spill] sm:$0xff]  ;;  %v13265_v7 = vld [vmem:[#allocation19_spill] sm:$0xff] }
 0x5d7   : > { %6582 = vst.msk [vmem:[%s11493_s28 + $0x2d0] sm:$0xff] %vm6491_vm4, %v6453_v46  ;;  %v6200_v39 = vpop.f32.mrf.mxu0 }
 0x5d8   : > { %6580 = vst.msk [vmem:[%s11493_s28 + $0x2c0] sm:$0xff] %vm6491_vm4, %v6451_v63  ;;  %v7220_v10 = vadd.f32 %v6925_v62, %v6451_v63  ;;  %v6201_v9 = vadd.f32 %v6200_v39, %v13255_v58  ;;  %v6454_v56 = vadd.f32 %v12040_v50, %v6209_v25  ;;  %v6949_v38 = vpop.permute.xlu1 %6948 }
 0x5d9   : > { %7351 = vst.msk [vmem:[%s11493_s28 + $0x2d0] sm:$0xff] %vm7260_vm5, %v7222_v20  ;;  %v8828_v33 = vpop.f32.mrf.mxu0 }
 0x5da   : > { %7349 = vst.msk [vmem:[%s11493_s28 + $0x2c0] sm:$0xff] %vm7260_vm5, %v7220_v10  ;;  %v6452_v45 = vadd.f32 %v12040_v50, %v6201_v9  ;;  %v7223_v0 = vadd.f32 %v6931_v43, %v6454_v56  ;;  %v6222_v1 = vadd.f32 %v8828_v33, %v13256_v19  ;;  %v6947_v16 = vpop.permute.xlu0 %6946  ;;  %v13266_v9 = vld [vmem:[#allocation33_spill] sm:$0xff]  ;;  %v13267_v19 = vld [vmem:[#allocation27_spill] sm:$0xff] }
 0x5db   : > { %6583 = vst.msk [vmem:[%s11493_s28 + $0x2d8] sm:$0xff] %vm6491_vm4, %v6454_v56  ;;  %v6213_v48 = vpop.f32.mrf.mxu0 }
 0x5dc   : > { %6581 = vst.msk [vmem:[%s11493_s28 + $0x2c8] sm:$0xff] %vm6491_vm4, %v6452_v45  ;;  %v7221_v62 = vadd.f32 %v6927_v3, %v6452_v45  ;;  %v6214_v18 = vadd.f32 %v6213_v48, %v13257_v49  ;;  %v6457_v12 = vadd.f32 %v12040_v50, %v6222_v1  ;;  %v6953_v20 = vpop.permute.xlu1 %6952 }
 0x5dd   : > { %7352 = vst.msk [vmem:[%s11493_s28 + $0x2d8] sm:$0xff] %vm7260_vm5, %v7223_v0  ;;  %v8829_v61 = vpop.f32.mrf.mxu0 }
 0x5de   : > { %7350 = vst.msk [vmem:[%s11493_s28 + $0x2c8] sm:$0xff] %vm7260_vm5, %v7221_v62  ;;  %v6455_v28 = vadd.f32 %v12040_v50, %v6214_v18  ;;  %v7226_v2 = vadd.f32 %v6937_v4, %v6457_v12  ;;  %v6225_v32 = vadd.f32 %v8829_v61, %v13258_v55  ;;  %v6951_v46 = vpop.permute.xlu0 %6950 }
 0x5df   : > { %6586 = vst.msk [vmem:[%s11493_s28 + $0x2f0] sm:$0xff] %vm6491_vm4, %v6457_v12  ;;  %v6216_v35 = vpop.f32.mrf.mxu0 }
 0x5e0   : > { %6584 = vst.msk [vmem:[%s11493_s28 + $0x2e0] sm:$0xff] %vm6491_vm4, %v6455_v28  ;;  %v7224_v3 = vadd.f32 %v6933_v53, %v6455_v28  ;;  %v6217_v13 = vadd.f32 %v6216_v35, %v13259_v24  ;;  %v6458_v37 = vadd.f32 %v12040_v50, %v6225_v32  ;;  %v6957_v18 = vpop.permute.xlu1 %6956  ;;  %v13269_v32 = vld [vmem:[#allocation30_spill] sm:$0xff] }
 0x5e1   : > { %7355 = vst.msk [vmem:[%s11493_s28 + $0x2f0] sm:$0xff] %vm7260_vm5, %v7226_v2  ;;  %v8832_v60 = vpop.f32.mrf.mxu0 }
 0x5e2   : > { %7353 = vst.msk [vmem:[%s11493_s28 + $0x2e0] sm:$0xff] %vm7260_vm5, %v7224_v3  ;;  %v6456_v21 = vadd.f32 %v12040_v50, %v6217_v13  ;;  %v7227_v51 = vadd.f32 %v6939_v23, %v6458_v37  ;;  %v6238_v8 = vadd.f32 %v8832_v60, %v13260_v52  ;;  %v6955_v45 = vpop.permute.xlu0 %6954  ;;  %v13270_v60 = vld [vmem:[#allocation45_spill] sm:$0xff] }
 0x5e3   : > { %6587 = vst.msk [vmem:[%s11493_s28 + $0x2f8] sm:$0xff] %vm6491_vm4, %v6458_v37  ;;  %v6229_v42 = vpop.f32.mrf.mxu0 }
 0x5e4   : > { %6585 = vst.msk [vmem:[%s11493_s28 + $0x2e8] sm:$0xff] %vm6491_vm4, %v6456_v21  ;;  %v7225_v17 = vadd.f32 %v6935_v40, %v6456_v21  ;;  %v6230_v14 = vadd.f32 %v6229_v42, %v13261_v44  ;;  %v6461_v57 = vadd.f32 %v12040_v50, %v6238_v8  ;;  %v6961_v55 = vpop.permute.xlu1 %6960  ;;  %v13271_v8 = vld [vmem:[#allocation39_spill] sm:$0xff] }
 0x5e5   : > { %7356 = vst.msk [vmem:[%s11493_s28 + $0x2f8] sm:$0xff] %vm7260_vm5, %v7227_v51  ;;  %v8833_v22 = vpop.f32.mrf.mxu0 }
 0x5e6   : > { %7354 = vst.msk [vmem:[%s11493_s28 + $0x2e8] sm:$0xff] %vm7260_vm5, %v7225_v17  ;;  %v6459_v43 = vadd.f32 %v12040_v50, %v6230_v14  ;;  %v7230_v15 = vadd.f32 %v6945_v31, %v6461_v57  ;;  %v6241_v29 = vadd.f32 %v8833_v22, %v13262_v11  ;;  %v6959_v61 = vpop.permute.xlu0 %6958 }
 0x5e7   : > { %6590 = vst.msk [vmem:[%s11493_s28 + $0x310] sm:$0xff] %vm6491_vm4, %v6461_v57  ;;  %v6232_v47 = vpop.f32.mrf.mxu0 }
 0x5e8   : > { %6588 = vst.msk [vmem:[%s11493_s28 + $0x300] sm:$0xff] %vm6491_vm4, %v6459_v43  ;;  %v7228_v53 = vadd.f32 %v6941_v41, %v6459_v43  ;;  %v6233_v30 = vadd.f32 %v6232_v47, %v13263_v54  ;;  %v6462_v26 = vadd.f32 %v12040_v50, %v6241_v29  ;;  %v13268_v41 = vld [vmem:[#allocation36_spill] sm:$0xff]  ;;  %v6965_v57 = vpop.permute.xlu1 %6964 }
 0x5e9   : > { %7359 = vst.msk [vmem:[%s11493_s28 + $0x310] sm:$0xff] %vm7260_vm5, %v7230_v15  ;;  %v13272_v15 = vld [vmem:[#allocation51_spill] sm:$0xff] }
 0x5ea   : > { %7357 = vst.msk [vmem:[%s11493_s28 + $0x300] sm:$0xff] %vm7260_vm5, %v7228_v53  ;;  %v6460_v27 = vadd.f32 %v12040_v50, %v6233_v30  ;;  %v7231_v6 = vadd.f32 %v6947_v16, %v6462_v26  ;;  %v6963_v51 = vpop.permute.xlu0 %6962  ;;  %v13273_v16 = vld [vmem:[#allocation42_spill] sm:$0xff] }
 0x5eb   : > { %6591 = vst.msk [vmem:[%s11493_s28 + $0x318] sm:$0xff] %vm6491_vm4, %v6462_v26 }
 0x5ec   : > { %6589 = vst.msk [vmem:[%s11493_s28 + $0x308] sm:$0xff] %vm6491_vm4, %v6460_v27  ;;  %v7229_v34 = vadd.f32 %v6943_v5, %v6460_v27  ;;  %v6969_v47 = vpop.permute.xlu1 %6968 }
 0x5ed   : > { %7360 = vst.msk [vmem:[%s11493_s28 + $0x318] sm:$0xff] %vm7260_vm5, %v7231_v6  ;;  %v13274_v6 = vld [vmem:[#allocation54_spill] sm:$0xff] }
 0x5ee   : > { %7358 = vst.msk [vmem:[%s11493_s28 + $0x308] sm:$0xff] %vm7260_vm5, %v7229_v34  ;;  %v6967_v43 = vpop.permute.xlu0 %6966 }
 0x5f0   : > { %v8836_v59 = vpop.f32.mrf.mxu0 }
 0x5f1   : > { %v6254_v40 = vadd.f32 %v8836_v59, %v13264_v36  ;;  %v13275_v36 = vld [vmem:[#allocation49_spill] sm:$0xff] }
 0x5f2   : > { %v6245_v63 = vpop.f32.mrf.mxu0  ;;  %v6971_v59 = vpop.permute.xlu0 %6970 }
 0x5f3   : > { %v6246_v25 = vadd.f32 %v6245_v63, %v13265_v7  ;;  %v6465_v39 = vadd.f32 %v12040_v50, %v6254_v40 }
 0x5f4   : > { %v8837_v4 = vpop.f32.mrf.mxu0 }
 0x5f5   : > { %v6463_v10 = vadd.f32 %v12040_v50, %v6246_v25  ;;  %6594 = vst.msk [vmem:[%s11493_s28 + $0x330] sm:$0xff] %vm6491_vm4, %v6465_v39  ;;  %v7234_v58 = vadd.f32 %v6953_v20, %v6465_v39  ;;  %v6257_v56 = vadd.f32 %v8837_v4, %v13266_v9  ;;  %v6973_v39 = vpop.permute.xlu1 %6972 }
 0x5f6   : > { %v6248_v33 = vpop.f32.mrf.mxu0 }
 0x5f7   : > { %6592 = vst.msk [vmem:[%s11493_s28 + $0x320] sm:$0xff] %vm6491_vm4, %v6463_v10  ;;  %v7232_v0 = vadd.f32 %v6949_v38, %v6463_v10  ;;  %v6249_v1 = vadd.f32 %v6248_v33, %v13267_v19  ;;  %v6466_v48 = vadd.f32 %v12040_v50, %v6257_v56  ;;  %v6975_v10 = vpop.permute.xlu0 %6974 }
 0x5f8   : > { %7363 = vst.msk [vmem:[%s11493_s28 + $0x330] sm:$0xff] %vm7260_vm5, %v7234_v58  ;;  %v13276_v58 = vld [vmem:[#allocation60_spill] sm:$0xff] }
 0x5f9   : > { %7361 = vst.msk [vmem:[%s11493_s28 + $0x320] sm:$0xff] %vm7260_vm5, %v7232_v0  ;;  %v6464_v23 = vadd.f32 %v12040_v50, %v6249_v1  ;;  %v7235_v62 = vadd.f32 %v6955_v45, %v6466_v48  ;;  %v6977_v33 = vpop.permute.xlu1 %6976  ;;  %v13277_v45 = vld [vmem:[#allocation47_spill] sm:$0xff] }
 0x5fa   : > { %6595 = vst.msk [vmem:[%s11493_s28 + $0x338] sm:$0xff] %vm6491_vm4, %v6466_v48 }
 0x5fb   : > { %6593 = vst.msk [vmem:[%s11493_s28 + $0x328] sm:$0xff] %vm6491_vm4, %v6464_v23  ;;  %v7233_v49 = vadd.f32 %v6951_v46, %v6464_v23 }
 0x5fc   : > { %7364 = vst.msk [vmem:[%s11493_s28 + $0x338] sm:$0xff] %vm7260_vm5, %v7235_v62  ;;  %v13278_v62 = vld [vmem:[#allocation63_spill] sm:$0xff] }
 0x5fd   : > { %7362 = vst.msk [vmem:[%s11493_s28 + $0x328] sm:$0xff] %vm7260_vm5, %v7233_v49 }
 0x600   : > { %v8840_v12 = vpop.f32.mrf.mxu0 }
 0x601   : > { %v6270_v28 = vadd.f32 %v8840_v12, %v13268_v41  ;;  %v6979_v12 = vpop.permute.xlu0 %6978  ;;  %v13279_v41 = vld [vmem:[#allocation57_spill] sm:$0xff] }
 0x602   : > { %v6261_v2 = vpop.f32.mrf.mxu0 }
 0x603   : > { %v6262_v35 = vadd.f32 %v6261_v2, %v13269_v32  ;;  %v6469_v3 = vadd.f32 %v12040_v50, %v6270_v28 }
 0x604   : > { %v8841_v24 = vpop.f32.mrf.mxu0 }
 0x605   : > { %v6467_v13 = vadd.f32 %v12040_v50, %v6262_v35  ;;  %6598 = vst.msk [vmem:[%s11493_s28 + $0x350] sm:$0xff] %vm6491_vm4, %v6469_v3  ;;  %v7238_v37 = vadd.f32 %v6961_v55, %v6469_v3  ;;  %v6273_v5 = vadd.f32 %v8841_v24, %v13270_v60  ;;  %v6981_v3 = vpop.permute.xlu1 %6980 }
 0x606   : > { %v6264_v21 = vpop.f32.mrf.mxu0 }
 0x607   : > { %6596 = vst.msk [vmem:[%s11493_s28 + $0x340] sm:$0xff] %vm6491_vm4, %v6467_v13  ;;  %v7236_v52 = vadd.f32 %v6957_v18, %v6467_v13  ;;  %v6265_v42 = vadd.f32 %v6264_v21, %v13271_v8  ;;  %v6470_v31 = vadd.f32 %v12040_v50, %v6273_v5  ;;  %v6983_v13 = vpop.permute.xlu0 %6982 }
 0x608   : > { %7367 = vst.msk [vmem:[%s11493_s28 + $0x350] sm:$0xff] %vm7260_vm5, %v7238_v37  ;;  %v13280_v37 = vld [vmem:[#allocation78_spill] sm:$0xff] }
 0x609   : > { %7365 = vst.msk [vmem:[%s11493_s28 + $0x340] sm:$0xff] %vm7260_vm5, %v7236_v52  ;;  %v6468_v17 = vadd.f32 %v12040_v50, %v6265_v42  ;;  %v7239_v44 = vadd.f32 %v6963_v51, %v6470_v31  ;;  %v6985_v21 = vpop.permute.xlu1 %6984  ;;  %v13281_v51 = vld [vmem:[#allocation66_spill] sm:$0xff] }
 0x60a   : > { %6599 = vst.msk [vmem:[%s11493_s28 + $0x358] sm:$0xff] %vm6491_vm4, %v6470_v31 }
 0x60b   : > { %6597 = vst.msk [vmem:[%s11493_s28 + $0x348] sm:$0xff] %vm6491_vm4, %v6468_v17  ;;  %v7237_v14 = vadd.f32 %v6959_v61, %v6468_v17 }
 0x60c   : > { %7368 = vst.msk [vmem:[%s11493_s28 + $0x358] sm:$0xff] %vm7260_vm5, %v7239_v44  ;;  %v13282_v44 = vld [vmem:[#allocation69_spill] sm:$0xff] }
 0x60d   : > { %7366 = vst.msk [vmem:[%s11493_s28 + $0x348] sm:$0xff] %vm7260_vm5, %v7237_v14 }
 0x610   : > { %v8844_v22 = vpop.f32.mrf.mxu0 }
 0x611   : > { %v6286_v11 = vadd.f32 %v8844_v22, %v13272_v15  ;;  %v6987_v22 = vpop.permute.xlu0 %6986  ;;  %v13283_v15 = vld [vmem:[#allocation72_spill] sm:$0xff] }
 0x612   : > { %v6277_v29 = vpop.f32.mrf.mxu0 }
 0x613   : > { %v6278_v53 = vadd.f32 %v6277_v29, %v13273_v16  ;;  %v6473_v54 = vadd.f32 %v12040_v50, %v6286_v11 }
 0x614   : > { %v8845_v30 = vpop.f32.mrf.mxu0 }
 0x615   : > { %v6471_v26 = vadd.f32 %v12040_v50, %v6278_v53  ;;  %6602 = vst.msk [vmem:[%s11493_s28 + $0x370] sm:$0xff] %vm6491_vm4, %v6473_v54  ;;  %v7242_v27 = vadd.f32 %v6969_v47, %v6473_v54  ;;  %v6289_v34 = vadd.f32 %v8845_v30, %v13274_v6  ;;  %v6989_v54 = vpop.permute.xlu1 %6988 }
 0x616   : > { %v6280_v38 = vpop.f32.mrf.mxu0 }
 0x617   : > { %6600 = vst.msk [vmem:[%s11493_s28 + $0x360] sm:$0xff] %vm6491_vm4, %v6471_v26  ;;  %v7240_v46 = vadd.f32 %v6965_v57, %v6471_v26  ;;  %v6281_v40 = vadd.f32 %v6280_v38, %v13275_v36  ;;  %v6474_v63 = vadd.f32 %v12040_v50, %v6289_v34  ;;  %v6991_v26 = vpop.permute.xlu0 %6990 }
 0x618   : > { %7371 = vst.msk [vmem:[%s11493_s28 + $0x370] sm:$0xff] %vm7260_vm5, %v7242_v27  ;;  %v13284_v27 = vld [vmem:[#allocation90_spill] sm:$0xff] }
 0x619   : > { %7369 = vst.msk [vmem:[%s11493_s28 + $0x360] sm:$0xff] %vm7260_vm5, %v7240_v46  ;;  %v6472_v20 = vadd.f32 %v12040_v50, %v6281_v40  ;;  %v7243_v7 = vadd.f32 %v6971_v59, %v6474_v63  ;;  %v6993_v38 = vpop.permute.xlu1 %6992  ;;  %v13285_v59 = vld [vmem:[#allocation75_spill] sm:$0xff] }
 0x61a   : > { %6603 = vst.msk [vmem:[%s11493_s28 + $0x378] sm:$0xff] %vm6491_vm4, %v6474_v63 }
 0x61b   : > { %6601 = vst.msk [vmem:[%s11493_s28 + $0x368] sm:$0xff] %vm6491_vm4, %v6472_v20  ;;  %v7241_v25 = vadd.f32 %v6967_v43, %v6472_v20 }
 0x61c   : > { %7372 = vst.msk [vmem:[%s11493_s28 + $0x378] sm:$0xff] %vm7260_vm5, %v7243_v7  ;;  %v13286_v7 = vld [vmem:[#allocation81_spill] sm:$0xff] }
 0x61d   : > { %7370 = vst.msk [vmem:[%s11493_s28 + $0x368] sm:$0xff] %vm7260_vm5, %v7241_v25 }
 0x620   : > { %v8848_v4 = vpop.f32.mrf.mxu0 }
 0x621   : > { %v6302_v9 = vadd.f32 %v8848_v4, %v13276_v58  ;;  %v6995_v4 = vpop.permute.xlu0 %6994  ;;  %v13287_v58 = vld [vmem:[#allocation84_spill] sm:$0xff] }
 0x622   : > { %v6293_v56 = vpop.f32.mrf.mxu0 }
 0x623   : > { %v6294_v0 = vadd.f32 %v6293_v56, %v13277_v45  ;;  %v6477_v19 = vadd.f32 %v12040_v50, %v6302_v9 }
 0x624   : > { %v8849_v1 = vpop.f32.mrf.mxu0 }
 0x625   : > { %v6475_v48 = vadd.f32 %v12040_v50, %v6294_v0  ;;  %6606 = vst.msk [vmem:[%s11493_s28 + $0x390] sm:$0xff] %vm6491_vm4, %v6477_v19  ;;  %v7246_v23 = vadd.f32 %v6977_v33, %v6477_v19  ;;  %v6305_v49 = vadd.f32 %v8849_v1, %v13278_v62  ;;  %v6997_v19 = vpop.permute.xlu1 %6996 }
 0x626   : > { %v6296_v18 = vpop.f32.mrf.mxu0 }
 0x627   : > { %6604 = vst.msk [vmem:[%s11493_s28 + $0x380] sm:$0xff] %vm6491_vm4, %v6475_v48  ;;  %v7244_v61 = vadd.f32 %v6973_v39, %v6475_v48  ;;  %v6297_v28 = vadd.f32 %v6296_v18, %v13279_v41  ;;  %v6478_v2 = vadd.f32 %v12040_v50, %v6305_v49  ;;  %v6999_v48 = vpop.permute.xlu0 %6998 }
 0x628   : > { %7375 = vst.msk [vmem:[%s11493_s28 + $0x390] sm:$0xff] %vm7260_vm5, %v7246_v23  ;;  %v13288_v23 = vld [vmem:[#allocation92_spill] sm:$0xff] }
 0x629   : > { %7373 = vst.msk [vmem:[%s11493_s28 + $0x380] sm:$0xff] %vm7260_vm5, %v7244_v61  ;;  %v6476_v55 = vadd.f32 %v12040_v50, %v6297_v28  ;;  %v7247_v32 = vadd.f32 %v6979_v12, %v6478_v2  ;;  %v7001_v18 = vpop.permute.xlu1 %7000  ;;  %v13289_v12 = vld [vmem:[#allocation87_spill] sm:$0xff] }
 0x62a   : > { %6607 = vst.msk [vmem:[%s11493_s28 + $0x398] sm:$0xff] %vm6491_vm4, %v6478_v2 }
 0x62b   : > { %6605 = vst.msk [vmem:[%s11493_s28 + $0x388] sm:$0xff] %vm6491_vm4, %v6476_v55  ;;  %v7245_v35 = vadd.f32 %v6975_v10, %v6476_v55 }
 0x62c   : > { %7376 = vst.msk [vmem:[%s11493_s28 + $0x398] sm:$0xff] %vm7260_vm5, %v7247_v32  ;;  %v13290_v32 = vld [vmem:[#allocation94_spill] sm:$0xff] }
 0x62d   : > { %7374 = vst.msk [vmem:[%s11493_s28 + $0x388] sm:$0xff] %vm7260_vm5, %v7245_v35 }
 0x630   : > { %v8852_v24 = vpop.f32.mrf.mxu0 }
 0x631   : > { %v6318_v60 = vadd.f32 %v8852_v24, %v13280_v37  ;;  %v7003_v24 = vpop.permute.xlu0 %7002  ;;  %v13291_v37 = vld [vmem:[#allocation91_spill] sm:$0xff] }
 0x632   : > { %v6309_v5 = vpop.f32.mrf.mxu0 }
 0x633   : > { %v6310_v52 = vadd.f32 %v6309_v5, %v13281_v51  ;;  %v6481_v8 = vadd.f32 %v12040_v50, %v6318_v60 }
 0x634   : > { %v8853_v42 = vpop.f32.mrf.mxu0 }
 0x635   : > { %v6479_v31 = vadd.f32 %v12040_v50, %v6310_v52  ;;  %6610 = vst.msk [vmem:[%s11493_s28 + $0x3b0] sm:$0xff] %vm6491_vm4, %v6481_v8  ;;  %v7250_v17 = vadd.f32 %v6985_v21, %v6481_v8  ;;  %v6321_v14 = vadd.f32 %v8853_v42, %v13282_v44  ;;  %v9056_v50 = vld [vmem:[%s12657_s10] ss:$0 sm:$0xff] }
 0x636   : > { %v6312_v57 = vpop.f32.mrf.mxu0 }
 0x637   : > { %6608 = vst.msk [vmem:[%s11493_s28 + $0x3a0] sm:$0xff] %vm6491_vm4, %v6479_v31  ;;  %v7248_v43 = vadd.f32 %v6981_v3, %v6479_v31  ;;  %v6313_v11 = vadd.f32 %v6312_v57, %v13283_v15  ;;  %v6482_v29 = vadd.f32 %v9056_v50, %v6321_v14 }
 0x638   : > { %7379 = vst.msk [vmem:[%s11493_s28 + $0x3b0] sm:$0xff] %vm7260_vm5, %v7250_v17 }
 0x639   : > { %7377 = vst.msk [vmem:[%s11493_s28 + $0x3a0] sm:$0xff] %vm7260_vm5, %v7248_v43  ;;  %v6480_v47 = vadd.f32 %v9056_v50, %v6313_v11  ;;  %v7251_v16 = vadd.f32 %v6987_v22, %v6482_v29 }
 0x63a   : > { %6611 = vst.msk [vmem:[%s11493_s28 + $0x3b8] sm:$0xff] %vm6491_vm4, %v6482_v29 }
 0x63b   : > { %6609 = vst.msk [vmem:[%s11493_s28 + $0x3a8] sm:$0xff] %vm6491_vm4, %v6480_v47  ;;  %v7249_v53 = vadd.f32 %v6983_v13, %v6480_v47 }
 0x63c   : > { %7380 = vst.msk [vmem:[%s11493_s28 + $0x3b8] sm:$0xff] %vm7260_vm5, %v7251_v16 }
 0x63d   : > { %7378 = vst.msk [vmem:[%s11493_s28 + $0x3a8] sm:$0xff] %vm7260_vm5, %v7249_v53 }
 0x640   : > { %v8856_v30 = vpop.f32.mrf.mxu0 }
 0x641   : > { %v6334_v6 = vadd.f32 %v8856_v30, %v13284_v27 }
 0x642   : > { %v6325_v34 = vpop.f32.mrf.mxu0 }
 0x643   : > { %v6326_v46 = vadd.f32 %v6325_v34, %v13285_v59  ;;  %v6485_v36 = vadd.f32 %v9056_v50, %v6334_v6 }
 0x644   : > { %v8857_v40 = vpop.f32.mrf.mxu0 }
 0x645   : > { %v6483_v63 = vadd.f32 %v9056_v50, %v6326_v46  ;;  %6614 = vst.msk [vmem:[%s11493_s28 + $0x3d0] sm:$0xff] %vm6491_vm4, %v6485_v36  ;;  %v7254_v20 = vadd.f32 %v6993_v38, %v6485_v36  ;;  %v6337_v25 = vadd.f32 %v8857_v40, %v13286_v7 }
 0x646   : > { %v6328_v39 = vpop.f32.mrf.mxu0 }
 0x647   : > { %6612 = vst.msk [vmem:[%s11493_s28 + $0x3c0] sm:$0xff] %vm6491_vm4, %v6483_v63  ;;  %v7252_v10 = vadd.f32 %v6989_v54, %v6483_v63  ;;  %v6329_v9 = vadd.f32 %v6328_v39, %v13287_v58  ;;  %v6486_v56 = vadd.f32 %v9056_v50, %v6337_v25 }
 0x648   : > { %7383 = vst.msk [vmem:[%s11493_s28 + $0x3d0] sm:$0xff] %vm7260_vm5, %v7254_v20 }
 0x649   : > { %7381 = vst.msk [vmem:[%s11493_s28 + $0x3c0] sm:$0xff] %vm7260_vm5, %v7252_v10  ;;  %v6484_v33 = vadd.f32 %v9056_v50, %v6329_v9  ;;  %v7255_v45 = vadd.f32 %v6995_v4, %v6486_v56 }
 0x64a   : > { %6615 = vst.msk [vmem:[%s11493_s28 + $0x3d8] sm:$0xff] %vm6491_vm4, %v6486_v56 }
 0x64b   : > { %6613 = vst.msk [vmem:[%s11493_s28 + $0x3c8] sm:$0xff] %vm6491_vm4, %v6484_v33  ;;  %v7253_v0 = vadd.f32 %v6991_v26, %v6484_v33 }
 0x64c   : > { %7384 = vst.msk [vmem:[%s11493_s28 + $0x3d8] sm:$0xff] %vm7260_vm5, %v7255_v45 }
 0x64d   : > { %7382 = vst.msk [vmem:[%s11493_s28 + $0x3c8] sm:$0xff] %vm7260_vm5, %v7253_v0 }
 0x650   : > { %v8860_v1 = vpop.f32.mrf.mxu0 }
 0x651   : > { %v6350_v62 = vadd.f32 %v8860_v1, %v13288_v23 }
 0x652   : > { %v6341_v49 = vpop.f32.mrf.mxu0 }
 0x653   : > { %v6342_v61 = vadd.f32 %v6341_v49, %v13289_v12  ;;  %v6489_v41 = vadd.f32 %v9056_v50, %v6350_v62 }
 0x654   : > { %v8861_v28 = vpop.f32.mrf.mxu0 }
 0x655   : > { %v6487_v2 = vadd.f32 %v9056_v50, %v6342_v61  ;;  %6618 = vst.msk [vmem:[%s11493_s28 + $0x3f0] sm:$0xff] %vm6491_vm4, %v6489_v41  ;;  %v7258_v55 = vadd.f32 %v7001_v18, %v6489_v41  ;;  %v6353_v35 = vadd.f32 %v8861_v28, %v13290_v32 }
 0x656   : > { %v6344_v3 = vpop.f32.mrf.mxu0 }
 0x657   : > { %6616 = vst.msk [vmem:[%s11493_s28 + $0x3e0] sm:$0xff] %vm6491_vm4, %v6487_v2  ;;  %v7256_v13 = vadd.f32 %v6997_v19, %v6487_v2  ;;  %v6345_v60 = vadd.f32 %v6344_v3, %v13291_v37  ;;  %v6490_v5 = vadd.f32 %v9056_v50, %v6353_v35 }
 0x658   : > { %7387 = vst.msk [vmem:[%s11493_s28 + $0x3f0] sm:$0xff] %vm7260_vm5, %v7258_v55 }
 0x659   : > { %7385 = vst.msk [vmem:[%s11493_s28 + $0x3e0] sm:$0xff] %vm7260_vm5, %v7256_v13  ;;  %v6488_v21 = vadd.f32 %v9056_v50, %v6345_v60  ;;  %v7259_v51 = vadd.f32 %v7003_v24, %v6490_v5 }
 0x65a   : > { %6619 = vst.msk [vmem:[%s11493_s28 + $0x3f8] sm:$0xff] %vm6491_vm4, %v6490_v5 }
 0x65b   : > { %6617 = vst.msk [vmem:[%s11493_s28 + $0x3e8] sm:$0xff] %vm6491_vm4, %v6488_v21  ;;  %v7257_v52 = vadd.f32 %v6999_v48, %v6488_v21 }
 0x65c   : > { %7388 = vst.msk [vmem:[%s11493_s28 + $0x3f8] sm:$0xff] %vm7260_vm5, %v7259_v51 }
 0x65d   : > { %7386 = vst.msk [vmem:[%s11493_s28 + $0x3e8] sm:$0xff] %vm7260_vm5, %v7257_v52 }
 0x65e PF: > { %s21_s21 = sadd.s32 1, %s9095_s21   ;;  %s13292_s17 = smov %s9087_s19 }
 0x65f   : > { %p18_p7 = scmp.ge.s32.totalorder %s21_s21, 6   ;;  %s13293_s18 = smov %s9091_s20 }
 0x660   : > { %s13294_s19 = smov %s13297_s22  ;;  %s13295_s20 = smov %s13301_s23 }
 0x661   :  { %20 = sbr.rel (!%p18_p7) target bundleno = 3 (0x3), region = 100 }

</bundles_post_ra>
